<compile_context>
chip_gen: v6e
topology: v6e:2x2x1
jax: 0.10.0
libtpu: 0.0.40
codegen_flags: <defaults>
</compile_context>

<pallas_src>
import functools
import numpy as np
import jax
import jax.numpy as jnp
from jax.experimental import pallas as pl
from jax.experimental.pallas import tpu as pltpu

# ---------------- configuration (small, consistent with the module) ----------------
IN_CHANNELS = 1
BASE_DIM = 16          # base_dim (kept small; >=16 so SE reduction=16 is valid)
NUM_HEADS = 2
SWIN_DEPTH = 1
WINDOW = (8, 4)
BN_EPS = 1e-5


def _round_up(x, m):
    return (x + m - 1) // m * m


# ================= Pallas kernel 1: fused complex matmul (+ optional GELU epilogue) =========
def _cmm_kernel(ar_ref, ai_ref, br_ref, bi_ref, or_ref, oi_ref, *, fuse_gelu):
    ar, ai = ar_ref[...], ai_ref[...]
    br, bi = br_ref[...], bi_ref[...]
    rr = jnp.dot(ar, br, preferred_element_type=jnp.float32)
    ii = jnp.dot(ai, bi, preferred_element_type=jnp.float32)
    ri = jnp.dot(ar, bi, preferred_element_type=jnp.float32)
    ir = jnp.dot(ai, br, preferred_element_type=jnp.float32)
    cr = rr - ii
    ci = ri + ir
    if fuse_gelu:
        # ComplexGELU epilogue: gelu(|z|)/( |z| + 1e-8 ) * z   (matches the reference formula)
        mag = jnp.sqrt(cr * cr + ci * ci)
        act = 0.5 * mag * (1.0 + jax.lax.erf(mag * 0.7071067811865476))
        scale = act / (mag + 1e-8)
        cr = cr * scale
        ci = ci * scale
    or_ref[...] = cr
    oi_ref[...] = ci


def complex_matmul(ar, ai, br, bi, fuse_gelu=False):
    """(Ar+iAi)@(Br+iBi): bf16 operands on the MXU, f32 accumulation, full-K single block."""
    M, K = ar.shape
    K2, N = br.shape
    assert K == K2, (ar.shape, br.shape)
    Kp = _round_up(K, 16)                      # full K in one block (no K grid axis)
    tm = min(_round_up(M, 16), 256)
    Mp = _round_up(M, tm)
    tn = min(_round_up(N, 128), 512)
    Np = _round_up(N, tn)

    def pad_cast(x, rows, cols):
        r, c = x.shape
        return jnp.pad(x, ((0, rows - r), (0, cols - c))).astype(jnp.bfloat16)

    a_r, a_i = pad_cast(ar, Mp, Kp), pad_cast(ai, Mp, Kp)
    b_r, b_i = pad_cast(br, Kp, Np), pad_cast(bi, Kp, Np)

    a_spec = pl.BlockSpec((tm, Kp), lambda i, j: (i, 0))
    b_spec = pl.BlockSpec((Kp, tn), lambda i, j: (0, j))   # weight block stays resident over i
    o_spec = pl.BlockSpec((tm, tn), lambda i, j: (i, j))

    out_r, out_i = pl.pallas_call(
        functools.partial(_cmm_kernel, fuse_gelu=fuse_gelu),
        out_shape=(jax.ShapeDtypeStruct((Mp, Np), jnp.float32),
                   jax.ShapeDtypeStruct((Mp, Np), jnp.float32)),
        grid=(Mp // tm, Np // tn),
        in_specs=[a_spec, a_spec, b_spec, b_spec],
        out_specs=(o_spec, o_spec),
        compiler_params=pltpu.CompilerParams(
            dimension_semantics=("parallel", "parallel")),
    )(a_r, a_i, b_r, b_i)
    return out_r[:M, :N], out_i[:M, :N]


# ================= Pallas kernel 2: batched complex window attention ========================
def _attn_kernel(rpb_ref, qr_ref, qi_ref, kr_ref, ki_ref, vr_ref, vi_ref,
                 or_ref, oi_ref, *, scale):
    qr, qi = qr_ref[...], qi_ref[...]          # (S, D)
    kr, ki = kr_ref[...], ki_ref[...]
    vr, vi = vr_ref[...], vi_ref[...]
    rpb = rpb_ref[...]                         # (S, S), real bias
    # attn = q @ conj(k)^T * scale + bias
    ar = (jnp.dot(qr, kr.T, preferred_element_type=jnp.float32)
          + jnp.dot(qi, ki.T, preferred_element_type=jnp.float32)) * scale + rpb
    ai = (jnp.dot(qi, kr.T, preferred_element_type=jnp.float32)
          - jnp.dot(qr, ki.T, preferred_element_type=jnp.float32)) * scale
    amag = jnp.sqrt(ar * ar + ai * ai)
    m = jnp.max(amag, axis=-1, keepdims=True)
    e = jnp.exp(amag - m)
    soft = e / jnp.sum(e, axis=-1, keepdims=True)
    fac = soft / (amag + 1e-8)
    ar = ar * fac
    ai = ai * fac
    or_ref[...] = (jnp.dot(ar, vr, preferred_element_type=jnp.float32)
                   - jnp.dot(ai, vi, preferred_element_type=jnp.float32))
    oi_ref[...] = (jnp.dot(ar, vi, preferred_element_type=jnp.float32)
                   + jnp.dot(ai, vr, preferred_element_type=jnp.float32))


def attention_pallas(qr, qi, kr, ki, vr, vi, rpb, scale):
    """All windows & heads in one pallas_call: grid=(Bw, heads), blocks of (S, head_dim)."""
    Bw, Hh, S, D = qr.shape
    qspec = pl.BlockSpec((None, None, S, D), lambda b, h: (b, h, 0, 0))
    rspec = pl.BlockSpec((None, S, S), lambda b, h: (h, 0, 0))
    out_r, out_i = pl.pallas_call(
        functools.partial(_attn_kernel, scale=scale),
        out_shape=(jax.ShapeDtypeStruct((Bw, Hh, S, D), jnp.float32),
                   jax.ShapeDtypeStruct((Bw, Hh, S, D), jnp.float32)),
        grid=(Bw, Hh),
        in_specs=[rspec, qspec, qspec, qspec, qspec, qspec, qspec],
        out_specs=(qspec, qspec),
        compiler_params=pltpu.CompilerParams(
            dimension_semantics=("parallel", "parallel")),
    )(rpb, qr, qi, kr, ki, vr, vi)
    return out_r, out_i


# ================= conv lowering ============================================================
def im2col(x, kh, kw, sh, sw, ph, pw):
    B, C, H, W = x.shape
    Ho = (H + 2 * ph - kh) // sh + 1
    Wo = (W + 2 * pw - kw) // sw + 1
    xp = jnp.pad(x, ((0, 0), (0, 0), (ph, ph), (pw, pw)))
    cols = []
    for i in range(kh):
        for j in range(kw):
            cols.append(xp[:, :, i:i + sh * Ho:sh, j:j + sw * Wo:sw])
    cols = jnp.stack(cols, axis=2)                       # (B, C, kh*kw, Ho, Wo)
    cols = cols.reshape(B, C * kh * kw, Ho, Wo)
    cols = cols.transpose(0, 2, 3, 1).reshape(B * Ho * Wo, C * kh * kw)
    return cols, Ho, Wo


def complex_conv2d(w, xr, xi, stride, padding, fuse_gelu=False):
    """ComplexConv2d (no bias): conv_r(x.r)-conv_i(x.i), conv_r(x.i)+conv_i(x.r)."""
    wr, wi = w['r'], w['i']
    Cout, _, kh, kw = wr.shape
    sh, sw = stride
    ph, pw = padding
    Pr, Ho, Wo = im2col(xr, kh, kw, sh, sw, ph, pw)
    Pi, _, _ = im2col(xi, kh, kw, sh, sw, ph, pw)
    outr, outi = complex_matmul(Pr, Pi, wr.reshape(Cout, -1).T, wi.reshape(Cout, -1).T,
                                fuse_gelu=fuse_gelu)
    B = xr.shape[0]
    outr = outr.reshape(B, Ho, Wo, Cout).transpose(0, 3, 1, 2)
    outi = outi.reshape(B, Ho, Wo, Cout).transpose(0, 3, 1, 2)
    return outr, outi


# ================= small / elementwise blocks (plain JAX, XLA-fused) ========================
def complex_gelu(xr, xi):
    mag = jnp.sqrt(xr * xr + xi * xi)
    act = 0.5 * mag * (1.0 + jax.lax.erf(mag * 0.7071067811865476))
    scale = act / (mag + 1e-8)
    return xr * scale, xi * scale


def _bn(x, g, b):
    # training-mode batch statistics (a freshly constructed nn.BatchNorm2d is in train mode)
    mean = jnp.mean(x, axis=(0, 2, 3), keepdims=True)
    var = jnp.mean((x - mean) ** 2, axis=(0, 2, 3), keepdims=True)
    xh = (x - mean) / jnp.sqrt(var + BN_EPS)
    return xh * g[None, :, None, None] + b[None, :, None, None]


def complex_bn(p, xr, xi):
    return _bn(xr, p['gr'], p['br']), _bn(xi, p['gi'], p['bi'])


def pixel_shuffle(x, r):
    B, C, H, W = x.shape
    Co = C // (r * r)
    x = x.reshape(B, Co, r, r, H, W).transpose(0, 1, 4, 2, 5, 3)
    return x.reshape(B, Co, H * r, W * r)


def complex_se(p, xr, xi):
    C = xr.shape[1]
    mag = jnp.sqrt(xr * xr + xi * xi)
    pooled = jnp.mean(mag, axis=(2, 3))                                  # (B, C)
    h = jax.nn.relu(pooled @ p['se1'].reshape(-1, C).T)
    s = jax.nn.sigmoid(h @ p['se2'].reshape(C, -1).T)
    s = s[:, :, None, None]
    return xr * s, xi * s


def complex_spatial_attn(w, xr, xi):
    mag = jnp.sqrt(xr * xr + xi * xi)
    # TODO(synk): reference cats (|z|, Re, Im) -> 3*C channels into a Conv2d(3,1,7) which is
    # shape-inconsistent for C>1; reduce each over channels so the 3-channel conv is defined.
    feat = jnp.stack([mag.mean(axis=1), xr.mean(axis=1), xi.mean(axis=1)], axis=1)
    attn = jax.lax.conv_general_dilated(
        feat, w, window_strides=(1, 1), padding=((3, 3), (3, 3)),
        dimension_numbers=('NCHW', 'OIHW', 'NCHW'))
    attn = jax.nn.sigmoid(attn)
    return xr * attn, xi * attn


# ================= swin transformer bottleneck ==============================================
def _relative_position_index(ws):
    ch, cw = np.arange(ws[0]), np.arange(ws[1])
    coords = np.stack(np.meshgrid(ch, cw, indexing='ij'))
    cf = coords.reshape(2, -1)
    rel = (cf[:, :, None] - cf[:, None, :]).transpose(1, 2, 0)
    rel[:, :, 0] += ws[0] - 1
    rel[:, :, 1] += ws[1] - 1
    rel[:, :, 0] *= 2 * ws[1] - 1
    return rel.sum(-1)                                                   # (S, S)


REL_POS_INDEX = _relative_position_index(WINDOW)


def swin_attention(p, xr, xi, num_heads):
    Bw, C, H, W = xr.shape
    head_dim = C // num_heads
    scale = head_dim ** (-0.5)
    S = H * W
    qkvr, qkvi = complex_conv2d(p['qkv'], xr, xi, (1, 1), (0, 0))        # (Bw, 3C, H, W)

    def split_heads(t):  # -> q, k, v each (Bw, heads, S, head_dim)
        t = t.reshape(Bw, 3, num_heads, head_dim, S).transpose(1, 0, 2, 4, 3)
        return t[0], t[1], t[2]

    qr, kr, vr = split_heads(qkvr)
    qi, ki, vi = split_heads(qkvi)

    rpb = p['rpb'][REL_POS_INDEX.reshape(-1)].reshape(S, S, num_heads).transpose(2, 0, 1)

    out_r, out_i = attention_pallas(qr, qi, kr, ki, vr, vi, rpb, scale)  # (Bw, heads, S, d)

    def merge(t):
        return t.transpose(0, 1, 3, 2).reshape(Bw, C, H, W)

    return complex_conv2d(p['proj'], merge(out_r), merge(out_i), (1, 1), (0, 0))


def swin_block(p, xr, xi):
    B, C, H, W = xr.shape
    p1, p2 = WINDOW
    hh, ww = H // p1, W // p2

    def to_w(t):
        return (t.reshape(B, C, hh, p1, ww, p2).transpose(0, 2, 4, 1, 3, 5)
                .reshape(B * hh * ww, C, p1, p2))

    def from_w(t):
        return (t.reshape(B, hh, ww, C, p1, p2).transpose(0, 3, 1, 4, 2, 5)
                .reshape(B, C, H, W))

    ar, ai = swin_attention(p, to_w(xr), to_w(xi), NUM_HEADS)
    xr = xr + from_w(ar)
    xi = xi + from_w(ai)
    xr, xi = complex_bn(p['norm1'], xr, xi)
    # mlp1 -> GELU fused in the matmul epilogue -> mlp2
    mr, mi = complex_conv2d(p['mlp1'], xr, xi, (1, 1), (0, 0), fuse_gelu=True)
    mr, mi = complex_conv2d(p['mlp2'], mr, mi, (1, 1), (0, 0))
    xr = xr + mr
    xi = xi + mi
    return complex_bn(p['norm2'], xr, xi)


# ================= encoder / decoder ========================================================
def encoder_block(p, xr, xi):
    xr, xi = complex_conv2d(p['conv'], xr, xi, (1, 2), (1, 3))
    xr, xi = complex_bn(p['bn'], xr, xi)
    return complex_gelu(xr, xi)


def decoder_block(p, xr, xi, sr, si):
    ur, ui = complex_conv2d(p['up'], xr, xi, (1, 1), (0, 0))
    ur, ui = pixel_shuffle(ur, 2), pixel_shuffle(ui, 2)
    # TODO(synk): reference model's isotropic PixelShuffle doubles H while the encoder keeps H
    # (stride (1,2)), so torch.cat would fail; subsample H by 2 so the skip concat is defined.
    ur, ui = ur[:, :, ::2, :], ui[:, :, ::2, :]
    cr = jnp.concatenate([ur, sr], axis=1)
    ci = jnp.concatenate([ui, si], axis=1)
    xr, xi = complex_conv2d(p['conv1'], cr, ci, (1, 1), (1, 1))
    xr, xi = complex_gelu(*complex_bn(p['bn1'], xr, xi))
    xr, xi = complex_conv2d(p['conv2'], xr, xi, (1, 1), (1, 1))
    xr, xi = complex_gelu(*complex_bn(p['bn2'], xr, xi))
    xr, xi = complex_se(p, xr, xi)
    xr, xi = complex_spatial_attn(p['sa'], xr, xi)
    return xr, xi


# ================= full forward =============================================================
def forward(params, xr, xi):
    B = xr.shape[0]
    vvr, vvi = xr[:, 0:1], xi[:, 0:1]
    vhr, vhi = xr[:, 1:2], xi[:, 1:2]

    vv1 = encoder_block(params['enc1'], vvr, vvi)
    vh1 = encoder_block(params['enc1'], vhr, vhi)
    vv2 = encoder_block(params['enc2'], *vv1)
    vh2 = encoder_block(params['enc2'], *vh1)
    vv3 = encoder_block(params['enc3'], *vv2)
    vh3 = encoder_block(params['enc3'], *vh2)

    br_, bi_ = vv3[0] + vh3[0], vv3[1] + vh3[1]
    for blk in params['bottleneck']:
        br_, bi_ = swin_block(blk, br_, bi_)

    d2r, d2i = decoder_block(params['dec2'], br_, bi_, vv2[0], vv2[1])
    d1r, d1i = decoder_block(params['dec1'], d2r, d2i, vv1[0], vv1[1])

    # final conv -> GELU fused in the matmul epilogue -> final 1x1 conv
    fr, fi = complex_conv2d(params['final1'], d1r, d1i, (1, 1), (1, 1), fuse_gelu=True)
    fr, fi = complex_conv2d(params['final2'], fr, fi, (1, 1), (0, 0))

    Hin, Win = vvr.shape[2], vvr.shape[3]
    up_shape = (B, 1, Hin, 4 * Win)
    res = {}
    for name, (rr, ii) in (('vv', (vvr, vvi)), ('vh', (vhr, vhi))):
        rr_u = jax.image.resize(rr, up_shape, method='bilinear')
        ii_u = jax.image.resize(ii, up_shape, method='bilinear')
        # TODO(synk): reference residual (B,1,H,4W) does not spatially match final_features
        # (B,1,H,W//2); resize the residual onto the feature grid so the addition is defined.
        rr_u = jax.image.resize(rr_u, fr.shape, method='bilinear')
        ii_u = jax.image.resize(ii_u, fi.shape, method='bilinear')
        res[name] = (rr_u, ii_u)

    out_vv = jax.lax.complex(fr + res['vv'][0], fi + res['vv'][1])
    out_vh = jax.lax.complex(fr + res['vh'][0], fi + res['vh'][1])
    return jnp.concatenate([out_vv, out_vh], axis=1)


# ================= deterministic parameter init =============================================
def init_params(key):
    keys = iter(jax.random.split(key, 256))

    def w(shape, scale=0.1):
        return jax.random.normal(next(keys), shape, jnp.float32) * scale

    def cconv(cin, cout, kh, kw):
        return {'r': w((cout, cin, kh, kw)), 'i': w((cout, cin, kh, kw))}

    def cbn(c):
        return {'gr': jnp.ones((c,), jnp.float32), 'br': jnp.zeros((c,), jnp.float32),
                'gi': jnp.ones((c,), jnp.float32), 'bi': jnp.zeros((c,), jnp.float32)}

    def enc(cin, cout):
        return {'conv': cconv(cin, cout, 3, 7), 'bn': cbn(cout)}

    def swin(dim, heads):
        return {'qkv': cconv(dim, dim * 3, 1, 1), 'proj': cconv(dim, dim, 1, 1),
                'rpb': jnp.zeros(((2 * WINDOW[0] - 1) * (2 * WINDOW[1] - 1), heads),
                                 jnp.float32),
                'norm1': cbn(dim), 'norm2': cbn(dim),
                'mlp1': cconv(dim, dim * 4, 1, 1), 'mlp2': cconv(dim * 4, dim, 1, 1)}

    def dec(cin, cout):
        cmid = max(cout // 16, 1)
        return {'up': cconv(cin, cout * 4, 1, 1),
                'conv1': cconv(cout * 2, cout, 3, 3), 'bn1': cbn(cout),
                'conv2': cconv(cout, cout, 3, 3), 'bn2': cbn(cout),
                'se1': w((cmid, cout, 1, 1)), 'se2': w((cout, cmid, 1, 1)),
                'sa': w((1, 3, 7, 7))}

    return {'enc1': enc(IN_CHANNELS, BASE_DIM),
            'enc2': enc(BASE_DIM, BASE_DIM * 2),
            'enc3': enc(BASE_DIM * 2, BASE_DIM * 4),
            'bottleneck': [swin(BASE_DIM * 4, NUM_HEADS) for _ in range(SWIN_DEPTH)],
            'dec2': dec(BASE_DIM * 4, BASE_DIM * 2),
            'dec1': dec(BASE_DIM * 2, BASE_DIM),
            'final1': cconv(BASE_DIM, BASE_DIM // 2, 3, 3),
            'final2': cconv(BASE_DIM // 2, IN_CHANNELS, 1, 1)}


if __name__ == "__main__":
    key = jax.random.PRNGKey(0)
    kp, kr, ki = jax.random.split(key, 3)
    params = init_params(kp)

    B, H, W = 1, 8, 32   # dual-polar complex input (B, 2, H, W); H%8==0, W%32==0
    xr = jax.random.normal(kr, (B, 2, H, W), jnp.float32)
    xi = jax.random.normal(ki, (B, 2, H, W), jnp.float32)

    out = jax.jit(forward)(params, xr, xi)
    out = jax.block_until_ready(out)
    assert out.shape == (B, 2, H, W // 2), out.shape
    assert out.dtype == jnp.complex64, out.dtype
    assert bool(jnp.all(jnp.isfinite(out.real)) & jnp.all(jnp.isfinite(out.imag)))
    print("KERNEL_OK")
</pallas_src>

<mosaic_0001>
module attributes {stable_mosaic.version = 11 : i64} {
  func.func @_cmm_kernel(%arg0: i32, %arg1: i32, %arg2: memref<128x32xbf16, #tpu.memory_space<vmem>>, %arg3: memref<128x32xbf16, #tpu.memory_space<vmem>>, %arg4: memref<32x128xbf16, #tpu.memory_space<vmem>>, %arg5: memref<32x128xbf16, #tpu.memory_space<vmem>>, %arg6: memref<128x128xf32, #tpu.memory_space<vmem>>, %arg7: memref<128x128xf32, #tpu.memory_space<vmem>>) attributes {dimension_semantics = [#tpu.dimension_semantics<parallel>, #tpu.dimension_semantics<parallel>], iteration_bounds = array<i64: 1, 1>, scalar_prefetch = 0 : i64, scratch_operands = 0 : i64, tpu.core_type = #tpu.core_type<tc>, window_params = [{transform_indices = @transform_0, window_bounds = array<i64: 128, 32>}, {transform_indices = @transform_1, window_bounds = array<i64: 128, 32>}, {transform_indices = @transform_2, window_bounds = array<i64: 32, 128>}, {transform_indices = @transform_3, window_bounds = array<i64: 32, 128>}, {transform_indices = @transform_4, window_bounds = array<i64: 128, 128>}, {transform_indices = @transform_5, window_bounds = array<i64: 128, 128>}]} {
    %c0 = arith.constant 0 : index
    %c0_0 = arith.constant 0 : index
    %0 = vector.load %arg2[%c0, %c0_0] : memref<128x32xbf16, #tpu.memory_space<vmem>>, vector<128x32xbf16>
    %c0_1 = arith.constant 0 : index
    %c0_2 = arith.constant 0 : index
    %1 = vector.load %arg3[%c0_1, %c0_2] : memref<128x32xbf16, #tpu.memory_space<vmem>>, vector<128x32xbf16>
    %c0_3 = arith.constant 0 : index
    %c0_4 = arith.constant 0 : index
    %2 = vector.load %arg4[%c0_3, %c0_4] : memref<32x128xbf16, #tpu.memory_space<vmem>>, vector<32x128xbf16>
    %c0_5 = arith.constant 0 : index
    %c0_6 = arith.constant 0 : index
    %3 = vector.load %arg5[%c0_5, %c0_6] : memref<32x128xbf16, #tpu.memory_space<vmem>>, vector<32x128xbf16>
    %cst = arith.constant dense<0.000000e+00> : vector<128x128xf32>
    %4 = tpu.matmul %0, %2, %cst {dimension_numbers = #tpu.dot_dimension_numbers<[1], [0], [0], [1], [0, 0, 1, 1], [], []>} : vector<128x32xbf16>, vector<32x128xbf16>, vector<128x128xf32> -> vector<128x128xf32>
    %cst_7 = arith.constant dense<0.000000e+00> : vector<128x128xf32>
    %5 = tpu.matmul %1, %3, %cst_7 {dimension_numbers = #tpu.dot_dimension_numbers<[1], [0], [0], [1], [0, 0, 1, 1], [], []>} : vector<128x32xbf16>, vector<32x128xbf16>, vector<128x128xf32> -> vector<128x128xf32>
    %cst_8 = arith.constant dense<0.000000e+00> : vector<128x128xf32>
    %6 = tpu.matmul %0, %3, %cst_8 {dimension_numbers = #tpu.dot_dimension_numbers<[1], [0], [0], [1], [0, 0, 1, 1], [], []>} : vector<128x32xbf16>, vector<32x128xbf16>, vector<128x128xf32> -> vector<128x128xf32>
    %cst_9 = arith.constant dense<0.000000e+00> : vector<128x128xf32>
    %7 = tpu.matmul %1, %2, %cst_9 {dimension_numbers = #tpu.dot_dimension_numbers<[1], [0], [0], [1], [0, 0, 1, 1], [], []>} : vector<128x32xbf16>, vector<32x128xbf16>, vector<128x128xf32> -> vector<128x128xf32>
    %8 = arith.subf %4, %5 : vector<128x128xf32>
    %9 = arith.addf %6, %7 : vector<128x128xf32>
    %c0_10 = arith.constant 0 : index
    %c0_11 = arith.constant 0 : index
    %10 = vector.load %arg6[%c0_10, %c0_11] : memref<128x128xf32, #tpu.memory_space<vmem>>, vector<128x128xf32>
    tpu.vector_store %arg6[%c0_10, %c0_11], %8 {strides = array<i32>} : memref<128x128xf32, #tpu.memory_space<vmem>>, vector<128x128xf32>,
    %c0_12 = arith.constant 0 : index
    %c0_13 = arith.constant 0 : index
    %11 = vector.load %arg7[%c0_12, %c0_13] : memref<128x128xf32, #tpu.memory_space<vmem>>, vector<128x128xf32>
    tpu.vector_store %arg7[%c0_12, %c0_13], %9 {strides = array<i32>} : memref<128x128xf32, #tpu.memory_space<vmem>>, vector<128x128xf32>,
    return
  }
  func.func @transform_0(%arg0: i32, %arg1: i32) -> (i32, i32) {
    %c0_i32 = arith.constant 0 : i32
    %c0_i32_0 = arith.constant 0 : i32
    return %arg0, %c0_i32 : i32, i32
  }
  func.func @transform_1(%arg0: i32, %arg1: i32) -> (i32, i32) {
    %c0_i32 = arith.constant 0 : i32
    %c0_i32_0 = arith.constant 0 : i32
    return %arg0, %c0_i32 : i32, i32
  }
  func.func @transform_2(%arg0: i32, %arg1: i32) -> (i32, i32) {
    %c0_i32 = arith.constant 0 : i32
    %c0_i32_0 = arith.constant 0 : i32
    return %c0_i32, %arg1 : i32, i32
  }
  func.func @transform_3(%arg0: i32, %arg1: i32) -> (i32, i32) {
    %c0_i32 = arith.constant 0 : i32
    %c0_i32_0 = arith.constant 0 : i32
    return %c0_i32, %arg1 : i32, i32
  }
  func.func @transform_4(%arg0: i32, %arg1: i32) -> (i32, i32) {
    %c0_i32 = arith.constant 0 : i32
    return %arg0, %arg1 : i32, i32
  }
  func.func @transform_5(%arg0: i32, %arg1: i32) -> (i32, i32) {
    %c0_i32 = arith.constant 0 : i32
    return %arg0, %arg1 : i32, i32
  }
}

module attributes {stable_mosaic.version = 11 : i64} {
  func.func @_cmm_kernel(%arg0: i32, %arg1: i32, %arg2: memref<64x336xbf16, #tpu.memory_space<vmem>>, %arg3: memref<64x336xbf16, #tpu.memory_space<vmem>>, %arg4: memref<336x128xbf16, #tpu.memory_space<vmem>>, %arg5: memref<336x128xbf16, #tpu.memory_space<vmem>>, %arg6: memref<64x128xf32, #tpu.memory_space<vmem>>, %arg7: memref<64x128xf32, #tpu.memory_space<vmem>>) attributes {dimension_semantics = [#tpu.dimension_semantics<parallel>, #tpu.dimension_semantics<parallel>], iteration_bounds = array<i64: 1, 1>, scalar_prefetch = 0 : i64, scratch_operands = 0 : i64, tpu.core_type = #tpu.core_type<tc>, window_params = [{transform_indices = @transform_0, window_bounds = array<i64: 64, 336>}, {transform_indices = @transform_1, window_bounds = array<i64: 64, 336>}, {transform_indices = @transform_2, window_bounds = array<i64: 336, 128>}, {transform_indices = @transform_3, window_bounds = array<i64: 336, 128>}, {transform_indices = @transform_4, window_bounds = array<i64: 64, 128>}, {transform_indices = @transform_5, window_bounds = array<i64: 64, 128>}]} {
    %c0 = arith.constant 0 : index
    %c0_0 = arith.constant 0 : index
    %0 = vector.load %arg2[%c0, %c0_0] : memref<64x336xbf16, #tpu.memory_space<vmem>>, vector<64x336xbf16>
    %c0_1 = arith.constant 0 : index
    %c0_2 = arith.constant 0 : index
    %1 = vector.load %arg3[%c0_1, %c0_2] : memref<64x336xbf16, #tpu.memory_space<vmem>>, vector<64x336xbf16>
    %c0_3 = arith.constant 0 : index
    %c0_4 = arith.constant 0 : index
    %2 = vector.load %arg4[%c0_3, %c0_4] : memref<336x128xbf16, #tpu.memory_space<vmem>>, vector<336x128xbf16>
    %c0_5 = arith.constant 0 : index
    %c0_6 = arith.constant 0 : index
    %3 = vector.load %arg5[%c0_5, %c0_6] : memref<336x128xbf16, #tpu.memory_space<vmem>>, vector<336x128xbf16>
    %cst = arith.constant dense<0.000000e+00> : vector<64x128xf32>
    %4 = tpu.matmul %0, %2, %cst {dimension_numbers = #tpu.dot_dimension_numbers<[1], [0], [0], [1], [0, 0, 1, 1], [], []>} : vector<64x336xbf16>, vector<336x128xbf16>, vector<64x128xf32> -> vector<64x128xf32>
    %cst_7 = arith.constant dense<0.000000e+00> : vector<64x128xf32>
    %5 = tpu.matmul %1, %3, %cst_7 {dimension_numbers = #tpu.dot_dimension_numbers<[1], [0], [0], [1], [0, 0, 1, 1], [], []>} : vector<64x336xbf16>, vector<336x128xbf16>, vector<64x128xf32> -> vector<64x128xf32>
    %cst_8 = arith.constant dense<0.000000e+00> : vector<64x128xf32>
    %6 = tpu.matmul %0, %3, %cst_8 {dimension_numbers = #tpu.dot_dimension_numbers<[1], [0], [0], [1], [0, 0, 1, 1], [], []>} : vector<64x336xbf16>, vector<336x128xbf16>, vector<64x128xf32> -> vector<64x128xf32>
    %cst_9 = arith.constant dense<0.000000e+00> : vector<64x128xf32>
    %7 = tpu.matmul %1, %2, %cst_9 {dimension_numbers = #tpu.dot_dimension_numbers<[1], [0], [0], [1], [0, 0, 1, 1], [], []>} : vector<64x336xbf16>, vector<336x128xbf16>, vector<64x128xf32> -> vector<64x128xf32>
    %8 = arith.subf %4, %5 : vector<64x128xf32>
    %9 = arith.addf %6, %7 : vector<64x128xf32>
    %c0_10 = arith.constant 0 : index
    %c0_11 = arith.constant 0 : index
    %10 = vector.load %arg6[%c0_10, %c0_11] : memref<64x128xf32, #tpu.memory_space<vmem>>, vector<64x128xf32>
    tpu.vector_store %arg6[%c0_10, %c0_11], %8 {strides = array<i32>} : memref<64x128xf32, #tpu.memory_space<vmem>>, vector<64x128xf32>,
    %c0_12 = arith.constant 0 : index
    %c0_13 = arith.constant 0 : index
    %11 = vector.load %arg7[%c0_12, %c0_13] : memref<64x128xf32, #tpu.memory_space<vmem>>, vector<64x128xf32>
    tpu.vector_store %arg7[%c0_12, %c0_13], %9 {strides = array<i32>} : memref<64x128xf32, #tpu.memory_space<vmem>>, vector<64x128xf32>,
    return
  }
  func.func @transform_0(%arg0: i32, %arg1: i32) -> (i32, i32) {
    %c0_i32 = arith.constant 0 : i32
    %c0_i32_0 = arith.constant 0 : i32
    return %arg0, %c0_i32 : i32, i32
  }
  func.func @transform_1(%arg0: i32, %arg1: i32) -> (i32, i32) {
    %c0_i32 = arith.constant 0 : i32
    %c0_i32_0 = arith.constant 0 : i32
    return %arg0, %c0_i32 : i32, i32
  }
  func.func @transform_2(%arg0: i32, %arg1: i32) -> (i32, i32) {
    %c0_i32 = arith.constant 0 : i32
    %c0_i32_0 = arith.constant 0 : i32
    return %c0_i32, %arg1 : i32, i32
  }
  func.func @transform_3(%arg0: i32, %arg1: i32) -> (i32, i32) {
    %c0_i32 = arith.constant 0 : i32
    %c0_i32_0 = arith.constant 0 : i32
    return %c0_i32, %arg1 : i32, i32
  }
  func.func @transform_4(%arg0: i32, %arg1: i32) -> (i32, i32) {
    %c0_i32 = arith.constant 0 : i32
    return %arg0, %arg1 : i32, i32
  }
  func.func @transform_5(%arg0: i32, %arg1: i32) -> (i32, i32) {
    %c0_i32 = arith.constant 0 : i32
    return %arg0, %arg1 : i32, i32
  }
}

module attributes {stable_mosaic.version = 11 : i64} {
  func.func @_cmm_kernel(%arg0: i32, %arg1: i32, %arg2: memref<32x672xbf16, #tpu.memory_space<vmem>>, %arg3: memref<32x672xbf16, #tpu.memory_space<vmem>>, %arg4: memref<672x128xbf16, #tpu.memory_space<vmem>>, %arg5: memref<672x128xbf16, #tpu.memory_space<vmem>>, %arg6: memref<32x128xf32, #tpu.memory_space<vmem>>, %arg7: memref<32x128xf32, #tpu.memory_space<vmem>>) attributes {dimension_semantics = [#tpu.dimension_semantics<parallel>, #tpu.dimension_semantics<parallel>], iteration_bounds = array<i64: 1, 1>, scalar_prefetch = 0 : i64, scratch_operands = 0 : i64, tpu.core_type = #tpu.core_type<tc>, window_params = [{transform_indices = @transform_0, window_bounds = array<i64: 32, 672>}, {transform_indices = @transform_1, window_bounds = array<i64: 32, 672>}, {transform_indices = @transform_2, window_bounds = array<i64: 672, 128>}, {transform_indices = @transform_3, window_bounds = array<i64: 672, 128>}, {transform_indices = @transform_4, window_bounds = array<i64: 32, 128>}, {transform_indices = @transform_5, window_bounds = array<i64: 32, 128>}]} {
    %c0 = arith.constant 0 : index
    %c0_0 = arith.constant 0 : index
    %0 = vector.load %arg2[%c0, %c0_0] : memref<32x672xbf16, #tpu.memory_space<vmem>>, vector<32x672xbf16>
    %c0_1 = arith.constant 0 : index
    %c0_2 = arith.constant 0 : index
    %1 = vector.load %arg3[%c0_1, %c0_2] : memref<32x672xbf16, #tpu.memory_space<vmem>>, vector<32x672xbf16>
    %c0_3 = arith.constant 0 : index
    %c0_4 = arith.constant 0 : index
    %2 = vector.load %arg4[%c0_3, %c0_4] : memref<672x128xbf16, #tpu.memory_space<vmem>>, vector<672x128xbf16>
    %c0_5 = arith.constant 0 : index
    %c0_6 = arith.constant 0 : index
    %3 = vector.load %arg5[%c0_5, %c0_6] : memref<672x128xbf16, #tpu.memory_space<vmem>>, vector<672x128xbf16>
    %cst = arith.constant dense<0.000000e+00> : vector<32x128xf32>
    %4 = tpu.matmul %0, %2, %cst {dimension_numbers = #tpu.dot_dimension_numbers<[1], [0], [0], [1], [0, 0, 1, 1], [], []>} : vector<32x672xbf16>, vector<672x128xbf16>, vector<32x128xf32> -> vector<32x128xf32>
    %cst_7 = arith.constant dense<0.000000e+00> : vector<32x128xf32>
    %5 = tpu.matmul %1, %3, %cst_7 {dimension_numbers = #tpu.dot_dimension_numbers<[1], [0], [0], [1], [0, 0, 1, 1], [], []>} : vector<32x672xbf16>, vector<672x128xbf16>, vector<32x128xf32> -> vector<32x128xf32>
    %cst_8 = arith.constant dense<0.000000e+00> : vector<32x128xf32>
    %6 = tpu.matmul %0, %3, %cst_8 {dimension_numbers = #tpu.dot_dimension_numbers<[1], [0], [0], [1], [0, 0, 1, 1], [], []>} : vector<32x672xbf16>, vector<672x128xbf16>, vector<32x128xf32> -> vector<32x128xf32>
    %cst_9 = arith.constant dense<0.000000e+00> : vector<32x128xf32>
    %7 = tpu.matmul %1, %2, %cst_9 {dimension_numbers = #tpu.dot_dimension_numbers<[1], [0], [0], [1], [0, 0, 1, 1], [], []>} : vector<32x672xbf16>, vector<672x128xbf16>, vector<32x128xf32> -> vector<32x128xf32>
    %8 = arith.subf %4, %5 : vector<32x128xf32>
    %9 = arith.addf %6, %7 : vector<32x128xf32>
    %c0_10 = arith.constant 0 : index
    %c0_11 = arith.constant 0 : index
    %10 = vector.load %arg6[%c0_10, %c0_11] : memref<32x128xf32, #tpu.memory_space<vmem>>, vector<32x128xf32>
    tpu.vector_store %arg6[%c0_10, %c0_11], %8 {strides = array<i32>} : memref<32x128xf32, #tpu.memory_space<vmem>>, vector<32x128xf32>,
    %c0_12 = arith.constant 0 : index
    %c0_13 = arith.constant 0 : index
    %11 = vector.load %arg7[%c0_12, %c0_13] : memref<32x128xf32, #tpu.memory_space<vmem>>, vector<32x128xf32>
    tpu.vector_store %arg7[%c0_12, %c0_13], %9 {strides = array<i32>} : memref<32x128xf32, #tpu.memory_space<vmem>>, vector<32x128xf32>,
    return
  }
  func.func @transform_0(%arg0: i32, %arg1: i32) -> (i32, i32) {
    %c0_i32 = arith.constant 0 : i32
    %c0_i32_0 = arith.constant 0 : i32
    return %arg0, %c0_i32 : i32, i32
  }
  func.func @transform_1(%arg0: i32, %arg1: i32) -> (i32, i32) {
    %c0_i32 = arith.constant 0 : i32
    %c0_i32_0 = arith.constant 0 : i32
    return %arg0, %c0_i32 : i32, i32
  }
  func.func @transform_2(%arg0: i32, %arg1: i32) -> (i32, i32) {
    %c0_i32 = arith.constant 0 : i32
    %c0_i32_0 = arith.constant 0 : i32
    return %c0_i32, %arg1 : i32, i32
  }
  func.func @transform_3(%arg0: i32, %arg1: i32) -> (i32, i32) {
    %c0_i32 = arith.constant 0 : i32
    %c0_i32_0 = arith.constant 0 : i32
    return %c0_i32, %arg1 : i32, i32
  }
  func.func @transform_4(%arg0: i32, %arg1: i32) -> (i32, i32) {
    %c0_i32 = arith.constant 0 : i32
    return %arg0, %arg1 : i32, i32
  }
  func.func @transform_5(%arg0: i32, %arg1: i32) -> (i32, i32) {
    %c0_i32 = arith.constant 0 : i32
    return %arg0, %arg1 : i32, i32
  }
}

module attributes {stable_mosaic.version = 11 : i64} {
  func.func @_cmm_kernel(%arg0: i32, %arg1: i32, %arg2: memref<32x64xbf16, #tpu.memory_space<vmem>>, %arg3: memref<32x64xbf16, #tpu.memory_space<vmem>>, %arg4: memref<64x256xbf16, #tpu.memory_space<vmem>>, %arg5: memref<64x256xbf16, #tpu.memory_space<vmem>>, %arg6: memref<32x256xf32, #tpu.memory_space<vmem>>, %arg7: memref<32x256xf32, #tpu.memory_space<vmem>>) attributes {dimension_semantics = [#tpu.dimension_semantics<parallel>, #tpu.dimension_semantics<parallel>], iteration_bounds = array<i64: 1, 1>, scalar_prefetch = 0 : i64, scratch_operands = 0 : i64, tpu.core_type = #tpu.core_type<tc>, window_params = [{transform_indices = @transform_0, window_bounds = array<i64: 32, 64>}, {transform_indices = @transform_1, window_bounds = array<i64: 32, 64>}, {transform_indices = @transform_2, window_bounds = array<i64: 64, 256>}, {transform_indices = @transform_3, window_bounds = array<i64: 64, 256>}, {transform_indices = @transform_4, window_bounds = array<i64: 32, 256>}, {transform_indices = @transform_5, window_bounds = array<i64: 32, 256>}]} {
    %c0 = arith.constant 0 : index
    %c0_0 = arith.constant 0 : index
    %0 = vector.load %arg2[%c0, %c0_0] : memref<32x64xbf16, #tpu.memory_space<vmem>>, vector<32x64xbf16>
    %c0_1 = arith.constant 0 : index
    %c0_2 = arith.constant 0 : index
    %1 = vector.load %arg3[%c0_1, %c0_2] : memref<32x64xbf16, #tpu.memory_space<vmem>>, vector<32x64xbf16>
    %c0_3 = arith.constant 0 : index
    %c0_4 = arith.constant 0 : index
    %2 = vector.load %arg4[%c0_3, %c0_4] : memref<64x256xbf16, #tpu.memory_space<vmem>>, vector<64x256xbf16>
    %c0_5 = arith.constant 0 : index
    %c0_6 = arith.constant 0 : index
    %3 = vector.load %arg5[%c0_5, %c0_6] : memref<64x256xbf16, #tpu.memory_space<vmem>>, vector<64x256xbf16>
    %cst = arith.constant dense<0.000000e+00> : vector<32x256xf32>
    %4 = tpu.matmul %0, %2, %cst {dimension_numbers = #tpu.dot_dimension_numbers<[1], [0], [0], [1], [0, 0, 1, 1], [], []>} : vector<32x64xbf16>, vector<64x256xbf16>, vector<32x256xf32> -> vector<32x256xf32>
    %cst_7 = arith.constant dense<0.000000e+00> : vector<32x256xf32>
    %5 = tpu.matmul %1, %3, %cst_7 {dimension_numbers = #tpu.dot_dimension_numbers<[1], [0], [0], [1], [0, 0, 1, 1], [], []>} : vector<32x64xbf16>, vector<64x256xbf16>, vector<32x256xf32> -> vector<32x256xf32>
    %cst_8 = arith.constant dense<0.000000e+00> : vector<32x256xf32>
    %6 = tpu.matmul %0, %3, %cst_8 {dimension_numbers = #tpu.dot_dimension_numbers<[1], [0], [0], [1], [0, 0, 1, 1], [], []>} : vector<32x64xbf16>, vector<64x256xbf16>, vector<32x256xf32> -> vector<32x256xf32>
    %cst_9 = arith.constant dense<0.000000e+00> : vector<32x256xf32>
    %7 = tpu.matmul %1, %2, %cst_9 {dimension_numbers = #tpu.dot_dimension_numbers<[1], [0], [0], [1], [0, 0, 1, 1], [], []>} : vector<32x64xbf16>, vector<64x256xbf16>, vector<32x256xf32> -> vector<32x256xf32>
    %8 = arith.subf %4, %5 : vector<32x256xf32>
    %9 = arith.addf %6, %7 : vector<32x256xf32>
    %c0_10 = arith.constant 0 : index
    %c0_11 = arith.constant 0 : index
    %10 = vector.load %arg6[%c0_10, %c0_11] : memref<32x256xf32, #tpu.memory_space<vmem>>, vector<32x256xf32>
    tpu.vector_store %arg6[%c0_10, %c0_11], %8 {strides = array<i32>} : memref<32x256xf32, #tpu.memory_space<vmem>>, vector<32x256xf32>,
    %c0_12 = arith.constant 0 : index
    %c0_13 = arith.constant 0 : index
    %11 = vector.load %arg7[%c0_12, %c0_13] : memref<32x256xf32, #tpu.memory_space<vmem>>, vector<32x256xf32>
    tpu.vector_store %arg7[%c0_12, %c0_13], %9 {strides = array<i32>} : memref<32x256xf32, #tpu.memory_space<vmem>>, vector<32x256xf32>,
    return
  }
  func.func @transform_0(%arg0: i32, %arg1: i32) -> (i32, i32) {
    %c0_i32 = arith.constant 0 : i32
    %c0_i32_0 = arith.constant 0 : i32
    return %arg0, %c0_i32 : i32, i32
  }
  func.func @transform_1(%arg0: i32, %arg1: i32) -> (i32, i32) {
    %c0_i32 = arith.constant 0 : i32
    %c0_i32_0 = arith.constant 0 : i32
    return %arg0, %c0_i32 : i32, i32
  }
  func.func @transform_2(%arg0: i32, %arg1: i32) -> (i32, i32) {
    %c0_i32 = arith.constant 0 : i32
    %c0_i32_0 = arith.constant 0 : i32
    return %c0_i32, %arg1 : i32, i32
  }
  func.func @transform_3(%arg0: i32, %arg1: i32) -> (i32, i32) {
    %c0_i32 = arith.constant 0 : i32
    %c0_i32_0 = arith.constant 0 : i32
    return %c0_i32, %arg1 : i32, i32
  }
  func.func @transform_4(%arg0: i32, %arg1: i32) -> (i32, i32) {
    %c0_i32 = arith.constant 0 : i32
    return %arg0, %arg1 : i32, i32
  }
  func.func @transform_5(%arg0: i32, %arg1: i32) -> (i32, i32) {
    %c0_i32 = arith.constant 0 : i32
    return %arg0, %arg1 : i32, i32
  }
}

module attributes {stable_mosaic.version = 11 : i64} {
  func.func @_attn_kernel(%arg0: i32, %arg1: i32, %arg2: memref<1x32x32xf32, #tpu.memory_space<vmem>>, %arg3: memref<1x1x32x32xf32, #tpu.memory_space<vmem>>, %arg4: memref<1x1x32x32xf32, #tpu.memory_space<vmem>>, %arg5: memref<1x1x32x32xf32, #tpu.memory_space<vmem>>, %arg6: memref<1x1x32x32xf32, #tpu.memory_space<vmem>>, %arg7: memref<1x1x32x32xf32, #tpu.memory_space<vmem>>, %arg8: memref<1x1x32x32xf32, #tpu.memory_space<vmem>>, %arg9: memref<1x1x32x32xf32, #tpu.memory_space<vmem>>, %arg10: memref<1x1x32x32xf32, #tpu.memory_space<vmem>>) attributes {dimension_semantics = [#tpu.dimension_semantics<parallel>, #tpu.dimension_semantics<parallel>], iteration_bounds = array<i64: 1, 2>, scalar_prefetch = 0 : i64, scratch_operands = 0 : i64, tpu.core_type = #tpu.core_type<tc>, window_params = [{transform_indices = @transform_0, window_bounds = array<i64: 1, 32, 32>}, {transform_indices = @transform_1, window_bounds = array<i64: 1, 1, 32, 32>}, {transform_indices = @transform_2, window_bounds = array<i64: 1, 1, 32, 32>}, {transform_indices = @transform_3, window_bounds = array<i64: 1, 1, 32, 32>}, {transform_indices = @transform_4, window_bounds = array<i64: 1, 1, 32, 32>}, {transform_indices = @transform_5, window_bounds = array<i64: 1, 1, 32, 32>}, {transform_indices = @transform_6, window_bounds = array<i64: 1, 1, 32, 32>}, {transform_indices = @transform_7, window_bounds = array<i64: 1, 1, 32, 32>}, {transform_indices = @transform_8, window_bounds = array<i64: 1, 1, 32, 32>}]} {
    %c0 = arith.constant 0 : index
    %c0_0 = arith.constant 0 : index
    %c0_1 = arith.constant 0 : index
    %c0_2 = arith.constant 0 : index
    %0 = vector.load %arg3[%c0, %c0_0, %c0_1, %c0_2] : memref<1x1x32x32xf32, #tpu.memory_space<vmem>>, vector<1x1x32x32xf32>
    %1 = vector.shape_cast %0 : vector<1x1x32x32xf32> to vector<32x32xf32>
    %c0_3 = arith.constant 0 : index
    %c0_4 = arith.constant 0 : index
    %c0_5 = arith.constant 0 : index
    %c0_6 = arith.constant 0 : index
    %2 = vector.load %arg4[%c0_3, %c0_4, %c0_5, %c0_6] : memref<1x1x32x32xf32, #tpu.memory_space<vmem>>, vector<1x1x32x32xf32>
    %3 = vector.shape_cast %2 : vector<1x1x32x32xf32> to vector<32x32xf32>
    %c0_7 = arith.constant 0 : index
    %c0_8 = arith.constant 0 : index
    %c0_9 = arith.constant 0 : index
    %c0_10 = arith.constant 0 : index
    %4 = vector.load %arg5[%c0_7, %c0_8, %c0_9, %c0_10] : memref<1x1x32x32xf32, #tpu.memory_space<vmem>>, vector<1x1x32x32xf32>
    %5 = vector.shape_cast %4 : vector<1x1x32x32xf32> to vector<32x32xf32>
    %c0_11 = arith.constant 0 : index
    %c0_12 = arith.constant 0 : index
    %c0_13 = arith.constant 0 : index
    %c0_14 = arith.constant 0 : index
    %6 = vector.load %arg6[%c0_11, %c0_12, %c0_13, %c0_14] : memref<1x1x32x32xf32, #tpu.memory_space<vmem>>, vector<1x1x32x32xf32>
    %7 = vector.shape_cast %6 : vector<1x1x32x32xf32> to vector<32x32xf32>
    %c0_15 = arith.constant 0 : index
    %c0_16 = arith.constant 0 : index
    %c0_17 = arith.constant 0 : index
    %c0_18 = arith.constant 0 : index
    %8 = vector.load %arg7[%c0_15, %c0_16, %c0_17, %c0_18] : memref<1x1x32x32xf32, #tpu.memory_space<vmem>>, vector<1x1x32x32xf32>
    %9 = vector.shape_cast %8 : vector<1x1x32x32xf32> to vector<32x32xf32>
    %c0_19 = arith.constant 0 : index
    %c0_20 = arith.constant 0 : index
    %c0_21 = arith.constant 0 : index
    %c0_22 = arith.constant 0 : index
    %10 = vector.load %arg8[%c0_19, %c0_20, %c0_21, %c0_22] : memref<1x1x32x32xf32, #tpu.memory_space<vmem>>, vector<1x1x32x32xf32>
    %11 = vector.shape_cast %10 : vector<1x1x32x32xf32> to vector<32x32xf32>
    %c0_23 = arith.constant 0 : index
    %c0_24 = arith.constant 0 : index
    %c0_25 = arith.constant 0 : index
    %12 = vector.load %arg2[%c0_23, %c0_24, %c0_25] : memref<1x32x32xf32, #tpu.memory_space<vmem>>, vector<1x32x32xf32>
    %13 = vector.shape_cast %12 : vector<1x32x32xf32> to vector<32x32xf32>
    %14 = tpu.transpose %5, [1, 0] : vector<32x32xf32> -> vector<32x32xf32>
    %cst = arith.constant dense<0.000000e+00> : vector<32x32xf32>
    %15 = tpu.matmul %1, %14, %cst {dimension_numbers = #tpu.dot_dimension_numbers<[1], [0], [0], [1], [0, 0, 1, 1], [], []>} : vector<32x32xf32>, vector<32x32xf32>, vector<32x32xf32> -> vector<32x32xf32>
    %16 = tpu.transpose %7, [1, 0] : vector<32x32xf32> -> vector<32x32xf32>
    %cst_26 = arith.constant dense<0.000000e+00> : vector<32x32xf32>
    %17 = tpu.matmul %3, %16, %cst_26 {dimension_numbers = #tpu.dot_dimension_numbers<[1], [0], [0], [1], [0, 0, 1, 1], [], []>} : vector<32x32xf32>, vector<32x32xf32>, vector<32x32xf32> -> vector<32x32xf32>
    %18 = arith.addf %15, %17 : vector<32x32xf32>
    %cst_27 = arith.constant 0.176776692 : f32
    %19 = vector.broadcast %cst_27 : f32 to vector<32x32xf32>
    %20 = arith.mulf %18, %19 : vector<32x32xf32>
    %21 = arith.addf %20, %13 : vector<32x32xf32>
    %22 = tpu.transpose %5, [1, 0] : vector<32x32xf32> -> vector<32x32xf32>
    %cst_28 = arith.constant dense<0.000000e+00> : vector<32x32xf32>
    %23 = tpu.matmul %3, %22, %cst_28 {dimension_numbers = #tpu.dot_dimension_numbers<[1], [0], [0], [1], [0, 0, 1, 1], [], []>} : vector<32x32xf32>, vector<32x32xf32>, vector<32x32xf32> -> vector<32x32xf32>
    %24 = tpu.transpose %7, [1, 0] : vector<32x32xf32> -> vector<32x32xf32>
    %cst_29 = arith.constant dense<0.000000e+00> : vector<32x32xf32>
    %25 = tpu.matmul %1, %24, %cst_29 {dimension_numbers = #tpu.dot_dimension_numbers<[1], [0], [0], [1], [0, 0, 1, 1], [], []>} : vector<32x32xf32>, vector<32x32xf32>, vector<32x32xf32> -> vector<32x32xf32>
    %26 = arith.subf %23, %25 : vector<32x32xf32>
    %cst_30 = arith.constant 0.176776692 : f32
    %27 = vector.broadcast %cst_30 : f32 to vector<32x32xf32>
    %28 = arith.mulf %26, %27 : vector<32x32xf32>
    %29 = arith.mulf %21, %21 : vector<32x32xf32>
    %30 = arith.mulf %28, %28 : vector<32x32xf32>
    %31 = arith.addf %29, %30 : vector<32x32xf32>
    %32 = math.sqrt %31 : vector<32x32xf32>
    %cst_31 = arith.constant dense<0xFF800000> : vector<32xf32>
    %33 = vector.multi_reduction <maximumf>, %32, %cst_31 [1] : vector<32x32xf32> to vector<32xf32>
    %34 = vector.shape_cast %33 : vector<32xf32> to vector<32x1xf32>
    %35 = vector.broadcast %34 : vector<32x1xf32> to vector<32x32xf32>
    %36 = arith.subf %32, %35 : vector<32x32xf32>
    %37 = math.exp %36 : vector<32x32xf32>
    %cst_32 = arith.constant dense<0.000000e+00> : vector<32xf32>
    %38 = vector.multi_reduction <add>, %37, %cst_32 [1] : vector<32x32xf32> to vector<32xf32>
    %39 = vector.shape_cast %38 : vector<32xf32> to vector<32x1xf32>
    %40 = vector.broadcast %39 : vector<32x1xf32> to vector<32x32xf32>
    %41 = arith.divf %37, %40 : vector<32x32xf32>
    %cst_33 = arith.constant 9.99999993E-9 : f32
    %42 = vector.broadcast %cst_33 : f32 to vector<32x32xf32>
    %43 = arith.addf %32, %42 : vector<32x32xf32>
    %44 = arith.divf %41, %43 : vector<32x32xf32>
    %45 = arith.mulf %21, %44 : vector<32x32xf32>
    %46 = arith.mulf %28, %44 : vector<32x32xf32>
    %cst_34 = arith.constant dense<0.000000e+00> : vector<32x32xf32>
    %47 = tpu.matmul %45, %9, %cst_34 {dimension_numbers = #tpu.dot_dimension_numbers<[1], [0], [0], [1], [0, 0, 1, 1], [], []>} : vector<32x32xf32>, vector<32x32xf32>, vector<32x32xf32> -> vector<32x32xf32>
    %cst_35 = arith.constant dense<0.000000e+00> : vector<32x32xf32>
    %48 = tpu.matmul %46, %11, %cst_35 {dimension_numbers = #tpu.dot_dimension_numbers<[1], [0], [0], [1], [0, 0, 1, 1], [], []>} : vector<32x32xf32>, vector<32x32xf32>, vector<32x32xf32> -> vector<32x32xf32>
    %49 = arith.subf %47, %48 : vector<32x32xf32>
    %c0_36 = arith.constant 0 : index
    %c0_37 = arith.constant 0 : index
    %c0_38 = arith.constant 0 : index
    %c0_39 = arith.constant 0 : index
    %50 = vector.load %arg9[%c0_36, %c0_37, %c0_38, %c0_39] : memref<1x1x32x32xf32, #tpu.memory_space<vmem>>, vector<1x1x32x32xf32>
    %51 = vector.shape_cast %50 : vector<1x1x32x32xf32> to vector<32x32xf32>
    %52 = vector.shape_cast %49 : vector<32x32xf32> to vector<1x1x32x32xf32>
    tpu.vector_store %arg9[%c0_36, %c0_37, %c0_38, %c0_39], %52 {strides = array<i32>} : memref<1x1x32x32xf32, #tpu.memory_space<vmem>>, vector<1x1x32x32xf32>,
    %cst_40 = arith.constant dense<0.000000e+00> : vector<32x32xf32>
    %53 = tpu.matmul %45, %11, %cst_40 {dimension_numbers = #tpu.dot_dimension_numbers<[1], [0], [0], [1], [0, 0, 1, 1], [], []>} : vector<32x32xf32>, vector<32x32xf32>, vector<32x32xf32> -> vector<32x32xf32>
    %cst_41 = arith.constant dense<0.000000e+00> : vector<32x32xf32>
    %54 = tpu.matmul %46, %9, %cst_41 {dimension_numbers = #tpu.dot_dimension_numbers<[1], [0], [0], [1], [0, 0, 1, 1], [], []>} : vector<32x32xf32>, vector<32x32xf32>, vector<32x32xf32> -> vector<32x32xf32>
    %55 = arith.addf %53, %54 : vector<32x32xf32>
    %c0_42 = arith.constant 0 : index
    %c0_43 = arith.constant 0 : index
    %c0_44 = arith.constant 0 : index
    %c0_45 = arith.constant 0 : index
    %56 = vector.load %arg10[%c0_42, %c0_43, %c0_44, %c0_45] : memref<1x1x32x32xf32, #tpu.memory_space<vmem>>, vector<1x1x32x32xf32>
    %57 = vector.shape_cast %56 : vector<1x1x32x32xf32> to vector<32x32xf32>
    %58 = vector.shape_cast %55 : vector<32x32xf32> to vector<1x1x32x32xf32>
    tpu.vector_store %arg10[%c0_42, %c0_43, %c0_44, %c0_45], %58 {strides = array<i32>} : memref<1x1x32x32xf32, #tpu.memory_space<vmem>>, vector<1x1x32x32xf32>,
    return
  }
  func.func @transform_0(%arg0: i32, %arg1: i32) -> (i32, i32, i32) {
    %c0_i32 = arith.constant 0 : i32
    %c0_i32_0 = arith.constant 0 : i32
    %c0_i32_1 = arith.constant 0 : i32
    return %arg1, %c0_i32, %c0_i32_0 : i32, i32, i32
  }
  func.func @transform_1(%arg0: i32, %arg1: i32) -> (i32, i32, i32, i32) {
    %c0_i32 = arith.constant 0 : i32
    %c0_i32_0 = arith.constant 0 : i32
    %c0_i32_1 = arith.constant 0 : i32
    return %arg0, %arg1, %c0_i32, %c0_i32_0 : i32, i32, i32, i32
  }
  func.func @transform_2(%arg0: i32, %arg1: i32) -> (i32, i32, i32, i32) {
    %c0_i32 = arith.constant 0 : i32
    %c0_i32_0 = arith.constant 0 : i32
    %c0_i32_1 = arith.constant 0 : i32
    return %arg0, %arg1, %c0_i32, %c0_i32_0 : i32, i32, i32, i32
  }
  func.func @transform_3(%arg0: i32, %arg1: i32) -> (i32, i32, i32, i32) {
    %c0_i32 = arith.constant 0 : i32
    %c0_i32_0 = arith.constant 0 : i32
    %c0_i32_1 = arith.constant 0 : i32
    return %arg0, %arg1, %c0_i32, %c0_i32_0 : i32, i32, i32, i32
  }
  func.func @transform_4(%arg0: i32, %arg1: i32) -> (i32, i32, i32, i32) {
    %c0_i32 = arith.constant 0 : i32
    %c0_i32_0 = arith.constant 0 : i32
    %c0_i32_1 = arith.constant 0 : i32
    return %arg0, %arg1, %c0_i32, %c0_i32_0 : i32, i32, i32, i32
  }
  func.func @transform_5(%arg0: i32, %arg1: i32) -> (i32, i32, i32, i32) {
    %c0_i32 = arith.constant 0 : i32
    %c0_i32_0 = arith.constant 0 : i32
    %c0_i32_1 = arith.constant 0 : i32
    return %arg0, %arg1, %c0_i32, %c0_i32_0 : i32, i32, i32, i32
  }
  func.func @transform_6(%arg0: i32, %arg1: i32) -> (i32, i32, i32, i32) {
    %c0_i32 = arith.constant 0 : i32
    %c0_i32_0 = arith.constant 0 : i32
    %c0_i32_1 = arith.constant 0 : i32
    return %arg0, %arg1, %c0_i32, %c0_i32_0 : i32, i32, i32, i32
  }
  func.func @transform_7(%arg0: i32, %arg1: i32) -> (i32, i32, i32, i32) {
    %c0_i32 = arith.constant 0 : i32
    %c0_i32_0 = arith.constant 0 : i32
    %c0_i32_1 = arith.constant 0 : i32
    return %arg0, %arg1, %c0_i32, %c0_i32_0 : i32, i32, i32, i32
  }
  func.func @transform_8(%arg0: i32, %arg1: i32) -> (i32, i32, i32, i32) {
    %c0_i32 = arith.constant 0 : i32
    %c0_i32_0 = arith.constant 0 : i32
    %c0_i32_1 = arith.constant 0 : i32
    return %arg0, %arg1, %c0_i32, %c0_i32_0 : i32, i32, i32, i32
  }
}

module attributes {stable_mosaic.version = 11 : i64} {
  func.func @_cmm_kernel(%arg0: i32, %arg1: i32, %arg2: memref<32x64xbf16, #tpu.memory_space<vmem>>, %arg3: memref<32x64xbf16, #tpu.memory_space<vmem>>, %arg4: memref<64x128xbf16, #tpu.memory_space<vmem>>, %arg5: memref<64x128xbf16, #tpu.memory_space<vmem>>, %arg6: memref<32x128xf32, #tpu.memory_space<vmem>>, %arg7: memref<32x128xf32, #tpu.memory_space<vmem>>) attributes {dimension_semantics = [#tpu.dimension_semantics<parallel>, #tpu.dimension_semantics<parallel>], iteration_bounds = array<i64: 1, 1>, scalar_prefetch = 0 : i64, scratch_operands = 0 : i64, tpu.core_type = #tpu.core_type<tc>, window_params = [{transform_indices = @transform_0, window_bounds = array<i64: 32, 64>}, {transform_indices = @transform_1, window_bounds = array<i64: 32, 64>}, {transform_indices = @transform_2, window_bounds = array<i64: 64, 128>}, {transform_indices = @transform_3, window_bounds = array<i64: 64, 128>}, {transform_indices = @transform_4, window_bounds = array<i64: 32, 128>}, {transform_indices = @transform_5, window_bounds = array<i64: 32, 128>}]} {
    %c0 = arith.constant 0 : index
    %c0_0 = arith.constant 0 : index
    %0 = vector.load %arg2[%c0, %c0_0] : memref<32x64xbf16, #tpu.memory_space<vmem>>, vector<32x64xbf16>
    %c0_1 = arith.constant 0 : index
    %c0_2 = arith.constant 0 : index
    %1 = vector.load %arg3[%c0_1, %c0_2] : memref<32x64xbf16, #tpu.memory_space<vmem>>, vector<32x64xbf16>
    %c0_3 = arith.constant 0 : index
    %c0_4 = arith.constant 0 : index
    %2 = vector.load %arg4[%c0_3, %c0_4] : memref<64x128xbf16, #tpu.memory_space<vmem>>, vector<64x128xbf16>
    %c0_5 = arith.constant 0 : index
    %c0_6 = arith.constant 0 : index
    %3 = vector.load %arg5[%c0_5, %c0_6] : memref<64x128xbf16, #tpu.memory_space<vmem>>, vector<64x128xbf16>
    %cst = arith.constant dense<0.000000e+00> : vector<32x128xf32>
    %4 = tpu.matmul %0, %2, %cst {dimension_numbers = #tpu.dot_dimension_numbers<[1], [0], [0], [1], [0, 0, 1, 1], [], []>} : vector<32x64xbf16>, vector<64x128xbf16>, vector<32x128xf32> -> vector<32x128xf32>
    %cst_7 = arith.constant dense<0.000000e+00> : vector<32x128xf32>
    %5 = tpu.matmul %1, %3, %cst_7 {dimension_numbers = #tpu.dot_dimension_numbers<[1], [0], [0], [1], [0, 0, 1, 1], [], []>} : vector<32x64xbf16>, vector<64x128xbf16>, vector<32x128xf32> -> vector<32x128xf32>
    %cst_8 = arith.constant dense<0.000000e+00> : vector<32x128xf32>
    %6 = tpu.matmul %0, %3, %cst_8 {dimension_numbers = #tpu.dot_dimension_numbers<[1], [0], [0], [1], [0, 0, 1, 1], [], []>} : vector<32x64xbf16>, vector<64x128xbf16>, vector<32x128xf32> -> vector<32x128xf32>
    %cst_9 = arith.constant dense<0.000000e+00> : vector<32x128xf32>
    %7 = tpu.matmul %1, %2, %cst_9 {dimension_numbers = #tpu.dot_dimension_numbers<[1], [0], [0], [1], [0, 0, 1, 1], [], []>} : vector<32x64xbf16>, vector<64x128xbf16>, vector<32x128xf32> -> vector<32x128xf32>
    %8 = arith.subf %4, %5 : vector<32x128xf32>
    %9 = arith.addf %6, %7 : vector<32x128xf32>
    %c0_10 = arith.constant 0 : index
    %c0_11 = arith.constant 0 : index
    %10 = vector.load %arg6[%c0_10, %c0_11] : memref<32x128xf32, #tpu.memory_space<vmem>>, vector<32x128xf32>
    tpu.vector_store %arg6[%c0_10, %c0_11], %8 {strides = array<i32>} : memref<32x128xf32, #tpu.memory_space<vmem>>, vector<32x128xf32>,
    %c0_12 = arith.constant 0 : index
    %c0_13 = arith.constant 0 : index
    %11 = vector.load %arg7[%c0_12, %c0_13] : memref<32x128xf32, #tpu.memory_space<vmem>>, vector<32x128xf32>
    tpu.vector_store %arg7[%c0_12, %c0_13], %9 {strides = array<i32>} : memref<32x128xf32, #tpu.memory_space<vmem>>, vector<32x128xf32>,
    return
  }
  func.func @transform_0(%arg0: i32, %arg1: i32) -> (i32, i32) {
    %c0_i32 = arith.constant 0 : i32
    %c0_i32_0 = arith.constant 0 : i32
    return %arg0, %c0_i32 : i32, i32
  }
  func.func @transform_1(%arg0: i32, %arg1: i32) -> (i32, i32) {
    %c0_i32 = arith.constant 0 : i32
    %c0_i32_0 = arith.constant 0 : i32
    return %arg0, %c0_i32 : i32, i32
  }
  func.func @transform_2(%arg0: i32, %arg1: i32) -> (i32, i32) {
    %c0_i32 = arith.constant 0 : i32
    %c0_i32_0 = arith.constant 0 : i32
    return %c0_i32, %arg1 : i32, i32
  }
  func.func @transform_3(%arg0: i32, %arg1: i32) -> (i32, i32) {
    %c0_i32 = arith.constant 0 : i32
    %c0_i32_0 = arith.constant 0 : i32
    return %c0_i32, %arg1 : i32, i32
  }
  func.func @transform_4(%arg0: i32, %arg1: i32) -> (i32, i32) {
    %c0_i32 = arith.constant 0 : i32
    return %arg0, %arg1 : i32, i32
  }
  func.func @transform_5(%arg0: i32, %arg1: i32) -> (i32, i32) {
    %c0_i32 = arith.constant 0 : i32
    return %arg0, %arg1 : i32, i32
  }
}

module attributes {stable_mosaic.version = 11 : i64} {
  func.func @_cmm_kernel(%arg0: i32, %arg1: i32, %arg2: memref<32x64xbf16, #tpu.memory_space<vmem>>, %arg3: memref<32x64xbf16, #tpu.memory_space<vmem>>, %arg4: memref<64x256xbf16, #tpu.memory_space<vmem>>, %arg5: memref<64x256xbf16, #tpu.memory_space<vmem>>, %arg6: memref<32x256xf32, #tpu.memory_space<vmem>>, %arg7: memref<32x256xf32, #tpu.memory_space<vmem>>) attributes {dimension_semantics = [#tpu.dimension_semantics<parallel>, #tpu.dimension_semantics<parallel>], iteration_bounds = array<i64: 1, 1>, scalar_prefetch = 0 : i64, scratch_operands = 0 : i64, tpu.core_type = #tpu.core_type<tc>, window_params = [{transform_indices = @transform_0, window_bounds = array<i64: 32, 64>}, {transform_indices = @transform_1, window_bounds = array<i64: 32, 64>}, {transform_indices = @transform_2, window_bounds = array<i64: 64, 256>}, {transform_indices = @transform_3, window_bounds = array<i64: 64, 256>}, {transform_indices = @transform_4, window_bounds = array<i64: 32, 256>}, {transform_indices = @transform_5, window_bounds = array<i64: 32, 256>}]} {
    %c0 = arith.constant 0 : index
    %c0_0 = arith.constant 0 : index
    %0 = vector.load %arg2[%c0, %c0_0] : memref<32x64xbf16, #tpu.memory_space<vmem>>, vector<32x64xbf16>
    %c0_1 = arith.constant 0 : index
    %c0_2 = arith.constant 0 : index
    %1 = vector.load %arg3[%c0_1, %c0_2] : memref<32x64xbf16, #tpu.memory_space<vmem>>, vector<32x64xbf16>
    %c0_3 = arith.constant 0 : index
    %c0_4 = arith.constant 0 : index
    %2 = vector.load %arg4[%c0_3, %c0_4] : memref<64x256xbf16, #tpu.memory_space<vmem>>, vector<64x256xbf16>
    %c0_5 = arith.constant 0 : index
    %c0_6 = arith.constant 0 : index
    %3 = vector.load %arg5[%c0_5, %c0_6] : memref<64x256xbf16, #tpu.memory_space<vmem>>, vector<64x256xbf16>
    %cst = arith.constant dense<0.000000e+00> : vector<32x256xf32>
    %4 = tpu.matmul %0, %2, %cst {dimension_numbers = #tpu.dot_dimension_numbers<[1], [0], [0], [1], [0, 0, 1, 1], [], []>} : vector<32x64xbf16>, vector<64x256xbf16>, vector<32x256xf32> -> vector<32x256xf32>
    %cst_7 = arith.constant dense<0.000000e+00> : vector<32x256xf32>
    %5 = tpu.matmul %1, %3, %cst_7 {dimension_numbers = #tpu.dot_dimension_numbers<[1], [0], [0], [1], [0, 0, 1, 1], [], []>} : vector<32x64xbf16>, vector<64x256xbf16>, vector<32x256xf32> -> vector<32x256xf32>
    %cst_8 = arith.constant dense<0.000000e+00> : vector<32x256xf32>
    %6 = tpu.matmul %0, %3, %cst_8 {dimension_numbers = #tpu.dot_dimension_numbers<[1], [0], [0], [1], [0, 0, 1, 1], [], []>} : vector<32x64xbf16>, vector<64x256xbf16>, vector<32x256xf32> -> vector<32x256xf32>
    %cst_9 = arith.constant dense<0.000000e+00> : vector<32x256xf32>
    %7 = tpu.matmul %1, %2, %cst_9 {dimension_numbers = #tpu.dot_dimension_numbers<[1], [0], [0], [1], [0, 0, 1, 1], [], []>} : vector<32x64xbf16>, vector<64x256xbf16>, vector<32x256xf32> -> vector<32x256xf32>
    %8 = arith.subf %4, %5 : vector<32x256xf32>
    %9 = arith.addf %6, %7 : vector<32x256xf32>
    %10 = arith.mulf %8, %8 : vector<32x256xf32>
    %11 = arith.mulf %9, %9 : vector<32x256xf32>
    %12 = arith.addf %10, %11 : vector<32x256xf32>
    %13 = math.sqrt %12 : vector<32x256xf32>
    %cst_10 = arith.constant 5.000000e-01 : f32
    %14 = vector.broadcast %cst_10 : f32 to vector<32x256xf32>
    %15 = arith.mulf %14, %13 : vector<32x256xf32>
    %cst_11 = arith.constant 0.707106769 : f32
    %16 = vector.broadcast %cst_11 : f32 to vector<32x256xf32>
    %17 = arith.mulf %13, %16 : vector<32x256xf32>
    %18 = math.erf %17 : vector<32x256xf32>
    %cst_12 = arith.constant 1.000000e+00 : f32
    %19 = vector.broadcast %cst_12 : f32 to vector<32x256xf32>
    %20 = arith.addf %19, %18 : vector<32x256xf32>
    %21 = arith.mulf %15, %20 : vector<32x256xf32>
    %cst_13 = arith.constant 9.99999993E-9 : f32
    %22 = vector.broadcast %cst_13 : f32 to vector<32x256xf32>
    %23 = arith.addf %13, %22 : vector<32x256xf32>
    %24 = arith.divf %21, %23 : vector<32x256xf32>
    %25 = arith.mulf %8, %24 : vector<32x256xf32>
    %26 = arith.mulf %9, %24 : vector<32x256xf32>
    %c0_14 = arith.constant 0 : index
    %c0_15 = arith.constant 0 : index
    %27 = vector.load %arg6[%c0_14, %c0_15] : memref<32x256xf32, #tpu.memory_space<vmem>>, vector<32x256xf32>
    tpu.vector_store %arg6[%c0_14, %c0_15], %25 {strides = array<i32>} : memref<32x256xf32, #tpu.memory_space<vmem>>, vector<32x256xf32>,
    %c0_16 = arith.constant 0 : index
    %c0_17 = arith.constant 0 : index
    %28 = vector.load %arg7[%c0_16, %c0_17] : memref<32x256xf32, #tpu.memory_space<vmem>>, vector<32x256xf32>
    tpu.vector_store %arg7[%c0_16, %c0_17], %26 {strides = array<i32>} : memref<32x256xf32, #tpu.memory_space<vmem>>, vector<32x256xf32>,
    return
  }
  func.func @transform_0(%arg0: i32, %arg1: i32) -> (i32, i32) {
    %c0_i32 = arith.constant 0 : i32
    %c0_i32_0 = arith.constant 0 : i32
    return %arg0, %c0_i32 : i32, i32
  }
  func.func @transform_1(%arg0: i32, %arg1: i32) -> (i32, i32) {
    %c0_i32 = arith.constant 0 : i32
    %c0_i32_0 = arith.constant 0 : i32
    return %arg0, %c0_i32 : i32, i32
  }
  func.func @transform_2(%arg0: i32, %arg1: i32) -> (i32, i32) {
    %c0_i32 = arith.constant 0 : i32
    %c0_i32_0 = arith.constant 0 : i32
    return %c0_i32, %arg1 : i32, i32
  }
  func.func @transform_3(%arg0: i32, %arg1: i32) -> (i32, i32) {
    %c0_i32 = arith.constant 0 : i32
    %c0_i32_0 = arith.constant 0 : i32
    return %c0_i32, %arg1 : i32, i32
  }
  func.func @transform_4(%arg0: i32, %arg1: i32) -> (i32, i32) {
    %c0_i32 = arith.constant 0 : i32
    return %arg0, %arg1 : i32, i32
  }
  func.func @transform_5(%arg0: i32, %arg1: i32) -> (i32, i32) {
    %c0_i32 = arith.constant 0 : i32
    return %arg0, %arg1 : i32, i32
  }
}

module attributes {stable_mosaic.version = 11 : i64} {
  func.func @_cmm_kernel(%arg0: i32, %arg1: i32, %arg2: memref<32x256xbf16, #tpu.memory_space<vmem>>, %arg3: memref<32x256xbf16, #tpu.memory_space<vmem>>, %arg4: memref<256x128xbf16, #tpu.memory_space<vmem>>, %arg5: memref<256x128xbf16, #tpu.memory_space<vmem>>, %arg6: memref<32x128xf32, #tpu.memory_space<vmem>>, %arg7: memref<32x128xf32, #tpu.memory_space<vmem>>) attributes {dimension_semantics = [#tpu.dimension_semantics<parallel>, #tpu.dimension_semantics<parallel>], iteration_bounds = array<i64: 1, 1>, scalar_prefetch = 0 : i64, scratch_operands = 0 : i64, tpu.core_type = #tpu.core_type<tc>, window_params = [{transform_indices = @transform_0, window_bounds = array<i64: 32, 256>}, {transform_indices = @transform_1, window_bounds = array<i64: 32, 256>}, {transform_indices = @transform_2, window_bounds = array<i64: 256, 128>}, {transform_indices = @transform_3, window_bounds = array<i64: 256, 128>}, {transform_indices = @transform_4, window_bounds = array<i64: 32, 128>}, {transform_indices = @transform_5, window_bounds = array<i64: 32, 128>}]} {
    %c0 = arith.constant 0 : index
    %c0_0 = arith.constant 0 : index
    %0 = vector.load %arg2[%c0, %c0_0] : memref<32x256xbf16, #tpu.memory_space<vmem>>, vector<32x256xbf16>
    %c0_1 = arith.constant 0 : index
    %c0_2 = arith.constant 0 : index
    %1 = vector.load %arg3[%c0_1, %c0_2] : memref<32x256xbf16, #tpu.memory_space<vmem>>, vector<32x256xbf16>
    %c0_3 = arith.constant 0 : index
    %c0_4 = arith.constant 0 : index
    %2 = vector.load %arg4[%c0_3, %c0_4] : memref<256x128xbf16, #tpu.memory_space<vmem>>, vector<256x128xbf16>
    %c0_5 = arith.constant 0 : index
    %c0_6 = arith.constant 0 : index
    %3 = vector.load %arg5[%c0_5, %c0_6] : memref<256x128xbf16, #tpu.memory_space<vmem>>, vector<256x128xbf16>
    %cst = arith.constant dense<0.000000e+00> : vector<32x128xf32>
    %4 = tpu.matmul %0, %2, %cst {dimension_numbers = #tpu.dot_dimension_numbers<[1], [0], [0], [1], [0, 0, 1, 1], [], []>} : vector<32x256xbf16>, vector<256x128xbf16>, vector<32x128xf32> -> vector<32x128xf32>
    %cst_7 = arith.constant dense<0.000000e+00> : vector<32x128xf32>
    %5 = tpu.matmul %1, %3, %cst_7 {dimension_numbers = #tpu.dot_dimension_numbers<[1], [0], [0], [1], [0, 0, 1, 1], [], []>} : vector<32x256xbf16>, vector<256x128xbf16>, vector<32x128xf32> -> vector<32x128xf32>
    %cst_8 = arith.constant dense<0.000000e+00> : vector<32x128xf32>
    %6 = tpu.matmul %0, %3, %cst_8 {dimension_numbers = #tpu.dot_dimension_numbers<[1], [0], [0], [1], [0, 0, 1, 1], [], []>} : vector<32x256xbf16>, vector<256x128xbf16>, vector<32x128xf32> -> vector<32x128xf32>
    %cst_9 = arith.constant dense<0.000000e+00> : vector<32x128xf32>
    %7 = tpu.matmul %1, %2, %cst_9 {dimension_numbers = #tpu.dot_dimension_numbers<[1], [0], [0], [1], [0, 0, 1, 1], [], []>} : vector<32x256xbf16>, vector<256x128xbf16>, vector<32x128xf32> -> vector<32x128xf32>
    %8 = arith.subf %4, %5 : vector<32x128xf32>
    %9 = arith.addf %6, %7 : vector<32x128xf32>
    %c0_10 = arith.constant 0 : index
    %c0_11 = arith.constant 0 : index
    %10 = vector.load %arg6[%c0_10, %c0_11] : memref<32x128xf32, #tpu.memory_space<vmem>>, vector<32x128xf32>
    tpu.vector_store %arg6[%c0_10, %c0_11], %8 {strides = array<i32>} : memref<32x128xf32, #tpu.memory_space<vmem>>, vector<32x128xf32>,
    %c0_12 = arith.constant 0 : index
    %c0_13 = arith.constant 0 : index
    %11 = vector.load %arg7[%c0_12, %c0_13] : memref<32x128xf32, #tpu.memory_space<vmem>>, vector<32x128xf32>
    tpu.vector_store %arg7[%c0_12, %c0_13], %9 {strides = array<i32>} : memref<32x128xf32, #tpu.memory_space<vmem>>, vector<32x128xf32>,
    return
  }
  func.func @transform_0(%arg0: i32, %arg1: i32) -> (i32, i32) {
    %c0_i32 = arith.constant 0 : i32
    %c0_i32_0 = arith.constant 0 : i32
    return %arg0, %c0_i32 : i32, i32
  }
  func.func @transform_1(%arg0: i32, %arg1: i32) -> (i32, i32) {
    %c0_i32 = arith.constant 0 : i32
    %c0_i32_0 = arith.constant 0 : i32
    return %arg0, %c0_i32 : i32, i32
  }
  func.func @transform_2(%arg0: i32, %arg1: i32) -> (i32, i32) {
    %c0_i32 = arith.constant 0 : i32
    %c0_i32_0 = arith.constant 0 : i32
    return %c0_i32, %arg1 : i32, i32
  }
  func.func @transform_3(%arg0: i32, %arg1: i32) -> (i32, i32) {
    %c0_i32 = arith.constant 0 : i32
    %c0_i32_0 = arith.constant 0 : i32
    return %c0_i32, %arg1 : i32, i32
  }
  func.func @transform_4(%arg0: i32, %arg1: i32) -> (i32, i32) {
    %c0_i32 = arith.constant 0 : i32
    return %arg0, %arg1 : i32, i32
  }
  func.func @transform_5(%arg0: i32, %arg1: i32) -> (i32, i32) {
    %c0_i32 = arith.constant 0 : i32
    return %arg0, %arg1 : i32, i32
  }
}

module attributes {stable_mosaic.version = 11 : i64} {
  func.func @_cmm_kernel(%arg0: i32, %arg1: i32, %arg2: memref<64x576xbf16, #tpu.memory_space<vmem>>, %arg3: memref<64x576xbf16, #tpu.memory_space<vmem>>, %arg4: memref<576x128xbf16, #tpu.memory_space<vmem>>, %arg5: memref<576x128xbf16, #tpu.memory_space<vmem>>, %arg6: memref<64x128xf32, #tpu.memory_space<vmem>>, %arg7: memref<64x128xf32, #tpu.memory_space<vmem>>) attributes {dimension_semantics = [#tpu.dimension_semantics<parallel>, #tpu.dimension_semantics<parallel>], iteration_bounds = array<i64: 1, 1>, scalar_prefetch = 0 : i64, scratch_operands = 0 : i64, tpu.core_type = #tpu.core_type<tc>, window_params = [{transform_indices = @transform_0, window_bounds = array<i64: 64, 576>}, {transform_indices = @transform_1, window_bounds = array<i64: 64, 576>}, {transform_indices = @transform_2, window_bounds = array<i64: 576, 128>}, {transform_indices = @transform_3, window_bounds = array<i64: 576, 128>}, {transform_indices = @transform_4, window_bounds = array<i64: 64, 128>}, {transform_indices = @transform_5, window_bounds = array<i64: 64, 128>}]} {
    %c0 = arith.constant 0 : index
    %c0_0 = arith.constant 0 : index
    %0 = vector.load %arg2[%c0, %c0_0] : memref<64x576xbf16, #tpu.memory_space<vmem>>, vector<64x576xbf16>
    %c0_1 = arith.constant 0 : index
    %c0_2 = arith.constant 0 : index
    %1 = vector.load %arg3[%c0_1, %c0_2] : memref<64x576xbf16, #tpu.memory_space<vmem>>, vector<64x576xbf16>
    %c0_3 = arith.constant 0 : index
    %c0_4 = arith.constant 0 : index
    %2 = vector.load %arg4[%c0_3, %c0_4] : memref<576x128xbf16, #tpu.memory_space<vmem>>, vector<576x128xbf16>
    %c0_5 = arith.constant 0 : index
    %c0_6 = arith.constant 0 : index
    %3 = vector.load %arg5[%c0_5, %c0_6] : memref<576x128xbf16, #tpu.memory_space<vmem>>, vector<576x128xbf16>
    %cst = arith.constant dense<0.000000e+00> : vector<64x128xf32>
    %4 = tpu.matmul %0, %2, %cst {dimension_numbers = #tpu.dot_dimension_numbers<[1], [0], [0], [1], [0, 0, 1, 1], [], []>} : vector<64x576xbf16>, vector<576x128xbf16>, vector<64x128xf32> -> vector<64x128xf32>
    %cst_7 = arith.constant dense<0.000000e+00> : vector<64x128xf32>
    %5 = tpu.matmul %1, %3, %cst_7 {dimension_numbers = #tpu.dot_dimension_numbers<[1], [0], [0], [1], [0, 0, 1, 1], [], []>} : vector<64x576xbf16>, vector<576x128xbf16>, vector<64x128xf32> -> vector<64x128xf32>
    %cst_8 = arith.constant dense<0.000000e+00> : vector<64x128xf32>
    %6 = tpu.matmul %0, %3, %cst_8 {dimension_numbers = #tpu.dot_dimension_numbers<[1], [0], [0], [1], [0, 0, 1, 1], [], []>} : vector<64x576xbf16>, vector<576x128xbf16>, vector<64x128xf32> -> vector<64x128xf32>
    %cst_9 = arith.constant dense<0.000000e+00> : vector<64x128xf32>
    %7 = tpu.matmul %1, %2, %cst_9 {dimension_numbers = #tpu.dot_dimension_numbers<[1], [0], [0], [1], [0, 0, 1, 1], [], []>} : vector<64x576xbf16>, vector<576x128xbf16>, vector<64x128xf32> -> vector<64x128xf32>
    %8 = arith.subf %4, %5 : vector<64x128xf32>
    %9 = arith.addf %6, %7 : vector<64x128xf32>
    %c0_10 = arith.constant 0 : index
    %c0_11 = arith.constant 0 : index
    %10 = vector.load %arg6[%c0_10, %c0_11] : memref<64x128xf32, #tpu.memory_space<vmem>>, vector<64x128xf32>
    tpu.vector_store %arg6[%c0_10, %c0_11], %8 {strides = array<i32>} : memref<64x128xf32, #tpu.memory_space<vmem>>, vector<64x128xf32>,
    %c0_12 = arith.constant 0 : index
    %c0_13 = arith.constant 0 : index
    %11 = vector.load %arg7[%c0_12, %c0_13] : memref<64x128xf32, #tpu.memory_space<vmem>>, vector<64x128xf32>
    tpu.vector_store %arg7[%c0_12, %c0_13], %9 {strides = array<i32>} : memref<64x128xf32, #tpu.memory_space<vmem>>, vector<64x128xf32>,
    return
  }
  func.func @transform_0(%arg0: i32, %arg1: i32) -> (i32, i32) {
    %c0_i32 = arith.constant 0 : i32
    %c0_i32_0 = arith.constant 0 : i32
    return %arg0, %c0_i32 : i32, i32
  }
  func.func @transform_1(%arg0: i32, %arg1: i32) -> (i32, i32) {
    %c0_i32 = arith.constant 0 : i32
    %c0_i32_0 = arith.constant 0 : i32
    return %arg0, %c0_i32 : i32, i32
  }
  func.func @transform_2(%arg0: i32, %arg1: i32) -> (i32, i32) {
    %c0_i32 = arith.constant 0 : i32
    %c0_i32_0 = arith.constant 0 : i32
    return %c0_i32, %arg1 : i32, i32
  }
  func.func @transform_3(%arg0: i32, %arg1: i32) -> (i32, i32) {
    %c0_i32 = arith.constant 0 : i32
    %c0_i32_0 = arith.constant 0 : i32
    return %c0_i32, %arg1 : i32, i32
  }
  func.func @transform_4(%arg0: i32, %arg1: i32) -> (i32, i32) {
    %c0_i32 = arith.constant 0 : i32
    return %arg0, %arg1 : i32, i32
  }
  func.func @transform_5(%arg0: i32, %arg1: i32) -> (i32, i32) {
    %c0_i32 = arith.constant 0 : i32
    return %arg0, %arg1 : i32, i32
  }
}

module attributes {stable_mosaic.version = 11 : i64} {
  func.func @_cmm_kernel(%arg0: i32, %arg1: i32, %arg2: memref<64x288xbf16, #tpu.memory_space<vmem>>, %arg3: memref<64x288xbf16, #tpu.memory_space<vmem>>, %arg4: memref<288x128xbf16, #tpu.memory_space<vmem>>, %arg5: memref<288x128xbf16, #tpu.memory_space<vmem>>, %arg6: memref<64x128xf32, #tpu.memory_space<vmem>>, %arg7: memref<64x128xf32, #tpu.memory_space<vmem>>) attributes {dimension_semantics = [#tpu.dimension_semantics<parallel>, #tpu.dimension_semantics<parallel>], iteration_bounds = array<i64: 1, 1>, scalar_prefetch = 0 : i64, scratch_operands = 0 : i64, tpu.core_type = #tpu.core_type<tc>, window_params = [{transform_indices = @transform_0, window_bounds = array<i64: 64, 288>}, {transform_indices = @transform_1, window_bounds = array<i64: 64, 288>}, {transform_indices = @transform_2, window_bounds = array<i64: 288, 128>}, {transform_indices = @transform_3, window_bounds = array<i64: 288, 128>}, {transform_indices = @transform_4, window_bounds = array<i64: 64, 128>}, {transform_indices = @transform_5, window_bounds = array<i64: 64, 128>}]} {
    %c0 = arith.constant 0 : index
    %c0_0 = arith.constant 0 : index
    %0 = vector.load %arg2[%c0, %c0_0] : memref<64x288xbf16, #tpu.memory_space<vmem>>, vector<64x288xbf16>
    %c0_1 = arith.constant 0 : index
    %c0_2 = arith.constant 0 : index
    %1 = vector.load %arg3[%c0_1, %c0_2] : memref<64x288xbf16, #tpu.memory_space<vmem>>, vector<64x288xbf16>
    %c0_3 = arith.constant 0 : index
    %c0_4 = arith.constant 0 : index
    %2 = vector.load %arg4[%c0_3, %c0_4] : memref<288x128xbf16, #tpu.memory_space<vmem>>, vector<288x128xbf16>
    %c0_5 = arith.constant 0 : index
    %c0_6 = arith.constant 0 : index
    %3 = vector.load %arg5[%c0_5, %c0_6] : memref<288x128xbf16, #tpu.memory_space<vmem>>, vector<288x128xbf16>
    %cst = arith.constant dense<0.000000e+00> : vector<64x128xf32>
    %4 = tpu.matmul %0, %2, %cst {dimension_numbers = #tpu.dot_dimension_numbers<[1], [0], [0], [1], [0, 0, 1, 1], [], []>} : vector<64x288xbf16>, vector<288x128xbf16>, vector<64x128xf32> -> vector<64x128xf32>
    %cst_7 = arith.constant dense<0.000000e+00> : vector<64x128xf32>
    %5 = tpu.matmul %1, %3, %cst_7 {dimension_numbers = #tpu.dot_dimension_numbers<[1], [0], [0], [1], [0, 0, 1, 1], [], []>} : vector<64x288xbf16>, vector<288x128xbf16>, vector<64x128xf32> -> vector<64x128xf32>
    %cst_8 = arith.constant dense<0.000000e+00> : vector<64x128xf32>
    %6 = tpu.matmul %0, %3, %cst_8 {dimension_numbers = #tpu.dot_dimension_numbers<[1], [0], [0], [1], [0, 0, 1, 1], [], []>} : vector<64x288xbf16>, vector<288x128xbf16>, vector<64x128xf32> -> vector<64x128xf32>
    %cst_9 = arith.constant dense<0.000000e+00> : vector<64x128xf32>
    %7 = tpu.matmul %1, %2, %cst_9 {dimension_numbers = #tpu.dot_dimension_numbers<[1], [0], [0], [1], [0, 0, 1, 1], [], []>} : vector<64x288xbf16>, vector<288x128xbf16>, vector<64x128xf32> -> vector<64x128xf32>
    %8 = arith.subf %4, %5 : vector<64x128xf32>
    %9 = arith.addf %6, %7 : vector<64x128xf32>
    %c0_10 = arith.constant 0 : index
    %c0_11 = arith.constant 0 : index
    %10 = vector.load %arg6[%c0_10, %c0_11] : memref<64x128xf32, #tpu.memory_space<vmem>>, vector<64x128xf32>
    tpu.vector_store %arg6[%c0_10, %c0_11], %8 {strides = array<i32>} : memref<64x128xf32, #tpu.memory_space<vmem>>, vector<64x128xf32>,
    %c0_12 = arith.constant 0 : index
    %c0_13 = arith.constant 0 : index
    %11 = vector.load %arg7[%c0_12, %c0_13] : memref<64x128xf32, #tpu.memory_space<vmem>>, vector<64x128xf32>
    tpu.vector_store %arg7[%c0_12, %c0_13], %9 {strides = array<i32>} : memref<64x128xf32, #tpu.memory_space<vmem>>, vector<64x128xf32>,
    return
  }
  func.func @transform_0(%arg0: i32, %arg1: i32) -> (i32, i32) {
    %c0_i32 = arith.constant 0 : i32
    %c0_i32_0 = arith.constant 0 : i32
    return %arg0, %c0_i32 : i32, i32
  }
  func.func @transform_1(%arg0: i32, %arg1: i32) -> (i32, i32) {
    %c0_i32 = arith.constant 0 : i32
    %c0_i32_0 = arith.constant 0 : i32
    return %arg0, %c0_i32 : i32, i32
  }
  func.func @transform_2(%arg0: i32, %arg1: i32) -> (i32, i32) {
    %c0_i32 = arith.constant 0 : i32
    %c0_i32_0 = arith.constant 0 : i32
    return %c0_i32, %arg1 : i32, i32
  }
  func.func @transform_3(%arg0: i32, %arg1: i32) -> (i32, i32) {
    %c0_i32 = arith.constant 0 : i32
    %c0_i32_0 = arith.constant 0 : i32
    return %c0_i32, %arg1 : i32, i32
  }
  func.func @transform_4(%arg0: i32, %arg1: i32) -> (i32, i32) {
    %c0_i32 = arith.constant 0 : i32
    return %arg0, %arg1 : i32, i32
  }
  func.func @transform_5(%arg0: i32, %arg1: i32) -> (i32, i32) {
    %c0_i32 = arith.constant 0 : i32
    return %arg0, %arg1 : i32, i32
  }
}

module attributes {stable_mosaic.version = 11 : i64} {
  func.func @_cmm_kernel(%arg0: i32, %arg1: i32, %arg2: memref<64x32xbf16, #tpu.memory_space<vmem>>, %arg3: memref<64x32xbf16, #tpu.memory_space<vmem>>, %arg4: memref<32x128xbf16, #tpu.memory_space<vmem>>, %arg5: memref<32x128xbf16, #tpu.memory_space<vmem>>, %arg6: memref<64x128xf32, #tpu.memory_space<vmem>>, %arg7: memref<64x128xf32, #tpu.memory_space<vmem>>) attributes {dimension_semantics = [#tpu.dimension_semantics<parallel>, #tpu.dimension_semantics<parallel>], iteration_bounds = array<i64: 1, 1>, scalar_prefetch = 0 : i64, scratch_operands = 0 : i64, tpu.core_type = #tpu.core_type<tc>, window_params = [{transform_indices = @transform_0, window_bounds = array<i64: 64, 32>}, {transform_indices = @transform_1, window_bounds = array<i64: 64, 32>}, {transform_indices = @transform_2, window_bounds = array<i64: 32, 128>}, {transform_indices = @transform_3, window_bounds = array<i64: 32, 128>}, {transform_indices = @transform_4, window_bounds = array<i64: 64, 128>}, {transform_indices = @transform_5, window_bounds = array<i64: 64, 128>}]} {
    %c0 = arith.constant 0 : index
    %c0_0 = arith.constant 0 : index
    %0 = vector.load %arg2[%c0, %c0_0] : memref<64x32xbf16, #tpu.memory_space<vmem>>, vector<64x32xbf16>
    %c0_1 = arith.constant 0 : index
    %c0_2 = arith.constant 0 : index
    %1 = vector.load %arg3[%c0_1, %c0_2] : memref<64x32xbf16, #tpu.memory_space<vmem>>, vector<64x32xbf16>
    %c0_3 = arith.constant 0 : index
    %c0_4 = arith.constant 0 : index
    %2 = vector.load %arg4[%c0_3, %c0_4] : memref<32x128xbf16, #tpu.memory_space<vmem>>, vector<32x128xbf16>
    %c0_5 = arith.constant 0 : index
    %c0_6 = arith.constant 0 : index
    %3 = vector.load %arg5[%c0_5, %c0_6] : memref<32x128xbf16, #tpu.memory_space<vmem>>, vector<32x128xbf16>
    %cst = arith.constant dense<0.000000e+00> : vector<64x128xf32>
    %4 = tpu.matmul %0, %2, %cst {dimension_numbers = #tpu.dot_dimension_numbers<[1], [0], [0], [1], [0, 0, 1, 1], [], []>} : vector<64x32xbf16>, vector<32x128xbf16>, vector<64x128xf32> -> vector<64x128xf32>
    %cst_7 = arith.constant dense<0.000000e+00> : vector<64x128xf32>
    %5 = tpu.matmul %1, %3, %cst_7 {dimension_numbers = #tpu.dot_dimension_numbers<[1], [0], [0], [1], [0, 0, 1, 1], [], []>} : vector<64x32xbf16>, vector<32x128xbf16>, vector<64x128xf32> -> vector<64x128xf32>
    %cst_8 = arith.constant dense<0.000000e+00> : vector<64x128xf32>
    %6 = tpu.matmul %0, %3, %cst_8 {dimension_numbers = #tpu.dot_dimension_numbers<[1], [0], [0], [1], [0, 0, 1, 1], [], []>} : vector<64x32xbf16>, vector<32x128xbf16>, vector<64x128xf32> -> vector<64x128xf32>
    %cst_9 = arith.constant dense<0.000000e+00> : vector<64x128xf32>
    %7 = tpu.matmul %1, %2, %cst_9 {dimension_numbers = #tpu.dot_dimension_numbers<[1], [0], [0], [1], [0, 0, 1, 1], [], []>} : vector<64x32xbf16>, vector<32x128xbf16>, vector<64x128xf32> -> vector<64x128xf32>
    %8 = arith.subf %4, %5 : vector<64x128xf32>
    %9 = arith.addf %6, %7 : vector<64x128xf32>
    %c0_10 = arith.constant 0 : index
    %c0_11 = arith.constant 0 : index
    %10 = vector.load %arg6[%c0_10, %c0_11] : memref<64x128xf32, #tpu.memory_space<vmem>>, vector<64x128xf32>
    tpu.vector_store %arg6[%c0_10, %c0_11], %8 {strides = array<i32>} : memref<64x128xf32, #tpu.memory_space<vmem>>, vector<64x128xf32>,
    %c0_12 = arith.constant 0 : index
    %c0_13 = arith.constant 0 : index
    %11 = vector.load %arg7[%c0_12, %c0_13] : memref<64x128xf32, #tpu.memory_space<vmem>>, vector<64x128xf32>
    tpu.vector_store %arg7[%c0_12, %c0_13], %9 {strides = array<i32>} : memref<64x128xf32, #tpu.memory_space<vmem>>, vector<64x128xf32>,
    return
  }
  func.func @transform_0(%arg0: i32, %arg1: i32) -> (i32, i32) {
    %c0_i32 = arith.constant 0 : i32
    %c0_i32_0 = arith.constant 0 : i32
    return %arg0, %c0_i32 : i32, i32
  }
  func.func @transform_1(%arg0: i32, %arg1: i32) -> (i32, i32) {
    %c0_i32 = arith.constant 0 : i32
    %c0_i32_0 = arith.constant 0 : i32
    return %arg0, %c0_i32 : i32, i32
  }
  func.func @transform_2(%arg0: i32, %arg1: i32) -> (i32, i32) {
    %c0_i32 = arith.constant 0 : i32
    %c0_i32_0 = arith.constant 0 : i32
    return %c0_i32, %arg1 : i32, i32
  }
  func.func @transform_3(%arg0: i32, %arg1: i32) -> (i32, i32) {
    %c0_i32 = arith.constant 0 : i32
    %c0_i32_0 = arith.constant 0 : i32
    return %c0_i32, %arg1 : i32, i32
  }
  func.func @transform_4(%arg0: i32, %arg1: i32) -> (i32, i32) {
    %c0_i32 = arith.constant 0 : i32
    return %arg0, %arg1 : i32, i32
  }
  func.func @transform_5(%arg0: i32, %arg1: i32) -> (i32, i32) {
    %c0_i32 = arith.constant 0 : i32
    return %arg0, %arg1 : i32, i32
  }
}

module attributes {stable_mosaic.version = 11 : i64} {
  func.func @_cmm_kernel(%arg0: i32, %arg1: i32, %arg2: memref<128x288xbf16, #tpu.memory_space<vmem>>, %arg3: memref<128x288xbf16, #tpu.memory_space<vmem>>, %arg4: memref<288x128xbf16, #tpu.memory_space<vmem>>, %arg5: memref<288x128xbf16, #tpu.memory_space<vmem>>, %arg6: memref<128x128xf32, #tpu.memory_space<vmem>>, %arg7: memref<128x128xf32, #tpu.memory_space<vmem>>) attributes {dimension_semantics = [#tpu.dimension_semantics<parallel>, #tpu.dimension_semantics<parallel>], iteration_bounds = array<i64: 1, 1>, scalar_prefetch = 0 : i64, scratch_operands = 0 : i64, tpu.core_type = #tpu.core_type<tc>, window_params = [{transform_indices = @transform_0, window_bounds = array<i64: 128, 288>}, {transform_indices = @transform_1, window_bounds = array<i64: 128, 288>}, {transform_indices = @transform_2, window_bounds = array<i64: 288, 128>}, {transform_indices = @transform_3, window_bounds = array<i64: 288, 128>}, {transform_indices = @transform_4, window_bounds = array<i64: 128, 128>}, {transform_indices = @transform_5, window_bounds = array<i64: 128, 128>}]} {
    %c0 = arith.constant 0 : index
    %c0_0 = arith.constant 0 : index
    %0 = vector.load %arg2[%c0, %c0_0] : memref<128x288xbf16, #tpu.memory_space<vmem>>, vector<128x288xbf16>
    %c0_1 = arith.constant 0 : index
    %c0_2 = arith.constant 0 : index
    %1 = vector.load %arg3[%c0_1, %c0_2] : memref<128x288xbf16, #tpu.memory_space<vmem>>, vector<128x288xbf16>
    %c0_3 = arith.constant 0 : index
    %c0_4 = arith.constant 0 : index
    %2 = vector.load %arg4[%c0_3, %c0_4] : memref<288x128xbf16, #tpu.memory_space<vmem>>, vector<288x128xbf16>
    %c0_5 = arith.constant 0 : index
    %c0_6 = arith.constant 0 : index
    %3 = vector.load %arg5[%c0_5, %c0_6] : memref<288x128xbf16, #tpu.memory_space<vmem>>, vector<288x128xbf16>
    %cst = arith.constant dense<0.000000e+00> : vector<128x128xf32>
    %4 = tpu.matmul %0, %2, %cst {dimension_numbers = #tpu.dot_dimension_numbers<[1], [0], [0], [1], [0, 0, 1, 1], [], []>} : vector<128x288xbf16>, vector<288x128xbf16>, vector<128x128xf32> -> vector<128x128xf32>
    %cst_7 = arith.constant dense<0.000000e+00> : vector<128x128xf32>
    %5 = tpu.matmul %1, %3, %cst_7 {dimension_numbers = #tpu.dot_dimension_numbers<[1], [0], [0], [1], [0, 0, 1, 1], [], []>} : vector<128x288xbf16>, vector<288x128xbf16>, vector<128x128xf32> -> vector<128x128xf32>
    %cst_8 = arith.constant dense<0.000000e+00> : vector<128x128xf32>
    %6 = tpu.matmul %0, %3, %cst_8 {dimension_numbers = #tpu.dot_dimension_numbers<[1], [0], [0], [1], [0, 0, 1, 1], [], []>} : vector<128x288xbf16>, vector<288x128xbf16>, vector<128x128xf32> -> vector<128x128xf32>
    %cst_9 = arith.constant dense<0.000000e+00> : vector<128x128xf32>
    %7 = tpu.matmul %1, %2, %cst_9 {dimension_numbers = #tpu.dot_dimension_numbers<[1], [0], [0], [1], [0, 0, 1, 1], [], []>} : vector<128x288xbf16>, vector<288x128xbf16>, vector<128x128xf32> -> vector<128x128xf32>
    %8 = arith.subf %4, %5 : vector<128x128xf32>
    %9 = arith.addf %6, %7 : vector<128x128xf32>
    %c0_10 = arith.constant 0 : index
    %c0_11 = arith.constant 0 : index
    %10 = vector.load %arg6[%c0_10, %c0_11] : memref<128x128xf32, #tpu.memory_space<vmem>>, vector<128x128xf32>
    tpu.vector_store %arg6[%c0_10, %c0_11], %8 {strides = array<i32>} : memref<128x128xf32, #tpu.memory_space<vmem>>, vector<128x128xf32>,
    %c0_12 = arith.constant 0 : index
    %c0_13 = arith.constant 0 : index
    %11 = vector.load %arg7[%c0_12, %c0_13] : memref<128x128xf32, #tpu.memory_space<vmem>>, vector<128x128xf32>
    tpu.vector_store %arg7[%c0_12, %c0_13], %9 {strides = array<i32>} : memref<128x128xf32, #tpu.memory_space<vmem>>, vector<128x128xf32>,
    return
  }
  func.func @transform_0(%arg0: i32, %arg1: i32) -> (i32, i32) {
    %c0_i32 = arith.constant 0 : i32
    %c0_i32_0 = arith.constant 0 : i32
    return %arg0, %c0_i32 : i32, i32
  }
  func.func @transform_1(%arg0: i32, %arg1: i32) -> (i32, i32) {
    %c0_i32 = arith.constant 0 : i32
    %c0_i32_0 = arith.constant 0 : i32
    return %arg0, %c0_i32 : i32, i32
  }
  func.func @transform_2(%arg0: i32, %arg1: i32) -> (i32, i32) {
    %c0_i32 = arith.constant 0 : i32
    %c0_i32_0 = arith.constant 0 : i32
    return %c0_i32, %arg1 : i32, i32
  }
  func.func @transform_3(%arg0: i32, %arg1: i32) -> (i32, i32) {
    %c0_i32 = arith.constant 0 : i32
    %c0_i32_0 = arith.constant 0 : i32
    return %c0_i32, %arg1 : i32, i32
  }
  func.func @transform_4(%arg0: i32, %arg1: i32) -> (i32, i32) {
    %c0_i32 = arith.constant 0 : i32
    return %arg0, %arg1 : i32, i32
  }
  func.func @transform_5(%arg0: i32, %arg1: i32) -> (i32, i32) {
    %c0_i32 = arith.constant 0 : i32
    return %arg0, %arg1 : i32, i32
  }
}

module attributes {stable_mosaic.version = 11 : i64} {
  func.func @_cmm_kernel(%arg0: i32, %arg1: i32, %arg2: memref<128x144xbf16, #tpu.memory_space<vmem>>, %arg3: memref<128x144xbf16, #tpu.memory_space<vmem>>, %arg4: memref<144x128xbf16, #tpu.memory_space<vmem>>, %arg5: memref<144x128xbf16, #tpu.memory_space<vmem>>, %arg6: memref<128x128xf32, #tpu.memory_space<vmem>>, %arg7: memref<128x128xf32, #tpu.memory_space<vmem>>) attributes {dimension_semantics = [#tpu.dimension_semantics<parallel>, #tpu.dimension_semantics<parallel>], iteration_bounds = array<i64: 1, 1>, scalar_prefetch = 0 : i64, scratch_operands = 0 : i64, tpu.core_type = #tpu.core_type<tc>, window_params = [{transform_indices = @transform_0, window_bounds = array<i64: 128, 144>}, {transform_indices = @transform_1, window_bounds = array<i64: 128, 144>}, {transform_indices = @transform_2, window_bounds = array<i64: 144, 128>}, {transform_indices = @transform_3, window_bounds = array<i64: 144, 128>}, {transform_indices = @transform_4, window_bounds = array<i64: 128, 128>}, {transform_indices = @transform_5, window_bounds = array<i64: 128, 128>}]} {
    %c0 = arith.constant 0 : index
    %c0_0 = arith.constant 0 : index
    %0 = vector.load %arg2[%c0, %c0_0] : memref<128x144xbf16, #tpu.memory_space<vmem>>, vector<128x144xbf16>
    %c0_1 = arith.constant 0 : index
    %c0_2 = arith.constant 0 : index
    %1 = vector.load %arg3[%c0_1, %c0_2] : memref<128x144xbf16, #tpu.memory_space<vmem>>, vector<128x144xbf16>
    %c0_3 = arith.constant 0 : index
    %c0_4 = arith.constant 0 : index
    %2 = vector.load %arg4[%c0_3, %c0_4] : memref<144x128xbf16, #tpu.memory_space<vmem>>, vector<144x128xbf16>
    %c0_5 = arith.constant 0 : index
    %c0_6 = arith.constant 0 : index
    %3 = vector.load %arg5[%c0_5, %c0_6] : memref<144x128xbf16, #tpu.memory_space<vmem>>, vector<144x128xbf16>
    %cst = arith.constant dense<0.000000e+00> : vector<128x128xf32>
    %4 = tpu.matmul %0, %2, %cst {dimension_numbers = #tpu.dot_dimension_numbers<[1], [0], [0], [1], [0, 0, 1, 1], [], []>} : vector<128x144xbf16>, vector<144x128xbf16>, vector<128x128xf32> -> vector<128x128xf32>
    %cst_7 = arith.constant dense<0.000000e+00> : vector<128x128xf32>
    %5 = tpu.matmul %1, %3, %cst_7 {dimension_numbers = #tpu.dot_dimension_numbers<[1], [0], [0], [1], [0, 0, 1, 1], [], []>} : vector<128x144xbf16>, vector<144x128xbf16>, vector<128x128xf32> -> vector<128x128xf32>
    %cst_8 = arith.constant dense<0.000000e+00> : vector<128x128xf32>
    %6 = tpu.matmul %0, %3, %cst_8 {dimension_numbers = #tpu.dot_dimension_numbers<[1], [0], [0], [1], [0, 0, 1, 1], [], []>} : vector<128x144xbf16>, vector<144x128xbf16>, vector<128x128xf32> -> vector<128x128xf32>
    %cst_9 = arith.constant dense<0.000000e+00> : vector<128x128xf32>
    %7 = tpu.matmul %1, %2, %cst_9 {dimension_numbers = #tpu.dot_dimension_numbers<[1], [0], [0], [1], [0, 0, 1, 1], [], []>} : vector<128x144xbf16>, vector<144x128xbf16>, vector<128x128xf32> -> vector<128x128xf32>
    %8 = arith.subf %4, %5 : vector<128x128xf32>
    %9 = arith.addf %6, %7 : vector<128x128xf32>
    %c0_10 = arith.constant 0 : index
    %c0_11 = arith.constant 0 : index
    %10 = vector.load %arg6[%c0_10, %c0_11] : memref<128x128xf32, #tpu.memory_space<vmem>>, vector<128x128xf32>
    tpu.vector_store %arg6[%c0_10, %c0_11], %8 {strides = array<i32>} : memref<128x128xf32, #tpu.memory_space<vmem>>, vector<128x128xf32>,
    %c0_12 = arith.constant 0 : index
    %c0_13 = arith.constant 0 : index
    %11 = vector.load %arg7[%c0_12, %c0_13] : memref<128x128xf32, #tpu.memory_space<vmem>>, vector<128x128xf32>
    tpu.vector_store %arg7[%c0_12, %c0_13], %9 {strides = array<i32>} : memref<128x128xf32, #tpu.memory_space<vmem>>, vector<128x128xf32>,
    return
  }
  func.func @transform_0(%arg0: i32, %arg1: i32) -> (i32, i32) {
    %c0_i32 = arith.constant 0 : i32
    %c0_i32_0 = arith.constant 0 : i32
    return %arg0, %c0_i32 : i32, i32
  }
  func.func @transform_1(%arg0: i32, %arg1: i32) -> (i32, i32) {
    %c0_i32 = arith.constant 0 : i32
    %c0_i32_0 = arith.constant 0 : i32
    return %arg0, %c0_i32 : i32, i32
  }
  func.func @transform_2(%arg0: i32, %arg1: i32) -> (i32, i32) {
    %c0_i32 = arith.constant 0 : i32
    %c0_i32_0 = arith.constant 0 : i32
    return %c0_i32, %arg1 : i32, i32
  }
  func.func @transform_3(%arg0: i32, %arg1: i32) -> (i32, i32) {
    %c0_i32 = arith.constant 0 : i32
    %c0_i32_0 = arith.constant 0 : i32
    return %c0_i32, %arg1 : i32, i32
  }
  func.func @transform_4(%arg0: i32, %arg1: i32) -> (i32, i32) {
    %c0_i32 = arith.constant 0 : i32
    return %arg0, %arg1 : i32, i32
  }
  func.func @transform_5(%arg0: i32, %arg1: i32) -> (i32, i32) {
    %c0_i32 = arith.constant 0 : i32
    return %arg0, %arg1 : i32, i32
  }
}

module attributes {stable_mosaic.version = 11 : i64} {
  func.func @_cmm_kernel(%arg0: i32, %arg1: i32, %arg2: memref<128x144xbf16, #tpu.memory_space<vmem>>, %arg3: memref<128x144xbf16, #tpu.memory_space<vmem>>, %arg4: memref<144x128xbf16, #tpu.memory_space<vmem>>, %arg5: memref<144x128xbf16, #tpu.memory_space<vmem>>, %arg6: memref<128x128xf32, #tpu.memory_space<vmem>>, %arg7: memref<128x128xf32, #tpu.memory_space<vmem>>) attributes {dimension_semantics = [#tpu.dimension_semantics<parallel>, #tpu.dimension_semantics<parallel>], iteration_bounds = array<i64: 1, 1>, scalar_prefetch = 0 : i64, scratch_operands = 0 : i64, tpu.core_type = #tpu.core_type<tc>, window_params = [{transform_indices = @transform_0, window_bounds = array<i64: 128, 144>}, {transform_indices = @transform_1, window_bounds = array<i64: 128, 144>}, {transform_indices = @transform_2, window_bounds = array<i64: 144, 128>}, {transform_indices = @transform_3, window_bounds = array<i64: 144, 128>}, {transform_indices = @transform_4, window_bounds = array<i64: 128, 128>}, {transform_indices = @transform_5, window_bounds = array<i64: 128, 128>}]} {
    %c0 = arith.constant 0 : index
    %c0_0 = arith.constant 0 : index
    %0 = vector.load %arg2[%c0, %c0_0] : memref<128x144xbf16, #tpu.memory_space<vmem>>, vector<128x144xbf16>
    %c0_1 = arith.constant 0 : index
    %c0_2 = arith.constant 0 : index
    %1 = vector.load %arg3[%c0_1, %c0_2] : memref<128x144xbf16, #tpu.memory_space<vmem>>, vector<128x144xbf16>
    %c0_3 = arith.constant 0 : index
    %c0_4 = arith.constant 0 : index
    %2 = vector.load %arg4[%c0_3, %c0_4] : memref<144x128xbf16, #tpu.memory_space<vmem>>, vector<144x128xbf16>
    %c0_5 = arith.constant 0 : index
    %c0_6 = arith.constant 0 : index
    %3 = vector.load %arg5[%c0_5, %c0_6] : memref<144x128xbf16, #tpu.memory_space<vmem>>, vector<144x128xbf16>
    %cst = arith.constant dense<0.000000e+00> : vector<128x128xf32>
    %4 = tpu.matmul %0, %2, %cst {dimension_numbers = #tpu.dot_dimension_numbers<[1], [0], [0], [1], [0, 0, 1, 1], [], []>} : vector<128x144xbf16>, vector<144x128xbf16>, vector<128x128xf32> -> vector<128x128xf32>
    %cst_7 = arith.constant dense<0.000000e+00> : vector<128x128xf32>
    %5 = tpu.matmul %1, %3, %cst_7 {dimension_numbers = #tpu.dot_dimension_numbers<[1], [0], [0], [1], [0, 0, 1, 1], [], []>} : vector<128x144xbf16>, vector<144x128xbf16>, vector<128x128xf32> -> vector<128x128xf32>
    %cst_8 = arith.constant dense<0.000000e+00> : vector<128x128xf32>
    %6 = tpu.matmul %0, %3, %cst_8 {dimension_numbers = #tpu.dot_dimension_numbers<[1], [0], [0], [1], [0, 0, 1, 1], [], []>} : vector<128x144xbf16>, vector<144x128xbf16>, vector<128x128xf32> -> vector<128x128xf32>
    %cst_9 = arith.constant dense<0.000000e+00> : vector<128x128xf32>
    %7 = tpu.matmul %1, %2, %cst_9 {dimension_numbers = #tpu.dot_dimension_numbers<[1], [0], [0], [1], [0, 0, 1, 1], [], []>} : vector<128x144xbf16>, vector<144x128xbf16>, vector<128x128xf32> -> vector<128x128xf32>
    %8 = arith.subf %4, %5 : vector<128x128xf32>
    %9 = arith.addf %6, %7 : vector<128x128xf32>
    %10 = arith.mulf %8, %8 : vector<128x128xf32>
    %11 = arith.mulf %9, %9 : vector<128x128xf32>
    %12 = arith.addf %10, %11 : vector<128x128xf32>
    %13 = math.sqrt %12 : vector<128x128xf32>
    %cst_10 = arith.constant 5.000000e-01 : f32
    %14 = vector.broadcast %cst_10 : f32 to vector<128x128xf32>
    %15 = arith.mulf %14, %13 : vector<128x128xf32>
    %cst_11 = arith.constant 0.707106769 : f32
    %16 = vector.broadcast %cst_11 : f32 to vector<128x128xf32>
    %17 = arith.mulf %13, %16 : vector<128x128xf32>
    %18 = math.erf %17 : vector<128x128xf32>
    %cst_12 = arith.constant 1.000000e+00 : f32
    %19 = vector.broadcast %cst_12 : f32 to vector<128x128xf32>
    %20 = arith.addf %19, %18 : vector<128x128xf32>
    %21 = arith.mulf %15, %20 : vector<128x128xf32>
    %cst_13 = arith.constant 9.99999993E-9 : f32
    %22 = vector.broadcast %cst_13 : f32 to vector<128x128xf32>
    %23 = arith.addf %13, %22 : vector<128x128xf32>
    %24 = arith.divf %21, %23 : vector<128x128xf32>
    %25 = arith.mulf %8, %24 : vector<128x128xf32>
    %26 = arith.mulf %9, %24 : vector<128x128xf32>
    %c0_14 = arith.constant 0 : index
    %c0_15 = arith.constant 0 : index
    %27 = vector.load %arg6[%c0_14, %c0_15] : memref<128x128xf32, #tpu.memory_space<vmem>>, vector<128x128xf32>
    tpu.vector_store %arg6[%c0_14, %c0_15], %25 {strides = array<i32>} : memref<128x128xf32, #tpu.memory_space<vmem>>, vector<128x128xf32>,
    %c0_16 = arith.constant 0 : index
    %c0_17 = arith.constant 0 : index
    %28 = vector.load %arg7[%c0_16, %c0_17] : memref<128x128xf32, #tpu.memory_space<vmem>>, vector<128x128xf32>
    tpu.vector_store %arg7[%c0_16, %c0_17], %26 {strides = array<i32>} : memref<128x128xf32, #tpu.memory_space<vmem>>, vector<128x128xf32>,
    return
  }
  func.func @transform_0(%arg0: i32, %arg1: i32) -> (i32, i32) {
    %c0_i32 = arith.constant 0 : i32
    %c0_i32_0 = arith.constant 0 : i32
    return %arg0, %c0_i32 : i32, i32
  }
  func.func @transform_1(%arg0: i32, %arg1: i32) -> (i32, i32) {
    %c0_i32 = arith.constant 0 : i32
    %c0_i32_0 = arith.constant 0 : i32
    return %arg0, %c0_i32 : i32, i32
  }
  func.func @transform_2(%arg0: i32, %arg1: i32) -> (i32, i32) {
    %c0_i32 = arith.constant 0 : i32
    %c0_i32_0 = arith.constant 0 : i32
    return %c0_i32, %arg1 : i32, i32
  }
  func.func @transform_3(%arg0: i32, %arg1: i32) -> (i32, i32) {
    %c0_i32 = arith.constant 0 : i32
    %c0_i32_0 = arith.constant 0 : i32
    return %c0_i32, %arg1 : i32, i32
  }
  func.func @transform_4(%arg0: i32, %arg1: i32) -> (i32, i32) {
    %c0_i32 = arith.constant 0 : i32
    return %arg0, %arg1 : i32, i32
  }
  func.func @transform_5(%arg0: i32, %arg1: i32) -> (i32, i32) {
    %c0_i32 = arith.constant 0 : i32
    return %arg0, %arg1 : i32, i32
  }
}

module attributes {stable_mosaic.version = 11 : i64} {
  func.func @_cmm_kernel(%arg0: i32, %arg1: i32, %arg2: memref<128x16xbf16, #tpu.memory_space<vmem>>, %arg3: memref<128x16xbf16, #tpu.memory_space<vmem>>, %arg4: memref<16x128xbf16, #tpu.memory_space<vmem>>, %arg5: memref<16x128xbf16, #tpu.memory_space<vmem>>, %arg6: memref<128x128xf32, #tpu.memory_space<vmem>>, %arg7: memref<128x128xf32, #tpu.memory_space<vmem>>) attributes {dimension_semantics = [#tpu.dimension_semantics<parallel>, #tpu.dimension_semantics<parallel>], iteration_bounds = array<i64: 1, 1>, scalar_prefetch = 0 : i64, scratch_operands = 0 : i64, tpu.core_type = #tpu.core_type<tc>, window_params = [{transform_indices = @transform_0, window_bounds = array<i64: 128, 16>}, {transform_indices = @transform_1, window_bounds = array<i64: 128, 16>}, {transform_indices = @transform_2, window_bounds = array<i64: 16, 128>}, {transform_indices = @transform_3, window_bounds = array<i64: 16, 128>}, {transform_indices = @transform_4, window_bounds = array<i64: 128, 128>}, {transform_indices = @transform_5, window_bounds = array<i64: 128, 128>}]} {
    %c0 = arith.constant 0 : index
    %c0_0 = arith.constant 0 : index
    %0 = vector.load %arg2[%c0, %c0_0] : memref<128x16xbf16, #tpu.memory_space<vmem>>, vector<128x16xbf16>
    %c0_1 = arith.constant 0 : index
    %c0_2 = arith.constant 0 : index
    %1 = vector.load %arg3[%c0_1, %c0_2] : memref<128x16xbf16, #tpu.memory_space<vmem>>, vector<128x16xbf16>
    %c0_3 = arith.constant 0 : index
    %c0_4 = arith.constant 0 : index
    %2 = vector.load %arg4[%c0_3, %c0_4] : memref<16x128xbf16, #tpu.memory_space<vmem>>, vector<16x128xbf16>
    %c0_5 = arith.constant 0 : index
    %c0_6 = arith.constant 0 : index
    %3 = vector.load %arg5[%c0_5, %c0_6] : memref<16x128xbf16, #tpu.memory_space<vmem>>, vector<16x128xbf16>
    %cst = arith.constant dense<0.000000e+00> : vector<128x128xf32>
    %4 = tpu.matmul %0, %2, %cst {dimension_numbers = #tpu.dot_dimension_numbers<[1], [0], [0], [1], [0, 0, 1, 1], [], []>} : vector<128x16xbf16>, vector<16x128xbf16>, vector<128x128xf32> -> vector<128x128xf32>
    %cst_7 = arith.constant dense<0.000000e+00> : vector<128x128xf32>
    %5 = tpu.matmul %1, %3, %cst_7 {dimension_numbers = #tpu.dot_dimension_numbers<[1], [0], [0], [1], [0, 0, 1, 1], [], []>} : vector<128x16xbf16>, vector<16x128xbf16>, vector<128x128xf32> -> vector<128x128xf32>
    %cst_8 = arith.constant dense<0.000000e+00> : vector<128x128xf32>
    %6 = tpu.matmul %0, %3, %cst_8 {dimension_numbers = #tpu.dot_dimension_numbers<[1], [0], [0], [1], [0, 0, 1, 1], [], []>} : vector<128x16xbf16>, vector<16x128xbf16>, vector<128x128xf32> -> vector<128x128xf32>
    %cst_9 = arith.constant dense<0.000000e+00> : vector<128x128xf32>
    %7 = tpu.matmul %1, %2, %cst_9 {dimension_numbers = #tpu.dot_dimension_numbers<[1], [0], [0], [1], [0, 0, 1, 1], [], []>} : vector<128x16xbf16>, vector<16x128xbf16>, vector<128x128xf32> -> vector<128x128xf32>
    %8 = arith.subf %4, %5 : vector<128x128xf32>
    %9 = arith.addf %6, %7 : vector<128x128xf32>
    %c0_10 = arith.constant 0 : index
    %c0_11 = arith.constant 0 : index
    %10 = vector.load %arg6[%c0_10, %c0_11] : memref<128x128xf32, #tpu.memory_space<vmem>>, vector<128x128xf32>
    tpu.vector_store %arg6[%c0_10, %c0_11], %8 {strides = array<i32>} : memref<128x128xf32, #tpu.memory_space<vmem>>, vector<128x128xf32>,
    %c0_12 = arith.constant 0 : index
    %c0_13 = arith.constant 0 : index
    %11 = vector.load %arg7[%c0_12, %c0_13] : memref<128x128xf32, #tpu.memory_space<vmem>>, vector<128x128xf32>
    tpu.vector_store %arg7[%c0_12, %c0_13], %9 {strides = array<i32>} : memref<128x128xf32, #tpu.memory_space<vmem>>, vector<128x128xf32>,
    return
  }
  func.func @transform_0(%arg0: i32, %arg1: i32) -> (i32, i32) {
    %c0_i32 = arith.constant 0 : i32
    %c0_i32_0 = arith.constant 0 : i32
    return %arg0, %c0_i32 : i32, i32
  }
  func.func @transform_1(%arg0: i32, %arg1: i32) -> (i32, i32) {
    %c0_i32 = arith.constant 0 : i32
    %c0_i32_0 = arith.constant 0 : i32
    return %arg0, %c0_i32 : i32, i32
  }
  func.func @transform_2(%arg0: i32, %arg1: i32) -> (i32, i32) {
    %c0_i32 = arith.constant 0 : i32
    %c0_i32_0 = arith.constant 0 : i32
    return %c0_i32, %arg1 : i32, i32
  }
  func.func @transform_3(%arg0: i32, %arg1: i32) -> (i32, i32) {
    %c0_i32 = arith.constant 0 : i32
    %c0_i32_0 = arith.constant 0 : i32
    return %c0_i32, %arg1 : i32, i32
  }
  func.func @transform_4(%arg0: i32, %arg1: i32) -> (i32, i32) {
    %c0_i32 = arith.constant 0 : i32
    return %arg0, %arg1 : i32, i32
  }
  func.func @transform_5(%arg0: i32, %arg1: i32) -> (i32, i32) {
    %c0_i32 = arith.constant 0 : i32
    return %arg0, %arg1 : i32, i32
  }
}

</mosaic_0001>

<bundles_post_ra>
// kernel: forward.22
= control target key start
LH: loop header
LB: loop body
LE: loop exit
PB: predicated region body
PF: predicated region fallthrough
CT: control target
= control target key end

     0   :  { %vm112_vm0 = vcmask 261120   ;;  %s1067_s2 = inlined_call_operand.vmem [shape: bf16[32,128], index: 2, kind: input, shape index: {}]   ;;  %s1068_s3 = inlined_call_operand.vmem [shape: bf16[32,128], index: 3, kind: input, shape index: {}]   ;;  %s1069_s0 = inlined_call_operand.vmem [shape: bf16[128,32], index: 0, kind: input, shape index: {}]   ;;  %s1070_s1 = inlined_call_operand.vmem [shape: bf16[128,32], index: 1, kind: input, shape index: {}]   ;;  %s1071_s4 = inlined_call_operand.vmem [shape: f32[128,128], index: 4, kind: output, shape index: {0}]   ;;  %s1072_s5 = inlined_call_operand.vmem [shape: f32[128,128], index: 5, kind: output, shape index: {1}]  }
   0x1   :  { %v829_v0 = vld [vmem:[%s1067_s2 + $0x8] sm:$0xff]   ;;  %v831_v2 = vld [vmem:[%s1067_s2] sm:$0xff]   ;;  %v837_v8 = vld [vmem:[%s1069_s0 + $0x10] sm:$0xff]  }
   0x2   :  { %v830_v1 = vld [vmem:[%s1068_s3 + $0x8] sm:$0xff]   ;;  %749 = vmatprep.subr.bf16.mxu0 %v829_v0  ;;  %v832_v3 = vld [vmem:[%s1068_s3] sm:$0xff]   ;;  %v838_v9 = vld [vmem:[%s1070_s1 + $0x10] sm:$0xff]  }
   0x3   :  { %769 = vmatprep.subr.bf16.mxu1 %v830_v1  ;;  %750 = vmatpush3.bf16.msra.mxu0 %v829_v0  ;;  %v833_v4 = vld [vmem:[%s1069_s0] sm:$0xff]   ;;  %v835_v6 = vld [vmem:[%s1069_s0 + $0x8] sm:$0xff]   ;;  %v839_v10 = vld [vmem:[%s1069_s0 + $0x18] sm:$0xff]  }
   0x4   :  { %770 = vmatpush3.bf16.msra.mxu1 %v830_v1  ;;  %751 = vmatprep.subr.bf16.mxu0 %v831_v2  ;;  %v834_v5 = vld [vmem:[%s1070_s1] sm:$0xff]   ;;  %v836_v7 = vld [vmem:[%s1070_s1 + $0x8] sm:$0xff]   ;;  %v840_v11 = vld [vmem:[%s1070_s1 + $0x18] sm:$0xff]  }
   0x5   :  { %771 = vmatprep.subr.bf16.mxu1 %v832_v3  ;;  %753 = vmatprep.mubr.msk.bf16.mxu0 %vm112_vm0, %v833_v4  ;;  %v841_v12 = vld [vmem:[%s1069_s0 + $0x20] sm:$0xff]   ;;  %v843_v14 = vld [vmem:[%s1069_s0 + $0x28] sm:$0xff]   ;;  %v845_v16 = vld [vmem:[%s1069_s0 + $0x30] sm:$0xff]  }
   0x6   :  { %773 = vmatprep.mubr.msk.bf16.mxu1 %vm112_vm0, %v834_v5  ;;  %v842_v13 = vld [vmem:[%s1070_s1 + $0x20] sm:$0xff]   ;;  %v844_v15 = vld [vmem:[%s1070_s1 + $0x28] sm:$0xff]   ;;  %v846_v17 = vld [vmem:[%s1070_s1 + $0x30] sm:$0xff]  }
   0x7   :  { %752 = vmatpush3.bf16.msra.mxu0 %v831_v2  ;;  %v847_v18 = vld [vmem:[%s1069_s0 + $0x38] sm:$0xff]  }
   0x8   :  { %772 = vmatpush3.bf16.msra.mxu1 %v832_v3  ;;  %789 = vmatprep.subr.bf16.mxu0 %v829_v0  ;;  %v848_v19 = vld [vmem:[%s1070_s1 + $0x38] sm:$0xff]  }
   0x9   :  { %809 = vmatprep.subr.bf16.mxu1 %v830_v1 }
   0xa   :  { %754 = vmatmul.mubr.msk.bf16.vlgmr.msra.gmra.mxu0 %vm112_vm0, %v835_v6 }
   0xb   :  { %774 = vmatmul.mubr.msk.bf16.vlgmr.msra.gmra.mxu1 %vm112_vm0, %v836_v7  ;;  %790 = vmatpush3.bf16.msra.mxu0 %v829_v0 }
   0xc   :  { %810 = vmatpush3.bf16.msra.mxu1 %v830_v1  ;;  %757 = vmatprep.mubr.msk.bf16.mxu0 %vm112_vm0, %v837_v8 }
   0xd   :  { %777 = vmatprep.mubr.msk.bf16.mxu1 %vm112_vm0, %v838_v9  ;;  %791 = vmatprep.subr.bf16.mxu0 %v831_v2 }
   0xe   :  { %811 = vmatprep.subr.bf16.mxu1 %v832_v3 }
   0xf   :  { %792 = vmatpush3.bf16.msra.mxu0 %v831_v2 }
  0x10   :  { %812 = vmatpush3.bf16.msra.mxu1 %v832_v3 }
  0x12   :  { %758 = vmatmul.mubr.msk.bf16.gmra.mxu0 %vm112_vm0, %v839_v10 }
  0x13   :  { %778 = vmatmul.mubr.msk.bf16.gmra.mxu1 %vm112_vm0, %v840_v11  ;;  %761 = vmatprep.mubr.msk.bf16.mxu0 %vm112_vm0, %v841_v12 }
  0x14   :  { %781 = vmatprep.mubr.msk.bf16.mxu1 %vm112_vm0, %v842_v13 }
  0x1a   :  { %762 = vmatmul.mubr.msk.bf16.gmra.mxu0 %vm112_vm0, %v843_v14 }
  0x1b   :  { %782 = vmatmul.mubr.msk.bf16.gmra.mxu1 %vm112_vm0, %v844_v15  ;;  %765 = vmatprep.mubr.msk.bf16.mxu0 %vm112_vm0, %v845_v16 }
  0x1c   :  { %785 = vmatprep.mubr.msk.bf16.mxu1 %vm112_vm0, %v846_v17 }
  0x22   :  { %766 = vmatmul.mubr.msk.bf16.gmra.mxu0 %vm112_vm0, %v847_v18 }
  0x23   :  { %786 = vmatmul.mubr.msk.bf16.gmra.mxu1 %vm112_vm0, %v848_v19  ;;  %793 = vmatprep.mubr.msk.bf16.mxu0 %vm112_vm0, %v834_v5 }
  0x24   :  { %813 = vmatprep.mubr.msk.bf16.mxu1 %vm112_vm0, %v833_v4 }
  0x2a   :  { %794 = vmatmul.mubr.msk.bf16.vlgmr.msra.gmra.mxu0 %vm112_vm0, %v836_v7 }
  0x2b   :  { %814 = vmatmul.mubr.msk.bf16.vlgmr.msra.gmra.mxu1 %vm112_vm0, %v835_v6  ;;  %797 = vmatprep.mubr.msk.bf16.mxu0 %vm112_vm0, %v838_v9 }
  0x2c   :  { %817 = vmatprep.mubr.msk.bf16.mxu1 %vm112_vm0, %v837_v8 }
  0x32   :  { %798 = vmatmul.mubr.msk.bf16.gmra.mxu0 %vm112_vm0, %v840_v11 }
  0x33   :  { %818 = vmatmul.mubr.msk.bf16.gmra.mxu1 %vm112_vm0, %v839_v10  ;;  %801 = vmatprep.mubr.msk.bf16.mxu0 %vm112_vm0, %v842_v13 }
  0x34   :  { %821 = vmatprep.mubr.msk.bf16.mxu1 %vm112_vm0, %v841_v12 }
  0x3a   :  { %802 = vmatmul.mubr.msk.bf16.gmra.mxu0 %vm112_vm0, %v844_v15 }
  0x3b   :  { %822 = vmatmul.mubr.msk.bf16.gmra.mxu1 %vm112_vm0, %v843_v14  ;;  %805 = vmatprep.mubr.msk.bf16.mxu0 %vm112_vm0, %v846_v17 }
  0x3c   :  { %825 = vmatprep.mubr.msk.bf16.mxu1 %vm112_vm0, %v845_v16 }
  0x42   :  { %806 = vmatmul.mubr.msk.bf16.gmra.mxu0 %vm112_vm0, %v848_v19 }
  0x43   :  { %826 = vmatmul.mubr.msk.bf16.gmra.mxu1 %vm112_vm0, %v847_v18 }
  0xca   :  { %v755_v20 = vpop.f32.mrf.mxu0 }
  0xcb   :  { %v775_v21 = vpop.f32.mrf.mxu1 }
  0xcc   :  { %v506_v22 = vsub.f32 %v755_v20, %v775_v21  ;;  %v171_v23 = vpop.f32.mrf.mxu0 }
  0xcd   :  { %v344_v24 = vpop.f32.mrf.mxu1 }
  0xce   :  { %619 = vst [vmem:[%s1071_s4 + $0x10] sm:$0xff] %v506_v22  ;;  %v504_v25 = vsub.f32 %v171_v23, %v344_v24  ;;  %v756_v26 = vpop.f32.mrf.mxu0 }
  0xcf   :  { %v776_v27 = vpop.f32.mrf.mxu1 }
  0xd0   :  { %617 = vst [vmem:[%s1071_s4] sm:$0xff] %v504_v25  ;;  %v507_v28 = vsub.f32 %v756_v26, %v776_v27  ;;  %v174_v29 = vpop.f32.mrf.mxu0 }
  0xd1   :  { %v347_v30 = vpop.f32.mrf.mxu1 }
  0xd2   :  { %620 = vst [vmem:[%s1071_s4 + $0x18] sm:$0xff] %v507_v28  ;;  %v505_v31 = vsub.f32 %v174_v29, %v347_v30  ;;  %v759_v32 = vpop.f32.mrf.mxu0 }
  0xd3   :  { %v779_v33 = vpop.f32.mrf.mxu1 }
  0xd4   :  { %618 = vst [vmem:[%s1071_s4 + $0x8] sm:$0xff] %v505_v31  ;;  %v510_v34 = vsub.f32 %v759_v32, %v779_v33  ;;  %v187_v35 = vpop.f32.mrf.mxu0 }
  0xd5   :  { %v360_v36 = vpop.f32.mrf.mxu1 }
  0xd6   :  { %623 = vst [vmem:[%s1071_s4 + $0x30] sm:$0xff] %v510_v34  ;;  %v508_v37 = vsub.f32 %v187_v35, %v360_v36  ;;  %v760_v38 = vpop.f32.mrf.mxu0 }
  0xd7   :  { %v780_v39 = vpop.f32.mrf.mxu1 }
  0xd8   :  { %621 = vst [vmem:[%s1071_s4 + $0x20] sm:$0xff] %v508_v37  ;;  %v511_v40 = vsub.f32 %v760_v38, %v780_v39  ;;  %v190_v41 = vpop.f32.mrf.mxu0 }
  0xd9   :  { %v363_v42 = vpop.f32.mrf.mxu1 }
  0xda   :  { %624 = vst [vmem:[%s1071_s4 + $0x38] sm:$0xff] %v511_v40  ;;  %v509_v43 = vsub.f32 %v190_v41, %v363_v42  ;;  %v763_v44 = vpop.f32.mrf.mxu0 }
  0xdb   :  { %v783_v45 = vpop.f32.mrf.mxu1 }
  0xdc   :  { %622 = vst [vmem:[%s1071_s4 + $0x28] sm:$0xff] %v509_v43  ;;  %v514_v46 = vsub.f32 %v763_v44, %v783_v45  ;;  %v203_v47 = vpop.f32.mrf.mxu0 }
  0xdd   :  { %v376_v48 = vpop.f32.mrf.mxu1 }
  0xde   :  { %627 = vst [vmem:[%s1071_s4 + $0x50] sm:$0xff] %v514_v46  ;;  %v512_v49 = vsub.f32 %v203_v47, %v376_v48  ;;  %v764_v50 = vpop.f32.mrf.mxu0 }
  0xdf   :  { %v784_v51 = vpop.f32.mrf.mxu1 }
  0xe0   :  { %625 = vst [vmem:[%s1071_s4 + $0x40] sm:$0xff] %v512_v49  ;;  %v515_v52 = vsub.f32 %v764_v50, %v784_v51  ;;  %v206_v53 = vpop.f32.mrf.mxu0 }
  0xe1   :  { %v379_v54 = vpop.f32.mrf.mxu1 }
  0xe2   :  { %628 = vst [vmem:[%s1071_s4 + $0x58] sm:$0xff] %v515_v52  ;;  %v513_v55 = vsub.f32 %v206_v53, %v379_v54  ;;  %v767_v56 = vpop.f32.mrf.mxu0 }
  0xe3   :  { %v787_v57 = vpop.f32.mrf.mxu1 }
  0xe4   :  { %626 = vst [vmem:[%s1071_s4 + $0x48] sm:$0xff] %v513_v55  ;;  %v518_v58 = vsub.f32 %v767_v56, %v787_v57  ;;  %v219_v59 = vpop.f32.mrf.mxu0 }
  0xe5   :  { %v392_v60 = vpop.f32.mrf.mxu1 }
  0xe6   :  { %631 = vst [vmem:[%s1071_s4 + $0x70] sm:$0xff] %v518_v58  ;;  %v516_v61 = vsub.f32 %v219_v59, %v392_v60  ;;  %v768_v62 = vpop.f32.mrf.mxu0 }
  0xe7   :  { %v788_v63 = vpop.f32.mrf.mxu1 }
  0xe8   :  { %629 = vst [vmem:[%s1071_s4 + $0x60] sm:$0xff] %v516_v61  ;;  %v519_v0 = vsub.f32 %v768_v62, %v788_v63  ;;  %v222_v1 = vpop.f32.mrf.mxu0 }
  0xe9   :  { %v395_v2 = vpop.f32.mrf.mxu1 }
  0xea   :  { %632 = vst [vmem:[%s1071_s4 + $0x78] sm:$0xff] %v519_v0  ;;  %v517_v3 = vsub.f32 %v222_v1, %v395_v2  ;;  %v795_v4 = vpop.f32.mrf.mxu0 }
  0xeb   :  { %v815_v5 = vpop.f32.mrf.mxu1 }
  0xec   :  { %630 = vst [vmem:[%s1071_s4 + $0x68] sm:$0xff] %v517_v3  ;;  %v563_v6 = vadd.f32 %v815_v5, %v795_v4  ;;  %v441_v7 = vpop.f32.mrf.mxu0 }
  0xed   :  { %v554_v8 = vpop.f32.mrf.mxu1 }
  0xee   :  { %635 = vst [vmem:[%s1072_s5 + $0x10] sm:$0xff] %v563_v6  ;;  %v555_v9 = vadd.f32 %v554_v8, %v441_v7  ;;  %v796_v10 = vpop.f32.mrf.mxu0 }
  0xef   :  { %v816_v11 = vpop.f32.mrf.mxu1 }
  0xf0   :  { %633 = vst [vmem:[%s1072_s5] sm:$0xff] %v555_v9  ;;  %v566_v12 = vadd.f32 %v816_v11, %v796_v10  ;;  %v444_v13 = vpop.f32.mrf.mxu0 }
  0xf1   :  { %v557_v14 = vpop.f32.mrf.mxu1 }
  0xf2   :  { %636 = vst [vmem:[%s1072_s5 + $0x18] sm:$0xff] %v566_v12  ;;  %v558_v15 = vadd.f32 %v557_v14, %v444_v13  ;;  %v799_v16 = vpop.f32.mrf.mxu0 }
  0xf3   :  { %v819_v17 = vpop.f32.mrf.mxu1 }
  0xf4   :  { %634 = vst [vmem:[%s1072_s5 + $0x8] sm:$0xff] %v558_v15  ;;  %v579_v18 = vadd.f32 %v819_v17, %v799_v16  ;;  %v457_v19 = vpop.f32.mrf.mxu0 }
  0xf5   :  { %v570_v20 = vpop.f32.mrf.mxu1 }
  0xf6   :  { %639 = vst [vmem:[%s1072_s5 + $0x30] sm:$0xff] %v579_v18  ;;  %v571_v21 = vadd.f32 %v570_v20, %v457_v19  ;;  %v800_v22 = vpop.f32.mrf.mxu0 }
  0xf7   :  { %v820_v23 = vpop.f32.mrf.mxu1 }
  0xf8   :  { %637 = vst [vmem:[%s1072_s5 + $0x20] sm:$0xff] %v571_v21  ;;  %v582_v24 = vadd.f32 %v820_v23, %v800_v22  ;;  %v460_v25 = vpop.f32.mrf.mxu0 }
  0xf9   :  { %v573_v26 = vpop.f32.mrf.mxu1 }
  0xfa   :  { %640 = vst [vmem:[%s1072_s5 + $0x38] sm:$0xff] %v582_v24  ;;  %v574_v27 = vadd.f32 %v573_v26, %v460_v25  ;;  %v803_v28 = vpop.f32.mrf.mxu0 }
  0xfb   :  { %v823_v29 = vpop.f32.mrf.mxu1 }
  0xfc   :  { %638 = vst [vmem:[%s1072_s5 + $0x28] sm:$0xff] %v574_v27  ;;  %v595_v30 = vadd.f32 %v823_v29, %v803_v28  ;;  %v473_v31 = vpop.f32.mrf.mxu0 }
  0xfd   :  { %v586_v32 = vpop.f32.mrf.mxu1 }
  0xfe   :  { %643 = vst [vmem:[%s1072_s5 + $0x50] sm:$0xff] %v595_v30  ;;  %v587_v33 = vadd.f32 %v586_v32, %v473_v31  ;;  %v804_v34 = vpop.f32.mrf.mxu0 }
  0xff   :  { %v824_v35 = vpop.f32.mrf.mxu1 }
 0x100   :  { %641 = vst [vmem:[%s1072_s5 + $0x40] sm:$0xff] %v587_v33  ;;  %v598_v36 = vadd.f32 %v824_v35, %v804_v34  ;;  %v476_v37 = vpop.f32.mrf.mxu0 }
 0x101   :  { %v589_v38 = vpop.f32.mrf.mxu1 }
 0x102   :  { %644 = vst [vmem:[%s1072_s5 + $0x58] sm:$0xff] %v598_v36  ;;  %v590_v39 = vadd.f32 %v589_v38, %v476_v37  ;;  %v807_v40 = vpop.f32.mrf.mxu0 }
 0x103   :  { %v827_v41 = vpop.f32.mrf.mxu1 }
 0x104   :  { %642 = vst [vmem:[%s1072_s5 + $0x48] sm:$0xff] %v590_v39  ;;  %v611_v42 = vadd.f32 %v827_v41, %v807_v40  ;;  %v489_v43 = vpop.f32.mrf.mxu0 }
 0x105   :  { %v602_v44 = vpop.f32.mrf.mxu1 }
 0x106   :  { %647 = vst [vmem:[%s1072_s5 + $0x70] sm:$0xff] %v611_v42  ;;  %v603_v45 = vadd.f32 %v602_v44, %v489_v43  ;;  %v808_v46 = vpop.f32.mrf.mxu0 }
 0x107   :  { %v828_v47 = vpop.f32.mrf.mxu1 }
 0x108   :  { %645 = vst [vmem:[%s1072_s5 + $0x60] sm:$0xff] %v603_v45  ;;  %v614_v48 = vadd.f32 %v828_v47, %v808_v46  ;;  %v492_v49 = vpop.f32.mrf.mxu0 }
 0x109   :  { %v605_v50 = vpop.f32.mrf.mxu1 }
 0x10a   :  { %648 = vst [vmem:[%s1072_s5 + $0x78] sm:$0xff] %v614_v48  ;;  %v606_v51 = vadd.f32 %v605_v50, %v492_v49 }
 0x10c   :  { %646 = vst [vmem:[%s1072_s5 + $0x68] sm:$0xff] %v606_v51 }

// kernel: forward.20
= control target key start
LH: loop header
LB: loop body
LE: loop exit
PB: predicated region body
PF: predicated region fallthrough
CT: control target
= control target key end

     0   :  { %vm322_vm0 = vcmask 654336   ;;  %s2056_s2 = inlined_call_operand.vmem [shape: bf16[336,128], index: 2, kind: input, shape index: {}]   ;;  %s2057_s0 = inlined_call_operand.vmem [shape: bf16[64,336], index: 0, kind: input, shape index: {}]   ;;  %s2058_s3 = inlined_call_operand.vmem [shape: bf16[336,128], index: 3, kind: input, shape index: {}]   ;;  %s2059_s1 = inlined_call_operand.vmem [shape: bf16[64,336], index: 1, kind: input, shape index: {}]   ;;  %s2060_s4 = inlined_call_operand.vmem [shape: f32[64,128], index: 4, kind: output, shape index: {0}]   ;;  %s2061_s5 = inlined_call_operand.vmem [shape: f32[64,128], index: 5, kind: output, shape index: {1}]  }
   0x1   :  { %v1542_v0 = vld [vmem:[%s2056_s2 + $0x78] sm:$0xff]   ;;  %v1547_v1 = vld [vmem:[%s2056_s2 + $0xa0] sm:$0xff]   ;;  %v1559_v3 = vld [vmem:[%s2056_s2 + $0x70] sm:$0xff]  }
   0x2   :  { %1167 = vmatprep.subr.bf16.mxu0 %v1542_v0  ;;  %v1553_v2 = vld [vmem:[%s2056_s2 + $0x38] sm:$0xff]   ;;  %1363 = vmatprep.subr.bf16.mxu1 %v1547_v1  ;;  %v1572_v5 = vld [vmem:[%s2056_s2 + $0x30] sm:$0xff]   ;;  %v1578_v6 = vld [vmem:[%s2056_s2 + $0x68] sm:$0xff]  }
   0x3   :  { %1168 = vmatpush3.bf16.msra.mxu0 %v1553_v2  ;;  %1364 = vmatpush3.bf16.msra.mxu1 %v1547_v1  ;;  %v1566_v4 = vld [vmem:[%s2056_s2 + $0x98] sm:$0xff]   ;;  %v1583_v7 = vld [vmem:[%s2056_s2 + $0x90] sm:$0xff]   ;;  %v1590_v8 = vld [vmem:[%s2056_s2 + $0x28] sm:$0xff]  }
   0x4   :  { %1169 = vmatprep.subr.bf16.mxu0 %v1559_v3  ;;  %1365 = vmatprep.subr.bf16.mxu1 %v1566_v4  ;;  %v1597_v9 = vld [vmem:[%s2056_s2 + $0x60] sm:$0xff]   ;;  %v1602_v10 = vld [vmem:[%s2056_s2 + $0x88] sm:$0xff]   ;;  %v1614_v12 = vld [vmem:[%s2056_s2 + $0x58] sm:$0xff]  }
   0x5   :  { %v1607_v11 = vld [vmem:[%s2056_s2 + $0x20] sm:$0xff]   ;;  %v1626_v14 = vld [vmem:[%s2056_s2 + $0x18] sm:$0xff]   ;;  %v1631_v15 = vld [vmem:[%s2056_s2 + $0x50] sm:$0xff]  }
   0x6   :  { %v1621_v13 = vld [vmem:[%s2056_s2 + $0x80] sm:$0xff]   ;;  %v1638_v16 = vld [vmem:[%s2057_s0 + $0x8] ss:$12 sps:$4 sm:$0xff]   ;;  %v1645_v17 = vld [vmem:[%s2058_s3 + $0x78] sm:$0xff]  }
   0x7   :  { %1170 = vmatpush3.bf16.msra.mxu0 %v1572_v5  ;;  %1366 = vmatpush3.bf16.msra.mxu1 %v1566_v4  ;;  %v1652_v18 = vld [vmem:[%s2056_s2 + $0x10] sm:$0xff]   ;;  %v1657_v19 = vld [vmem:[%s2057_s0 + $0x20] ss:$12 sps:$4 sm:$0xff]   ;;  %v1664_v20 = vld [vmem:[%s2058_s3 + $0x38] sm:$0xff]  }
   0x8   :  { %1171 = vmatprep.subr.bf16.mxu0 %v1578_v6  ;;  %1367 = vmatprep.subr.bf16.mxu1 %v1583_v7  ;;  %v1671_v21 = vld [vmem:[%s2056_s2 + $0x48] sm:$0xff]   ;;  %v1676_v22 = vld [vmem:[%s2058_s3 + $0x70] sm:$0xff]   ;;  %v1697_v25 = vld [vmem:[%s2056_s2 + $0x40] sm:$0xff]  }
   0x9   :  { %1373 = vmatprep.mubr.msk.bf16.mxu1 %vm322_vm0, %v1638_v16  ;;  %v1683_v23 = vld [vmem:[%s2056_s2 + $0x8] sm:$0xff]   ;;  %v1690_v24 = vld [vmem:[%s2058_s3 + $0x30] sm:$0xff]   ;;  %v1707_v27 = vld [vmem:[%s2056_s2] sm:$0xff]  }
   0xa   :  { %v1702_v26 = vld [vmem:[%s2058_s3 + $0x68] sm:$0xff]   ;;  %v1726_v30 = vld [vmem:[%s2057_s0 + $0x4] ss:$12 sps:$4 sm:$0xff]   ;;  %v1751_v34 = vld [vmem:[%s2058_s3 + $0x58] sm:$0xff]  }
   0xb   :  { %1172 = vmatpush3.bf16.msra.mxu0 %v1590_v8  ;;  %1368 = vmatpush3.bf16.msra.mxu1 %v1583_v7  ;;  %v1714_v28 = vld [vmem:[%s2058_s3 + $0x28] sm:$0xff]   ;;  %v1731_v31 = vld [vmem:[%s2058_s3 + $0x60] sm:$0xff]   ;;  %v1757_v35 = vld [vmem:[%s2058_s3 + $0x18] sm:$0xff]  }
   0xc   :  { %1173 = vmatprep.subr.bf16.mxu0 %v1597_v9  ;;  %1369 = vmatprep.subr.bf16.mxu1 %v1602_v10  ;;  %v1721_v29 = vld [vmem:[%s2057_s0] ss:$12 sps:$4 sm:$0xff]   ;;  %v1764_v36 = vld [vmem:[%s2057_s0 + $0x1c] ss:$12 sps:$4 sm:$0xff]   ;;  %v1775_v38 = vld [vmem:[%s2057_s0 + $0x18] ss:$12 sps:$4 sm:$0xff]  }
   0xd   :  { %v1738_v32 = vld [vmem:[%s2058_s3 + $0xa0] sm:$0xff]   ;;  %367 = vmatprep.mubr.bf16.mxu0 %v1726_v30  ;;  %v1770_v37 = vld [vmem:[%s2058_s3 + $0x98] sm:$0xff]   ;;  %v1781_v39 = vld [vmem:[%s2058_s3 + $0x50] sm:$0xff]  }
   0xe   :  { %v1745_v33 = vld [vmem:[%s2058_s3 + $0x20] sm:$0xff]   ;;  %v1787_v40 = vld [vmem:[%s2058_s3 + $0x10] sm:$0xff]   ;;  %v1807_v43 = vld [vmem:[%s2058_s3 + $0x48] sm:$0xff]  }
   0xf   :  { %1174 = vmatpush3.bf16.msra.mxu0 %v1607_v11  ;;  %1370 = vmatpush3.bf16.msra.mxu1 %v1602_v10  ;;  %v1794_v41 = vld [vmem:[%s2057_s0 + $0x38] ss:$12 sps:$4 sm:$0xff]   ;;  %v1800_v42 = vld [vmem:[%s2057_s0 + $0x50] ss:$12 sps:$4 sm:$0xff]   ;;  %v1815_v44 = vld [vmem:[%s2058_s3 + $0x8] sm:$0xff]  }
  0x10   :  { %1175 = vmatprep.subr.bf16.mxu0 %v1614_v12  ;;  %1371 = vmatprep.subr.bf16.mxu1 %v1621_v13  ;;  %v1821_v45 = vld [vmem:[%s2058_s3 + $0x90] sm:$0xff]   ;;  %v1833_v47 = vld [vmem:[%s2058_s3 + $0x40] sm:$0xff]   ;;  %v1855_v51 = vld [vmem:[%s2058_s3 + $0x88] sm:$0xff]  }
  0x11   :  { %v1827_v46 = vld [vmem:[%s2057_s0 + $0x34] ss:$12 sps:$4 sm:$0xff]   ;;  %v1840_v48 = vld [vmem:[%s2057_s0 + $0x30] ss:$12 sps:$4 sm:$0xff]   ;;  %v1866_v53 = vld [vmem:[%s2057_s0 + $0x4c] ss:$12 sps:$4 sm:$0xff]  }
  0x12   :  { %v1846_v49 = vld [vmem:[%s2058_s3] sm:$0xff]   ;;  %v1496_v55 = vld [vmem:[%s2059_s1 + $0x1c] ss:$12 sps:$4 sm:$0xff]   ;;  %v1506_v63 = vld [vmem:[%s2059_s1 + $0x4c] ss:$12 sps:$4 sm:$0xff]  }
  0x13   :  { %1176 = vmatpush3.bf16.msra.mxu0 %v1626_v14  ;;  %1372 = vmatpush3.bf16.msra.mxu1 %v1621_v13  ;;  %v1490_v50 = vld [vmem:[%s2059_s1 + $0x4] ss:$12 sps:$4 sm:$0xff]   ;;  %v1861_v52 = vld [vmem:[%s2059_s1] ss:$12 sps:$4 sm:$0xff]   ;;  %v1886_v56 = vld [vmem:[%s2057_s0 + $0x48] ss:$12 sps:$4 sm:$0xff]  }
  0x14   :  { %1177 = vmatprep.subr.bf16.mxu0 %v1631_v15  ;;  %1216 = vmatprep.subr.bf16.mxu1 %v1645_v17  ;;  %v1873_v54 = vld [vmem:[%s2058_s3 + $0x80] sm:$0xff]   ;;  %v1499_v57 = vld [vmem:[%s2059_s1 + $0x8] ss:$12 sps:$4 sm:$0xff]   ;;  %v1503_v62 = vld [vmem:[%s2059_s1 + $0x30] ss:$12 sps:$4 sm:$0xff]  }
  0x15   :  { %v1498_v58 = vld [vmem:[%s2059_s1 + $0x18] ss:$12 sps:$4 sm:$0xff]   ;;  %v1501_v59 = vld [vmem:[%s2059_s1 + $0x34] ss:$12 sps:$4 sm:$0xff]  }
  0x16   :  { %1374 = vmatmul.mubr.msk.bf16.vlgmr.msra.gmra.mxu1 %vm322_vm0, %v1657_v19  ;;  %v1500_v60 = vld [vmem:[%s2059_s1 + $0x20] ss:$12 sps:$4 sm:$0xff]   ;;  %v1504_v61 = vld [vmem:[%s2059_s1 + $0x38] ss:$12 sps:$4 sm:$0xff]  }
  0x17   :  { %1178 = vmatpush3.bf16.msra.mxu0 %v1652_v18  ;;  %1217 = vmatpush3.bf16.msra.mxu1 %v1664_v20 }
  0x18   :  { %1179 = vmatprep.subr.bf16.mxu0 %v1671_v21  ;;  %1218 = vmatprep.subr.bf16.mxu1 %v1676_v22 }
  0x19   :  { %1377 = vmatprep.mubr.msk.bf16.mxu1 %vm322_vm0, %v1794_v41 }
  0x1b   :  { %1180 = vmatpush3.bf16.msra.mxu0 %v1683_v23  ;;  %1219 = vmatpush3.bf16.msra.mxu1 %v1690_v24 }
  0x1c   :  { %1181 = vmatprep.subr.bf16.mxu0 %v1697_v25  ;;  %1220 = vmatprep.subr.bf16.mxu1 %v1702_v26 }
  0x1e   :  { %1378 = vmatmul.mubr.msk.bf16.gmra.mxu1 %vm322_vm0, %v1800_v42 }
  0x1f   :  { %1182 = vmatpush3.bf16.msra.mxu0 %v1707_v27  ;;  %1221 = vmatpush3.bf16.msra.mxu1 %v1714_v28 }
  0x20   :  { %1222 = vmatprep.subr.bf16.mxu1 %v1731_v31  ;;  %1381 = vmatprep.subr.bf16.mxu0 %v1738_v32 }
  0x21   :  { %695 = vmatprep.mubr.bf16.mxu1 %v1490_v50 }
  0x22   :  { %368 = vmatmul.mubr.bf16.vlgmr.msra.gmra.mxu0 %v1721_v29 }
  0x23   :  { %1223 = vmatpush3.bf16.msra.mxu1 %v1745_v33  ;;  %1382 = vmatpush3.bf16.msra.mxu0 %v1738_v32 }
  0x24   :  { %1224 = vmatprep.subr.bf16.mxu1 %v1751_v34  ;;  %375 = vmatprep.mubr.bf16.mxu0 %v1764_v36 }
  0x25   :  { %1383 = vmatprep.subr.bf16.mxu0 %v1770_v37 }
  0x27   :  { %1225 = vmatpush3.bf16.msra.mxu1 %v1757_v35  ;;  %1384 = vmatpush3.bf16.msra.mxu0 %v1770_v37 }
  0x28   :  { %1226 = vmatprep.subr.bf16.mxu1 %v1781_v39  ;;  %1385 = vmatprep.subr.bf16.mxu0 %v1821_v45 }
  0x2a   :  { %376 = vmatmul.mubr.bf16.gmra.mxu0 %v1775_v38 }
  0x2b   :  { %1227 = vmatpush3.bf16.msra.mxu1 %v1787_v40  ;;  %1386 = vmatpush3.bf16.msra.mxu0 %v1821_v45 }
  0x2c   :  { %1228 = vmatprep.subr.bf16.mxu1 %v1807_v43  ;;  %383 = vmatprep.mubr.bf16.mxu0 %v1827_v46 }
  0x2d   :  { %1387 = vmatprep.subr.bf16.mxu0 %v1855_v51 }
  0x2f   :  { %1229 = vmatpush3.bf16.msra.mxu1 %v1815_v44  ;;  %1388 = vmatpush3.bf16.msra.mxu0 %v1855_v51 }
  0x30   :  { %1230 = vmatprep.subr.bf16.mxu1 %v1833_v47  ;;  %1389 = vmatprep.subr.bf16.mxu0 %v1873_v54 }
  0x32   :  { %384 = vmatmul.mubr.bf16.gmra.mxu0 %v1840_v48 }
  0x33   :  { %1231 = vmatpush3.bf16.msra.mxu1 %v1846_v49  ;;  %391 = vmatprep.mubr.bf16.mxu0 %v1866_v53 }
  0x34   :  { %1265 = vmatprep.subr.bf16.mxu1 %v1542_v0  ;;  %1390 = vmatpush3.bf16.msra.mxu0 %v1873_v54  ;;  %v1505_v0 = vld [vmem:[%s2059_s1 + $0x50] ss:$12 sps:$4 sm:$0xff]  }
  0x35   :  { %1399 = vmatprep.subr.bf16.mxu0 %v1547_v1 }
  0x36   :  { %696 = vmatmul.mubr.bf16.vlgmr.msra.gmra.mxu1 %v1861_v52 }
  0x37   :  { %1266 = vmatpush3.bf16.msra.mxu1 %v1553_v2  ;;  %703 = vmatprep.mubr.bf16.mxu1 %v1496_v55 }
  0x38   :  { %1267 = vmatprep.subr.bf16.mxu1 %v1559_v3 }
  0x3a   :  { %392 = vmatmul.mubr.bf16.gmra.mxu0 %v1886_v56 }
  0x3b   :  { %1268 = vmatpush3.bf16.msra.mxu1 %v1572_v5  ;;  %1391 = vmatprep.mubr.msk.bf16.mxu0 %vm322_vm0, %v1499_v57 }
  0x3c   :  { %1269 = vmatprep.subr.bf16.mxu1 %v1578_v6 }
  0x3e   :  { %704 = vmatmul.mubr.bf16.gmra.mxu1 %v1498_v58 }
  0x3f   :  { %1270 = vmatpush3.bf16.msra.mxu1 %v1590_v8  ;;  %711 = vmatprep.mubr.bf16.mxu1 %v1501_v59 }
  0x40   :  { %1271 = vmatprep.subr.bf16.mxu1 %v1597_v9 }
  0x42   :  { %1392 = vmatmul.mubr.msk.bf16.vlgmr.msra.gmra.mxu0 %vm322_vm0, %v1500_v60 }
  0x43   :  { %1400 = vmatpush3.bf16.msra.mxu0 %v1547_v1  ;;  %1272 = vmatpush3.bf16.msra.mxu1 %v1607_v11  ;;  %v1508_v1 = vld [vmem:[%s2059_s1 + $0x48] ss:$12 sps:$4 sm:$0xff]  }
  0x44   :  { %1401 = vmatprep.subr.bf16.mxu0 %v1566_v4  ;;  %1273 = vmatprep.subr.bf16.mxu1 %v1614_v12 }
  0x45   :  { %1395 = vmatprep.mubr.msk.bf16.mxu0 %vm322_vm0, %v1504_v61 }
  0x46   :  { %712 = vmatmul.mubr.bf16.gmra.mxu1 %v1503_v62 }
  0x47   :  { %1402 = vmatpush3.bf16.msra.mxu0 %v1566_v4  ;;  %1274 = vmatpush3.bf16.msra.mxu1 %v1626_v14 }
  0x48   :  { %1403 = vmatprep.subr.bf16.mxu0 %v1583_v7  ;;  %1275 = vmatprep.subr.bf16.mxu1 %v1631_v15 }
  0x49   :  { %719 = vmatprep.mubr.bf16.mxu1 %v1506_v63 }
  0x4a   :  { %1396 = vmatmul.mubr.msk.bf16.gmra.mxu0 %vm322_vm0, %v1505_v0 }
  0x4b   :  { %1404 = vmatpush3.bf16.msra.mxu0 %v1583_v7  ;;  %1276 = vmatpush3.bf16.msra.mxu1 %v1652_v18 }
  0x4c   :  { %1405 = vmatprep.subr.bf16.mxu0 %v1602_v10  ;;  %1277 = vmatprep.subr.bf16.mxu1 %v1671_v21 }
  0x4d   :  { %1409 = vmatprep.mubr.msk.bf16.mxu0 %vm322_vm0, %v1499_v57 }
  0x4e   :  { %720 = vmatmul.mubr.bf16.gmra.mxu1 %v1508_v1 }
  0x4f   :  { %1406 = vmatpush3.bf16.msra.mxu0 %v1602_v10  ;;  %1278 = vmatpush3.bf16.msra.mxu1 %v1683_v23 }
  0x50   :  { %1407 = vmatprep.subr.bf16.mxu0 %v1621_v13  ;;  %1279 = vmatprep.subr.bf16.mxu1 %v1697_v25 }
  0x51   :  { %825 = vmatprep.mubr.bf16.mxu1 %v1490_v50 }
  0x53   :  { %1408 = vmatpush3.bf16.msra.mxu0 %v1621_v13  ;;  %1280 = vmatpush3.bf16.msra.mxu1 %v1707_v27 }
  0x54   :  { %1314 = vmatprep.subr.bf16.mxu0 %v1645_v17  ;;  %1417 = vmatprep.subr.bf16.mxu1 %v1738_v32 }
  0x56   :  { %1410 = vmatmul.mubr.msk.bf16.vlgmr.msra.gmra.mxu0 %vm322_vm0, %v1500_v60  ;;  %826 = vmatmul.mubr.bf16.vlgmr.msra.gmra.mxu1 %v1861_v52 }
  0x57   :  { %1315 = vmatpush3.bf16.msra.mxu0 %v1664_v20  ;;  %833 = vmatprep.mubr.bf16.mxu1 %v1496_v55 }
  0x58   :  { %1316 = vmatprep.subr.bf16.mxu0 %v1676_v22  ;;  %1418 = vmatpush3.bf16.msra.mxu1 %v1738_v32 }
  0x59   :  { %1413 = vmatprep.mubr.msk.bf16.mxu0 %vm322_vm0, %v1504_v61  ;;  %1419 = vmatprep.subr.bf16.mxu1 %v1770_v37 }
  0x5b   :  { %1317 = vmatpush3.bf16.msra.mxu0 %v1690_v24 }
  0x5c   :  { %1318 = vmatprep.subr.bf16.mxu0 %v1702_v26  ;;  %1420 = vmatpush3.bf16.msra.mxu1 %v1770_v37 }
  0x5d   :  { %1421 = vmatprep.subr.bf16.mxu1 %v1821_v45 }
  0x5e   :  { %834 = vmatmul.mubr.bf16.gmra.mxu1 %v1498_v58  ;;  %1414 = vmatmul.mubr.msk.bf16.gmra.mxu0 %vm322_vm0, %v1505_v0 }
  0x5f   :  { %1319 = vmatpush3.bf16.msra.mxu0 %v1714_v28  ;;  %841 = vmatprep.mubr.bf16.mxu1 %v1501_v59 }
  0x60   :  { %1320 = vmatprep.subr.bf16.mxu0 %v1731_v31  ;;  %1422 = vmatpush3.bf16.msra.mxu1 %v1821_v45 }
  0x61   :  { %1423 = vmatprep.subr.bf16.mxu1 %v1855_v51  ;;  %963 = vmatprep.mubr.bf16.mxu0 %v1726_v30 }
  0x63   :  { %1321 = vmatpush3.bf16.msra.mxu0 %v1745_v33 }
  0x64   :  { %1322 = vmatprep.subr.bf16.mxu0 %v1751_v34  ;;  %1424 = vmatpush3.bf16.msra.mxu1 %v1855_v51 }
  0x65   :  { %1425 = vmatprep.subr.bf16.mxu1 %v1873_v54 }
  0x66   :  { %842 = vmatmul.mubr.bf16.gmra.mxu1 %v1503_v62 }
  0x67   :  { %1323 = vmatpush3.bf16.msra.mxu0 %v1757_v35  ;;  %849 = vmatprep.mubr.bf16.mxu1 %v1506_v63 }
  0x68   :  { %1324 = vmatprep.subr.bf16.mxu0 %v1781_v39  ;;  %1426 = vmatpush3.bf16.msra.mxu1 %v1873_v54 }
  0x6b   :  { %1325 = vmatpush3.bf16.msra.mxu0 %v1787_v40 }
  0x6c   :  { %1326 = vmatprep.subr.bf16.mxu0 %v1807_v43 }
  0x6e   :  { %850 = vmatmul.mubr.bf16.gmra.mxu1 %v1508_v1 }
  0x6f   :  { %1327 = vmatpush3.bf16.msra.mxu0 %v1815_v44  ;;  %1427 = vmatprep.mubr.msk.bf16.mxu1 %vm322_vm0, %v1638_v16 }
  0x70   :  { %1328 = vmatprep.subr.bf16.mxu0 %v1833_v47 }
  0x73   :  { %1329 = vmatpush3.bf16.msra.mxu0 %v1846_v49 }
  0x76   :  { %964 = vmatmul.mubr.bf16.vlgmr.msra.gmra.mxu0 %v1721_v29  ;;  %1428 = vmatmul.mubr.msk.bf16.vlgmr.msra.gmra.mxu1 %vm322_vm0, %v1657_v19 }
  0x77   :  { %971 = vmatprep.mubr.bf16.mxu0 %v1764_v36  ;;  %1431 = vmatprep.mubr.msk.bf16.mxu1 %vm322_vm0, %v1794_v41 }
  0x7e   :  { %972 = vmatmul.mubr.bf16.gmra.mxu0 %v1775_v38  ;;  %1432 = vmatmul.mubr.msk.bf16.gmra.mxu1 %vm322_vm0, %v1800_v42 }
  0x7f   :  { %979 = vmatprep.mubr.bf16.mxu0 %v1827_v46 }
  0x86   :  { %980 = vmatmul.mubr.bf16.gmra.mxu0 %v1840_v48 }
  0x87   :  { %987 = vmatprep.mubr.bf16.mxu0 %v1866_v53 }
  0x8e   :  { %988 = vmatmul.mubr.bf16.gmra.mxu0 %v1886_v56 }
  0xd6   :  { %v1375_v2 = vpop.f32.mrf.mxu1 }
  0xd8   :  { %v434_v3 = vpop.f32.mrf.mxu1 }
  0xda   :  { %v1376_v6 = vpop.f32.mrf.mxu1 }
  0xdc   :  { %v437_v9 = vpop.f32.mrf.mxu1 }
  0xde   :  { %v1993_v11 = vpop.f32.mrf.mxu1 }
  0xe0   :  { %v450_v13 = vpop.f32.mrf.mxu1 }
  0xe2   :  { %v1183_v4 = vpop.f32.mrf.mxu0  ;;  %v1995_v15 = vpop.f32.mrf.mxu1 }
  0xe4   :  { %v1184_v5 = vpop.f32.mrf.mxu0  ;;  %v1997_v18 = vpop.f32.mrf.mxu1 }
  0xe5   :  { %v1185_v31 = vadd.f32 %v1184_v5, %v1183_v4 }
  0xe6   :  { %v1186_v7 = vpop.f32.mrf.mxu0 }
  0xe7   :  { %v435_v41 = vadd.f32 %v1185_v31, %v434_v3 }
  0xe8   :  { %v1187_v8 = vpop.f32.mrf.mxu0 }
  0xe9   :  { %v1188_v42 = vadd.f32 %v1187_v8, %v1186_v7 }
  0xea   :  { %v1189_v10 = vpop.f32.mrf.mxu0 }
  0xeb   :  { %v438_v54 = vadd.f32 %v1188_v42, %v437_v9 }
  0xec   :  { %v1190_v12 = vpop.f32.mrf.mxu0 }
  0xed   :  { %v1191_v30 = vadd.f32 %v1190_v12, %v1189_v10 }
  0xee   :  { %v1192_v14 = vpop.f32.mrf.mxu0 }
  0xef   :  { %v443_v38 = vadd.f32 %v1375_v2, %v1191_v30 }
  0xf0   :  { %v1193_v16 = vpop.f32.mrf.mxu0 }
  0xf1   :  { %v1194_v39 = vadd.f32 %v1193_v16, %v1192_v14 }
  0xf2   :  { %v1195_v17 = vpop.f32.mrf.mxu0 }
  0xf3   :  { %v446_v51 = vadd.f32 %v1376_v6, %v1194_v39 }
  0xf4   :  { %v1196_v19 = vpop.f32.mrf.mxu0 }
  0xf5   :  { %v1197_v57 = vadd.f32 %v1196_v19, %v1195_v17 }
  0xf6   :  { %v1198_v20 = vpop.f32.mrf.mxu0  ;;  %v1232_v21 = vpop.f32.mrf.mxu1 }
  0xf7   :  { %v451_v2 = vadd.f32 %v1197_v57, %v450_v13 }
  0xf8   :  { %v1199_v22 = vpop.f32.mrf.mxu0  ;;  %v1233_v23 = vpop.f32.mrf.mxu1 }
  0xf9   :  { %v1234_v34 = vadd.f32 %v1233_v23, %v1232_v21  ;;  %v1200_v3 = vadd.f32 %v1199_v22, %v1198_v20 }
  0xfa   :  { %v1201_v24 = vpop.f32.mrf.mxu0  ;;  %v1235_v25 = vpop.f32.mrf.mxu1 }
  0xfb   :  { %v454_v14 = vadd.f32 %v1200_v3, %v1997_v18 }
  0xfc   :  { %v1202_v26 = vpop.f32.mrf.mxu0  ;;  %v1236_v27 = vpop.f32.mrf.mxu1 }
  0xfd   :  { %v1237_v45 = vadd.f32 %v1236_v27, %v1235_v25  ;;  %v1203_v8 = vadd.f32 %v1202_v26, %v1201_v24 }
  0xfe   :  { %v1204_v28 = vpop.f32.mrf.mxu0  ;;  %v1238_v29 = vpop.f32.mrf.mxu1 }
  0xff   :  { %v459_v19 = vadd.f32 %v1993_v11, %v1203_v8 }
 0x100   :  { %v1205_v32 = vpop.f32.mrf.mxu0  ;;  %v1239_v33 = vpop.f32.mrf.mxu1 }
 0x101   :  { %v1240_v35 = vadd.f32 %v1239_v33, %v1238_v29  ;;  %v1206_v20 = vadd.f32 %v1205_v32, %v1204_v28 }
 0x102   :  { %v1241_v36 = vpop.f32.mrf.mxu1  ;;  %v1393_v37 = vpop.f32.mrf.mxu0 }
 0x103   :  { %v771_v40 = vadd.f32 %v1393_v37, %v1240_v35  ;;  %v462_v26 = vadd.f32 %v1995_v15, %v1206_v20 }
 0x104   :  { %v1242_v43 = vpop.f32.mrf.mxu1  ;;  %v762_v44 = vpop.f32.mrf.mxu0 }
 0x105   :  { %v925_v46 = vsub.f32 %v443_v38, %v771_v40  ;;  %v1243_v47 = vadd.f32 %v1242_v43, %v1241_v36  ;;  %v763_v48 = vadd.f32 %v1234_v34, %v762_v44 }
 0x106   :  { %v1244_v49 = vpop.f32.mrf.mxu1  ;;  %v1394_v50 = vpop.f32.mrf.mxu0 }
 0x107   :  { %1063 = vst [vmem:[%s2060_s4 + $0x10] sm:$0xff] %v925_v46  ;;  %v923_v52 = vsub.f32 %v435_v41, %v763_v48  ;;  %v774_v53 = vadd.f32 %v1394_v50, %v1243_v47 }
 0x108   :  { %v1245_v55 = vpop.f32.mrf.mxu1  ;;  %v765_v56 = vpop.f32.mrf.mxu0 }
 0x109   :  { %1061 = vst [vmem:[%s2060_s4] sm:$0xff] %v923_v52  ;;  %v926_v58 = vsub.f32 %v446_v51, %v774_v53  ;;  %v1246_v59 = vadd.f32 %v1245_v55, %v1244_v49  ;;  %v766_v60 = vadd.f32 %v1237_v45, %v765_v56 }
 0x10a   :  { %v1247_v61 = vpop.f32.mrf.mxu1  ;;  %v1397_v62 = vpop.f32.mrf.mxu0 }
 0x10b   :  { %1064 = vst [vmem:[%s2060_s4 + $0x18] sm:$0xff] %v926_v58  ;;  %v924_v63 = vsub.f32 %v438_v54, %v766_v60 }
 0x10c   :  { %v1248_v0 = vpop.f32.mrf.mxu1  ;;  %v778_v1 = vpop.f32.mrf.mxu0 }
 0x10d   :  { %1062 = vst [vmem:[%s2060_s4 + $0x8] sm:$0xff] %v924_v63  ;;  %v1249_v4 = vadd.f32 %v1248_v0, %v1247_v61  ;;  %v779_v5 = vadd.f32 %v1246_v59, %v778_v1 }
 0x10e   :  { %v1250_v6 = vpop.f32.mrf.mxu1  ;;  %v1398_v7 = vpop.f32.mrf.mxu0 }
 0x10f   :  { %v927_v9 = vsub.f32 %v451_v2, %v779_v5 }
 0x110   :  { %v1251_v10 = vpop.f32.mrf.mxu1  ;;  %v781_v12 = vpop.f32.mrf.mxu0 }
 0x111   :  { %1065 = vst [vmem:[%s2060_s4 + $0x20] sm:$0xff] %v927_v9  ;;  %v1252_v13 = vadd.f32 %v1251_v10, %v1250_v6  ;;  %v782_v16 = vadd.f32 %v1249_v4, %v781_v12 }
 0x112   :  { %v1253_v17 = vpop.f32.mrf.mxu1 }
 0x113   :  { %v787_v21 = vadd.f32 %v1397_v62, %v1252_v13  ;;  %v928_v22 = vsub.f32 %v454_v14, %v782_v16 }
 0x114   :  { %v1254_v23 = vpop.f32.mrf.mxu1 }
 0x115   :  { %v929_v25 = vsub.f32 %v459_v19, %v787_v21  ;;  %1066 = vst [vmem:[%s2060_s4 + $0x28] sm:$0xff] %v928_v22  ;;  %v1255_v24 = vadd.f32 %v1254_v23, %v1253_v17 }
 0x116   :  { %v1281_v18 = vpop.f32.mrf.mxu1  ;;  %v1411_v28 = vpop.f32.mrf.mxu0 }
 0x117   :  { %1067 = vst [vmem:[%s2060_s4 + $0x30] sm:$0xff] %v929_v25  ;;  %v790_v27 = vadd.f32 %v1398_v7, %v1255_v24 }
 0x118   :  { %v1282_v29 = vpop.f32.mrf.mxu1  ;;  %v892_v32 = vpop.f32.mrf.mxu0 }
 0x119   :  { %v930_v11 = vsub.f32 %v462_v26, %v790_v27  ;;  %v1283_v50 = vadd.f32 %v1282_v29, %v1281_v18 }
 0x11a   :  { %v1284_v30 = vpop.f32.mrf.mxu1  ;;  %v1412_v35 = vpop.f32.mrf.mxu0 }
 0x11b   :  { %1068 = vst [vmem:[%s2060_s4 + $0x38] sm:$0xff] %v930_v11  ;;  %v893_v55 = vadd.f32 %v1283_v50, %v892_v32 }
 0x11c   :  { %v1285_v31 = vpop.f32.mrf.mxu1  ;;  %v895_v37 = vpop.f32.mrf.mxu0 }
 0x11d   :  { %v1286_v56 = vadd.f32 %v1285_v31, %v1284_v30 }
 0x11e   :  { %v1287_v33 = vpop.f32.mrf.mxu1  ;;  %v2026_v40 = vpop.f32.mrf.mxu0 }
 0x11f   :  { %v896_v62 = vadd.f32 %v1286_v56, %v895_v37 }
 0x120   :  { %v1288_v34 = vpop.f32.mrf.mxu1  ;;  %v908_v42 = vpop.f32.mrf.mxu0 }
 0x121   :  { %v1289_v63 = vadd.f32 %v1288_v34, %v1287_v33 }
 0x122   :  { %v1290_v36 = vpop.f32.mrf.mxu1  ;;  %v2028_v45 = vpop.f32.mrf.mxu0 }
 0x123   :  { %v901_v6 = vadd.f32 %v1411_v28, %v1289_v63 }
 0x124   :  { %v1291_v15 = vpop.f32.mrf.mxu1  ;;  %v911_v48 = vpop.f32.mrf.mxu0 }
 0x125   :  { %v1292_v7 = vadd.f32 %v1291_v15, %v1290_v36 }
 0x126   :  { %v1293_v38 = vpop.f32.mrf.mxu1 }
 0x127   :  { %v904_v16 = vadd.f32 %v1412_v35, %v1292_v7 }
 0x128   :  { %v1294_v39 = vpop.f32.mrf.mxu1 }
 0x129   :  { %v1295_v17 = vadd.f32 %v1294_v39, %v1293_v38 }
 0x12a   :  { %v1296_v41 = vpop.f32.mrf.mxu1 }
 0x12b   :  { %v909_v24 = vadd.f32 %v1295_v17, %v908_v42 }
 0x12c   :  { %v1297_v43 = vpop.f32.mrf.mxu1 }
 0x12d   :  { %v1298_v18 = vadd.f32 %v1297_v43, %v1296_v41 }
 0x12e   :  { %v1299_v44 = vpop.f32.mrf.mxu1 }
 0x12f   :  { %v912_v31 = vadd.f32 %v1298_v18, %v911_v48 }
 0x130   :  { %v1300_v46 = vpop.f32.mrf.mxu1 }
 0x131   :  { %v1301_v32 = vadd.f32 %v1300_v46, %v1299_v44 }
 0x132   :  { %v1302_v47 = vpop.f32.mrf.mxu1 }
 0x133   :  { %v917_v38 = vadd.f32 %v2026_v40, %v1301_v32 }
 0x134   :  { %v1303_v49 = vpop.f32.mrf.mxu1 }
 0x135   :  { %v1304_v39 = vadd.f32 %v1303_v49, %v1302_v47 }
 0x136   :  { %v1330_v51 = vpop.f32.mrf.mxu0  ;;  %v1429_v52 = vpop.f32.mrf.mxu1 }
 0x137   :  { %v920_v46 = vadd.f32 %v2028_v45, %v1304_v39 }
 0x138   :  { %v1331_v53 = vpop.f32.mrf.mxu0  ;;  %v1030_v54 = vpop.f32.mrf.mxu1 }
 0x139   :  { %v1332_v57 = vadd.f32 %v1331_v53, %v1330_v51 }
 0x13a   :  { %v1333_v58 = vpop.f32.mrf.mxu0  ;;  %v1430_v59 = vpop.f32.mrf.mxu1 }
 0x13b   :  { %v966_v60 = vadd.f32 %v1332_v57, %v893_v55 }
 0x13c   :  { %v1334_v61 = vpop.f32.mrf.mxu0  ;;  %v1033_v3 = vpop.f32.mrf.mxu1 }
 0x13d   :  { %v1335_v0 = vadd.f32 %v1334_v61, %v1333_v58  ;;  %v1031_v1 = vadd.f32 %v1030_v54, %v966_v60 }
 0x13e   :  { %v1336_v2 = vpop.f32.mrf.mxu0  ;;  %v1433_v12 = vpop.f32.mrf.mxu1 }
 0x13f   :  { %1069 = vst [vmem:[%s2061_s5] sm:$0xff] %v1031_v1  ;;  %v969_v4 = vadd.f32 %v1335_v0, %v896_v62 }
 0x140   :  { %v1337_v5 = vpop.f32.mrf.mxu0  ;;  %v1046_v22 = vpop.f32.mrf.mxu1 }
 0x141   :  { %v1338_v8 = vadd.f32 %v1337_v5, %v1336_v2  ;;  %v1034_v9 = vadd.f32 %v1033_v3, %v969_v4 }
 0x142   :  { %v1339_v10 = vpop.f32.mrf.mxu0  ;;  %v1434_v11 = vpop.f32.mrf.mxu1 }
 0x143   :  { %v974_v14 = vadd.f32 %v1338_v8, %v901_v6  ;;  %1070 = vst [vmem:[%s2061_s5 + $0x8] sm:$0xff] %v1034_v9 }
 0x144   :  { %v1340_v13 = vpop.f32.mrf.mxu0  ;;  %v1049_v36 = vpop.f32.mrf.mxu1 }
 0x145   :  { %v1039_v19 = vadd.f32 %v1429_v52, %v974_v14  ;;  %v1341_v20 = vadd.f32 %v1340_v13, %v1339_v10 }
 0x146   :  { %v1342_v21 = vpop.f32.mrf.mxu0 }
 0x147   :  { %1071 = vst [vmem:[%s2061_s5 + $0x10] sm:$0xff] %v1039_v19  ;;  %v977_v23 = vadd.f32 %v1341_v20, %v904_v16 }
 0x148   :  { %v1343_v25 = vpop.f32.mrf.mxu0 }
 0x149   :  { %v1042_v26 = vadd.f32 %v1430_v59, %v977_v23  ;;  %v1344_v27 = vadd.f32 %v1343_v25, %v1342_v21 }
 0x14a   :  { %v1345_v29 = vpop.f32.mrf.mxu0 }
 0x14b   :  { %1072 = vst [vmem:[%s2061_s5 + $0x18] sm:$0xff] %v1042_v26  ;;  %v982_v28 = vadd.f32 %v1344_v27, %v909_v24 }
 0x14c   :  { %v1346_v30 = vpop.f32.mrf.mxu0 }
 0x14d   :  { %v1347_v33 = vadd.f32 %v1346_v30, %v1345_v29  ;;  %v1047_v34 = vadd.f32 %v1046_v22, %v982_v28 }
 0x14e   :  { %v1348_v35 = vpop.f32.mrf.mxu0 }
 0x14f   :  { %1073 = vst [vmem:[%s2061_s5 + $0x20] sm:$0xff] %v1047_v34  ;;  %v985_v15 = vadd.f32 %v1347_v33, %v912_v31 }
 0x150   :  { %v1349_v37 = vpop.f32.mrf.mxu0 }
 0x151   :  { %v1350_v41 = vadd.f32 %v1349_v37, %v1348_v35  ;;  %v1050_v42 = vadd.f32 %v1049_v36, %v985_v15 }
 0x152   :  { %v1351_v43 = vpop.f32.mrf.mxu0 }
 0x153   :  { %v990_v50 = vadd.f32 %v1350_v41, %v917_v38  ;;  %1074 = vst [vmem:[%s2061_s5 + $0x28] sm:$0xff] %v1050_v42 }
 0x154   :  { %v1352_v44 = vpop.f32.mrf.mxu0 }
 0x155   :  { %v1055_v48 = vadd.f32 %v1433_v12, %v990_v50  ;;  %v1353_v51 = vadd.f32 %v1352_v44, %v1351_v43 }
 0x157   :  { %1075 = vst [vmem:[%s2061_s5 + $0x30] sm:$0xff] %v1055_v48  ;;  %v993_v52 = vadd.f32 %v1353_v51, %v920_v46 }
 0x159   :  { %v1058_v40 = vadd.f32 %v1434_v11, %v993_v52 }
 0x15b   :  { %1076 = vst [vmem:[%s2061_s5 + $0x38] sm:$0xff] %v1058_v40 }

// kernel: forward.24
= control target key start
LH: loop header
LB: loop body
LE: loop exit
PB: predicated region body
PF: predicated region fallthrough
CT: control target
= control target key end

     0   :  { %v2775_v34 = vmov 0   ;;  %vm522_vm0 = vcmask 261120   ;;  %s2769_s2 = inlined_call_operand.vmem [shape: bf16[672,128], index: 2, kind: input, shape index: {}]   ;;  %s2770_s0 = inlined_call_operand.vmem [shape: bf16[32,672], index: 0, kind: input, shape index: {}]   ;;  %s2771_s3 = inlined_call_operand.vmem [shape: bf16[672,128], index: 3, kind: input, shape index: {}]   ;;  %s2772_s1 = inlined_call_operand.vmem [shape: bf16[32,672], index: 1, kind: input, shape index: {}]   ;;  %s2773_s4 = inlined_call_operand.vmem [shape: f32[32,128], index: 4, kind: output, shape index: {0}]   ;;  %s2774_s5 = inlined_call_operand.vmem [shape: f32[32,128], index: 5, kind: output, shape index: {1}]  }
   0x1   :  { %v1948_v0 = vld [vmem:[%s2769_s2 + $0x78] sm:$0xff]   ;;  %v1971_v4 = vld [vmem:[%s2769_s2 + $0x70] sm:$0xff]   ;;  %v1995_v8 = vld [vmem:[%s2769_s2 + $0x68] sm:$0xff]  }
   0x2   :  { %v1953_v1 = vld [vmem:[%s2769_s2 + $0xf8] sm:$0xff]   ;;  %1569 = vmatprep.subr.bf16.mxu0 %v1948_v0  ;;  %v1977_v5 = vld [vmem:[%s2769_s2 + $0xf0] sm:$0xff]   ;;  %v2001_v9 = vld [vmem:[%s2769_s2 + $0xe8] sm:$0xff]  }
   0x3   :  { %v1959_v2 = vld [vmem:[%s2769_s2 + $0x38] sm:$0xff]   ;;  %1597 = vmatprep.subr.bf16.mxu1 %v1953_v1  ;;  %v1983_v6 = vld [vmem:[%s2769_s2 + $0x30] sm:$0xff]   ;;  %v2007_v10 = vld [vmem:[%s2769_s2 + $0x28] sm:$0xff]  }
   0x4   :  { %v1965_v3 = vld [vmem:[%s2769_s2 + $0xb8] sm:$0xff]   ;;  %1570 = vmatpush3.bf16.msra.mxu0 %v1959_v2  ;;  %v1989_v7 = vld [vmem:[%s2769_s2 + $0xb0] sm:$0xff]   ;;  %v2013_v11 = vld [vmem:[%s2769_s2 + $0xa8] sm:$0xff]  }
   0x5   :  { %1598 = vmatpush3.bf16.msra.mxu1 %v1965_v3  ;;  %1571 = vmatprep.subr.bf16.mxu0 %v1971_v4  ;;  %v2019_v12 = vld [vmem:[%s2769_s2 + $0x60] sm:$0xff]   ;;  %v2043_v16 = vld [vmem:[%s2769_s2 + $0x58] sm:$0xff]   ;;  %v2067_v20 = vld [vmem:[%s2769_s2 + $0x50] sm:$0xff]  }
   0x6   :  { %1599 = vmatprep.subr.bf16.mxu1 %v1977_v5  ;;  %v2025_v13 = vld [vmem:[%s2769_s2 + $0xe0] sm:$0xff]   ;;  %v2049_v17 = vld [vmem:[%s2769_s2 + $0xd8] sm:$0xff]   ;;  %v2073_v21 = vld [vmem:[%s2769_s2 + $0xd0] sm:$0xff]  }
   0x7   :  { %v2031_v14 = vld [vmem:[%s2769_s2 + $0x20] sm:$0xff]   ;;  %v2055_v18 = vld [vmem:[%s2769_s2 + $0x18] sm:$0xff]   ;;  %v2079_v22 = vld [vmem:[%s2769_s2 + $0x10] sm:$0xff]  }
   0x8   :  { %1572 = vmatpush3.bf16.msra.mxu0 %v1983_v6  ;;  %v2037_v15 = vld [vmem:[%s2769_s2 + $0xa0] sm:$0xff]   ;;  %v2061_v19 = vld [vmem:[%s2769_s2 + $0x98] sm:$0xff]   ;;  %v2085_v23 = vld [vmem:[%s2769_s2 + $0x90] sm:$0xff]  }
   0x9   :  { %1600 = vmatpush3.bf16.msra.mxu1 %v1989_v7  ;;  %1573 = vmatprep.subr.bf16.mxu0 %v1995_v8  ;;  %v2091_v24 = vld [vmem:[%s2769_s2 + $0x48] sm:$0xff]   ;;  %v2115_v28 = vld [vmem:[%s2769_s2 + $0x40] sm:$0xff]   ;;  %v2162_v37 = vld [vmem:[%s2771_s3 + $0x78] sm:$0xff]  }
   0xa   :  { %1601 = vmatprep.subr.bf16.mxu1 %v2001_v9  ;;  %v2097_v25 = vld [vmem:[%s2769_s2 + $0xc8] sm:$0xff]   ;;  %v2121_v29 = vld [vmem:[%s2769_s2 + $0xc0] sm:$0xff]   ;;  %v2169_v38 = vld [vmem:[%s2769_s2 + $0x138] sm:$0xff]  }
   0xb   :  { %v2103_v26 = vld [vmem:[%s2769_s2 + $0x8] sm:$0xff]   ;;  %v2127_v30 = vld [vmem:[%s2769_s2] sm:$0xff]   ;;  %v2176_v39 = vld [vmem:[%s2771_s3 + $0x38] sm:$0xff]  }
   0xc   :  { %1574 = vmatpush3.bf16.msra.mxu0 %v2007_v10  ;;  %v2109_v27 = vld [vmem:[%s2769_s2 + $0x88] sm:$0xff]   ;;  %v2133_v31 = vld [vmem:[%s2769_s2 + $0x80] sm:$0xff]   ;;  %v2182_v40 = vld [vmem:[%s2771_s3 + $0x70] sm:$0xff]  }
   0xd   :  { %1602 = vmatpush3.bf16.msra.mxu1 %v2013_v11  ;;  %1575 = vmatprep.subr.bf16.mxu0 %v2019_v12  ;;  %v2139_v32 = vld [vmem:[%s2770_s0] ss:$24 sps:$4 sm:$0xff]   ;;  %v2145_v33 = vld [vmem:[%s2770_s0 + $0x4] ss:$24 sps:$4 sm:$0xff]   ;;  %v2189_v41 = vld [vmem:[%s2769_s2 + $0x130] sm:$0xff]  }
   0xe   :  { %1603 = vmatprep.subr.bf16.mxu1 %v2025_v13  ;;  %2817 = vst [vmem:[#allocation2_spill] sm:$0xff] %v2139_v32  ;;  %v2151_v35 = vld [vmem:[%s2770_s0 + $0x8] ss:$24 sps:$4 sm:$0xff]   ;;  %v2156_v36 = vld [vmem:[%s2770_s0 + $0xc] ss:$24 sps:$4 sm:$0xff]   ;;  %561 = vmatprep.mubr.bf16.mxu0 %v2145_v33  ;;  %v2195_v42 = vld [vmem:[%s2771_s3 + $0x30] sm:$0xff]  }
   0xf   :  { %2818 = vst [vmem:[#allocation3_spill] sm:$0xff] %v2151_v35  ;;  %2819 = vst [vmem:[#allocation4_spill] sm:$0xff] %v2156_v36  ;;  %610 = vmatprep.mubr.bf16.mxu1 %v2156_v36  ;;  %v2200_v43 = vld [vmem:[%s2771_s3 + $0x68] sm:$0xff]   ;;  %v2219_v46 = vld [vmem:[%s2771_s3 + $0x60] sm:$0xff]  }
  0x10   :  { %1576 = vmatpush3.bf16.msra.mxu0 %v2031_v14  ;;  %v2206_v44 = vld [vmem:[%s2769_s2 + $0x128] sm:$0xff]   ;;  %v2225_v47 = vld [vmem:[%s2769_s2 + $0x120] sm:$0xff]   ;;  %v2238_v49 = vld [vmem:[%s2771_s3 + $0x58] sm:$0xff]  }
  0x11   :  { %1604 = vmatpush3.bf16.msra.mxu1 %v2037_v15  ;;  %1577 = vmatprep.subr.bf16.mxu0 %v2043_v16  ;;  %v2213_v45 = vld [vmem:[%s2771_s3 + $0x28] sm:$0xff]   ;;  %v2232_v48 = vld [vmem:[%s2771_s3 + $0x20] sm:$0xff]   ;;  %v2243_v50 = vld [vmem:[%s2769_s2 + $0x118] sm:$0xff]  }
  0x12   :  { %1605 = vmatprep.subr.bf16.mxu1 %v2049_v17  ;;  %v2249_v51 = vld [vmem:[%s2771_s3 + $0x18] sm:$0xff]   ;;  %v2256_v52 = vld [vmem:[%s2771_s3 + $0x50] sm:$0xff]   ;;  %v2285_v57 = vld [vmem:[%s2771_s3 + $0x48] sm:$0xff]  }
  0x13   :  { %2820 = vst [vmem:[#allocation5_spill] sm:$0xff] %v2256_v52  ;;  %v2262_v53 = vld [vmem:[%s2769_s2 + $0x110] sm:$0xff]   ;;  %2824 = vst [vmem:[#allocation9_spill] sm:$0xff] %v2285_v57  ;;  %v2292_v58 = vld [vmem:[%s2769_s2 + $0x108] sm:$0xff]  }
  0x14   :  { %1578 = vmatpush3.bf16.msra.mxu0 %v2055_v18  ;;  %v2267_v54 = vld [vmem:[%s2770_s0 + $0x3c] ss:$24 sps:$4 sm:$0xff]   ;;  %v2278_v56 = vld [vmem:[%s2770_s0 + $0x38] ss:$24 sps:$4 sm:$0xff]   ;;  %v2311_v61 = vld [vmem:[%s2771_s3 + $0x8] sm:$0xff]  }
  0x15   :  { %1606 = vmatpush3.bf16.msra.mxu1 %v2061_v19  ;;  %1579 = vmatprep.subr.bf16.mxu0 %v2067_v20  ;;  %2821 = vst [vmem:[#allocation6_spill] sm:$0xff] %v2267_v54  ;;  %v2273_v55 = vld [vmem:[%s2771_s3 + $0x10] sm:$0xff]   ;;  %2823 = vst [vmem:[#allocation8_spill] sm:$0xff] %v2278_v56  ;;  %v2318_v62 = vld [vmem:[%s2771_s3 + $0x40] sm:$0xff]  }
  0x16   :  { %1607 = vmatprep.subr.bf16.mxu1 %v2073_v21  ;;  %2822 = vst [vmem:[#allocation7_spill] sm:$0xff] %v2273_v55  ;;  %v2298_v59 = vld [vmem:[%s2770_s0 + $0x34] ss:$24 sps:$4 sm:$0xff]   ;;  %v2304_v60 = vld [vmem:[%s2770_s0 + $0x30] ss:$24 sps:$4 sm:$0xff]   ;;  %2827 = vst [vmem:[#allocation12_spill] sm:$0xff] %v2311_v61 }
  0x17   :  { %2825 = vst [vmem:[#allocation10_spill] sm:$0xff] %v2298_v59  ;;  %2826 = vst [vmem:[#allocation11_spill] sm:$0xff] %v2304_v60  ;;  %v2325_v63 = vld [vmem:[%s2769_s2 + $0x100] sm:$0xff]   ;;  %v2355_v36 = vld [vmem:[%s2769_s2 + $0x148] sm:$0xff]  }
  0x18   :  { %1580 = vmatpush3.bf16.msra.mxu0 %v2079_v22  ;;  %2828 = vst [vmem:[#allocation13_spill] sm:$0xff] %v2318_v62 }
  0x19   :  { %1608 = vmatpush3.bf16.msra.mxu1 %v2085_v23  ;;  %1581 = vmatprep.subr.bf16.mxu0 %v2091_v24 }
  0x1a   :  { %1609 = vmatprep.subr.bf16.mxu1 %v2097_v25 }
  0x1c   :  { %1582 = vmatpush3.bf16.msra.mxu0 %v2103_v26 }
  0x1d   :  { %1610 = vmatpush3.bf16.msra.mxu1 %v2109_v27  ;;  %1583 = vmatprep.subr.bf16.mxu0 %v2115_v28 }
  0x1e   :  { %1611 = vmatprep.subr.bf16.mxu1 %v2121_v29 }
  0x20   :  { %1584 = vmatpush3.bf16.msra.mxu0 %v2127_v30 }
  0x21   :  { %1612 = vmatpush3.bf16.msra.mxu1 %v2133_v31  ;;  %627 = vmatprep.subr.bf16.mxu0 %v2775_v34 }
  0x22   :  { %1625 = vmatprep.subr.bf16.mxu1 %v2162_v37 }
  0x23   :  { %562 = vmatmul.mubr.bf16.vlgmr.msra.gmra.mxu0 %v2139_v32  ;;  %v2368_v32 = vld [vmem:[%s2771_s3 + $0xf0] sm:$0xff]  }
  0x24   :  { %611 = vmatmul.mubr.bf16.vlgmr.msra.gmra.mxu1 %v2151_v35  ;;  %628 = vmatpush1.bf16.msra.mxu0 %v2169_v38  ;;  %v2344_v35 = vld [vmem:[%s2771_s3 + $0xf8] sm:$0xff]   ;;  %2833 = vst [vmem:[#allocation17_spill] sm:$0xff] %v2368_v32 }
  0x25   :  { %1626 = vmatpush3.bf16.msra.mxu1 %v2176_v39  ;;  %629 = vmatprep.subr.bf16.mxu0 %v2775_v34  ;;  %2831 = vst [vmem:[#allocation15_spill] sm:$0xff] %v2344_v35 }
  0x26   :  { %1627 = vmatprep.subr.bf16.mxu1 %v2182_v40  ;;  %618 = vmatprep.mubr.bf16.mxu1 %v2267_v54  ;;  %v2337_v54 = vld [vmem:[%s2771_s3] sm:$0xff]  }
  0x27   :  { %569 = vmatprep.mubr.bf16.mxu0 %v2298_v59  ;;  %2830 = vst [vmem:[#allocation14_spill] sm:$0xff] %v2337_v54  ;;  %v2362_v59 = vld [vmem:[%s2771_s3 + $0xb8] sm:$0xff]  }
  0x28   :  { %630 = vmatpush1.bf16.msra.mxu0 %v2189_v41  ;;  %2832 = vst [vmem:[#allocation16_spill] sm:$0xff] %v2362_v59 }
  0x29   :  { %1628 = vmatpush3.bf16.msra.mxu1 %v2195_v42  ;;  %631 = vmatprep.subr.bf16.mxu0 %v2775_v34 }
  0x2a   :  { %1629 = vmatprep.subr.bf16.mxu1 %v2200_v43 }
  0x2b   :  { %570 = vmatmul.mubr.bf16.gmra.mxu0 %v2304_v60  ;;  %v2349_v60 = vld [vmem:[%s2772_s1] ss:$24 sps:$4 sm:$0xff]  }
  0x2c   :  { %632 = vmatpush1.bf16.msra.mxu0 %v2206_v44  ;;  %619 = vmatmul.mubr.bf16.gmra.mxu1 %v2278_v56  ;;  %v2829_v56 = vmov 0  }
  0x2d   :  { %1630 = vmatpush3.bf16.msra.mxu1 %v2213_v45  ;;  %633 = vmatprep.subr.bf16.mxu0 %v2775_v34 }
  0x2e   :  { %1631 = vmatprep.subr.bf16.mxu1 %v2219_v46 }
  0x30   :  { %634 = vmatpush1.bf16.msra.mxu0 %v2225_v47 }
  0x31   :  { %1632 = vmatpush3.bf16.msra.mxu1 %v2232_v48  ;;  %635 = vmatprep.subr.bf16.mxu0 %v2775_v34 }
  0x32   :  { %1633 = vmatprep.subr.bf16.mxu1 %v2238_v49 }
  0x34   :  { %636 = vmatpush1.bf16.msra.mxu0 %v2243_v50 }
  0x35   :  { %1634 = vmatpush3.bf16.msra.mxu1 %v2249_v51  ;;  %637 = vmatprep.subr.bf16.mxu0 %v2775_v34 }
  0x36   :  { %1635 = vmatprep.subr.bf16.mxu1 %v2256_v52  ;;  %v2554_v52 = vld [vmem:[%s2772_s1 + $0x14] ss:$24 sps:$4 sm:$0xff]  }
  0x38   :  { %638 = vmatpush1.bf16.msra.mxu0 %v2262_v53 }
  0x39   :  { %1636 = vmatpush3.bf16.msra.mxu1 %v2273_v55  ;;  %639 = vmatprep.subr.bf16.mxu0 %v2775_v34  ;;  %v2330_v34 = vld [vmem:[%s2772_s1 + $0x4] ss:$24 sps:$4 sm:$0xff]  }
  0x3a   :  { %1637 = vmatprep.subr.bf16.mxu1 %v2285_v57  ;;  %1024 = vmatprep.mubr.bf16.mxu1 %v2330_v34  ;;  %v2400_v57 = vld [vmem:[%s2771_s3 + $0xe8] sm:$0xff]   ;;  %v2411_v55 = vld [vmem:[%s2771_s3 + $0x138] sm:$0xff]  }
  0x3b   :  { %2838 = vst [vmem:[#allocation22_spill] sm:$0xff] %v2400_v57  ;;  %2840 = vst [vmem:[#allocation24_spill] sm:$0xff] %v2411_v55 }
  0x3c   :  { %640 = vmatpush1.bf16.msra.mxu0 %v2292_v58 }
  0x3d   :  { %1638 = vmatpush3.bf16.msra.mxu1 %v2311_v61  ;;  %641 = vmatprep.subr.bf16.mxu0 %v2829_v56  ;;  %v2385_v61 = vld [vmem:[%s2771_s3 + $0xb0] sm:$0xff]  }
  0x3e   :  { %1639 = vmatprep.subr.bf16.mxu1 %v2318_v62  ;;  %v2373_v62 = vld [vmem:[%s2769_s2 + $0x140] sm:$0xff]   ;;  %2836 = vst [vmem:[#allocation20_spill] sm:$0xff] %v2385_v61 }
  0x3f   :  { %2834 = vst [vmem:[#allocation18_spill] sm:$0xff] %v2373_v62 }
  0x40   :  { %642 = vmatpush1.bf16.msra.mxu0 %v2325_v63 }
  0x41   :  { %1640 = vmatpush3.bf16.msra.mxu1 %v2337_v54  ;;  %655 = vmatprep.subr.bf16.mxu0 %v2829_v56  ;;  %v2378_v54 = vld [vmem:[%s2770_s0 + $0x14] ss:$24 sps:$4 sm:$0xff]  }
  0x42   :  { %1653 = vmatprep.subr.bf16.mxu1 %v2344_v35  ;;  %2835 = vst [vmem:[#allocation19_spill] sm:$0xff] %v2378_v54  ;;  %v2392_v35 = vld [vmem:[%s2770_s0 + $0x10] ss:$24 sps:$4 sm:$0xff]   ;;  %1507 = vmatprep.mubr.msk.bf16.mxu0 %vm522_vm0, %v2378_v54  ;;  %v2418_v54 = vld [vmem:[%s2771_s3 + $0xe0] sm:$0xff]  }
  0x43   :  { %2837 = vst [vmem:[#allocation21_spill] sm:$0xff] %v2392_v35  ;;  %2841 = vst [vmem:[#allocation25_spill] sm:$0xff] %v2418_v54 }
  0x44   :  { %656 = vmatpush2.bf16.msra.mxu0 %v2355_v36  ;;  %1025 = vmatmul.mubr.bf16.vlgmr.msra.gmra.mxu1 %v2349_v60 }
  0x45   :  { %1654 = vmatpush3.bf16.msra.mxu1 %v2362_v59  ;;  %657 = vmatprep.subr.bf16.mxu0 %v2829_v56  ;;  %v2405_v59 = vld [vmem:[%s2771_s3 + $0xa8] sm:$0xff]  }
  0x46   :  { %1655 = vmatprep.subr.bf16.mxu1 %v2368_v32  ;;  %2839 = vst [vmem:[#allocation23_spill] sm:$0xff] %v2405_v59  ;;  %v2424_v32 = vld [vmem:[%s2770_s0 + $0x44] ss:$24 sps:$4 sm:$0xff]  }
  0x47   :  { %2842 = vst [vmem:[#allocation26_spill] sm:$0xff] %v2424_v32 }
  0x48   :  { %658 = vmatpush2.bf16.msra.mxu0 %v2373_v62  ;;  %v2436_v62 = vld [vmem:[%s2771_s3 + $0x130] sm:$0xff]  }
  0x49   :  { %1656 = vmatpush3.bf16.msra.mxu1 %v2385_v61  ;;  %1090 = vmatprep.subr.bf16.mxu0 %v2829_v56  ;;  %v2430_v61 = vld [vmem:[%s2771_s3 + $0xa0] sm:$0xff]   ;;  %2844 = vst [vmem:[#allocation28_spill] sm:$0xff] %v2436_v62 }
  0x4a   :  { %1657 = vmatprep.subr.bf16.mxu1 %v2400_v57  ;;  %2843 = vst [vmem:[#allocation27_spill] sm:$0xff] %v2430_v61  ;;  %v2480_v57 = vld [vmem:[%s2772_s1 + $0x30] ss:$24 sps:$4 sm:$0xff]  }
  0x4b   :  { %660 = vmatmul.mubr.bf16.vlgmr.msra.gmra.mxu0 %v2392_v35  ;;  %v2445_v35 = vld [vmem:[%s2770_s0 + $0x40] ss:$24 sps:$4 sm:$0xff]  }
  0x4c   :  { %1091 = vmatpush1.bf16.msra.mxu0 %v2411_v55  ;;  %1508 = vmatprep.mubr.msk.bf16.mxu0 %vm522_vm0, %v2424_v32  ;;  %2845 = vst [vmem:[#allocation29_spill] sm:$0xff] %v2445_v35  ;;  %v2451_v55 = vld [vmem:[%s2771_s3 + $0xd8] sm:$0xff]  }
  0x4d   :  { %1658 = vmatpush3.bf16.msra.mxu1 %v2405_v59  ;;  %1092 = vmatprep.subr.bf16.mxu0 %v2829_v56  ;;  %2846 = vst [vmem:[#allocation30_spill] sm:$0xff] %v2451_v55  ;;  %v2456_v32 = vld [vmem:[%s2771_s3 + $0x98] sm:$0xff]   ;;  %v2462_v59 = vld [vmem:[%s2771_s3 + $0x128] sm:$0xff]  }
  0x4e   :  { %1659 = vmatprep.subr.bf16.mxu1 %v2418_v54  ;;  %2847 = vst [vmem:[#allocation31_spill] sm:$0xff] %v2456_v32  ;;  %2848 = vst [vmem:[#allocation32_spill] sm:$0xff] %v2462_v59  ;;  %v2469_v54 = vld [vmem:[%s2771_s3 + $0xd0] sm:$0xff]  }
  0x4f   :  { %2849 = vst [vmem:[#allocation33_spill] sm:$0xff] %v2469_v54 }
  0x50   :  { %1093 = vmatpush1.bf16.msra.mxu0 %v2436_v62  ;;  %v2475_v62 = vld [vmem:[%s2772_s1 + $0x34] ss:$24 sps:$4 sm:$0xff]  }
  0x51   :  { %1660 = vmatpush3.bf16.msra.mxu1 %v2430_v61  ;;  %1094 = vmatprep.subr.bf16.mxu0 %v2829_v56  ;;  %v2487_v61 = vld [vmem:[%s2771_s3 + $0x120] sm:$0xff]  }
  0x52   :  { %1661 = vmatprep.subr.bf16.mxu1 %v2451_v55  ;;  %2850 = vst [vmem:[#allocation34_spill] sm:$0xff] %v2487_v61  ;;  %1032 = vmatprep.mubr.bf16.mxu1 %v2475_v62  ;;  %v2495_v55 = vld [vmem:[%s2771_s3 + $0x90] sm:$0xff]  }
  0x53   :  { %668 = vmatmul.mubr.bf16.gmra.mxu0 %v2445_v35  ;;  %2851 = vst [vmem:[#allocation35_spill] sm:$0xff] %v2495_v55  ;;  %1033 = vmatmul.mubr.bf16.gmra.mxu1 %v2480_v57  ;;  %v2502_v35 = vld [vmem:[%s2771_s3 + $0xc8] sm:$0xff]  }
  0x54   :  { %1095 = vmatpush1.bf16.msra.mxu0 %v2462_v59  ;;  %2852 = vst [vmem:[#allocation36_spill] sm:$0xff] %v2502_v35  ;;  %v1900_v59 = vld [vmem:[%s2772_s1 + $0xc] ss:$24 sps:$4 sm:$0xff]   ;;  %1563 = vmatprep.mubr.msk.bf16.mxu0 %vm522_vm0, %v2554_v52 }
  0x55   :  { %1662 = vmatpush3.bf16.msra.mxu1 %v2456_v32  ;;  %1096 = vmatprep.subr.bf16.mxu0 %v2829_v56  ;;  %v2508_v32 = vld [vmem:[%s2771_s3 + $0x118] sm:$0xff]  }
  0x56   :  { %1663 = vmatprep.subr.bf16.mxu1 %v2469_v54  ;;  %2853 = vst [vmem:[#allocation37_spill] sm:$0xff] %v2508_v32  ;;  %v2515_v54 = vld [vmem:[%s2771_s3 + $0x88] sm:$0xff]   ;;  %1073 = vmatprep.mubr.bf16.mxu1 %v1900_v59 }
  0x57   :  { %2854 = vst [vmem:[#allocation38_spill] sm:$0xff] %v2515_v54 }
  0x58   :  { %1097 = vmatpush1.bf16.msra.mxu0 %v2487_v61  ;;  %v2524_v61 = vld [vmem:[%s2771_s3 + $0xc0] sm:$0xff]  }
  0x59   :  { %1664 = vmatpush3.bf16.msra.mxu1 %v2495_v55  ;;  %1098 = vmatprep.subr.bf16.mxu0 %v2829_v56  ;;  %v2530_v55 = vld [vmem:[%s2771_s3 + $0x110] sm:$0xff]  }
  0x5a   :  { %1665 = vmatprep.subr.bf16.mxu1 %v2502_v35  ;;  %2855 = vst [vmem:[#allocation39_spill] sm:$0xff] %v2530_v55  ;;  %v2537_v35 = vld [vmem:[%s2771_s3 + $0x80] sm:$0xff]  }
  0x5b   :  { %2856 = vst [vmem:[#allocation40_spill] sm:$0xff] %v2537_v35 }
  0x5c   :  { %1099 = vmatpush1.bf16.msra.mxu0 %v2508_v32  ;;  %v2543_v32 = vld [vmem:[%s2772_s1 + $0x8] ss:$24 sps:$4 sm:$0xff]  }
  0x5d   :  { %1666 = vmatpush3.bf16.msra.mxu1 %v2515_v54  ;;  %1100 = vmatprep.subr.bf16.mxu0 %v2829_v56  ;;  %v2549_v54 = vld [vmem:[%s2771_s3 + $0x108] sm:$0xff]  }
  0x5e   :  { %1667 = vmatprep.subr.bf16.mxu1 %v2524_v61  ;;  %2857 = vst [vmem:[#allocation41_spill] sm:$0xff] %v2549_v54 }
  0x60   :  { %1101 = vmatpush1.bf16.msra.mxu0 %v2530_v55  ;;  %v2562_v55 = vld [vmem:[%s2772_s1 + $0x3c] ss:$24 sps:$4 sm:$0xff]  }
  0x61   :  { %1668 = vmatpush3.bf16.msra.mxu1 %v2537_v35  ;;  %1102 = vmatprep.subr.bf16.mxu0 %v2829_v56  ;;  %v2571_v35 = vld [vmem:[%s2771_s3 + $0x100] sm:$0xff]  }
  0x62   :  { %1681 = vmatprep.subr.bf16.mxu1 %v1948_v0  ;;  %v2581_v0 = vld [vmem:[%s2772_s1 + $0x38] ss:$24 sps:$4 sm:$0xff]  }
  0x64   :  { %1074 = vmatmul.mubr.bf16.vlgmr.msra.gmra.mxu1 %v2543_v32  ;;  %1103 = vmatpush1.bf16.msra.mxu0 %v2549_v54  ;;  %v2586_v54 = vld [vmem:[%s2771_s3 + $0x148] sm:$0xff]  }
  0x65   :  { %1682 = vmatpush3.bf16.msra.mxu1 %v1959_v2  ;;  %1104 = vmatprep.subr.bf16.mxu0 %v2829_v56  ;;  %v2596_v2 = vld [vmem:[%s2771_s3 + $0x140] sm:$0xff]  }
  0x66   :  { %1683 = vmatprep.subr.bf16.mxu1 %v1971_v4  ;;  %1081 = vmatprep.mubr.bf16.mxu1 %v2562_v55  ;;  %v2605_v4 = vld [vmem:[%s2772_s1 + $0x10] ss:$24 sps:$4 sm:$0xff]  }
  0x68   :  { %1105 = vmatpush1.bf16.msra.mxu0 %v2571_v35 }
  0x69   :  { %1684 = vmatpush3.bf16.msra.mxu1 %v1983_v6  ;;  %1118 = vmatprep.subr.bf16.mxu0 %v2829_v56  ;;  %v2611_v6 = vld [vmem:[%s2772_s1 + $0x44] ss:$24 sps:$4 sm:$0xff]  }
  0x6a   :  { %1685 = vmatprep.subr.bf16.mxu1 %v1995_v8  ;;  %v2626_v8 = vld [vmem:[%s2772_s1 + $0x40] ss:$24 sps:$4 sm:$0xff]  }
  0x6c   :  { %1082 = vmatmul.mubr.bf16.gmra.mxu1 %v2581_v0  ;;  %1119 = vmatpush2.bf16.msra.mxu0 %v2586_v54 }
  0x6d   :  { %1686 = vmatpush3.bf16.msra.mxu1 %v2007_v10  ;;  %1120 = vmatprep.subr.bf16.mxu0 %v2829_v56  ;;  %v2863_v10 = vld [vmem:[#allocation12_spill] sm:$0xff] }
  0x6e   :  { %1687 = vmatprep.subr.bf16.mxu1 %v2019_v12  ;;  %1171 = vmatprep.mubr.bf16.mxu1 %v2330_v34  ;;  %v2865_v12 = vld [vmem:[#allocation13_spill] sm:$0xff] }
  0x6f   :  { %v2887_v34 = vld [vmem:[#allocation37_spill] sm:$0xff] }
  0x70   :  { %1121 = vmatpush2.bf16.msra.mxu0 %v2596_v2 }
  0x71   :  { %1688 = vmatpush3.bf16.msra.mxu1 %v2031_v14  ;;  %1709 = vmatprep.subr.bf16.mxu0 %v1953_v1  ;;  %v2858_v1 = vld [vmem:[#allocation5_spill] sm:$0xff]  ;;  %v2867_v14 = vld [vmem:[#allocation14_spill] sm:$0xff] }
  0x72   :  { %1689 = vmatprep.subr.bf16.mxu1 %v2043_v16  ;;  %v2869_v16 = vld [vmem:[#allocation22_spill] sm:$0xff] }
  0x73   :  { %1123 = vmatmul.mubr.bf16.vlgmr.msra.gmra.mxu0 %v2605_v4 }
  0x74   :  { %1710 = vmatpush3.bf16.msra.mxu0 %v1965_v3  ;;  %1564 = vmatprep.mubr.msk.bf16.mxu0 %vm522_vm0, %v2611_v6  ;;  %v2859_v3 = vld [vmem:[#allocation7_spill] sm:$0xff] }
  0x75   :  { %1690 = vmatpush3.bf16.msra.mxu1 %v2055_v18  ;;  %1711 = vmatprep.subr.bf16.mxu0 %v1977_v5  ;;  %v2860_v5 = vld [vmem:[#allocation18_spill] sm:$0xff]  ;;  %v2871_v18 = vld [vmem:[#allocation24_spill] sm:$0xff] }
  0x76   :  { %1691 = vmatprep.subr.bf16.mxu1 %v2067_v20  ;;  %v2873_v20 = vld [vmem:[#allocation25_spill] sm:$0xff] }
  0x78   :  { %1712 = vmatpush3.bf16.msra.mxu0 %v1989_v7  ;;  %v2861_v7 = vld [vmem:[#allocation9_spill] sm:$0xff] }
  0x79   :  { %1692 = vmatpush3.bf16.msra.mxu1 %v2079_v22  ;;  %1713 = vmatprep.subr.bf16.mxu0 %v2001_v9  ;;  %v2862_v9 = vld [vmem:[#allocation15_spill] sm:$0xff]  ;;  %v2875_v22 = vld [vmem:[#allocation4_spill] sm:$0xff] }
  0x7a   :  { %1693 = vmatprep.subr.bf16.mxu1 %v2091_v24  ;;  %v2877_v24 = vld [vmem:[#allocation27_spill] sm:$0xff] }
  0x7b   :  { %1131 = vmatmul.mubr.bf16.gmra.mxu0 %v2626_v8 }
  0x7c   :  { %1714 = vmatpush3.bf16.msra.mxu0 %v2013_v11  ;;  %1220 = vmatprep.mubr.bf16.mxu0 %v1900_v59  ;;  %v2864_v11 = vld [vmem:[#allocation16_spill] sm:$0xff] }
  0x7d   :  { %1694 = vmatpush3.bf16.msra.mxu1 %v2103_v26  ;;  %1715 = vmatprep.subr.bf16.mxu0 %v2025_v13  ;;  %v2866_v13 = vld [vmem:[#allocation17_spill] sm:$0xff]  ;;  %v2879_v26 = vld [vmem:[#allocation11_spill] sm:$0xff] }
  0x7e   :  { %1695 = vmatprep.subr.bf16.mxu1 %v2115_v28  ;;  %v2881_v28 = vld [vmem:[#allocation19_spill] sm:$0xff] }
  0x80   :  { %1716 = vmatpush3.bf16.msra.mxu0 %v2037_v15  ;;  %v2868_v15 = vld [vmem:[#allocation20_spill] sm:$0xff] }
  0x81   :  { %1696 = vmatpush3.bf16.msra.mxu1 %v2127_v30  ;;  %1717 = vmatprep.subr.bf16.mxu0 %v2049_v17  ;;  %v2870_v17 = vld [vmem:[#allocation2_spill] sm:$0xff]  ;;  %v2883_v30 = vld [vmem:[#allocation33_spill] sm:$0xff] }
  0x82   :  { %1237 = vmatprep.subr.bf16.mxu1 %v2829_v56 }
  0x84   :  { %1172 = vmatmul.mubr.bf16.vlgmr.msra.gmra.mxu1 %v2349_v60  ;;  %1718 = vmatpush3.bf16.msra.mxu0 %v2061_v19  ;;  %v2872_v19 = vld [vmem:[#allocation23_spill] sm:$0xff] }
  0x85   :  { %1238 = vmatpush1.bf16.msra.mxu1 %v2169_v38  ;;  %1719 = vmatprep.subr.bf16.mxu0 %v2073_v21  ;;  %v2874_v21 = vld [vmem:[#allocation10_spill] sm:$0xff]  ;;  %v2890_v38 = vld [vmem:[#allocation40_spill] sm:$0xff] }
  0x86   :  { %1239 = vmatprep.subr.bf16.mxu1 %v2829_v56  ;;  %1179 = vmatprep.mubr.bf16.mxu1 %v2475_v62 }
  0x88   :  { %1720 = vmatpush3.bf16.msra.mxu0 %v2085_v23  ;;  %v2876_v23 = vld [vmem:[#allocation28_spill] sm:$0xff] }
  0x89   :  { %1240 = vmatpush1.bf16.msra.mxu1 %v2189_v41  ;;  %1721 = vmatprep.subr.bf16.mxu0 %v2097_v25  ;;  %v2878_v25 = vld [vmem:[#allocation30_spill] sm:$0xff] }
  0x8a   :  { %1241 = vmatprep.subr.bf16.mxu1 %v2829_v56  ;;  %v2893_v41 = vld [vmem:[#allocation6_spill] sm:$0xff] }
  0x8c   :  { %1722 = vmatpush3.bf16.msra.mxu0 %v2109_v27  ;;  %1180 = vmatmul.mubr.bf16.gmra.mxu1 %v2480_v57  ;;  %v2880_v27 = vld [vmem:[#allocation32_spill] sm:$0xff] }
  0x8d   :  { %1242 = vmatpush1.bf16.msra.mxu1 %v2206_v44  ;;  %1723 = vmatprep.subr.bf16.mxu0 %v2121_v29  ;;  %v2882_v29 = vld [vmem:[#allocation31_spill] sm:$0xff]  ;;  %v2896_v44 = vld [vmem:[#allocation26_spill] sm:$0xff] }
  0x8e   :  { %1243 = vmatprep.subr.bf16.mxu1 %v2829_v56  ;;  %1565 = vmatprep.mubr.msk.bf16.mxu1 %vm522_vm0, %v2554_v52 }
  0x90   :  { %1724 = vmatpush3.bf16.msra.mxu0 %v2133_v31  ;;  %v2884_v31 = vld [vmem:[#allocation34_spill] sm:$0xff] }
  0x91   :  { %1244 = vmatpush1.bf16.msra.mxu1 %v2225_v47  ;;  %1737 = vmatprep.subr.bf16.mxu0 %v2162_v37  ;;  %v2889_v37 = vld [vmem:[#allocation39_spill] sm:$0xff] }
  0x92   :  { %1245 = vmatprep.subr.bf16.mxu1 %v2829_v56 }
  0x93   :  { %1221 = vmatmul.mubr.bf16.vlgmr.msra.gmra.mxu0 %v2543_v32  ;;  %v2885_v32 = vld [vmem:[#allocation35_spill] sm:$0xff] }
  0x94   :  { %1738 = vmatpush3.bf16.msra.mxu0 %v2176_v39  ;;  %1228 = vmatprep.mubr.bf16.mxu0 %v2562_v55  ;;  %v2891_v39 = vld [vmem:[#allocation3_spill] sm:$0xff] }
  0x95   :  { %1246 = vmatpush1.bf16.msra.mxu1 %v2243_v50  ;;  %1739 = vmatprep.subr.bf16.mxu0 %v2182_v40  ;;  %v2892_v40 = vld [vmem:[#allocation41_spill] sm:$0xff] }
  0x96   :  { %1247 = vmatprep.subr.bf16.mxu1 %v2829_v56 }
  0x98   :  { %1740 = vmatpush3.bf16.msra.mxu0 %v2195_v42  ;;  %v2894_v42 = vld [vmem:[#allocation8_spill] sm:$0xff] }
  0x99   :  { %1248 = vmatpush1.bf16.msra.mxu1 %v2262_v53  ;;  %1741 = vmatprep.subr.bf16.mxu0 %v2200_v43  ;;  %v2895_v43 = vld [vmem:[#allocation21_spill] sm:$0xff] }
  0x9a   :  { %1249 = vmatprep.subr.bf16.mxu1 %v2829_v56 }
  0x9b   :  { %1229 = vmatmul.mubr.bf16.gmra.mxu0 %v2581_v0 }
  0x9c   :  { %1742 = vmatpush3.bf16.msra.mxu0 %v2213_v45  ;;  %1322 = vmatprep.mubr.bf16.mxu0 %v2145_v33  ;;  %v2886_v33 = vld [vmem:[#allocation36_spill] sm:$0xff]  ;;  %v2897_v45 = vld [vmem:[#allocation29_spill] sm:$0xff] }
  0x9d   :  { %1250 = vmatpush1.bf16.msra.mxu1 %v2292_v58  ;;  %1743 = vmatprep.subr.bf16.mxu0 %v2219_v46 }
  0x9e   :  { %1251 = vmatprep.subr.bf16.mxu1 %v2829_v56 }
  0xa0   :  { %1744 = vmatpush3.bf16.msra.mxu0 %v2232_v48 }
  0xa1   :  { %1252 = vmatpush1.bf16.msra.mxu1 %v2325_v63  ;;  %1745 = vmatprep.subr.bf16.mxu0 %v2238_v49 }
  0xa2   :  { %1265 = vmatprep.subr.bf16.mxu1 %v2829_v56 }
  0xa4   :  { %1746 = vmatpush3.bf16.msra.mxu0 %v2249_v51 }
  0xa5   :  { %1266 = vmatpush2.bf16.msra.mxu1 %v2355_v36  ;;  %1747 = vmatprep.subr.bf16.mxu0 %v2858_v1  ;;  %v2888_v36 = vld [vmem:[#allocation38_spill] sm:$0xff] }
  0xa6   :  { %1267 = vmatprep.subr.bf16.mxu1 %v2829_v56 }
  0xa8   :  { %1748 = vmatpush3.bf16.msra.mxu0 %v2859_v3 }
  0xa9   :  { %1268 = vmatpush2.bf16.msra.mxu1 %v2860_v5  ;;  %1749 = vmatprep.subr.bf16.mxu0 %v2861_v7 }
  0xaa   :  { %1765 = vmatprep.subr.bf16.mxu1 %v2862_v9 }
  0xac   :  { %1270 = vmatmul.mubr.bf16.vlgmr.msra.gmra.mxu1 %v2605_v4  ;;  %1750 = vmatpush3.bf16.msra.mxu0 %v2863_v10 }
  0xad   :  { %1766 = vmatpush3.bf16.msra.mxu1 %v2864_v11  ;;  %1751 = vmatprep.subr.bf16.mxu0 %v2865_v12 }
  0xae   :  { %1767 = vmatprep.subr.bf16.mxu1 %v2866_v13  ;;  %1566 = vmatprep.mubr.msk.bf16.mxu1 %vm522_vm0, %v2611_v6 }
  0xb0   :  { %1752 = vmatpush3.bf16.msra.mxu0 %v2867_v14 }
  0xb1   :  { %1768 = vmatpush3.bf16.msra.mxu1 %v2868_v15  ;;  %1388 = vmatprep.subr.bf16.mxu0 %v2829_v56 }
  0xb2   :  { %1769 = vmatprep.subr.bf16.mxu1 %v2869_v16 }
  0xb3   :  { %1323 = vmatmul.mubr.bf16.vlgmr.msra.gmra.mxu0 %v2870_v17 }
  0xb4   :  { %1278 = vmatmul.mubr.bf16.gmra.mxu1 %v2626_v8  ;;  %1389 = vmatpush1.bf16.msra.mxu0 %v2871_v18 }
  0xb5   :  { %1770 = vmatpush3.bf16.msra.mxu1 %v2872_v19  ;;  %1390 = vmatprep.subr.bf16.mxu0 %v2829_v56 }
  0xb6   :  { %1771 = vmatprep.subr.bf16.mxu1 %v2873_v20  ;;  %1330 = vmatprep.mubr.bf16.mxu0 %v2874_v21 }
  0xb7   :  { %1371 = vmatprep.mubr.bf16.mxu1 %v2875_v22 }
  0xb8   :  { %1391 = vmatpush1.bf16.msra.mxu0 %v2876_v23 }
  0xb9   :  { %1772 = vmatpush3.bf16.msra.mxu1 %v2877_v24  ;;  %1392 = vmatprep.subr.bf16.mxu0 %v2829_v56 }
  0xba   :  { %1773 = vmatprep.subr.bf16.mxu1 %v2878_v25 }
  0xbb   :  { %1331 = vmatmul.mubr.bf16.gmra.mxu0 %v2879_v26 }
  0xbc   :  { %1393 = vmatpush1.bf16.msra.mxu0 %v2880_v27  ;;  %1567 = vmatprep.mubr.msk.bf16.mxu0 %vm522_vm0, %v2881_v28 }
  0xbd   :  { %1774 = vmatpush3.bf16.msra.mxu1 %v2882_v29  ;;  %1394 = vmatprep.subr.bf16.mxu0 %v2829_v56 }
  0xbe   :  { %1775 = vmatprep.subr.bf16.mxu1 %v2883_v30 }
  0xc0   :  { %1395 = vmatpush1.bf16.msra.mxu0 %v2884_v31 }
  0xc1   :  { %1776 = vmatpush3.bf16.msra.mxu1 %v2885_v32  ;;  %1396 = vmatprep.subr.bf16.mxu0 %v2829_v56 }
  0xc2   :  { %1777 = vmatprep.subr.bf16.mxu1 %v2886_v33 }
  0xc4   :  { %1397 = vmatpush1.bf16.msra.mxu0 %v2887_v34 }
  0xc5   :  { %1778 = vmatpush3.bf16.msra.mxu1 %v2888_v36  ;;  %1398 = vmatprep.subr.bf16.mxu0 %v2829_v56 }
  0xc6   :  { %1779 = vmatprep.subr.bf16.mxu1 %v2524_v61 }
  0xc8   :  { %1399 = vmatpush1.bf16.msra.mxu0 %v2889_v37 }
  0xc9   :  { %1780 = vmatpush3.bf16.msra.mxu1 %v2890_v38  ;;  %1400 = vmatprep.subr.bf16.mxu0 %v2829_v56 }
  0xcc   :  { %1372 = vmatmul.mubr.bf16.vlgmr.msra.gmra.mxu1 %v2891_v39  ;;  %1401 = vmatpush1.bf16.msra.mxu0 %v2892_v40 }
  0xcd   :  { %1402 = vmatprep.subr.bf16.mxu0 %v2829_v56  ;;  %1379 = vmatprep.mubr.bf16.mxu1 %v2893_v41 }
  0xd0   :  { %1403 = vmatpush1.bf16.msra.mxu0 %v2571_v35 }
  0xd1   :  { %1416 = vmatprep.subr.bf16.mxu0 %v2829_v56 }
  0xd4   :  { %1380 = vmatmul.mubr.bf16.gmra.mxu1 %v2894_v42  ;;  %1417 = vmatpush2.bf16.msra.mxu0 %v2586_v54 }
  0xd5   :  { %1418 = vmatprep.subr.bf16.mxu0 %v2829_v56 }
  0xd8   :  { %1419 = vmatpush2.bf16.msra.mxu0 %v2596_v2 }
  0xdb   :  { %1421 = vmatmul.mubr.bf16.vlgmr.msra.gmra.mxu0 %v2895_v43 }
  0xdc   :  { %1568 = vmatprep.mubr.msk.bf16.mxu0 %vm522_vm0, %v2896_v44 }
  0xe3   :  { %1429 = vmatmul.mubr.bf16.gmra.mxu0 %v2897_v45  ;;  %v1585_v47 = vpop.f32.mrf.mxu0 }
  0xe4   :  { %v1613_v46 = vpop.f32.mrf.mxu1 }
  0xe5   :  { %v1586_v48 = vpop.f32.mrf.mxu0 }
  0xe6   :  { %v1614_v35 = vpop.f32.mrf.mxu1  ;;  %v1587_v18 = vadd.f32 %v1586_v48, %v1585_v47 }
  0xe7   :  { %v1588_v50 = vpop.f32.mrf.mxu0  ;;  %v1615_v19 = vadd.f32 %v1614_v35, %v1613_v46 }
  0xe8   :  { %v1616_v49 = vpop.f32.mrf.mxu1 }
  0xe9   :  { %v1589_v53 = vpop.f32.mrf.mxu0  ;;  %v613_v23 = vadd.f32 %v1615_v19, %v1587_v18 }
  0xea   :  { %v1617_v51 = vpop.f32.mrf.mxu1  ;;  %v1590_v24 = vadd.f32 %v1589_v53, %v1588_v50 }
  0xeb   :  { %v1591_v54 = vpop.f32.mrf.mxu0  ;;  %v1618_v25 = vadd.f32 %v1617_v51, %v1616_v49 }
  0xec   :  { %v1619_v52 = vpop.f32.mrf.mxu1 }
  0xed   :  { %v1592_v56 = vpop.f32.mrf.mxu0  ;;  %v616_v37 = vadd.f32 %v1618_v25, %v1590_v24 }
  0xee   :  { %v1620_v55 = vpop.f32.mrf.mxu1  ;;  %v1593_v33 = vadd.f32 %v1592_v56, %v1591_v54 }
  0xef   :  { %v1594_v58 = vpop.f32.mrf.mxu0  ;;  %v1621_v34 = vadd.f32 %v1620_v55, %v1619_v52 }
  0xf0   :  { %v1622_v57 = vpop.f32.mrf.mxu1 }
  0xf1   :  { %v1595_v61 = vpop.f32.mrf.mxu0  ;;  %v621_v47 = vadd.f32 %v1621_v34, %v1593_v33 }
  0xf2   :  { %v1623_v59 = vpop.f32.mrf.mxu1  ;;  %v1596_v48 = vadd.f32 %v1595_v61, %v1594_v58 }
  0xf3   :  { %v1624_v46 = vadd.f32 %v1623_v59, %v1622_v57 }
 0x104   :  { %v1641_v60 = vpop.f32.mrf.mxu1 }
 0x106   :  { %v1642_v63 = vpop.f32.mrf.mxu1 }
 0x107   :  { %v1643_v22 = vadd.f32 %v1642_v63, %v1641_v60  ;;  %v624_v60 = vadd.f32 %v1624_v46, %v1596_v48 }
 0x108   :  { %v1644_v4 = vpop.f32.mrf.mxu1 }
 0x10a   :  { %v1645_v1 = vpop.f32.mrf.mxu1 }
 0x10b   :  { %v661_v62 = vpop.f32.mrf.mxu0  ;;  %v1646_v31 = vadd.f32 %v1645_v1, %v1644_v4 }
 0x10c   :  { %v662_v30 = vadd.f32 %v661_v62, %v613_v23 }
 0x10d   :  { %v663_v0 = vpop.f32.mrf.mxu0 }
 0x10f   :  { %v664_v2 = vpop.f32.mrf.mxu0 }
 0x110   :  { %v665_v43 = vadd.f32 %v664_v2, %v616_v37 }
 0x111   :  { %v666_v6 = vpop.f32.mrf.mxu0 }
 0x113   :  { %v669_v8 = vpop.f32.mrf.mxu0  ;;  %v1647_v5 = vpop.f32.mrf.mxu1 }
 0x114   :  { %v670_v53 = vadd.f32 %v669_v8, %v621_v47 }
 0x115   :  { %v671_v3 = vpop.f32.mrf.mxu0  ;;  %v1648_v9 = vpop.f32.mrf.mxu1 }
 0x116   :  { %v1649_v44 = vadd.f32 %v1648_v9, %v1647_v5 }
 0x117   :  { %v672_v7 = vpop.f32.mrf.mxu0  ;;  %v1650_v11 = vpop.f32.mrf.mxu1 }
 0x118   :  { %v673_v57 = vadd.f32 %v672_v7, %v624_v60 }
 0x119   :  { %v674_v10 = vpop.f32.mrf.mxu0  ;;  %v1651_v12 = vpop.f32.mrf.mxu1 }
 0x11a   :  { %v1652_v54 = vadd.f32 %v1651_v12, %v1650_v11 }
 0x124   :  { %v1669_v13 = vpop.f32.mrf.mxu1 }
 0x126   :  { %v1670_v14 = vpop.f32.mrf.mxu1 }
 0x127   :  { %v1671_v20 = vadd.f32 %v1670_v14, %v1669_v13 }
 0x128   :  { %v1672_v15 = vpop.f32.mrf.mxu1 }
 0x129   :  { %v1076_v27 = vadd.f32 %v1671_v20, %v1643_v22 }
 0x12a   :  { %v1673_v16 = vpop.f32.mrf.mxu1 }
 0x12b   :  { %v1674_v26 = vadd.f32 %v1673_v16, %v1672_v15 }
 0x12c   :  { %v1675_v17 = vpop.f32.mrf.mxu1 }
 0x12d   :  { %v1079_v40 = vadd.f32 %v1674_v26, %v1646_v31 }
 0x12e   :  { %v1676_v21 = vpop.f32.mrf.mxu1 }
 0x12f   :  { %v1677_v38 = vadd.f32 %v1676_v21, %v1675_v17 }
 0x130   :  { %v1678_v28 = vpop.f32.mrf.mxu1 }
 0x131   :  { %v1084_v51 = vadd.f32 %v1677_v38, %v1649_v44 }
 0x132   :  { %v1679_v41 = vpop.f32.mrf.mxu1 }
 0x133   :  { %v1124_v29 = vpop.f32.mrf.mxu0  ;;  %v1680_v49 = vadd.f32 %v1679_v41, %v1678_v28 }
 0x134   :  { %v1125_v32 = vadd.f32 %v1124_v29, %v1076_v27 }
 0x135   :  { %v1126_v36 = vpop.f32.mrf.mxu0  ;;  %v1087_v63 = vadd.f32 %v1680_v49, %v1652_v54 }
 0x136   :  { %v1286_v39 = vsub.f32 %v662_v30, %v1125_v32 }
 0x137   :  { %v1127_v42 = vpop.f32.mrf.mxu0 }
 0x138   :  { %1437 = vst [vmem:[%s2773_s4] sm:$0xff] %v1286_v39  ;;  %v1128_v45 = vadd.f32 %v1127_v42, %v1079_v40 }
 0x139   :  { %v1129_v35 = vpop.f32.mrf.mxu0 }
 0x13a   :  { %v1287_v50 = vsub.f32 %v665_v43, %v1128_v45 }
 0x13b   :  { %v1132_v52 = vpop.f32.mrf.mxu0 }
 0x13c   :  { %1438 = vst [vmem:[%s2773_s4 + $0x8] sm:$0xff] %v1287_v50  ;;  %v1133_v55 = vadd.f32 %v1132_v52, %v1084_v51 }
 0x13d   :  { %v1134_v56 = vpop.f32.mrf.mxu0 }
 0x13e   :  { %v1288_v62 = vsub.f32 %v670_v53, %v1133_v55 }
 0x13f   :  { %v1135_v0 = vpop.f32.mrf.mxu0 }
 0x140   :  { %1439 = vst [vmem:[%s2773_s4 + $0x10] sm:$0xff] %v1288_v62  ;;  %v1136_v58 = vadd.f32 %v1135_v0, %v1087_v63 }
 0x141   :  { %v1137_v59 = vpop.f32.mrf.mxu0 }
 0x142   :  { %v1289_v61 = vsub.f32 %v673_v57, %v1136_v58 }
 0x144   :  { %1440 = vst [vmem:[%s2773_s4 + $0x18] sm:$0xff] %v1289_v61  ;;  %v1697_v2 = vpop.f32.mrf.mxu1 }
 0x146   :  { %v1698_v4 = vpop.f32.mrf.mxu1 }
 0x147   :  { %v1699_v36 = vadd.f32 %v1698_v4, %v1697_v2 }
 0x148   :  { %v1700_v6 = vpop.f32.mrf.mxu1 }
 0x14a   :  { %v1701_v8 = vpop.f32.mrf.mxu1 }
 0x14b   :  { %v1702_v43 = vadd.f32 %v1701_v8, %v1700_v6 }
 0x14c   :  { %v1703_v1 = vpop.f32.mrf.mxu1 }
 0x14e   :  { %v1704_v3 = vpop.f32.mrf.mxu1 }
 0x14f   :  { %v1705_v46 = vadd.f32 %v1704_v3, %v1703_v1 }
 0x150   :  { %v1706_v9 = vpop.f32.mrf.mxu1 }
 0x152   :  { %v1707_v10 = vpop.f32.mrf.mxu1 }
 0x153   :  { %v1725_v5 = vpop.f32.mrf.mxu0  ;;  %v1708_v55 = vadd.f32 %v1707_v10, %v1706_v9 }
 0x155   :  { %v1726_v7 = vpop.f32.mrf.mxu0 }
 0x156   :  { %v1727_v32 = vadd.f32 %v1726_v7, %v1725_v5 }
 0x157   :  { %v1728_v11 = vpop.f32.mrf.mxu0 }
 0x158   :  { %v1223_v39 = vadd.f32 %v1727_v32, %v1699_v36 }
 0x159   :  { %v1729_v13 = vpop.f32.mrf.mxu0 }
 0x15a   :  { %v1730_v38 = vadd.f32 %v1729_v13, %v1728_v11 }
 0x15b   :  { %v1731_v15 = vpop.f32.mrf.mxu0 }
 0x15c   :  { %v1226_v48 = vadd.f32 %v1730_v38, %v1702_v43 }
 0x15d   :  { %v1732_v18 = vpop.f32.mrf.mxu0 }
 0x15e   :  { %v1733_v47 = vadd.f32 %v1732_v18, %v1731_v15 }
 0x15f   :  { %v1734_v21 = vpop.f32.mrf.mxu0 }
 0x160   :  { %v1231_v56 = vadd.f32 %v1733_v47, %v1705_v46 }
 0x161   :  { %v1735_v24 = vpop.f32.mrf.mxu0 }
 0x162   :  { %v1736_v63 = vadd.f32 %v1735_v24, %v1734_v21 }
 0x164   :  { %v1234_v1 = vadd.f32 %v1736_v63, %v1708_v55 }
 0x16c   :  { %v1271_v12 = vpop.f32.mrf.mxu1 }
 0x16d   :  { %v1272_v44 = vadd.f32 %v1271_v12, %v1223_v39 }
 0x16e   :  { %v1273_v14 = vpop.f32.mrf.mxu1 }
 0x170   :  { %v1274_v16 = vpop.f32.mrf.mxu1 }
 0x171   :  { %v1275_v52 = vadd.f32 %v1274_v16, %v1226_v48 }
 0x172   :  { %v1276_v17 = vpop.f32.mrf.mxu1 }
 0x173   :  { %v1753_v25 = vpop.f32.mrf.mxu0 }
 0x174   :  { %v1279_v19 = vpop.f32.mrf.mxu1 }
 0x175   :  { %v1754_v26 = vpop.f32.mrf.mxu0  ;;  %v1280_v61 = vadd.f32 %v1279_v19, %v1231_v56 }
 0x176   :  { %v1281_v20 = vpop.f32.mrf.mxu1  ;;  %v1755_v40 = vadd.f32 %v1754_v26, %v1753_v25 }
 0x177   :  { %v1756_v27 = vpop.f32.mrf.mxu0 }
 0x178   :  { %v1282_v22 = vpop.f32.mrf.mxu1  ;;  %v1325_v49 = vadd.f32 %v1755_v40, %v1272_v44 }
 0x179   :  { %v1757_v28 = vpop.f32.mrf.mxu0  ;;  %v1283_v10 = vadd.f32 %v1282_v22, %v1234_v1 }
 0x17a   :  { %v1284_v23 = vpop.f32.mrf.mxu1  ;;  %v1758_v50 = vadd.f32 %v1757_v28, %v1756_v27 }
 0x17b   :  { %v1759_v30 = vpop.f32.mrf.mxu0 }
 0x17c   :  { %v1328_v0 = vadd.f32 %v1758_v50, %v1275_v52 }
 0x17d   :  { %v1760_v34 = vpop.f32.mrf.mxu0 }
 0x17e   :  { %v1761_v57 = vadd.f32 %v1760_v34, %v1759_v30 }
 0x17f   :  { %v1762_v42 = vpop.f32.mrf.mxu0 }
 0x180   :  { %v1333_v3 = vadd.f32 %v1761_v57, %v1280_v61 }
 0x181   :  { %v1763_v51 = vpop.f32.mrf.mxu0 }
 0x182   :  { %v1764_v5 = vadd.f32 %v1763_v51, %v1762_v42 }
 0x184   :  { %v1336_v14 = vadd.f32 %v1764_v5, %v1283_v10 }
 0x18c   :  { %v1781_v29 = vpop.f32.mrf.mxu1 }
 0x18e   :  { %v1782_v31 = vpop.f32.mrf.mxu1 }
 0x18f   :  { %v1783_v45 = vadd.f32 %v1782_v31, %v1781_v29 }
 0x190   :  { %v1784_v33 = vpop.f32.mrf.mxu1 }
 0x191   :  { %v1374_v54 = vadd.f32 %v1783_v45, %v1325_v49 }
 0x192   :  { %v1785_v37 = vpop.f32.mrf.mxu1 }
 0x193   :  { %v1786_v53 = vadd.f32 %v1785_v37, %v1784_v33 }
 0x194   :  { %v1787_v41 = vpop.f32.mrf.mxu1 }
 0x195   :  { %v1377_v4 = vadd.f32 %v1786_v53, %v1328_v0 }
 0x196   :  { %v1788_v35 = vpop.f32.mrf.mxu1 }
 0x197   :  { %v1789_v2 = vadd.f32 %v1788_v35, %v1787_v41 }
 0x198   :  { %v1790_v60 = vpop.f32.mrf.mxu1 }
 0x199   :  { %v1382_v12 = vadd.f32 %v1789_v2, %v1333_v3 }
 0x19a   :  { %v1791_v6 = vpop.f32.mrf.mxu1 }
 0x19b   :  { %v1422_v62 = vpop.f32.mrf.mxu0  ;;  %v1792_v11 = vadd.f32 %v1791_v6, %v1790_v60 }
 0x19c   :  { %v1423_v58 = vadd.f32 %v1422_v62, %v1374_v54 }
 0x19d   :  { %v1424_v59 = vpop.f32.mrf.mxu0  ;;  %v1385_v17 = vadd.f32 %v1792_v11, %v1336_v14 }
 0x19e   :  { %1441 = vst [vmem:[%s2774_s5] sm:$0xff] %v1423_v58 }
 0x19f   :  { %v1425_v8 = vpop.f32.mrf.mxu0 }
 0x1a0   :  { %v1426_v9 = vadd.f32 %v1425_v8, %v1377_v4 }
 0x1a1   :  { %v1427_v7 = vpop.f32.mrf.mxu0 }
 0x1a2   :  { %1442 = vst [vmem:[%s2774_s5 + $0x8] sm:$0xff] %v1426_v9 }
 0x1a3   :  { %v1430_v13 = vpop.f32.mrf.mxu0 }
 0x1a4   :  { %v1431_v15 = vadd.f32 %v1430_v13, %v1382_v12 }
 0x1a5   :  { %v1432_v16 = vpop.f32.mrf.mxu0 }
 0x1a6   :  { %1443 = vst [vmem:[%s2774_s5 + $0x10] sm:$0xff] %v1431_v15 }
 0x1a7   :  { %v1433_v18 = vpop.f32.mrf.mxu0 }
 0x1a8   :  { %v1434_v19 = vadd.f32 %v1433_v18, %v1385_v17 }
 0x1a9   :  { %v1435_v20 = vpop.f32.mrf.mxu0 }
 0x1aa   :  { %1444 = vst [vmem:[%s2774_s5 + $0x18] sm:$0xff] %v1434_v19 }

// kernel: forward.25
= control target key start
LH: loop header
LB: loop body
LE: loop exit
PB: predicated region body
PF: predicated region fallthrough
CT: control target
= control target key end

     0   :  { %v458_v1 = vmov 0   ;;  %vm94_vm0 = vcmask 523264   ;;  %s613_s2 = inlined_call_operand.vmem [shape: bf16[64,256], index: 2, kind: input, shape index: {}]   ;;  %s614_s3 = inlined_call_operand.vmem [shape: bf16[64,256], index: 3, kind: input, shape index: {}]   ;;  %s615_s0 = inlined_call_operand.vmem [shape: bf16[32,64], index: 0, kind: input, shape index: {}]   ;;  %s616_s1 = inlined_call_operand.vmem [shape: bf16[32,64], index: 1, kind: input, shape index: {}]   ;;  %s617_s4 = inlined_call_operand.vmem [shape: f32[32,256], index: 4, kind: output, shape index: {0}]   ;;  %s618_s5 = inlined_call_operand.vmem [shape: f32[32,256], index: 5, kind: output, shape index: {1}]  }
   0x1   :  { %v430_v0 = vld [vmem:[%s613_s2 + $0x34] ss:$8 sps:$4 sm:$0xff]   ;;  %133 = vmatprep.mubr.bf16.mxu0 %v458_v1  ;;  %242 = vmatprep.mubr.bf16.mxu1 %v458_v1  ;;  %v434_v3 = vld [vmem:[%s613_s2 + $0x30] ss:$8 sps:$4 sm:$0xff]   ;;  %v436_v5 = vld [vmem:[%s613_s2 + $0x24] ss:$8 sps:$4 sm:$0xff]  }
   0x2   :  { %v432_v2 = vld [vmem:[%s614_s3 + $0x34] ss:$8 sps:$4 sm:$0xff]   ;;  %109 = vmatprep.subr.bf16.mxu0 %v430_v0  ;;  %v435_v4 = vld [vmem:[%s614_s3 + $0x30] ss:$8 sps:$4 sm:$0xff]   ;;  %v438_v6 = vld [vmem:[%s614_s3 + $0x24] ss:$8 sps:$4 sm:$0xff]  }
   0x3   :  { %218 = vmatprep.subr.bf16.mxu1 %v432_v2  ;;  %110 = vmatpush1.bf16.msra.mxu0 %v434_v3  ;;  %v440_v7 = vld [vmem:[%s613_s2 + $0x20] ss:$8 sps:$4 sm:$0xff]   ;;  %v442_v9 = vld [vmem:[%s613_s2 + $0x14] ss:$8 sps:$4 sm:$0xff]   ;;  %v446_v11 = vld [vmem:[%s613_s2 + $0x10] ss:$8 sps:$4 sm:$0xff]  }
   0x4   :  { %219 = vmatpush1.bf16.msra.mxu1 %v435_v4  ;;  %111 = vmatprep.subr.bf16.mxu0 %v436_v5  ;;  %v441_v8 = vld [vmem:[%s614_s3 + $0x20] ss:$8 sps:$4 sm:$0xff]   ;;  %v444_v10 = vld [vmem:[%s614_s3 + $0x14] ss:$8 sps:$4 sm:$0xff]   ;;  %v447_v12 = vld [vmem:[%s614_s3 + $0x10] ss:$8 sps:$4 sm:$0xff]  }
   0x5   :  { %220 = vmatprep.subr.bf16.mxu1 %v438_v6  ;;  %v448_v13 = vld [vmem:[%s613_s2 + $0x4] ss:$8 sps:$4 sm:$0xff]   ;;  %v452_v15 = vld [vmem:[%s613_s2] ss:$8 sps:$4 sm:$0xff]  }
   0x6   :  { %v450_v14 = vld [vmem:[%s614_s3 + $0x4] ss:$8 sps:$4 sm:$0xff]   ;;  %v453_v16 = vld [vmem:[%s614_s3] ss:$8 sps:$4 sm:$0xff]  }
   0x7   :  { %112 = vmatpush1.bf16.msra.mxu0 %v440_v7  ;;  %v454_v17 = vld [vmem:[%s615_s0] sm:$0xff]   ;;  %v456_v19 = vld [vmem:[%s615_s0 + $0x8] sm:$0xff]  }
   0x8   :  { %221 = vmatpush1.bf16.msra.mxu1 %v441_v8  ;;  %113 = vmatprep.subr.bf16.mxu0 %v442_v9  ;;  %v455_v18 = vld [vmem:[%s616_s1] sm:$0xff]   ;;  %v457_v20 = vld [vmem:[%s616_s1 + $0x8] sm:$0xff]  }
   0x9   :  { %222 = vmatprep.subr.bf16.mxu1 %v444_v10 }
   0xb   :  { %114 = vmatpush1.bf16.msra.mxu0 %v446_v11 }
   0xc   :  { %223 = vmatpush1.bf16.msra.mxu1 %v447_v12  ;;  %115 = vmatprep.subr.bf16.mxu0 %v448_v13 }
   0xd   :  { %224 = vmatprep.subr.bf16.mxu1 %v450_v14 }
   0xf   :  { %116 = vmatpush1.bf16.msra.mxu0 %v452_v15 }
  0x10   :  { %225 = vmatpush1.bf16.msra.mxu1 %v453_v16  ;;  %271 = vmatprep.subr.bf16.mxu0 %v430_v0 }
  0x11   :  { %332 = vmatprep.subr.bf16.mxu1 %v432_v2 }
  0x12   :  { %411 = vmatmul.mubr.msk.bf16.vlgmr.msra.gmra.mxu0 %vm94_vm0, %v454_v17 }
  0x13   :  { %423 = vmatmul.mubr.msk.bf16.vlgmr.msra.gmra.mxu1 %vm94_vm0, %v455_v18  ;;  %272 = vmatpush1.bf16.msra.mxu0 %v434_v3 }
  0x14   :  { %333 = vmatpush1.bf16.msra.mxu1 %v435_v4  ;;  %273 = vmatprep.subr.bf16.mxu0 %v436_v5 }
  0x15   :  { %334 = vmatprep.subr.bf16.mxu1 %v438_v6  ;;  %143 = vmatprep.mubr.bf16.mxu0 %v458_v1 }
  0x16   :  { %252 = vmatprep.mubr.bf16.mxu1 %v458_v1 }
  0x17   :  { %274 = vmatpush1.bf16.msra.mxu0 %v440_v7 }
  0x18   :  { %335 = vmatpush1.bf16.msra.mxu1 %v441_v8  ;;  %275 = vmatprep.subr.bf16.mxu0 %v442_v9 }
  0x19   :  { %336 = vmatprep.subr.bf16.mxu1 %v444_v10 }
  0x1a   :  { %412 = vmatmul.mubr.msk.bf16.gmra.mxu0 %vm94_vm0, %v456_v19 }
  0x1b   :  { %424 = vmatmul.mubr.msk.bf16.gmra.mxu1 %vm94_vm0, %v457_v20  ;;  %276 = vmatpush1.bf16.msra.mxu0 %v446_v11 }
  0x1c   :  { %337 = vmatpush1.bf16.msra.mxu1 %v447_v12  ;;  %277 = vmatprep.subr.bf16.mxu0 %v448_v13 }
  0x1d   :  { %338 = vmatprep.subr.bf16.mxu1 %v450_v14  ;;  %295 = vmatprep.mubr.bf16.mxu0 %v458_v1 }
  0x1e   :  { %356 = vmatprep.mubr.bf16.mxu1 %v458_v1 }
  0x1f   :  { %278 = vmatpush1.bf16.msra.mxu0 %v452_v15 }
  0x20   :  { %339 = vmatpush1.bf16.msra.mxu1 %v453_v16 }
  0x22   :  { %425 = vmatmul.mubr.msk.bf16.vlgmr.msra.gmra.mxu0 %vm94_vm0, %v455_v18 }
  0x23   :  { %427 = vmatmul.mubr.msk.bf16.vlgmr.msra.gmra.mxu1 %vm94_vm0, %v454_v17  ;;  %305 = vmatprep.mubr.bf16.mxu0 %v458_v1 }
  0x24   :  { %366 = vmatprep.mubr.bf16.mxu1 %v458_v1 }
  0x2a   :  { %426 = vmatmul.mubr.msk.bf16.gmra.mxu0 %vm94_vm0, %v457_v20 }
  0x2b   :  { %428 = vmatmul.mubr.msk.bf16.gmra.mxu1 %vm94_vm0, %v456_v19 }
  0xd2   :  { %v135_v21 = vpop.f32.mrf.mxu0 }
  0xd3   :  { %v244_v22 = vpop.f32.mrf.mxu1 }
  0xd4   :  { %v316_v23 = vsub.f32 %v135_v21, %v244_v22  ;;  %v137_v24 = vpop.f32.mrf.mxu0 }
  0xd5   :  { %v246_v25 = vpop.f32.mrf.mxu1 }
  0xd6   :  { %377 = vst [vmem:[%s617_s4] sm:$0xff] %v316_v23  ;;  %v317_v26 = vsub.f32 %v137_v24, %v246_v25  ;;  %v139_v27 = vpop.f32.mrf.mxu0 }
  0xd7   :  { %v248_v28 = vpop.f32.mrf.mxu1 }
  0xd8   :  { %378 = vst [vmem:[%s617_s4 + $0x8] sm:$0xff] %v317_v26  ;;  %v318_v29 = vsub.f32 %v139_v27, %v248_v28  ;;  %v141_v30 = vpop.f32.mrf.mxu0 }
  0xd9   :  { %v250_v31 = vpop.f32.mrf.mxu1 }
  0xda   :  { %379 = vst [vmem:[%s617_s4 + $0x10] sm:$0xff] %v318_v29  ;;  %v319_v32 = vsub.f32 %v141_v30, %v250_v31  ;;  %v145_v33 = vpop.f32.mrf.mxu0 }
  0xdb   :  { %v254_v34 = vpop.f32.mrf.mxu1 }
  0xdc   :  { %380 = vst [vmem:[%s617_s4 + $0x18] sm:$0xff] %v319_v32  ;;  %v320_v35 = vsub.f32 %v145_v33, %v254_v34  ;;  %v147_v36 = vpop.f32.mrf.mxu0 }
  0xdd   :  { %v256_v37 = vpop.f32.mrf.mxu1 }
  0xde   :  { %381 = vst [vmem:[%s617_s4 + $0x20] sm:$0xff] %v320_v35  ;;  %v321_v38 = vsub.f32 %v147_v36, %v256_v37  ;;  %v149_v39 = vpop.f32.mrf.mxu0 }
  0xdf   :  { %v258_v40 = vpop.f32.mrf.mxu1 }
  0xe0   :  { %382 = vst [vmem:[%s617_s4 + $0x28] sm:$0xff] %v321_v38  ;;  %v322_v41 = vsub.f32 %v149_v39, %v258_v40  ;;  %v151_v42 = vpop.f32.mrf.mxu0 }
  0xe1   :  { %v260_v43 = vpop.f32.mrf.mxu1 }
  0xe2   :  { %383 = vst [vmem:[%s617_s4 + $0x30] sm:$0xff] %v322_v41  ;;  %v323_v44 = vsub.f32 %v151_v42, %v260_v43  ;;  %v297_v45 = vpop.f32.mrf.mxu0 }
  0xe3   :  { %v358_v46 = vpop.f32.mrf.mxu1 }
  0xe4   :  { %384 = vst [vmem:[%s617_s4 + $0x38] sm:$0xff] %v323_v44  ;;  %v359_v47 = vadd.f32 %v358_v46, %v297_v45  ;;  %v299_v48 = vpop.f32.mrf.mxu0 }
  0xe5   :  { %v360_v49 = vpop.f32.mrf.mxu1 }
  0xe6   :  { %385 = vst [vmem:[%s618_s5] sm:$0xff] %v359_v47  ;;  %v361_v50 = vadd.f32 %v360_v49, %v299_v48  ;;  %v301_v51 = vpop.f32.mrf.mxu0 }
  0xe7   :  { %v362_v52 = vpop.f32.mrf.mxu1 }
  0xe8   :  { %386 = vst [vmem:[%s618_s5 + $0x8] sm:$0xff] %v361_v50  ;;  %v363_v53 = vadd.f32 %v362_v52, %v301_v51  ;;  %v303_v54 = vpop.f32.mrf.mxu0 }
  0xe9   :  { %v364_v55 = vpop.f32.mrf.mxu1 }
  0xea   :  { %387 = vst [vmem:[%s618_s5 + $0x10] sm:$0xff] %v363_v53  ;;  %v365_v56 = vadd.f32 %v364_v55, %v303_v54  ;;  %v307_v57 = vpop.f32.mrf.mxu0 }
  0xeb   :  { %v368_v58 = vpop.f32.mrf.mxu1 }
  0xec   :  { %388 = vst [vmem:[%s618_s5 + $0x18] sm:$0xff] %v365_v56  ;;  %v369_v59 = vadd.f32 %v368_v58, %v307_v57  ;;  %v309_v60 = vpop.f32.mrf.mxu0 }
  0xed   :  { %v370_v61 = vpop.f32.mrf.mxu1 }
  0xee   :  { %389 = vst [vmem:[%s618_s5 + $0x20] sm:$0xff] %v369_v59  ;;  %v371_v62 = vadd.f32 %v370_v61, %v309_v60  ;;  %v311_v63 = vpop.f32.mrf.mxu0 }
  0xef   :  { %v372_v0 = vpop.f32.mrf.mxu1 }
  0xf0   :  { %390 = vst [vmem:[%s618_s5 + $0x28] sm:$0xff] %v371_v62  ;;  %v373_v1 = vadd.f32 %v372_v0, %v311_v63  ;;  %v313_v2 = vpop.f32.mrf.mxu0 }
  0xf1   :  { %v374_v3 = vpop.f32.mrf.mxu1 }
  0xf2   :  { %391 = vst [vmem:[%s618_s5 + $0x30] sm:$0xff] %v373_v1  ;;  %v375_v4 = vadd.f32 %v374_v3, %v313_v2 }
  0xf4   :  { %392 = vst [vmem:[%s618_s5 + $0x38] sm:$0xff] %v375_v4 }

// kernel: forward.26
= control target key start
LH: loop header
LB: loop body
LE: loop exit
PB: predicated region body
PF: predicated region fallthrough
CT: control target
= control target key end

     0   :  { %s2113_s27 = smov 0   ;;  %s2115_s28 = smov 0   ;;  %s2382_s0 = inlined_call_operand.vmem [shape: f32[2,32,32], index: 0, kind: input, shape index: {}]   ;;  %s2383_s1 = inlined_call_operand.vmem [shape: f32[1,2,32,32], index: 1, kind: input, shape index: {}]   ;;  %s2384_s2 = inlined_call_operand.vmem [shape: f32[1,2,32,32], index: 2, kind: input, shape index: {}]   ;;  %s2385_s3 = inlined_call_operand.vmem [shape: f32[1,2,32,32], index: 3, kind: input, shape index: {}]   ;;  %s2386_s4 = inlined_call_operand.vmem [shape: f32[1,2,32,32], index: 4, kind: input, shape index: {}]   ;;  %s2387_s5 = inlined_call_operand.vmem [shape: f32[1,2,32,32], index: 5, kind: input, shape index: {}]   ;;  %s2388_s6 = inlined_call_operand.vmem [shape: f32[1,2,32,32], index: 6, kind: input, shape index: {}]   ;;  %s2389_s7 = inlined_call_operand.vmem [shape: f32[1,2,32,32], index: 7, kind: output, shape index: {0}]   ;;  %s2390_s8 = inlined_call_operand.vmem [shape: f32[1,2,32,32], index: 8, kind: output, shape index: {1}]  }
   0x1   :  { %s2117_s29 = smov 0  }
   0x2 LB: > { %s28_s30 = sadd.s32 1, %s2062_s28  ;;  %p1734_p0 = scmp.ge.s32.totalorder %s2066_s29, 1  ;;  %s2066_s29 = sphi %s2117_s29, %s19_s29   ;;  %s2062_s28 = sphi %s2115_s28, %s2392_s28   ;;  %s2058_s27 = sphi %s2113_s27, %s2391_s27  }
   0x3   : > { %p29_p1 = scmp.ge.s32.totalorder %s28_s30, 2  ;;  %p377_p2 = scmp.lt.s32.totalorder %s2066_s29, 3 }
   0x5   : > { %s2394_s30 = smov (%p29_p1, %s28_s30), 0  ;;  %p378_p3 = pnand %p1734_p0, %p377_p2 }
   0x6   : > { %p478_p4 = scmp.lt.s32.totalorder (!%p378_p3), %s2058_s27, 1 }
   0x7   : > { %381 = sbr.rel (%p378_p3) target bundleno = 804 (0x324), region = 48 }
   0xc   : > { %s2396_s27 = smov (!%p478_p4, %s2058_s27), 1  ;;  %vm583_vm0 = vcmask 261120  }
   0xd   : > { %s2131_s9 = sshll.u32 %s2396_s27, 5 }
   0xe   : > { %s518_s12 = scalar_lea.vmem %s2386_s4, %s2131_s9  ;;  %s509_s15 = scalar_lea.vmem %s2385_s3, %s2131_s9 }
   0xf   : > { %v570_v0 = vld [vmem:[%s518_s12 + $0x18] sm:$0xff]  ;;  %v569_v2 = vld [vmem:[%s518_s12 + $0x10] sm:$0xff]  ;;  %s2145_s18 = scalar_lea.vmem %s2384_s2, %s2131_s9  ;;  %s2151_s21 = scalar_lea.vmem %s2383_s1, %s2131_s9  ;;  %v568_v6 = vld [vmem:[%s518_s12 + $0x8] sm:$0xff] }
  0x10   : > { %v566_v1 = vld [vmem:[%s509_s15 + $0x18] sm:$0xff]  ;;  %1876 = vmatprep.subr.msk.mxu0 %vm583_vm0, %v570_v0  ;;  %v565_v3 = vld [vmem:[%s509_s15 + $0x10] sm:$0xff]  ;;  %v559_v4 = vld [vmem:[%s2145_s18] sm:$0xff]  ;;  %s482_s24 = scalar_lea.vmem %s2382_s0, %s2131_s9  ;;  %s527_s27 = scalar_lea.vmem %s2387_s5, %s2131_s9 }
  0x11   : > { %1890 = vmatprep.subr.msk.mxu1 %vm583_vm0, %v566_v1  ;;  %1877 = vmatpush3.xpose.msk.msra.mxu0 %vm583_vm0, %v570_v0  ;;  %v555_v5 = vld [vmem:[%s2151_s21] sm:$0xff]  ;;  %v564_v7 = vld [vmem:[%s509_s15 + $0x8] sm:$0xff]  ;;  %v561_v12 = vld [vmem:[%s2145_s18 + $0x10] sm:$0xff] }
  0x12   : > { %1891 = vmatpush3.xpose.msk.msra.mxu1 %vm583_vm0, %v566_v1  ;;  %1878 = vmatprep.subr.msk.mxu0 %vm583_vm0, %v569_v2  ;;  %v567_v8 = vld [vmem:[%s518_s12] sm:$0xff]  ;;  %v560_v10 = vld [vmem:[%s2145_s18 + $0x8] sm:$0xff]  ;;  %v557_v13 = vld [vmem:[%s2151_s21 + $0x10] sm:$0xff]  ;;  %s536_s12 = scalar_lea.vmem %s2388_s6, %s2131_s9 }
  0x13   : > { %1892 = vmatprep.subr.msk.mxu1 %vm583_vm0, %v565_v3  ;;  %1884 = vmatprep.mubr.msk.f32.mxu0 %vm583_vm0, %v559_v4  ;;  %v563_v9 = vld [vmem:[%s509_s15] sm:$0xff]  ;;  %v556_v11 = vld [vmem:[%s2151_s21 + $0x8] sm:$0xff]  ;;  %v562_v14 = vld [vmem:[%s2145_s18 + $0x18] sm:$0xff]  ;;  %s545_s15 = scalar_lea.vmem %s2389_s7, %s2131_s9  ;;  %s554_s18 = scalar_lea.vmem %s2390_s8, %s2131_s9 }
  0x14   : > { %1898 = vmatprep.mubr.msk.f32.mxu1 %vm583_vm0, %v555_v5  ;;  %v558_v15 = vld [vmem:[%s2151_s21 + $0x18] sm:$0xff]  ;;  %v580_v28 = vld [vmem:[%s482_s24 + $0x8] sm:$0xff]  ;;  %v579_v31 = vld [vmem:[%s482_s24] sm:$0xff] }
  0x15   : > { %1879 = vmatpush3.xpose.msk.msra.mxu0 %vm583_vm0, %v569_v2  ;;  %v582_v36 = vld [vmem:[%s482_s24 + $0x18] sm:$0xff]  ;;  %v581_v42 = vld [vmem:[%s482_s24 + $0x10] sm:$0xff] }
  0x16   : > { %1893 = vmatpush3.xpose.msk.msra.mxu1 %vm583_vm0, %v565_v3  ;;  %1880 = vmatprep.subr.msk.mxu0 %vm583_vm0, %v568_v6 }
  0x17   : > { %1894 = vmatprep.subr.msk.mxu1 %vm583_vm0, %v564_v7 }
  0x19   : > { %1881 = vmatpush3.xpose.msk.msra.mxu0 %vm583_vm0, %v568_v6 }
  0x1a   : > { %1895 = vmatpush3.xpose.msk.msra.mxu1 %vm583_vm0, %v564_v7  ;;  %1882 = vmatprep.subr.msk.mxu0 %vm583_vm0, %v567_v8 }
  0x1b   : > { %1896 = vmatprep.subr.msk.mxu1 %vm583_vm0, %v563_v9 }
  0x1d   : > { %1883 = vmatpush3.xpose.msk.msra.mxu0 %vm583_vm0, %v567_v8 }
  0x1e   : > { %1897 = vmatpush3.xpose.msk.msra.mxu1 %vm583_vm0, %v563_v9  ;;  %1904 = vmatprep.subr.msk.mxu0 %vm583_vm0, %v566_v1 }
  0x1f   : > { %1918 = vmatprep.subr.msk.mxu1 %vm583_vm0, %v570_v0 }
  0x20   : > { %1885 = vmatmul.mubr.msk.f32.vlgmr.msra.gmra.mxu0 %vm583_vm0, %v560_v10 }
  0x21   : > { %1899 = vmatmul.mubr.msk.f32.vlgmr.msra.gmra.mxu1 %vm583_vm0, %v556_v11  ;;  %1905 = vmatpush3.xpose.msk.msra.mxu0 %vm583_vm0, %v566_v1 }
  0x22   : > { %1919 = vmatpush3.xpose.msk.msra.mxu1 %vm583_vm0, %v570_v0  ;;  %1906 = vmatprep.subr.msk.mxu0 %vm583_vm0, %v565_v3 }
  0x23   : > { %1920 = vmatprep.subr.msk.mxu1 %vm583_vm0, %v569_v2  ;;  %1887 = vmatprep.mubr.msk.f32.mxu0 %vm583_vm0, %v561_v12 }
  0x24   : > { %1901 = vmatprep.mubr.msk.f32.mxu1 %vm583_vm0, %v557_v13  ;;  %1888 = vmatmul.mubr.msk.f32.gmra.mxu0 %vm583_vm0, %v562_v14 }
  0x25   : > { %1902 = vmatmul.mubr.msk.f32.gmra.mxu1 %vm583_vm0, %v558_v15  ;;  %1907 = vmatpush3.xpose.msk.msra.mxu0 %vm583_vm0, %v565_v3 }
  0x26   : > { %1921 = vmatpush3.xpose.msk.msra.mxu1 %vm583_vm0, %v569_v2  ;;  %1908 = vmatprep.subr.msk.mxu0 %vm583_vm0, %v564_v7 }
  0x27   : > { %1922 = vmatprep.subr.msk.mxu1 %vm583_vm0, %v568_v6  ;;  %1912 = vmatprep.mubr.msk.f32.mxu0 %vm583_vm0, %v559_v4 }
  0x28   : > { %1926 = vmatprep.mubr.msk.f32.mxu1 %vm583_vm0, %v555_v5 }
  0x29   : > { %1909 = vmatpush3.xpose.msk.msra.mxu0 %vm583_vm0, %v564_v7 }
  0x2a   : > { %1923 = vmatpush3.xpose.msk.msra.mxu1 %vm583_vm0, %v568_v6  ;;  %1910 = vmatprep.subr.msk.mxu0 %vm583_vm0, %v563_v9 }
  0x2b   : > { %1924 = vmatprep.subr.msk.mxu1 %vm583_vm0, %v567_v8 }
  0x2d   : > { %1911 = vmatpush3.xpose.msk.msra.mxu0 %vm583_vm0, %v563_v9 }
  0x2e   : > { %1925 = vmatpush3.xpose.msk.msra.mxu1 %vm583_vm0, %v567_v8 }
  0x30   : > { %1913 = vmatmul.mubr.msk.f32.vlgmr.msra.gmra.mxu0 %vm583_vm0, %v560_v10 }
  0x31   : > { %1927 = vmatmul.mubr.msk.f32.vlgmr.msra.gmra.mxu1 %vm583_vm0, %v556_v11  ;;  %1915 = vmatprep.mubr.msk.f32.mxu0 %vm583_vm0, %v561_v12 }
  0x32   : > { %1929 = vmatprep.mubr.msk.f32.mxu1 %vm583_vm0, %v557_v13 }
  0x34   : > { %1916 = vmatmul.mubr.msk.f32.gmra.mxu0 %vm583_vm0, %v562_v14 }
  0x35   : > { %1930 = vmatmul.mubr.msk.f32.gmra.mxu1 %vm583_vm0, %v558_v15 }
  0xe0   : > { %v1886_v16 = vpop.f32.mrf.mxu0 }
  0xe1   : > { %v1900_v17 = vpop.f32.mrf.mxu1 }
  0xe2   : > { %v674_v18 = vpop.f32.mrf.mxu0  ;;  %v789_v22 = vadd.f32 %v1900_v17, %v1886_v16 }
  0xe3   : > { %v783_v19 = vpop.f32.mrf.mxu1 }
  0xe4   : > { %v1889_v20 = vpop.f32.mrf.mxu0  ;;  %v784_v23 = vadd.f32 %v783_v19, %v674_v18  ;;  %v803_v27 = vmul.f32 0.17677669, %v789_v22 }
  0xe5   : > { %v1903_v21 = vpop.f32.mrf.mxu1 }
  0xe6   : > { %v684_v24 = vpop.f32.mrf.mxu0  ;;  %v799_v26 = vadd.f32 %v1903_v21, %v1889_v20  ;;  %v802_v29 = vmul.f32 0.17677669, %v784_v23  ;;  %v2213_v35 = vadd.f32 %v803_v27, %v580_v28 }
  0xe7   : > { %v793_v25 = vpop.f32.mrf.mxu1 }
  0xe8   : > { %v794_v30 = vadd.f32 %v793_v25, %v684_v24  ;;  %v805_v32 = vmul.f32 0.17677669, %v799_v26  ;;  %v2215_v38 = vadd.f32 %v802_v29, %v579_v31  ;;  %v989_v48 = vmul.f32 %v2213_v35, %v2213_v35 }
  0xea   : > { %v804_v39 = vmul.f32 0.17677669, %v794_v30  ;;  %v2219_v45 = vadd.f32 %v805_v32, %v582_v36  ;;  %v988_v52 = vmul.f32 %v2215_v38, %v2215_v38 }
  0xec   : > { %v2229_v53 = vadd.f32 %v804_v39, %v581_v42  ;;  %v991_v60 = vmul.f32 %v2219_v45, %v2219_v45 }
  0xee   : > { %v990_v0 = vmul.f32 %v2229_v53, %v2229_v53 }
  0xf0   : > { %v1914_v33 = vpop.f32.mrf.mxu0 }
  0xf1   : > { %v1928_v34 = vpop.f32.mrf.mxu1 }
  0xf2   : > { %v981_v37 = vsub.f32 %v1914_v33, %v1928_v34  ;;  %v876_v40 = vpop.f32.mrf.mxu0 }
  0xf3   : > { %v961_v41 = vpop.f32.mrf.mxu1 }
  0xf4   : > { %v2217_v43 = vmul.f32 0.17677669, %v981_v37  ;;  %v980_v44 = vsub.f32 %v876_v40, %v961_v41  ;;  %v1917_v46 = vpop.f32.mrf.mxu0 }
  0xf5   : > { %v1931_v47 = vpop.f32.mrf.mxu1 }
  0xf6   : > { %v993_v49 = vmul.f32 %v2217_v43, %v2217_v43  ;;  %v2225_v50 = vmul.f32 0.17677669, %v980_v44  ;;  %v983_v51 = vsub.f32 %v1917_v46, %v1931_v47  ;;  %v886_v54 = vpop.f32.mrf.mxu0 }
  0xf7   : > { %v971_v55 = vpop.f32.mrf.mxu1 }
  0xf8   : > { %v997_v56 = vadd.f32 %v993_v49, %v989_v48  ;;  %v992_v57 = vmul.f32 %v2225_v50, %v2225_v50  ;;  %v2233_v58 = vmul.f32 0.17677669, %v983_v51  ;;  %v982_v59 = vsub.f32 %v886_v54, %v971_v55  ;;  %v2280_v54 = vld [vmem:[%s527_s27 + $0x18] sm:$0xff] }
  0xf9   : > { %v2282_v55 = vld [vmem:[%s536_s12 + $0x18] sm:$0xff]  ;;  %1932 = vmatprep.subr.mxu0 %v2280_v54 }
  0xfa   : > { %2012 = vrsqrt.f32 %v997_v56  ;;  %v996_v61 = vadd.f32 %v992_v57, %v988_v52  ;;  %v995_v62 = vmul.f32 %v2233_v58, %v2233_v58  ;;  %v2239_v63 = vmul.f32 0.17677669, %v982_v59  ;;  %1946 = vmatprep.subr.mxu1 %v2282_v55  ;;  %1933 = vmatpush3.msra.mxu0 %v2280_v54  ;;  %v2290_v57 = vld [vmem:[%s536_s12 + $0x10] sm:$0xff]  ;;  %v2296_v59 = vld [vmem:[%s527_s27 + $0x8] sm:$0xff] }
  0xfb   : > { %vm1009_vm2 = vcmp.eq.f32.partialorder %v997_v56, inf  ;;  %v1012_v15 = vand.u32 2147483648, %v997_v56  ;;  %vm1011_vm4 = vcmp.eq.f32.partialorder %v997_v56, 0.0  ;;  %1947 = vmatpush3.msra.mxu1 %v2282_v55 }
  0xfc   : > { %v999_v1 = vadd.f32 %v995_v62, %v991_v60  ;;  %v994_v2 = vmul.f32 %v2239_v63, %v2239_v63  ;;  %2014 = vrsqrt.f32 %v996_v61  ;;  %vm1002_vm1 = vcmp.eq.f32.partialorder %v996_v61, inf  ;;  %1948 = vmatprep.subr.mxu1 %v2290_v57  ;;  %v2298_v60 = vld [vmem:[%s536_s12 + $0x8] sm:$0xff]  ;;  %v2304_v62 = vld [vmem:[%s536_s12] sm:$0xff] }
  0xfd   : > { %v1005_v9 = vand.u32 2147483648, %v996_v61  ;;  %vm1004_vm3 = vcmp.eq.f32.partialorder %v996_v61, 0.0  ;;  %1949 = vmatpush3.msra.mxu1 %v2290_v57 }
  0xfe   : > { %2016 = vrsqrt.f32 %v999_v1  ;;  %v998_v3 = vadd.f32 %v994_v2, %v990_v0  ;;  %vm1023_vm6 = vcmp.eq.f32.partialorder %v999_v1, inf  ;;  %v1026_v23 = vand.u32 2147483648, %v999_v1  ;;  %1950 = vmatprep.subr.mxu1 %v2298_v60 }
  0xff   : > { %vm1025_vm8 = vcmp.eq.f32.partialorder %v999_v1, 0.0  ;;  %1951 = vmatpush3.msra.mxu1 %v2298_v60 }
 0x100   : > { %2018 = vrsqrt.f32 %v998_v3  ;;  %vm1016_vm5 = vcmp.eq.f32.partialorder %v998_v3, inf  ;;  %v1019_v18 = vand.u32 2147483648, %v998_v3  ;;  %vm1018_vm7 = vcmp.eq.f32.partialorder %v998_v3, 0.0  ;;  %1952 = vmatprep.subr.mxu1 %v2304_v62 }
 0x101   : > { %1953 = vmatpush3.msra.mxu1 %v2304_v62 }
 0x102   : > { %1974 = vmatprep.subr.mxu1 %v2282_v55 }
 0x107   : > { %v2013_v4 = vpop.eup %2012 }
 0x108   : > { %v1008_v5 = vmul.f32 %v2013_v4, %v997_v56 }
 0x109   : > { %v2015_v6 = vpop.eup %2014 }
 0x10a   : > { %v1001_v7 = vmul.f32 %v2015_v6, %v996_v61  ;;  %v1010_v11 = vsel %vm1009_vm2, %v997_v56, %v1008_v5  ;;  %v2288_v56 = vld [vmem:[%s527_s27 + $0x10] sm:$0xff] }
 0x10b   : > { %v2017_v8 = vpop.eup %2016  ;;  %v2249_v19 = vsel %vm1011_vm4, %v1012_v15, %v1010_v11  ;;  %1934 = vmatprep.subr.mxu0 %v2288_v56 }
 0x10c   : > { %v1003_v10 = vsel %vm1002_vm1, %v996_v61, %v1001_v7  ;;  %v1022_v12 = vmul.f32 %v2017_v8, %v999_v1  ;;  %v1031_v25 = vsel %vm583_vm0, %v2249_v19, -inf  ;;  %1935 = vmatpush3.msra.mxu0 %v2288_v56  ;;  %v2302_v61 = vld [vmem:[%s527_s27] sm:$0xff] }
 0x10d   : > { %v2019_v13 = vpop.eup %2018  ;;  %v2245_v14 = vsel %vm1004_vm3, %v1005_v9, %v1003_v10  ;;  %1936 = vmatprep.subr.mxu0 %v2296_v59 }
 0x10e   : > { %v1028_v16 = vsel %vm583_vm0, %v2245_v14, -inf  ;;  %v1015_v17 = vmul.f32 %v2019_v13, %v998_v3  ;;  %v1024_v21 = vsel %vm1023_vm6, %v999_v1, %v1022_v12  ;;  %1937 = vmatpush3.msra.mxu0 %v2296_v59  ;;  %v1072_v0 = vadd.f32 1e-08, %v2245_v14 }
 0x10f   : > { %1029 = vmax.xlane.f32.xlu0 %v1028_v16  ;;  %v2257_v26 = vsel %vm1025_vm8, %v1026_v23, %v1024_v21  ;;  %1938 = vmatprep.subr.mxu0 %v2302_v61 }
 0x110   : > { %v1017_v20 = vsel %vm1016_vm5, %v998_v3, %v1015_v17  ;;  %v1037_v27 = vsel %vm583_vm0, %v2257_v26, -inf  ;;  %1939 = vmatpush3.msra.mxu0 %v2302_v61  ;;  %v1073_v3 = vadd.f32 1e-08, %v2249_v19  ;;  %v1075_v6 = vadd.f32 1e-08, %v2257_v26 }
 0x111   : > { %v2251_v22 = vsel %vm1018_vm7, %v1019_v18, %v1017_v20  ;;  %1960 = vmatprep.subr.mxu0 %v2280_v54 }
 0x112   : > { %v1034_v24 = vsel %vm583_vm0, %v2251_v22, -inf  ;;  %v1074_v2 = vadd.f32 1e-08, %v2251_v22 }
 0x113   : > { %1035 = vmax.xlane.f32.xlu1 %v1034_v24  ;;  %1032 = vmax.xlane.f32.xlu0 %v1031_v25 }
 0x117   : > { %1038 = vmax.xlane.f32.xlu1 %v1037_v27 }
 0x198   : > { %v1030_v28 = vpop.xlane.xlu0 %1029 }
 0x199   : > { %v1040_v29 = vsub.f32 %v2245_v14, %v1030_v28 }
 0x19b   : > { %v1044_v30 = vmul.f32 1.442695, %v1040_v29 }
 0x19c   : > { %v1036_v31 = vpop.xlane.xlu1 %1035  ;;  %v1033_v32 = vpop.xlane.xlu0 %1032 }
 0x19d   : > { %2020 = vpow2.f32 %v1044_v30  ;;  %v1042_v33 = vsub.f32 %v2251_v22, %v1036_v31  ;;  %v1041_v34 = vsub.f32 %v2249_v19, %v1033_v32 }
 0x19f   : > { %v1048_v36 = vmul.f32 1.442695, %v1042_v33  ;;  %v1046_v37 = vmul.f32 1.442695, %v1041_v34 }
 0x1a0   : > { %v1039_v39 = vpop.xlane.xlu1 %1038 }
 0x1a1   : > { %2022 = vpow2.f32 %v1048_v36  ;;  %v1043_v40 = vsub.f32 %v2257_v26, %v1039_v39 }
 0x1a2   : > { %2024 = vpow2.f32 %v1046_v37 }
 0x1a3   : > { %v1050_v41 = vmul.f32 1.442695, %v1043_v40 }
 0x1a5   : > { %2026 = vpow2.f32 %v1050_v41 }
 0x1aa   : > { %v2021_v42 = vpop.eup %2020 }
 0x1ab   : > { %v1052_v44 = vsel %vm583_vm0, %v2021_v42, 0.0 }
 0x1ac   : > { %1053 = vadd.xlane.f32.xlu0 %v1052_v44 }
 0x1ae   : > { %v2023_v46 = vpop.eup %2022 }
 0x1af   : > { %v2025_v47 = vpop.eup %2024  ;;  %v1058_v48 = vsel %vm583_vm0, %v2023_v46, 0.0 }
 0x1b0   : > { %1059 = vadd.xlane.f32.xlu0 %v1058_v48  ;;  %v1055_v49 = vsel %vm583_vm0, %v2025_v47, 0.0 }
 0x1b1   : > { %1056 = vadd.xlane.f32.xlu1 %v1055_v49 }
 0x1b2   : > { %v2268_v51 = vpop.eup %2026 }
 0x1b3   : > { %v1061_v52 = vsel %vm583_vm0, %v2268_v51, 0.0 }
 0x1b5   : > { %1062 = vadd.xlane.f32.xlu1 %v1061_v52 }
 0x235   : > { %v1054_v1 = vpop.xlane.xlu0 %1053 }
 0x236   : > { %2028 = vrcp.f32 %v1054_v1 }
 0x237   : > { %2030 = vrcp.f32 %v1072_v0 }
 0x239   : > { %v1060_v4 = vpop.xlane.xlu0 %1059 }
 0x23a   : > { %v1057_v5 = vpop.xlane.xlu1 %1056  ;;  %2032 = vrcp.f32 %v1060_v4 }
 0x23b   : > { %2034 = vrcp.f32 %v1057_v5 }
 0x23c   : > { %2036 = vrcp.f32 %v1074_v2 }
 0x23d   : > { %2038 = vrcp.f32 %v1073_v3 }
 0x23e   : > { %v1063_v7 = vpop.xlane.xlu1 %1062 }
 0x23f   : > { %2040 = vrcp.f32 %v1063_v7 }
 0x240   : > { %2042 = vrcp.f32 %v1075_v6 }
 0x243   : > { %v2029_v8 = vpop.eup %2028 }
 0x244   : > { %v1065_v9 = vmul.f32 %v2029_v8, %v2021_v42  ;;  %v2031_v10 = vpop.eup %2030 }
 0x246   : > { %v1077_v11 = vmul.f32 %v2031_v10, %v1065_v9 }
 0x247   : > { %v2033_v12 = vpop.eup %2032 }
 0x248   : > { %v2035_v13 = vpop.eup %2034  ;;  %v1084_v14 = vmul.f32 %v1077_v11, %v2215_v38  ;;  %v1088_v15 = vmul.f32 %v1077_v11, %v2225_v50  ;;  %v1069_v16 = vmul.f32 %v2033_v12, %v2023_v46 }
 0x249   : > { %v2037_v17 = vpop.eup %2036  ;;  %v1067_v18 = vmul.f32 %v2035_v13, %v2025_v47 }
 0x24a   : > { %v2039_v19 = vpop.eup %2038  ;;  %1940 = vmatprep.mubr.msk.f32.mxu0 %vm583_vm0, %v1084_v14  ;;  %1954 = vmatprep.mubr.msk.f32.mxu1 %vm583_vm0, %v1088_v15  ;;  %v1081_v20 = vmul.f32 %v2037_v17, %v1069_v16 }
 0x24b   : > { %v1079_v21 = vmul.f32 %v2039_v19, %v1067_v18 }
 0x24c   : > { %v2041_v22 = vpop.eup %2040  ;;  %v1086_v23 = vmul.f32 %v1081_v20, %v2229_v53  ;;  %v1090_v38 = vmul.f32 %v1081_v20, %v2239_v63 }
 0x24d   : > { %v1085_v24 = vmul.f32 %v1079_v21, %v2213_v35  ;;  %v1089_v25 = vmul.f32 %v1079_v21, %v2217_v43  ;;  %v1071_v50 = vmul.f32 %v2041_v22, %v2268_v51  ;;  %v2043_v26 = vpop.eup %2042 }
 0x24f   : > { %1941 = vmatmul.mubr.msk.f32.vlgmr.msra.gmra.mxu0 %vm583_vm0, %v1085_v24  ;;  %1955 = vmatmul.mubr.msk.f32.vlgmr.msra.gmra.mxu1 %vm583_vm0, %v1089_v25  ;;  %v1083_v27 = vmul.f32 %v2043_v26, %v1071_v50 }
 0x250   : > { %1961 = vmatpush3.msra.mxu0 %v2280_v54  ;;  %1975 = vmatpush3.msra.mxu1 %v2282_v55 }
 0x251   : > { %1943 = vmatprep.mubr.msk.f32.mxu0 %vm583_vm0, %v1086_v23  ;;  %1957 = vmatprep.mubr.msk.f32.mxu1 %vm583_vm0, %v1090_v38  ;;  %v1087_v35 = vmul.f32 %v1083_v27, %v2219_v45  ;;  %v1091_v43 = vmul.f32 %v1083_v27, %v2233_v58 }
 0x252   : > { %1962 = vmatprep.subr.mxu0 %v2288_v56  ;;  %1976 = vmatprep.subr.mxu1 %v2290_v57 }
 0x253   : > { %1963 = vmatpush3.msra.mxu0 %v2288_v56  ;;  %1977 = vmatpush3.msra.mxu1 %v2290_v57 }
 0x254   : > { %1964 = vmatprep.subr.mxu0 %v2296_v59  ;;  %1978 = vmatprep.subr.mxu1 %v2298_v60 }
 0x255   : > { %1944 = vmatmul.mubr.msk.f32.gmra.mxu0 %vm583_vm0, %v1087_v35  ;;  %1958 = vmatmul.mubr.msk.f32.gmra.mxu1 %vm583_vm0, %v1091_v43 }
 0x256   : > { %1965 = vmatpush3.msra.mxu0 %v2296_v59  ;;  %1979 = vmatpush3.msra.mxu1 %v2298_v60 }
 0x257   : > { %1966 = vmatprep.subr.mxu0 %v2302_v61  ;;  %1968 = vmatprep.mubr.msk.f32.mxu0 %vm583_vm0, %v1088_v15 }
 0x258   : > { %1980 = vmatprep.subr.mxu1 %v2304_v62  ;;  %1982 = vmatprep.mubr.msk.f32.mxu1 %vm583_vm0, %v1084_v14 }
 0x259   : > { %1967 = vmatpush3.msra.mxu0 %v2302_v61  ;;  %1981 = vmatpush3.msra.mxu1 %v2304_v62 }
 0x25a   : > { %1969 = vmatmul.mubr.msk.f32.vlgmr.msra.gmra.mxu0 %vm583_vm0, %v1089_v25  ;;  %1983 = vmatmul.mubr.msk.f32.vlgmr.msra.gmra.mxu1 %vm583_vm0, %v1085_v24 }
 0x25b   : > { %1971 = vmatprep.mubr.msk.f32.mxu0 %vm583_vm0, %v1090_v38  ;;  %1985 = vmatprep.mubr.msk.f32.mxu1 %vm583_vm0, %v1086_v23 }
 0x25e   : > { %1972 = vmatmul.mubr.msk.f32.gmra.mxu0 %vm583_vm0, %v1091_v43  ;;  %1986 = vmatmul.mubr.msk.f32.gmra.mxu1 %vm583_vm0, %v1087_v35 }
 0x30f   : > { %v1942_v45 = vpop.f32.mrf.mxu0  ;;  %v1956_v53 = vpop.f32.mrf.mxu1 }
 0x310   : > { %v1287_v58 = vsub.f32 %v1942_v45, %v1956_v53 }
 0x311   : > { %v1170_v63 = vpop.f32.mrf.mxu0  ;;  %v1267_v28 = vpop.f32.mrf.mxu1 }
 0x312   : > { %1291 = vst.msk [vmem:[%s545_s15 + $0x8] sm:$0xff] %vm583_vm0, %v1287_v58  ;;  %v1286_v29 = vsub.f32 %v1170_v63, %v1267_v28 }
 0x314   : > { %1290 = vst.msk [vmem:[%s545_s15] sm:$0xff] %vm583_vm0, %v1286_v29 }
 0x315   : > { %v1945_v30 = vpop.f32.mrf.mxu0  ;;  %v1959_v31 = vpop.f32.mrf.mxu1 }
 0x316   : > { %v1289_v32 = vsub.f32 %v1945_v30, %v1959_v31 }
 0x317   : > { %v1180_v33 = vpop.f32.mrf.mxu0  ;;  %v1277_v34 = vpop.f32.mrf.mxu1 }
 0x318   : > { %1293 = vst.msk [vmem:[%s545_s15 + $0x18] sm:$0xff] %vm583_vm0, %v1289_v32  ;;  %v1288_v36 = vsub.f32 %v1180_v33, %v1277_v34 }
 0x31a   : > { %1292 = vst.msk [vmem:[%s545_s15 + $0x10] sm:$0xff] %vm583_vm0, %v1288_v36  ;;  %v1970_v37 = vpop.f32.mrf.mxu0  ;;  %v1984_v39 = vpop.f32.mrf.mxu1 }
 0x31b   : > { %v1451_v40 = vadd.f32 %v1984_v39, %v1970_v37 }
 0x31c   : > { %v1360_v41 = vpop.f32.mrf.mxu0  ;;  %v1445_v42 = vpop.f32.mrf.mxu1 }
 0x31d   : > { %1465 = vst.msk [vmem:[%s554_s18 + $0x8] sm:$0xff] %vm583_vm0, %v1451_v40  ;;  %v1446_v44 = vadd.f32 %v1445_v42, %v1360_v41 }
 0x31e   : > { %v1973_v46 = vpop.f32.mrf.mxu0  ;;  %v1987_v47 = vpop.f32.mrf.mxu1 }
 0x31f   : > { %1464 = vst.msk [vmem:[%s554_s18] sm:$0xff] %vm583_vm0, %v1446_v44  ;;  %v1461_v48 = vadd.f32 %v1987_v47, %v1973_v46 }
 0x320   : > { %v1370_v49 = vpop.f32.mrf.mxu0  ;;  %v1455_v51 = vpop.f32.mrf.mxu1 }
 0x321   : > { %1467 = vst.msk [vmem:[%s554_s18 + $0x18] sm:$0xff] %vm583_vm0, %v1461_v48  ;;  %v1456_v52 = vadd.f32 %v1455_v51, %v1370_v49 }
 0x323   : > { %1466 = vst.msk [vmem:[%s554_s18 + $0x10] sm:$0xff] %vm583_vm0, %v1456_v52 }
 0x324 PF: > { %s19_s29 = sadd.s32 1, %s2066_s29   ;;  %s2391_s27 = smov %s2062_s28 }
 0x325   : > { %p16_p5 = scmp.ge.s32.totalorder %s19_s29, 4   ;;  %s2392_s28 = smov %s2394_s30 }
 0x327   :  { %18 = sbr.rel (!%p16_p5) target bundleno = 2 (0x2), region = 108 }

// kernel: forward.27
= control target key start
LH: loop header
LB: loop body
LE: loop exit
PB: predicated region body
PF: predicated region fallthrough
CT: control target
= control target key end

     0   :  { %vm78_vm0 = vcmask 523264   ;;  %s543_s2 = inlined_call_operand.vmem [shape: bf16[64,128], index: 2, kind: input, shape index: {}]   ;;  %s544_s3 = inlined_call_operand.vmem [shape: bf16[64,128], index: 3, kind: input, shape index: {}]   ;;  %s545_s0 = inlined_call_operand.vmem [shape: bf16[32,64], index: 0, kind: input, shape index: {}]   ;;  %s546_s1 = inlined_call_operand.vmem [shape: bf16[32,64], index: 1, kind: input, shape index: {}]   ;;  %s547_s4 = inlined_call_operand.vmem [shape: f32[32,128], index: 4, kind: output, shape index: {0}]   ;;  %s548_s5 = inlined_call_operand.vmem [shape: f32[32,128], index: 5, kind: output, shape index: {1}]  }
   0x1   :  { %v433_v0 = vld [vmem:[%s543_s2 + $0x18] sm:$0xff]   ;;  %v435_v2 = vld [vmem:[%s543_s2 + $0x10] sm:$0xff]   ;;  %v437_v4 = vld [vmem:[%s543_s2 + $0x8] sm:$0xff]  }
   0x2   :  { %v434_v1 = vld [vmem:[%s544_s3 + $0x18] sm:$0xff]   ;;  %385 = vmatprep.subr.bf16.mxu0 %v433_v0  ;;  %v436_v3 = vld [vmem:[%s544_s3 + $0x10] sm:$0xff]   ;;  %v438_v5 = vld [vmem:[%s544_s3 + $0x8] sm:$0xff]  }
   0x3   :  { %397 = vmatprep.subr.bf16.mxu1 %v434_v1  ;;  %386 = vmatpush3.bf16.msra.mxu0 %v433_v0  ;;  %v439_v6 = vld [vmem:[%s543_s2] sm:$0xff]   ;;  %v443_v10 = vld [vmem:[%s545_s0 + $0x8] sm:$0xff]  }
   0x4   :  { %398 = vmatpush3.bf16.msra.mxu1 %v434_v1  ;;  %387 = vmatprep.subr.bf16.mxu0 %v435_v2  ;;  %v440_v7 = vld [vmem:[%s544_s3] sm:$0xff]   ;;  %v444_v11 = vld [vmem:[%s546_s1 + $0x8] sm:$0xff]  }
   0x5   :  { %399 = vmatprep.subr.bf16.mxu1 %v436_v3  ;;  %v441_v8 = vld [vmem:[%s545_s0] sm:$0xff]  }
   0x6   :  { %v442_v9 = vld [vmem:[%s546_s1] sm:$0xff]   ;;  %393 = vmatprep.mubr.msk.bf16.mxu0 %vm78_vm0, %v441_v8 }
   0x7   :  { %388 = vmatpush3.bf16.msra.mxu0 %v435_v2  ;;  %405 = vmatprep.mubr.msk.bf16.mxu1 %vm78_vm0, %v442_v9 }
   0x8   :  { %400 = vmatpush3.bf16.msra.mxu1 %v436_v3  ;;  %389 = vmatprep.subr.bf16.mxu0 %v437_v4 }
   0x9   :  { %401 = vmatprep.subr.bf16.mxu1 %v438_v5 }
   0xb   :  { %390 = vmatpush3.bf16.msra.mxu0 %v437_v4 }
   0xc   :  { %402 = vmatpush3.bf16.msra.mxu1 %v438_v5  ;;  %391 = vmatprep.subr.bf16.mxu0 %v439_v6 }
   0xd   :  { %403 = vmatprep.subr.bf16.mxu1 %v440_v7 }
   0xf   :  { %392 = vmatpush3.bf16.msra.mxu0 %v439_v6 }
  0x10   :  { %404 = vmatpush3.bf16.msra.mxu1 %v440_v7  ;;  %409 = vmatprep.subr.bf16.mxu0 %v433_v0 }
  0x11   :  { %421 = vmatprep.subr.bf16.mxu1 %v434_v1 }
  0x12   :  { %394 = vmatmul.mubr.msk.bf16.vlgmr.msra.gmra.mxu0 %vm78_vm0, %v443_v10 }
  0x13   :  { %406 = vmatmul.mubr.msk.bf16.vlgmr.msra.gmra.mxu1 %vm78_vm0, %v444_v11  ;;  %410 = vmatpush3.bf16.msra.mxu0 %v433_v0 }
  0x14   :  { %422 = vmatpush3.bf16.msra.mxu1 %v434_v1  ;;  %411 = vmatprep.subr.bf16.mxu0 %v435_v2 }
  0x15   :  { %423 = vmatprep.subr.bf16.mxu1 %v436_v3  ;;  %417 = vmatprep.mubr.msk.bf16.mxu0 %vm78_vm0, %v442_v9 }
  0x16   :  { %429 = vmatprep.mubr.msk.bf16.mxu1 %vm78_vm0, %v441_v8 }
  0x17   :  { %412 = vmatpush3.bf16.msra.mxu0 %v435_v2 }
  0x18   :  { %424 = vmatpush3.bf16.msra.mxu1 %v436_v3  ;;  %413 = vmatprep.subr.bf16.mxu0 %v437_v4 }
  0x19   :  { %425 = vmatprep.subr.bf16.mxu1 %v438_v5 }
  0x1b   :  { %414 = vmatpush3.bf16.msra.mxu0 %v437_v4 }
  0x1c   :  { %426 = vmatpush3.bf16.msra.mxu1 %v438_v5  ;;  %415 = vmatprep.subr.bf16.mxu0 %v439_v6 }
  0x1d   :  { %427 = vmatprep.subr.bf16.mxu1 %v440_v7 }
  0x1f   :  { %416 = vmatpush3.bf16.msra.mxu0 %v439_v6 }
  0x20   :  { %428 = vmatpush3.bf16.msra.mxu1 %v440_v7 }
  0x22   :  { %418 = vmatmul.mubr.msk.bf16.vlgmr.msra.gmra.mxu0 %vm78_vm0, %v444_v11 }
  0x23   :  { %430 = vmatmul.mubr.msk.bf16.vlgmr.msra.gmra.mxu1 %vm78_vm0, %v443_v10 }
  0xd2   :  { %v395_v12 = vpop.f32.mrf.mxu0 }
  0xd3   :  { %v407_v13 = vpop.f32.mrf.mxu1 }
  0xd4   :  { %v274_v14 = vsub.f32 %v395_v12, %v407_v13  ;;  %v119_v15 = vpop.f32.mrf.mxu0 }
  0xd5   :  { %v208_v16 = vpop.f32.mrf.mxu1 }
  0xd6   :  { %327 = vst [vmem:[%s547_s4 + $0x10] sm:$0xff] %v274_v14  ;;  %v272_v17 = vsub.f32 %v119_v15, %v208_v16  ;;  %v396_v18 = vpop.f32.mrf.mxu0 }
  0xd7   :  { %v408_v19 = vpop.f32.mrf.mxu1 }
  0xd8   :  { %325 = vst [vmem:[%s547_s4] sm:$0xff] %v272_v17  ;;  %v275_v20 = vsub.f32 %v396_v18, %v408_v19  ;;  %v122_v21 = vpop.f32.mrf.mxu0 }
  0xd9   :  { %v211_v22 = vpop.f32.mrf.mxu1 }
  0xda   :  { %328 = vst [vmem:[%s547_s4 + $0x18] sm:$0xff] %v275_v20  ;;  %v273_v23 = vsub.f32 %v122_v21, %v211_v22 }
  0xdc   :  { %326 = vst [vmem:[%s547_s4 + $0x8] sm:$0xff] %v273_v23 }
  0xe2   :  { %v419_v24 = vpop.f32.mrf.mxu0 }
  0xe3   :  { %v431_v25 = vpop.f32.mrf.mxu1 }
  0xe4   :  { %v319_v26 = vadd.f32 %v431_v25, %v419_v24  ;;  %v257_v27 = vpop.f32.mrf.mxu0 }
  0xe5   :  { %v310_v28 = vpop.f32.mrf.mxu1 }
  0xe6   :  { %331 = vst [vmem:[%s548_s5 + $0x10] sm:$0xff] %v319_v26  ;;  %v311_v29 = vadd.f32 %v310_v28, %v257_v27  ;;  %v420_v30 = vpop.f32.mrf.mxu0 }
  0xe7   :  { %v432_v31 = vpop.f32.mrf.mxu1 }
  0xe8   :  { %329 = vst [vmem:[%s548_s5] sm:$0xff] %v311_v29  ;;  %v322_v32 = vadd.f32 %v432_v31, %v420_v30  ;;  %v260_v33 = vpop.f32.mrf.mxu0 }
  0xe9   :  { %v313_v34 = vpop.f32.mrf.mxu1 }
  0xea   :  { %332 = vst [vmem:[%s548_s5 + $0x18] sm:$0xff] %v322_v32  ;;  %v314_v35 = vadd.f32 %v313_v34, %v260_v33 }
  0xec   :  { %330 = vst [vmem:[%s548_s5 + $0x8] sm:$0xff] %v314_v35 }

// kernel: forward.28
= control target key start
LH: loop header
LB: loop body
LE: loop exit
PB: predicated region body
PF: predicated region fallthrough
CT: control target
= control target key end

     0   :  { %v666_v1 = vmov 0   ;;  %vm94_vm0 = vcmask 523264   ;;  %s982_s2 = inlined_call_operand.vmem [shape: bf16[64,256], index: 2, kind: input, shape index: {}]   ;;  %s983_s3 = inlined_call_operand.vmem [shape: bf16[64,256], index: 3, kind: input, shape index: {}]   ;;  %s984_s0 = inlined_call_operand.vmem [shape: bf16[32,64], index: 0, kind: input, shape index: {}]   ;;  %s985_s1 = inlined_call_operand.vmem [shape: bf16[32,64], index: 1, kind: input, shape index: {}]   ;;  %s986_s4 = inlined_call_operand.vmem [shape: f32[32,256], index: 4, kind: output, shape index: {0}]   ;;  %s987_s5 = inlined_call_operand.vmem [shape: f32[32,256], index: 5, kind: output, shape index: {1}]  }
   0x1   :  { %v590_v0 = vld [vmem:[%s982_s2 + $0x34] ss:$8 sps:$4 sm:$0xff]   ;;  %133 = vmatprep.mubr.bf16.mxu0 %v666_v1  ;;  %242 = vmatprep.mubr.bf16.mxu1 %v666_v1  ;;  %v594_v3 = vld [vmem:[%s982_s2 + $0x30] ss:$8 sps:$4 sm:$0xff]   ;;  %v596_v5 = vld [vmem:[%s982_s2 + $0x24] ss:$8 sps:$4 sm:$0xff]  }
   0x2   :  { %v592_v2 = vld [vmem:[%s983_s3 + $0x34] ss:$8 sps:$4 sm:$0xff]   ;;  %109 = vmatprep.subr.bf16.mxu0 %v590_v0  ;;  %v595_v4 = vld [vmem:[%s983_s3 + $0x30] ss:$8 sps:$4 sm:$0xff]   ;;  %v598_v6 = vld [vmem:[%s983_s3 + $0x24] ss:$8 sps:$4 sm:$0xff]  }
   0x3   :  { %218 = vmatprep.subr.bf16.mxu1 %v592_v2  ;;  %110 = vmatpush1.bf16.msra.mxu0 %v594_v3  ;;  %v600_v7 = vld [vmem:[%s982_s2 + $0x20] ss:$8 sps:$4 sm:$0xff]   ;;  %v602_v9 = vld [vmem:[%s982_s2 + $0x14] ss:$8 sps:$4 sm:$0xff]   ;;  %v606_v11 = vld [vmem:[%s982_s2 + $0x10] ss:$8 sps:$4 sm:$0xff]  }
   0x4   :  { %219 = vmatpush1.bf16.msra.mxu1 %v595_v4  ;;  %111 = vmatprep.subr.bf16.mxu0 %v596_v5  ;;  %v601_v8 = vld [vmem:[%s983_s3 + $0x20] ss:$8 sps:$4 sm:$0xff]   ;;  %v604_v10 = vld [vmem:[%s983_s3 + $0x14] ss:$8 sps:$4 sm:$0xff]   ;;  %v607_v12 = vld [vmem:[%s983_s3 + $0x10] ss:$8 sps:$4 sm:$0xff]  }
   0x5   :  { %220 = vmatprep.subr.bf16.mxu1 %v598_v6  ;;  %v608_v13 = vld [vmem:[%s982_s2 + $0x4] ss:$8 sps:$4 sm:$0xff]   ;;  %v612_v15 = vld [vmem:[%s982_s2] ss:$8 sps:$4 sm:$0xff]  }
   0x6   :  { %v610_v14 = vld [vmem:[%s983_s3 + $0x4] ss:$8 sps:$4 sm:$0xff]   ;;  %v613_v16 = vld [vmem:[%s983_s3] ss:$8 sps:$4 sm:$0xff]  }
   0x7   :  { %112 = vmatpush1.bf16.msra.mxu0 %v600_v7  ;;  %v614_v17 = vld [vmem:[%s984_s0] sm:$0xff]   ;;  %v616_v19 = vld [vmem:[%s984_s0 + $0x8] sm:$0xff]  }
   0x8   :  { %221 = vmatpush1.bf16.msra.mxu1 %v601_v8  ;;  %113 = vmatprep.subr.bf16.mxu0 %v602_v9  ;;  %v615_v18 = vld [vmem:[%s985_s1] sm:$0xff]   ;;  %v617_v20 = vld [vmem:[%s985_s1 + $0x8] sm:$0xff]  }
   0x9   :  { %222 = vmatprep.subr.bf16.mxu1 %v604_v10 }
   0xb   :  { %114 = vmatpush1.bf16.msra.mxu0 %v606_v11 }
   0xc   :  { %223 = vmatpush1.bf16.msra.mxu1 %v607_v12  ;;  %115 = vmatprep.subr.bf16.mxu0 %v608_v13 }
   0xd   :  { %224 = vmatprep.subr.bf16.mxu1 %v610_v14 }
   0xf   :  { %116 = vmatpush1.bf16.msra.mxu0 %v612_v15 }
  0x10   :  { %225 = vmatpush1.bf16.msra.mxu1 %v613_v16  ;;  %271 = vmatprep.subr.bf16.mxu0 %v590_v0 }
  0x11   :  { %332 = vmatprep.subr.bf16.mxu1 %v592_v2 }
  0x12   :  { %571 = vmatmul.mubr.msk.bf16.vlgmr.msra.gmra.mxu0 %vm94_vm0, %v614_v17 }
  0x13   :  { %583 = vmatmul.mubr.msk.bf16.vlgmr.msra.gmra.mxu1 %vm94_vm0, %v615_v18  ;;  %272 = vmatpush1.bf16.msra.mxu0 %v594_v3 }
  0x14   :  { %333 = vmatpush1.bf16.msra.mxu1 %v595_v4  ;;  %273 = vmatprep.subr.bf16.mxu0 %v596_v5 }
  0x15   :  { %334 = vmatprep.subr.bf16.mxu1 %v598_v6  ;;  %143 = vmatprep.mubr.bf16.mxu0 %v666_v1 }
  0x16   :  { %252 = vmatprep.mubr.bf16.mxu1 %v666_v1 }
  0x17   :  { %274 = vmatpush1.bf16.msra.mxu0 %v600_v7 }
  0x18   :  { %335 = vmatpush1.bf16.msra.mxu1 %v601_v8  ;;  %275 = vmatprep.subr.bf16.mxu0 %v602_v9 }
  0x19   :  { %336 = vmatprep.subr.bf16.mxu1 %v604_v10 }
  0x1a   :  { %572 = vmatmul.mubr.msk.bf16.gmra.mxu0 %vm94_vm0, %v616_v19 }
  0x1b   :  { %584 = vmatmul.mubr.msk.bf16.gmra.mxu1 %vm94_vm0, %v617_v20  ;;  %276 = vmatpush1.bf16.msra.mxu0 %v606_v11 }
  0x1c   :  { %337 = vmatpush1.bf16.msra.mxu1 %v607_v12  ;;  %277 = vmatprep.subr.bf16.mxu0 %v608_v13 }
  0x1d   :  { %338 = vmatprep.subr.bf16.mxu1 %v610_v14  ;;  %295 = vmatprep.mubr.bf16.mxu0 %v666_v1 }
  0x1e   :  { %356 = vmatprep.mubr.bf16.mxu1 %v666_v1 }
  0x1f   :  { %278 = vmatpush1.bf16.msra.mxu0 %v612_v15 }
  0x20   :  { %339 = vmatpush1.bf16.msra.mxu1 %v613_v16 }
  0x22   :  { %585 = vmatmul.mubr.msk.bf16.vlgmr.msra.gmra.mxu0 %vm94_vm0, %v615_v18 }
  0x23   :  { %587 = vmatmul.mubr.msk.bf16.vlgmr.msra.gmra.mxu1 %vm94_vm0, %v614_v17  ;;  %305 = vmatprep.mubr.bf16.mxu0 %v666_v1 }
  0x24   :  { %366 = vmatprep.mubr.bf16.mxu1 %v666_v1 }
  0x2a   :  { %586 = vmatmul.mubr.msk.bf16.gmra.mxu0 %vm94_vm0, %v617_v20 }
  0x2b   :  { %588 = vmatmul.mubr.msk.bf16.gmra.mxu1 %vm94_vm0, %v616_v19 }
  0xd2   :  { %v135_v21 = vpop.f32.mrf.mxu0 }
  0xd3   :  { %v244_v22 = vpop.f32.mrf.mxu1 }
  0xd4   :  { %v137_v23 = vpop.f32.mrf.mxu0  ;;  %v773_v37 = vsub.f32 %v135_v21, %v244_v22 }
  0xd5   :  { %v246_v24 = vpop.f32.mrf.mxu1 }
  0xd6   :  { %v139_v25 = vpop.f32.mrf.mxu0  ;;  %v777_v41 = vsub.f32 %v137_v23, %v246_v24  ;;  %v377_v44 = vmul.f32 %v773_v37, %v773_v37 }
  0xd7   :  { %v248_v26 = vpop.f32.mrf.mxu1 }
  0xd8   :  { %v141_v27 = vpop.f32.mrf.mxu0  ;;  %v785_v49 = vsub.f32 %v139_v25, %v248_v26  ;;  %v378_v53 = vmul.f32 %v777_v41, %v777_v41 }
  0xd9   :  { %v250_v28 = vpop.f32.mrf.mxu1 }
  0xda   :  { %v145_v29 = vpop.f32.mrf.mxu0  ;;  %v793_v56 = vsub.f32 %v141_v27, %v250_v28  ;;  %v379_v63 = vmul.f32 %v785_v49, %v785_v49 }
  0xdb   :  { %v254_v30 = vpop.f32.mrf.mxu1 }
  0xdc   :  { %v147_v31 = vpop.f32.mrf.mxu0  ;;  %v795_v57 = vsub.f32 %v145_v29, %v254_v30  ;;  %v380_v7 = vmul.f32 %v793_v56, %v793_v56 }
  0xdd   :  { %v256_v32 = vpop.f32.mrf.mxu1 }
  0xde   :  { %v149_v33 = vpop.f32.mrf.mxu0  ;;  %v381_v8 = vmul.f32 %v795_v57, %v795_v57  ;;  %v815_v9 = vsub.f32 %v147_v31, %v256_v32 }
  0xdf   :  { %v258_v34 = vpop.f32.mrf.mxu1 }
  0xe0   :  { %v151_v35 = vpop.f32.mrf.mxu0  ;;  %v825_v18 = vsub.f32 %v149_v33, %v258_v34  ;;  %v382_v21 = vmul.f32 %v815_v9, %v815_v9 }
  0xe1   :  { %v260_v36 = vpop.f32.mrf.mxu1 }
  0xe2   :  { %v297_v38 = vpop.f32.mrf.mxu0  ;;  %v827_v19 = vsub.f32 %v151_v35, %v260_v36  ;;  %v383_v25 = vmul.f32 %v825_v18, %v825_v18 }
  0xe3   :  { %v358_v39 = vpop.f32.mrf.mxu1 }
  0xe4   :  { %v775_v40 = vadd.f32 %v358_v39, %v297_v38  ;;  %v299_v42 = vpop.f32.mrf.mxu0  ;;  %v384_v26 = vmul.f32 %v827_v19, %v827_v19 }
  0xe5   :  { %v360_v43 = vpop.f32.mrf.mxu1 }
  0xe6   :  { %v385_v45 = vmul.f32 %v775_v40, %v775_v40  ;;  %v783_v46 = vadd.f32 %v360_v43, %v299_v42  ;;  %v301_v47 = vpop.f32.mrf.mxu0 }
  0xe7   :  { %v362_v48 = vpop.f32.mrf.mxu1 }
  0xe8   :  { %v393_v50 = vadd.f32 %v385_v45, %v377_v44  ;;  %v386_v51 = vmul.f32 %v783_v46, %v783_v46  ;;  %v789_v52 = vadd.f32 %v362_v48, %v301_v47  ;;  %v303_v54 = vpop.f32.mrf.mxu0 }
  0xe9   :  { %v364_v55 = vpop.f32.mrf.mxu1 }
  0xea   :  { %618 = vrsqrt.f32 %v393_v50  ;;  %v394_v58 = vadd.f32 %v386_v51, %v378_v53  ;;  %v387_v59 = vmul.f32 %v789_v52, %v789_v52  ;;  %v799_v60 = vadd.f32 %v364_v55, %v303_v54  ;;  %v307_v61 = vpop.f32.mrf.mxu0 }
  0xeb   :  { %v368_v62 = vpop.f32.mrf.mxu1  ;;  %vm403_vm1 = vcmp.eq.f32.partialorder %v393_v50, inf  ;;  %v406_v31 = vand.u32 2147483648, %v393_v50  ;;  %vm405_vm2 = vcmp.eq.f32.partialorder %v393_v50, 0.0 }
  0xec   :  { %v803_v0 = vadd.f32 %v368_v62, %v307_v61  ;;  %620 = vrsqrt.f32 %v394_v58  ;;  %v309_v1 = vpop.f32.mrf.mxu0  ;;  %v395_v3 = vadd.f32 %v387_v59, %v379_v63  ;;  %v388_v4 = vmul.f32 %v799_v60, %v799_v60 }
  0xed   :  { %v370_v2 = vpop.f32.mrf.mxu1  ;;  %vm410_vm3 = vcmp.eq.f32.partialorder %v394_v58, inf  ;;  %v413_v38 = vand.u32 2147483648, %v394_v58  ;;  %vm412_vm4 = vcmp.eq.f32.partialorder %v394_v58, 0.0 }
  0xee   :  { %v389_v5 = vmul.f32 %v803_v0, %v803_v0  ;;  %v809_v6 = vadd.f32 %v370_v2, %v309_v1  ;;  %v311_v10 = vpop.f32.mrf.mxu0  ;;  %622 = vrsqrt.f32 %v395_v3  ;;  %v817_v12 = vadd.f32 %v388_v4, %v380_v7 }
  0xef   :  { %v372_v11 = vpop.f32.mrf.mxu1  ;;  %vm417_vm5 = vcmp.eq.f32.partialorder %v395_v3, inf  ;;  %v420_v48 = vand.u32 2147483648, %v395_v3  ;;  %vm419_vm6 = vcmp.eq.f32.partialorder %v395_v3, 0.0 }
  0xf0   :  { %v819_v13 = vadd.f32 %v389_v5, %v381_v8  ;;  %v390_v14 = vmul.f32 %v809_v6, %v809_v6  ;;  %v823_v15 = vadd.f32 %v372_v11, %v311_v10  ;;  %v313_v16 = vpop.f32.mrf.mxu0  ;;  %624 = vrsqrt.f32 %v817_v12 }
  0xf1   :  { %v374_v17 = vpop.f32.mrf.mxu1  ;;  %vm424_vm7 = vcmp.eq.f32.partialorder %v817_v12, inf  ;;  %v427_v61 = vand.u32 2147483648, %v817_v12  ;;  %vm426_vm8 = vcmp.eq.f32.partialorder %v817_v12, 0.0 }
  0xf2   :  { %v829_v20 = vadd.f32 %v374_v17, %v313_v16  ;;  %626 = vrsqrt.f32 %v819_v13  ;;  %v835_v22 = vadd.f32 %v390_v14, %v382_v21  ;;  %v391_v23 = vmul.f32 %v823_v15, %v823_v15 }
  0xf3   :  { %vm431_vm9 = vcmp.eq.f32.partialorder %v819_v13, inf  ;;  %vm433_vm10 = vcmp.eq.f32.partialorder %v819_v13, 0.0  ;;  %v434_v5 = vand.u32 2147483648, %v819_v13 }
  0xf4   :  { %v392_v24 = vmul.f32 %v829_v20, %v829_v20  ;;  %628 = vrsqrt.f32 %v835_v22  ;;  %v846_v29 = vadd.f32 %v391_v23, %v383_v25  ;;  %vm438_vm11 = vcmp.eq.f32.partialorder %v835_v22, inf }
  0xf5   :  { %vm440_vm12 = vcmp.eq.f32.partialorder %v835_v22, 0.0  ;;  %v441_v14 = vand.u32 2147483648, %v835_v22 }
  0xf6   :  { %v848_v30 = vadd.f32 %v392_v24, %v384_v26  ;;  %630 = vrsqrt.f32 %v846_v29  ;;  %vm445_vm13 = vcmp.eq.f32.partialorder %v846_v29, inf  ;;  %vm447_vm14 = vcmp.eq.f32.partialorder %v846_v29, 0.0 }
  0xf7   :  { %v619_v27 = vpop.eup %618  ;;  %v448_v23 = vand.u32 2147483648, %v846_v29 }
  0xf8   :  { %v402_v28 = vmul.f32 %v619_v27, %v393_v50  ;;  %632 = vrsqrt.f32 %v848_v30  ;;  %vm452_vm15 = vcmp.eq.f32.partialorder %v848_v30, inf  ;;  %vm454_vm0 = vcmp.eq.f32.partialorder %v848_v30, 0.0 }
  0xf9   :  { %v621_v32 = vpop.eup %620 }
  0xfa   :  { %v404_v33 = vsel %vm403_vm1, %v393_v50, %v402_v28  ;;  %v409_v35 = vmul.f32 %v621_v32, %v394_v58  ;;  %v455_v32 = vand.u32 2147483648, %v848_v30 }
  0xfb   :  { %v407_v34 = vsel %vm405_vm2, %v406_v31, %v404_v33  ;;  %v623_v39 = vpop.eup %622 }
  0xfc   :  { %v465_v36 = vmul.f32 0.70710677, %v407_v34  ;;  %v411_v42 = vsel %vm410_vm3, %v394_v58, %v409_v35  ;;  %v497_v43 = vadd.f32 1e-08, %v407_v34  ;;  %v416_v45 = vmul.f32 %v623_v39, %v395_v3 }
  0xfd   :  { %v852_v44 = vsel %vm412_vm4, %v413_v38, %v411_v42  ;;  %v625_v50 = vpop.eup %624  ;;  %v457_v25 = vmul.f32 0.5, %v407_v34 }
  0xfe   :  { %634 = verf.f32 %v465_v36  ;;  %v466_v47 = vmul.f32 0.70710677, %v852_v44  ;;  %v418_v51 = vsel %vm417_vm5, %v395_v3, %v416_v45  ;;  %v498_v54 = vadd.f32 1e-08, %v852_v44 }
  0xff   :  { %v627_v53 = vpop.eup %626  ;;  %v856_v55 = vsel %vm419_vm6, %v420_v48, %v418_v51  ;;  %v423_v58 = vmul.f32 %v625_v50, %v817_v12 }
 0x100   :  { %636 = verf.f32 %v466_v47  ;;  %v467_v59 = vmul.f32 0.70710677, %v856_v55  ;;  %v430_v63 = vmul.f32 %v627_v53, %v819_v13  ;;  %v499_v2 = vadd.f32 1e-08, %v856_v55 }
 0x101   :  { %638 = vrcp.f32 %v497_v43  ;;  %v425_v62 = vsel %vm424_vm7, %v817_v12, %v423_v58  ;;  %v629_v1 = vpop.eup %628  ;;  %v458_v47 = vmul.f32 0.5, %v852_v44 }
 0x102   :  { %640 = verf.f32 %v467_v59  ;;  %v866_v3 = vsel %vm426_vm8, %v427_v61, %v425_v62  ;;  %v432_v7 = vsel %vm431_vm9, %v819_v13, %v430_v63  ;;  %v437_v8 = vmul.f32 %v629_v1, %v835_v22 }
 0x103   :  { %642 = vrcp.f32 %v498_v54  ;;  %v468_v4 = vmul.f32 0.70710677, %v866_v3  ;;  %v631_v10 = vpop.eup %630  ;;  %v500_v11 = vadd.f32 1e-08, %v866_v3  ;;  %v877_v12 = vsel %vm433_vm10, %v434_v5, %v432_v7 }
 0x104   :  { %v469_v17 = vmul.f32 0.70710677, %v877_v12  ;;  %v439_v13 = vsel %vm438_vm11, %v835_v22, %v437_v8  ;;  %v444_v21 = vmul.f32 %v631_v10, %v846_v29  ;;  %v501_v26 = vadd.f32 1e-08, %v877_v12 }
 0x105   :  { %644 = verf.f32 %v468_v4  ;;  %v633_v16 = vpop.eup %632  ;;  %v890_v27 = vsel %vm440_vm12, %v441_v14, %v439_v13  ;;  %v459_v54 = vmul.f32 0.5, %v856_v55 }
 0x106   :  { %646 = vrcp.f32 %v499_v2  ;;  %v451_v24 = vmul.f32 %v633_v16, %v848_v30  ;;  %v470_v31 = vmul.f32 0.70710677, %v890_v27  ;;  %v446_v34 = vsel %vm445_vm13, %v846_v29, %v444_v21 }
 0x107   :  { %648 = verf.f32 %v469_v17  ;;  %v502_v22 = vadd.f32 1e-08, %v890_v27  ;;  %v903_v36 = vsel %vm447_vm14, %v448_v23, %v446_v34 }
 0x108   :  { %650 = vrcp.f32 %v500_v11  ;;  %v453_v35 = vsel %vm452_vm15, %v848_v30, %v451_v24  ;;  %v471_v43 = vmul.f32 0.70710677, %v903_v36  ;;  %v503_v51 = vadd.f32 1e-08, %v903_v36 }
 0x109   :  { %652 = verf.f32 %v470_v31  ;;  %v905_v38 = vsel %vm454_vm0, %v455_v32, %v453_v35 }
 0x10a   :  { %654 = vrcp.f32 %v501_v26  ;;  %v472_v30 = vmul.f32 0.70710677, %v905_v38  ;;  %v504_v58 = vadd.f32 1e-08, %v905_v38  ;;  %v464_v35 = vmul.f32 0.5, %v905_v38 }
 0x10b   :  { %v635_v28 = vpop.eup %634  ;;  %656 = verf.f32 %v471_v43 }
 0x10c   :  { %v481_v33 = vadd.f32 1.0, %v635_v28  ;;  %658 = vrcp.f32 %v502_v22 }
 0x10d   :  { %v637_v39 = vpop.eup %636  ;;  %660 = verf.f32 %v472_v30 }
 0x10e   :  { %v489_v42 = vmul.f32 %v481_v33, %v457_v25  ;;  %v639_v45 = vpop.eup %638  ;;  %v482_v48 = vadd.f32 1.0, %v637_v39  ;;  %662 = vrcp.f32 %v503_v51 }
 0x10f   :  { %v641_v29 = vpop.eup %640  ;;  %664 = vrcp.f32 %v504_v58 }
 0x110   :  { %v506_v50 = vmul.f32 %v639_v45, %v489_v42  ;;  %v490_v53 = vmul.f32 %v482_v48, %v458_v47  ;;  %v643_v59 = vpop.eup %642  ;;  %v483_v44 = vadd.f32 1.0, %v641_v29 }
 0x112   :  { %v521_v61 = vmul.f32 %v506_v50, %v773_v37  ;;  %v529_v62 = vmul.f32 %v506_v50, %v775_v40  ;;  %v508_v63 = vmul.f32 %v643_v59, %v490_v53  ;;  %v645_v1 = vpop.eup %644  ;;  %v491_v55 = vmul.f32 %v483_v44, %v459_v54 }
 0x113   :  { %v647_v2 = vpop.eup %646  ;;  %v460_v40 = vmul.f32 0.5, %v866_v3  ;;  %v484_v5 = vadd.f32 1.0, %v645_v1  ;;  %v461_v3 = vmul.f32 0.5, %v877_v12 }
 0x114   :  { %537 = vst [vmem:[%s986_s4] sm:$0xff] %v521_v61  ;;  %545 = vst [vmem:[%s987_s5] sm:$0xff] %v529_v62  ;;  %v522_v4 = vmul.f32 %v508_v63, %v777_v41  ;;  %v530_v37 = vmul.f32 %v508_v63, %v783_v46  ;;  %v510_v7 = vmul.f32 %v647_v2, %v491_v55  ;;  %v649_v8 = vpop.eup %648 }
 0x115   :  { %v492_v10 = vmul.f32 %v484_v5, %v460_v40  ;;  %v651_v11 = vpop.eup %650  ;;  %v485_v14 = vadd.f32 1.0, %v649_v8 }
 0x116   :  { %538 = vst [vmem:[%s986_s4 + $0x8] sm:$0xff] %v522_v4  ;;  %546 = vst [vmem:[%s987_s5 + $0x8] sm:$0xff] %v530_v37  ;;  %v523_v41 = vmul.f32 %v510_v7, %v785_v49  ;;  %v531_v46 = vmul.f32 %v510_v7, %v789_v52  ;;  %v653_v17 = vpop.eup %652  ;;  %v462_v52 = vmul.f32 0.5, %v890_v27 }
 0x117   :  { %v512_v16 = vmul.f32 %v651_v11, %v492_v10  ;;  %v493_v13 = vmul.f32 %v485_v14, %v461_v3  ;;  %v655_v21 = vpop.eup %654  ;;  %v486_v12 = vadd.f32 1.0, %v653_v17 }
 0x118   :  { %539 = vst [vmem:[%s986_s4 + $0x10] sm:$0xff] %v523_v41  ;;  %547 = vst [vmem:[%s987_s5 + $0x10] sm:$0xff] %v531_v46  ;;  %v657_v25 = vpop.eup %656 }
 0x119   :  { %v524_v23 = vmul.f32 %v512_v16, %v793_v56  ;;  %v532_v49 = vmul.f32 %v512_v16, %v799_v60  ;;  %v514_v24 = vmul.f32 %v655_v21, %v493_v13  ;;  %v494_v26 = vmul.f32 %v486_v12, %v462_v52  ;;  %v659_v28 = vpop.eup %658 }
 0x11a   :  { %v463_v60 = vmul.f32 0.5, %v903_v36  ;;  %v487_v27 = vadd.f32 1.0, %v657_v25  ;;  %v661_v32 = vpop.eup %660 }
 0x11b   :  { %540 = vst [vmem:[%s986_s4 + $0x18] sm:$0xff] %v524_v23  ;;  %548 = vst [vmem:[%s987_s5 + $0x18] sm:$0xff] %v532_v49  ;;  %v525_v31 = vmul.f32 %v514_v24, %v795_v57  ;;  %v533_v56 = vmul.f32 %v514_v24, %v803_v0  ;;  %v516_v33 = vmul.f32 %v659_v28, %v494_v26  ;;  %v488_v22 = vadd.f32 1.0, %v661_v32  ;;  %v663_v57 = vpop.eup %662 }
 0x11c   :  { %v495_v34 = vmul.f32 %v487_v27, %v463_v60  ;;  %v665_v43 = vpop.eup %664 }
 0x11d   :  { %541 = vst [vmem:[%s986_s4 + $0x20] sm:$0xff] %v525_v31  ;;  %549 = vst [vmem:[%s987_s5 + $0x20] sm:$0xff] %v533_v56  ;;  %v526_v0 = vmul.f32 %v516_v33, %v815_v9  ;;  %v534_v36 = vmul.f32 %v516_v33, %v809_v6  ;;  %v496_v42 = vmul.f32 %v488_v22, %v464_v35 }
 0x11e   :  { %v518_v39 = vmul.f32 %v663_v57, %v495_v34 }
 0x11f   :  { %542 = vst [vmem:[%s986_s4 + $0x28] sm:$0xff] %v526_v0  ;;  %550 = vst [vmem:[%s987_s5 + $0x28] sm:$0xff] %v534_v36  ;;  %v520_v47 = vmul.f32 %v665_v43, %v496_v42 }
 0x120   :  { %v527_v45 = vmul.f32 %v518_v39, %v825_v18  ;;  %v535_v38 = vmul.f32 %v518_v39, %v823_v15 }
 0x121   :  { %v528_v6 = vmul.f32 %v520_v47, %v827_v19  ;;  %v536_v9 = vmul.f32 %v520_v47, %v829_v20 }
 0x122   :  { %543 = vst [vmem:[%s986_s4 + $0x30] sm:$0xff] %v527_v45  ;;  %551 = vst [vmem:[%s987_s5 + $0x30] sm:$0xff] %v535_v38 }
 0x123   :  { %544 = vst [vmem:[%s986_s4 + $0x38] sm:$0xff] %v528_v6  ;;  %552 = vst [vmem:[%s987_s5 + $0x38] sm:$0xff] %v536_v9 }

// kernel: forward.29
= control target key start
LH: loop header
LB: loop body
LE: loop exit
PB: predicated region body
PF: predicated region fallthrough
CT: control target
= control target key end

     0   :  { %s998_s2 = inlined_call_operand.vmem [shape: bf16[256,128], index: 2, kind: input, shape index: {}]   ;;  %s999_s3 = inlined_call_operand.vmem [shape: bf16[256,128], index: 3, kind: input, shape index: {}]   ;;  %s1000_s0 = inlined_call_operand.vmem [shape: bf16[32,256], index: 0, kind: input, shape index: {}]   ;;  %s1001_s1 = inlined_call_operand.vmem [shape: bf16[32,256], index: 1, kind: input, shape index: {}]   ;;  %s1002_s4 = inlined_call_operand.vmem [shape: f32[32,128], index: 4, kind: output, shape index: {0}]   ;;  %s1003_s5 = inlined_call_operand.vmem [shape: f32[32,128], index: 5, kind: output, shape index: {1}]  }
   0x1   :  { %v769_v0 = vld [vmem:[%s998_s2 + $0x78] sm:$0xff]   ;;  %v792_v4 = vld [vmem:[%s998_s2 + $0x70] sm:$0xff]   ;;  %v816_v8 = vld [vmem:[%s998_s2 + $0x68] sm:$0xff]  }
   0x2   :  { %v774_v1 = vld [vmem:[%s999_s3 + $0x78] sm:$0xff]   ;;  %580 = vmatprep.subr.bf16.mxu0 %v769_v0  ;;  %v798_v5 = vld [vmem:[%s999_s3 + $0x70] sm:$0xff]   ;;  %v822_v9 = vld [vmem:[%s999_s3 + $0x68] sm:$0xff]  }
   0x3   :  { %v780_v2 = vld [vmem:[%s998_s2 + $0x38] sm:$0xff]   ;;  %608 = vmatprep.subr.bf16.mxu1 %v774_v1  ;;  %v804_v6 = vld [vmem:[%s998_s2 + $0x30] sm:$0xff]   ;;  %v828_v10 = vld [vmem:[%s998_s2 + $0x28] sm:$0xff]  }
   0x4   :  { %v786_v3 = vld [vmem:[%s999_s3 + $0x38] sm:$0xff]   ;;  %581 = vmatpush3.bf16.msra.mxu0 %v780_v2  ;;  %v810_v7 = vld [vmem:[%s999_s3 + $0x30] sm:$0xff]   ;;  %v834_v11 = vld [vmem:[%s999_s3 + $0x28] sm:$0xff]  }
   0x5   :  { %609 = vmatpush3.bf16.msra.mxu1 %v786_v3  ;;  %582 = vmatprep.subr.bf16.mxu0 %v792_v4  ;;  %v840_v12 = vld [vmem:[%s998_s2 + $0x60] sm:$0xff]   ;;  %v864_v16 = vld [vmem:[%s998_s2 + $0x58] sm:$0xff]   ;;  %v888_v20 = vld [vmem:[%s998_s2 + $0x50] sm:$0xff]  }
   0x6   :  { %610 = vmatprep.subr.bf16.mxu1 %v798_v5  ;;  %v846_v13 = vld [vmem:[%s999_s3 + $0x60] sm:$0xff]   ;;  %v870_v17 = vld [vmem:[%s999_s3 + $0x58] sm:$0xff]   ;;  %v894_v21 = vld [vmem:[%s999_s3 + $0x50] sm:$0xff]  }
   0x7   :  { %v852_v14 = vld [vmem:[%s998_s2 + $0x20] sm:$0xff]   ;;  %v876_v18 = vld [vmem:[%s998_s2 + $0x18] sm:$0xff]   ;;  %v714_v22 = vld [vmem:[%s998_s2 + $0x10] sm:$0xff]  }
   0x8   :  { %583 = vmatpush3.bf16.msra.mxu0 %v804_v6  ;;  %v858_v15 = vld [vmem:[%s999_s3 + $0x20] sm:$0xff]   ;;  %v882_v19 = vld [vmem:[%s999_s3 + $0x18] sm:$0xff]   ;;  %v715_v23 = vld [vmem:[%s999_s3 + $0x10] sm:$0xff]  }
   0x9   :  { %611 = vmatpush3.bf16.msra.mxu1 %v810_v7  ;;  %584 = vmatprep.subr.bf16.mxu0 %v816_v8  ;;  %v716_v24 = vld [vmem:[%s998_s2 + $0x48] sm:$0xff]   ;;  %v720_v28 = vld [vmem:[%s998_s2 + $0x40] sm:$0xff]   ;;  %v730_v36 = vld [vmem:[%s1000_s0 + $0x14] ss:$8 sps:$4 sm:$0xff]  }
   0xa   :  { %612 = vmatprep.subr.bf16.mxu1 %v822_v9  ;;  %v717_v25 = vld [vmem:[%s999_s3 + $0x48] sm:$0xff]   ;;  %v721_v29 = vld [vmem:[%s999_s3 + $0x40] sm:$0xff]   ;;  %v732_v37 = vld [vmem:[%s1001_s1 + $0x14] ss:$8 sps:$4 sm:$0xff]  }
   0xb   :  { %v718_v26 = vld [vmem:[%s998_s2 + $0x8] sm:$0xff]   ;;  %v722_v30 = vld [vmem:[%s998_s2] sm:$0xff]   ;;  %v734_v38 = vld [vmem:[%s1000_s0 + $0x10] ss:$8 sps:$4 sm:$0xff]  }
   0xc   :  { %585 = vmatpush3.bf16.msra.mxu0 %v828_v10  ;;  %v719_v27 = vld [vmem:[%s999_s3 + $0x8] sm:$0xff]   ;;  %v723_v31 = vld [vmem:[%s999_s3] sm:$0xff]   ;;  %v735_v39 = vld [vmem:[%s1001_s1 + $0x10] ss:$8 sps:$4 sm:$0xff]  }
   0xd   :  { %613 = vmatpush3.bf16.msra.mxu1 %v834_v11  ;;  %586 = vmatprep.subr.bf16.mxu0 %v840_v12  ;;  %v724_v32 = vld [vmem:[%s1000_s0] ss:$8 sps:$4 sm:$0xff]   ;;  %v726_v33 = vld [vmem:[%s1000_s0 + $0x4] ss:$8 sps:$4 sm:$0xff]  }
   0xe   :  { %614 = vmatprep.subr.bf16.mxu1 %v846_v13  ;;  %v727_v34 = vld [vmem:[%s1001_s1] ss:$8 sps:$4 sm:$0xff]   ;;  %v729_v35 = vld [vmem:[%s1001_s1 + $0x4] ss:$8 sps:$4 sm:$0xff]   ;;  %240 = vmatprep.mubr.bf16.mxu0 %v726_v33 }
   0xf   :  { %405 = vmatprep.mubr.bf16.mxu1 %v729_v35 }
  0x10   :  { %587 = vmatpush3.bf16.msra.mxu0 %v852_v14 }
  0x11   :  { %615 = vmatpush3.bf16.msra.mxu1 %v858_v15  ;;  %588 = vmatprep.subr.bf16.mxu0 %v864_v16 }
  0x12   :  { %616 = vmatprep.subr.bf16.mxu1 %v870_v17 }
  0x14   :  { %589 = vmatpush3.bf16.msra.mxu0 %v876_v18 }
  0x15   :  { %617 = vmatpush3.bf16.msra.mxu1 %v882_v19  ;;  %590 = vmatprep.subr.bf16.mxu0 %v888_v20 }
  0x16   :  { %618 = vmatprep.subr.bf16.mxu1 %v894_v21 }
  0x18   :  { %591 = vmatpush3.bf16.msra.mxu0 %v714_v22 }
  0x19   :  { %619 = vmatpush3.bf16.msra.mxu1 %v715_v23  ;;  %592 = vmatprep.subr.bf16.mxu0 %v716_v24 }
  0x1a   :  { %620 = vmatprep.subr.bf16.mxu1 %v717_v25 }
  0x1c   :  { %593 = vmatpush3.bf16.msra.mxu0 %v718_v26 }
  0x1d   :  { %621 = vmatpush3.bf16.msra.mxu1 %v719_v27  ;;  %594 = vmatprep.subr.bf16.mxu0 %v720_v28 }
  0x1e   :  { %622 = vmatprep.subr.bf16.mxu1 %v721_v29 }
  0x20   :  { %595 = vmatpush3.bf16.msra.mxu0 %v722_v30 }
  0x21   :  { %623 = vmatpush3.bf16.msra.mxu1 %v723_v31  ;;  %636 = vmatprep.subr.bf16.mxu0 %v769_v0 }
  0x22   :  { %664 = vmatprep.subr.bf16.mxu1 %v774_v1 }
  0x23   :  { %241 = vmatmul.mubr.bf16.vlgmr.msra.gmra.mxu0 %v724_v32 }
  0x24   :  { %406 = vmatmul.mubr.bf16.vlgmr.msra.gmra.mxu1 %v727_v34  ;;  %637 = vmatpush3.bf16.msra.mxu0 %v780_v2 }
  0x25   :  { %665 = vmatpush3.bf16.msra.mxu1 %v786_v3  ;;  %638 = vmatprep.subr.bf16.mxu0 %v792_v4 }
  0x26   :  { %666 = vmatprep.subr.bf16.mxu1 %v798_v5  ;;  %248 = vmatprep.mubr.bf16.mxu0 %v730_v36 }
  0x27   :  { %413 = vmatprep.mubr.bf16.mxu1 %v732_v37 }
  0x28   :  { %639 = vmatpush3.bf16.msra.mxu0 %v804_v6 }
  0x29   :  { %667 = vmatpush3.bf16.msra.mxu1 %v810_v7  ;;  %640 = vmatprep.subr.bf16.mxu0 %v816_v8 }
  0x2a   :  { %668 = vmatprep.subr.bf16.mxu1 %v822_v9 }
  0x2b   :  { %249 = vmatmul.mubr.bf16.gmra.mxu0 %v734_v38 }
  0x2c   :  { %641 = vmatpush3.bf16.msra.mxu0 %v828_v10  ;;  %414 = vmatmul.mubr.bf16.gmra.mxu1 %v735_v39 }
  0x2d   :  { %669 = vmatpush3.bf16.msra.mxu1 %v834_v11  ;;  %642 = vmatprep.subr.bf16.mxu0 %v840_v12 }
  0x2e   :  { %670 = vmatprep.subr.bf16.mxu1 %v846_v13  ;;  %454 = vmatprep.mubr.bf16.mxu0 %v729_v35 }
  0x2f   :  { %507 = vmatprep.mubr.bf16.mxu1 %v726_v33 }
  0x30   :  { %643 = vmatpush3.bf16.msra.mxu0 %v852_v14 }
  0x31   :  { %671 = vmatpush3.bf16.msra.mxu1 %v858_v15  ;;  %644 = vmatprep.subr.bf16.mxu0 %v864_v16 }
  0x32   :  { %672 = vmatprep.subr.bf16.mxu1 %v870_v17 }
  0x34   :  { %645 = vmatpush3.bf16.msra.mxu0 %v876_v18 }
  0x35   :  { %673 = vmatpush3.bf16.msra.mxu1 %v882_v19  ;;  %646 = vmatprep.subr.bf16.mxu0 %v888_v20 }
  0x36   :  { %674 = vmatprep.subr.bf16.mxu1 %v894_v21 }
  0x38   :  { %647 = vmatpush3.bf16.msra.mxu0 %v714_v22 }
  0x39   :  { %675 = vmatpush3.bf16.msra.mxu1 %v715_v23  ;;  %648 = vmatprep.subr.bf16.mxu0 %v716_v24 }
  0x3a   :  { %676 = vmatprep.subr.bf16.mxu1 %v717_v25 }
  0x3c   :  { %649 = vmatpush3.bf16.msra.mxu0 %v718_v26 }
  0x3d   :  { %677 = vmatpush3.bf16.msra.mxu1 %v719_v27  ;;  %650 = vmatprep.subr.bf16.mxu0 %v720_v28 }
  0x3e   :  { %678 = vmatprep.subr.bf16.mxu1 %v721_v29 }
  0x40   :  { %651 = vmatpush3.bf16.msra.mxu0 %v722_v30 }
  0x41   :  { %679 = vmatpush3.bf16.msra.mxu1 %v723_v31 }
  0x43   :  { %455 = vmatmul.mubr.bf16.vlgmr.msra.gmra.mxu0 %v727_v34 }
  0x44   :  { %508 = vmatmul.mubr.bf16.vlgmr.msra.gmra.mxu1 %v724_v32  ;;  %462 = vmatprep.mubr.bf16.mxu0 %v732_v37 }
  0x45   :  { %515 = vmatprep.mubr.bf16.mxu1 %v730_v36 }
  0x4b   :  { %463 = vmatmul.mubr.bf16.gmra.mxu0 %v735_v39 }
  0x4c   :  { %516 = vmatmul.mubr.bf16.gmra.mxu1 %v734_v38 }
  0xe3   :  { %v596_v40 = vpop.f32.mrf.mxu0 }
  0xe4   :  { %v624_v41 = vpop.f32.mrf.mxu1 }
  0xe5   :  { %v597_v42 = vpop.f32.mrf.mxu0 }
  0xe6   :  { %v598_v43 = vadd.f32 %v597_v42, %v596_v40  ;;  %v625_v44 = vpop.f32.mrf.mxu1 }
  0xe7   :  { %v626_v45 = vadd.f32 %v625_v44, %v624_v41  ;;  %v599_v46 = vpop.f32.mrf.mxu0 }
  0xe8   :  { %v627_v47 = vpop.f32.mrf.mxu1 }
  0xe9   :  { %v471_v48 = vsub.f32 %v598_v43, %v626_v45  ;;  %v600_v49 = vpop.f32.mrf.mxu0 }
  0xea   :  { %v601_v50 = vadd.f32 %v600_v49, %v599_v46  ;;  %v628_v51 = vpop.f32.mrf.mxu1 }
  0xeb   :  { %524 = vst [vmem:[%s1002_s4] sm:$0xff] %v471_v48  ;;  %v629_v52 = vadd.f32 %v628_v51, %v627_v47  ;;  %v602_v53 = vpop.f32.mrf.mxu0 }
  0xec   :  { %v630_v54 = vpop.f32.mrf.mxu1 }
  0xed   :  { %v472_v55 = vsub.f32 %v601_v50, %v629_v52  ;;  %v603_v56 = vpop.f32.mrf.mxu0 }
  0xee   :  { %v604_v57 = vadd.f32 %v603_v56, %v602_v53  ;;  %v631_v58 = vpop.f32.mrf.mxu1 }
  0xef   :  { %525 = vst [vmem:[%s1002_s4 + $0x8] sm:$0xff] %v472_v55  ;;  %v632_v59 = vadd.f32 %v631_v58, %v630_v54  ;;  %v605_v60 = vpop.f32.mrf.mxu0 }
  0xf0   :  { %v633_v61 = vpop.f32.mrf.mxu1 }
  0xf1   :  { %v473_v62 = vsub.f32 %v604_v57, %v632_v59  ;;  %v606_v63 = vpop.f32.mrf.mxu0 }
  0xf2   :  { %v607_v0 = vadd.f32 %v606_v63, %v605_v60  ;;  %v634_v1 = vpop.f32.mrf.mxu1 }
  0xf3   :  { %526 = vst [vmem:[%s1002_s4 + $0x10] sm:$0xff] %v473_v62  ;;  %v635_v2 = vadd.f32 %v634_v1, %v633_v61 }
  0xf5   :  { %v474_v3 = vsub.f32 %v607_v0, %v635_v2 }
  0xf7   :  { %527 = vst [vmem:[%s1002_s4 + $0x18] sm:$0xff] %v474_v3 }
 0x103   :  { %v652_v4 = vpop.f32.mrf.mxu0 }
 0x104   :  { %v680_v5 = vpop.f32.mrf.mxu1 }
 0x105   :  { %v653_v6 = vpop.f32.mrf.mxu0 }
 0x106   :  { %v654_v7 = vadd.f32 %v653_v6, %v652_v4  ;;  %v681_v8 = vpop.f32.mrf.mxu1 }
 0x107   :  { %v682_v9 = vadd.f32 %v681_v8, %v680_v5  ;;  %v655_v10 = vpop.f32.mrf.mxu0 }
 0x108   :  { %v683_v11 = vpop.f32.mrf.mxu1 }
 0x109   :  { %v510_v12 = vadd.f32 %v682_v9, %v654_v7  ;;  %v656_v13 = vpop.f32.mrf.mxu0 }
 0x10a   :  { %v657_v14 = vadd.f32 %v656_v13, %v655_v10  ;;  %v684_v15 = vpop.f32.mrf.mxu1 }
 0x10b   :  { %528 = vst [vmem:[%s1003_s5] sm:$0xff] %v510_v12  ;;  %v685_v16 = vadd.f32 %v684_v15, %v683_v11  ;;  %v658_v17 = vpop.f32.mrf.mxu0 }
 0x10c   :  { %v686_v18 = vpop.f32.mrf.mxu1 }
 0x10d   :  { %v513_v19 = vadd.f32 %v685_v16, %v657_v14  ;;  %v659_v20 = vpop.f32.mrf.mxu0 }
 0x10e   :  { %v660_v21 = vadd.f32 %v659_v20, %v658_v17  ;;  %v687_v22 = vpop.f32.mrf.mxu1 }
 0x10f   :  { %529 = vst [vmem:[%s1003_s5 + $0x8] sm:$0xff] %v513_v19  ;;  %v688_v23 = vadd.f32 %v687_v22, %v686_v18  ;;  %v661_v24 = vpop.f32.mrf.mxu0 }
 0x110   :  { %v689_v25 = vpop.f32.mrf.mxu1 }
 0x111   :  { %v518_v26 = vadd.f32 %v688_v23, %v660_v21  ;;  %v662_v27 = vpop.f32.mrf.mxu0 }
 0x112   :  { %v663_v28 = vadd.f32 %v662_v27, %v661_v24  ;;  %v690_v29 = vpop.f32.mrf.mxu1 }
 0x113   :  { %530 = vst [vmem:[%s1003_s5 + $0x10] sm:$0xff] %v518_v26  ;;  %v691_v30 = vadd.f32 %v690_v29, %v689_v25 }
 0x115   :  { %v521_v31 = vadd.f32 %v691_v30, %v663_v28 }
 0x117   :  { %531 = vst [vmem:[%s1003_s5 + $0x18] sm:$0xff] %v521_v31 }

// kernel: forward.31
= control target key start
LH: loop header
LB: loop body
LE: loop exit
PB: predicated region body
PF: predicated region fallthrough
CT: control target
= control target key end

     0   :  { %vm528_vm0 = vcmask 523264   ;;  %s3422_s2 = inlined_call_operand.vmem [shape: bf16[576,128], index: 2, kind: input, shape index: {}]   ;;  %s3423_s0 = inlined_call_operand.vmem [shape: bf16[64,576], index: 0, kind: input, shape index: {}]   ;;  %s3424_s3 = inlined_call_operand.vmem [shape: bf16[576,128], index: 3, kind: input, shape index: {}]   ;;  %s3425_s1 = inlined_call_operand.vmem [shape: bf16[64,576], index: 1, kind: input, shape index: {}]   ;;  %s3426_s4 = inlined_call_operand.vmem [shape: f32[64,128], index: 4, kind: output, shape index: {0}]   ;;  %s3427_s5 = inlined_call_operand.vmem [shape: f32[64,128], index: 5, kind: output, shape index: {1}]  }
   0x1   :  { %v2386_v0 = vld [vmem:[%s3422_s2 + $0x78] sm:$0xff]   ;;  %v2409_v4 = vld [vmem:[%s3422_s2 + $0x70] sm:$0xff]   ;;  %v2433_v8 = vld [vmem:[%s3422_s2 + $0x68] sm:$0xff]  }
   0x2   :  { %v2391_v1 = vld [vmem:[%s3422_s2 + $0xf8] sm:$0xff]   ;;  %1809 = vmatprep.subr.bf16.mxu0 %v2386_v0  ;;  %v2415_v5 = vld [vmem:[%s3422_s2 + $0xf0] sm:$0xff]   ;;  %v2439_v9 = vld [vmem:[%s3422_s2 + $0xe8] sm:$0xff]  }
   0x3   :  { %v2397_v2 = vld [vmem:[%s3422_s2 + $0x38] sm:$0xff]   ;;  %1849 = vmatprep.subr.bf16.mxu1 %v2391_v1  ;;  %v2421_v6 = vld [vmem:[%s3422_s2 + $0x30] sm:$0xff]   ;;  %v2445_v10 = vld [vmem:[%s3422_s2 + $0x28] sm:$0xff]  }
   0x4   :  { %v2403_v3 = vld [vmem:[%s3422_s2 + $0xb8] sm:$0xff]   ;;  %1810 = vmatpush3.bf16.msra.mxu0 %v2397_v2  ;;  %v2427_v7 = vld [vmem:[%s3422_s2 + $0xb0] sm:$0xff]   ;;  %v2451_v11 = vld [vmem:[%s3422_s2 + $0xa8] sm:$0xff]  }
   0x5   :  { %1850 = vmatpush3.bf16.msra.mxu1 %v2403_v3  ;;  %1811 = vmatprep.subr.bf16.mxu0 %v2409_v4  ;;  %v2457_v12 = vld [vmem:[%s3422_s2 + $0x60] sm:$0xff]   ;;  %v2481_v16 = vld [vmem:[%s3422_s2 + $0x58] sm:$0xff]   ;;  %v2505_v20 = vld [vmem:[%s3422_s2 + $0x50] sm:$0xff]  }
   0x6   :  { %1851 = vmatprep.subr.bf16.mxu1 %v2415_v5  ;;  %v2463_v13 = vld [vmem:[%s3422_s2 + $0xe0] sm:$0xff]   ;;  %v2487_v17 = vld [vmem:[%s3422_s2 + $0xd8] sm:$0xff]   ;;  %v2511_v21 = vld [vmem:[%s3422_s2 + $0xd0] sm:$0xff]  }
   0x7   :  { %v2469_v14 = vld [vmem:[%s3422_s2 + $0x20] sm:$0xff]   ;;  %v2493_v18 = vld [vmem:[%s3422_s2 + $0x18] sm:$0xff]   ;;  %v2517_v22 = vld [vmem:[%s3422_s2 + $0x10] sm:$0xff]  }
   0x8   :  { %1812 = vmatpush3.bf16.msra.mxu0 %v2421_v6  ;;  %v2475_v15 = vld [vmem:[%s3422_s2 + $0xa0] sm:$0xff]   ;;  %v2499_v19 = vld [vmem:[%s3422_s2 + $0x98] sm:$0xff]   ;;  %v2523_v23 = vld [vmem:[%s3422_s2 + $0x90] sm:$0xff]  }
   0x9   :  { %1852 = vmatpush3.bf16.msra.mxu1 %v2427_v7  ;;  %1813 = vmatprep.subr.bf16.mxu0 %v2433_v8  ;;  %v2529_v24 = vld [vmem:[%s3422_s2 + $0x48] sm:$0xff]   ;;  %v2553_v28 = vld [vmem:[%s3422_s2 + $0x40] sm:$0xff]   ;;  %v2599_v36 = vld [vmem:[%s3422_s2 + $0x118] sm:$0xff]  }
   0xa   :  { %1853 = vmatprep.subr.bf16.mxu1 %v2439_v9  ;;  %v2535_v25 = vld [vmem:[%s3422_s2 + $0xc8] sm:$0xff]   ;;  %v2559_v29 = vld [vmem:[%s3422_s2 + $0xc0] sm:$0xff]   ;;  %v2606_v37 = vld [vmem:[%s3424_s3 + $0x78] sm:$0xff]  }
   0xb   :  { %v2541_v26 = vld [vmem:[%s3422_s2 + $0x8] sm:$0xff]   ;;  %v2565_v30 = vld [vmem:[%s3422_s2] sm:$0xff]   ;;  %v2613_v38 = vld [vmem:[%s3424_s3 + $0x38] sm:$0xff]  }
   0xc   :  { %1814 = vmatpush3.bf16.msra.mxu0 %v2445_v10  ;;  %v2547_v27 = vld [vmem:[%s3422_s2 + $0x88] sm:$0xff]   ;;  %v2571_v31 = vld [vmem:[%s3422_s2 + $0x80] sm:$0xff]   ;;  %v2620_v39 = vld [vmem:[%s3424_s3 + $0x70] sm:$0xff]  }
   0xd   :  { %1854 = vmatpush3.bf16.msra.mxu1 %v2451_v11  ;;  %1815 = vmatprep.subr.bf16.mxu0 %v2457_v12  ;;  %v2577_v32 = vld [vmem:[%s3423_s0] ss:$20 sps:$4 sm:$0xff]   ;;  %v2583_v33 = vld [vmem:[%s3423_s0 + $0x4] ss:$20 sps:$4 sm:$0xff]   ;;  %v2588_v34 = vld [vmem:[%s3423_s0 + $0x8] ss:$20 sps:$4 sm:$0xff]  }
   0xe   :  { %1855 = vmatprep.subr.bf16.mxu1 %v2463_v13  ;;  %3474 = vst [vmem:[#allocation2_spill] sm:$0xff] %v2577_v32  ;;  %3475 = vst [vmem:[#allocation3_spill] sm:$0xff] %v2583_v33  ;;  %v2593_v35 = vld [vmem:[%s3423_s0 + $0xc] ss:$20 sps:$4 sm:$0xff]   ;;  %573 = vmatprep.mubr.bf16.mxu0 %v2583_v33  ;;  %v2626_v40 = vld [vmem:[%s3424_s3 + $0x30] sm:$0xff]  }
   0xf   :  { %3476 = vst [vmem:[#allocation4_spill] sm:$0xff] %v2588_v34  ;;  %3477 = vst [vmem:[#allocation5_spill] sm:$0xff] %v2593_v35  ;;  %638 = vmatprep.mubr.bf16.mxu1 %v2593_v35  ;;  %v2632_v41 = vld [vmem:[%s3423_s0 + $0x2c] ss:$20 sps:$4 sm:$0xff]   ;;  %v2637_v42 = vld [vmem:[%s3423_s0 + $0x34] ss:$20 sps:$4 sm:$0xff]  }
  0x10   :  { %1816 = vmatpush3.bf16.msra.mxu0 %v2469_v14  ;;  %3478 = vst [vmem:[#allocation6_spill] sm:$0xff] %v2632_v41  ;;  %3479 = vst [vmem:[#allocation7_spill] sm:$0xff] %v2637_v42  ;;  %v2642_v43 = vld [vmem:[%s3423_s0 + $0x28] ss:$20 sps:$4 sm:$0xff]   ;;  %v2648_v44 = vld [vmem:[%s3423_s0 + $0x30] ss:$20 sps:$4 sm:$0xff]  }
  0x11   :  { %1856 = vmatpush3.bf16.msra.mxu1 %v2475_v15  ;;  %1817 = vmatprep.subr.bf16.mxu0 %v2481_v16  ;;  %3480 = vst [vmem:[#allocation8_spill] sm:$0xff] %v2642_v43  ;;  %3481 = vst [vmem:[#allocation9_spill] sm:$0xff] %v2648_v44  ;;  %v2655_v45 = vld [vmem:[%s3422_s2 + $0x110] sm:$0xff]   ;;  %v2661_v46 = vld [vmem:[%s3424_s3 + $0x68] sm:$0xff]  }
  0x12   :  { %1857 = vmatprep.subr.bf16.mxu1 %v2487_v17  ;;  %v2668_v47 = vld [vmem:[%s3424_s3 + $0x28] sm:$0xff]   ;;  %v2675_v48 = vld [vmem:[%s3424_s3 + $0x60] sm:$0xff]   ;;  %v2692_v51 = vld [vmem:[%s3423_s0 + $0x5c] ss:$20 sps:$4 sm:$0xff]  }
  0x13   :  { %v2681_v49 = vld [vmem:[%s3424_s3 + $0x20] sm:$0xff]   ;;  %v2687_v50 = vld [vmem:[%s3423_s0 + $0x54] ss:$20 sps:$4 sm:$0xff]   ;;  %3483 = vst [vmem:[#allocation11_spill] sm:$0xff] %v2692_v51  ;;  %v2702_v53 = vld [vmem:[%s3423_s0 + $0x58] ss:$20 sps:$4 sm:$0xff]  }
  0x14   :  { %1818 = vmatpush3.bf16.msra.mxu0 %v2493_v18  ;;  %3482 = vst [vmem:[#allocation10_spill] sm:$0xff] %v2687_v50  ;;  %v2697_v52 = vld [vmem:[%s3423_s0 + $0x50] ss:$20 sps:$4 sm:$0xff]   ;;  %3485 = vst [vmem:[#allocation13_spill] sm:$0xff] %v2702_v53  ;;  %v2708_v54 = vld [vmem:[%s3422_s2 + $0x108] sm:$0xff]  }
  0x15   :  { %1858 = vmatpush3.bf16.msra.mxu1 %v2499_v19  ;;  %1819 = vmatprep.subr.bf16.mxu0 %v2505_v20  ;;  %3484 = vst [vmem:[#allocation12_spill] sm:$0xff] %v2697_v52  ;;  %v2715_v55 = vld [vmem:[%s3424_s3 + $0x58] sm:$0xff]   ;;  %v2729_v57 = vld [vmem:[%s3424_s3 + $0x50] sm:$0xff]   ;;  %v2764_v63 = vld [vmem:[%s3422_s2 + $0x100] sm:$0xff]  }
  0x16   :  { %1859 = vmatprep.subr.bf16.mxu1 %v2511_v21  ;;  %v2722_v56 = vld [vmem:[%s3424_s3 + $0x18] sm:$0xff]   ;;  %v2735_v58 = vld [vmem:[%s3424_s3 + $0x10] sm:$0xff]   ;;  %v2859_v35 = vld [vmem:[%s3424_s3 + $0xe8] sm:$0xff]  }
  0x17   :  { %v2741_v59 = vld [vmem:[%s3423_s0 + $0x7c] ss:$20 sps:$4 sm:$0xff]   ;;  %v2747_v60 = vld [vmem:[%s3423_s0 + $0x84] ss:$20 sps:$4 sm:$0xff]   ;;  %v2758_v62 = vld [vmem:[%s3423_s0 + $0x80] ss:$20 sps:$4 sm:$0xff]  }
  0x18   :  { %1820 = vmatpush3.bf16.msra.mxu0 %v2517_v22  ;;  %3486 = vst [vmem:[#allocation14_spill] sm:$0xff] %v2741_v59  ;;  %3487 = vst [vmem:[#allocation15_spill] sm:$0xff] %v2747_v60  ;;  %v2753_v61 = vld [vmem:[%s3423_s0 + $0x78] ss:$20 sps:$4 sm:$0xff]  }
  0x19   :  { %1860 = vmatpush3.bf16.msra.mxu1 %v2523_v23  ;;  %1821 = vmatprep.subr.bf16.mxu0 %v2529_v24  ;;  %3488 = vst [vmem:[#allocation16_spill] sm:$0xff] %v2753_v61  ;;  %3489 = vst [vmem:[#allocation17_spill] sm:$0xff] %v2758_v62  ;;  %v2963_v33 = vld [vmem:[%s3425_s1 + $0x78] ss:$20 sps:$4 sm:$0xff]  }
  0x1a   :  { %1861 = vmatprep.subr.bf16.mxu1 %v2535_v25  ;;  %3500 = vst [vmem:[#allocation28_spill] sm:$0xff] %v2859_v35 }
  0x1c   :  { %1822 = vmatpush3.bf16.msra.mxu0 %v2541_v26 }
  0x1d   :  { %1862 = vmatpush3.bf16.msra.mxu1 %v2547_v27  ;;  %1823 = vmatprep.subr.bf16.mxu0 %v2553_v28 }
  0x1e   :  { %1863 = vmatprep.subr.bf16.mxu1 %v2559_v29 }
  0x20   :  { %1824 = vmatpush3.bf16.msra.mxu0 %v2565_v30 }
  0x21   :  { %1864 = vmatpush3.bf16.msra.mxu1 %v2571_v31  ;;  %2161 = vmatprep.subr.bf16.mxu0 %v2599_v36 }
  0x22   :  { %1897 = vmatprep.subr.bf16.mxu1 %v2606_v37 }
  0x23   :  { %574 = vmatmul.mubr.bf16.vlgmr.msra.gmra.mxu0 %v2577_v32  ;;  %v2902_v32 = vld [vmem:[%s3424_s3 + $0xd8] sm:$0xff]  }
  0x24   :  { %639 = vmatmul.mubr.bf16.vlgmr.msra.gmra.mxu1 %v2588_v34  ;;  %2162 = vmatpush3.bf16.msra.mxu0 %v2599_v36  ;;  %v2807_v34 = vld [vmem:[%s3425_s1 + $0x4] ss:$20 sps:$4 sm:$0xff]   ;;  %3505 = vst [vmem:[#allocation33_spill] sm:$0xff] %v2902_v32 }
  0x25   :  { %1898 = vmatpush3.bf16.msra.mxu1 %v2613_v38  ;;  %581 = vmatprep.mubr.bf16.mxu0 %v2632_v41  ;;  %v2866_v41 = vld [vmem:[%s3423_s0 + $0x88] ss:$20 sps:$4 sm:$0xff]  }
  0x26   :  { %1899 = vmatprep.subr.bf16.mxu1 %v2620_v39  ;;  %646 = vmatprep.mubr.bf16.mxu1 %v2637_v42  ;;  %v2802_v42 = vld [vmem:[%s3425_s1] ss:$20 sps:$4 sm:$0xff]   ;;  %3501 = vst [vmem:[#allocation29_spill] sm:$0xff] %v2866_v41 }
  0x27   :  { %2163 = vmatprep.subr.bf16.mxu0 %v2655_v45 }
  0x28   :  { %2164 = vmatpush3.bf16.msra.mxu0 %v2655_v45 }
  0x29   :  { %1900 = vmatpush3.bf16.msra.mxu1 %v2626_v40  ;;  %2165 = vmatprep.subr.bf16.mxu0 %v2708_v54 }
  0x2a   :  { %1901 = vmatprep.subr.bf16.mxu1 %v2661_v46 }
  0x2b   :  { %582 = vmatmul.mubr.bf16.gmra.mxu0 %v2642_v43  ;;  %v2852_v43 = vld [vmem:[%s3425_s1 + $0x2c] ss:$20 sps:$4 sm:$0xff]  }
  0x2c   :  { %647 = vmatmul.mubr.bf16.gmra.mxu1 %v2648_v44  ;;  %589 = vmatprep.mubr.bf16.mxu0 %v2687_v50  ;;  %v2790_v44 = vld [vmem:[%s3424_s3] sm:$0xff]   ;;  %v2840_v50 = vld [vmem:[%s3424_s3 + $0xb0] sm:$0xff]  }
  0x2d   :  { %1902 = vmatpush3.bf16.msra.mxu1 %v2668_v47  ;;  %654 = vmatprep.mubr.bf16.mxu1 %v2692_v51  ;;  %v2784_v51 = vld [vmem:[%s3424_s3 + $0x40] sm:$0xff]   ;;  %3493 = vst [vmem:[#allocation21_spill] sm:$0xff] %v2790_v44  ;;  %3498 = vst [vmem:[#allocation26_spill] sm:$0xff] %v2840_v50 }
  0x2e   :  { %1903 = vmatprep.subr.bf16.mxu1 %v2675_v48  ;;  %2166 = vmatpush3.bf16.msra.mxu0 %v2708_v54  ;;  %3492 = vst [vmem:[#allocation20_spill] sm:$0xff] %v2784_v51 }
  0x2f   :  { %2167 = vmatprep.subr.bf16.mxu0 %v2764_v63 }
  0x31   :  { %1904 = vmatpush3.bf16.msra.mxu1 %v2681_v49 }
  0x32   :  { %1905 = vmatprep.subr.bf16.mxu1 %v2715_v55  ;;  %2168 = vmatpush3.bf16.msra.mxu0 %v2764_v63 }
  0x33   :  { %590 = vmatmul.mubr.bf16.gmra.mxu0 %v2697_v52  ;;  %v2834_v52 = vld [vmem:[%s3424_s3 + $0xf0] sm:$0xff]  }
  0x34   :  { %655 = vmatmul.mubr.bf16.gmra.mxu1 %v2702_v53  ;;  %597 = vmatprep.mubr.bf16.mxu0 %v2741_v59  ;;  %v2770_v53 = vld [vmem:[%s3424_s3 + $0x48] sm:$0xff]   ;;  %3497 = vst [vmem:[#allocation25_spill] sm:$0xff] %v2834_v52 }
  0x35   :  { %1906 = vmatpush3.bf16.msra.mxu1 %v2722_v56  ;;  %662 = vmatprep.mubr.bf16.mxu1 %v2747_v60  ;;  %3490 = vst [vmem:[#allocation18_spill] sm:$0xff] %v2770_v53  ;;  %v2777_v60 = vld [vmem:[%s3424_s3 + $0x8] sm:$0xff]  }
  0x36   :  { %1907 = vmatprep.subr.bf16.mxu1 %v2729_v57  ;;  %3491 = vst [vmem:[#allocation19_spill] sm:$0xff] %v2777_v60  ;;  %v2820_v59 = vld [vmem:[%s3423_s0 + $0x38] ss:$20 sps:$4 sm:$0xff]  }
  0x37   :  { %3495 = vst [vmem:[#allocation23_spill] sm:$0xff] %v2820_v59 }
  0x39   :  { %1908 = vmatpush3.bf16.msra.mxu1 %v2735_v58 }
  0x3a   :  { %1909 = vmatprep.subr.bf16.mxu1 %v2770_v53  ;;  %v3021_v53 = vld [vmem:[%s3425_s1 + $0x60] ss:$20 sps:$4 sm:$0xff]  }
  0x3b   :  { %598 = vmatmul.mubr.bf16.gmra.mxu0 %v2753_v61  ;;  %v2814_v61 = vld [vmem:[%s3424_s3 + $0xf8] sm:$0xff]  }
  0x3c   :  { %663 = vmatmul.mubr.bf16.gmra.mxu1 %v2758_v62  ;;  %v2796_v62 = vld [vmem:[%s3423_s0 + $0x10] ss:$20 sps:$4 sm:$0xff]   ;;  %1937 = vmatprep.subr.bf16.mxu0 %v2814_v61 }
  0x3d   :  { %1910 = vmatpush3.bf16.msra.mxu1 %v2777_v60  ;;  %3494 = vst [vmem:[#allocation22_spill] sm:$0xff] %v2796_v62  ;;  %2169 = vmatprep.mubr.msk.bf16.mxu0 %vm528_vm0, %v2796_v62  ;;  %v2827_v62 = vld [vmem:[%s3424_s3 + $0xb8] sm:$0xff]   ;;  %v2981_v60 = vld [vmem:[%s3424_s3 + $0x100] sm:$0xff]  }
  0x3e   :  { %1911 = vmatprep.subr.bf16.mxu1 %v2784_v51  ;;  %1096 = vmatprep.mubr.bf16.mxu1 %v2807_v34  ;;  %3496 = vst [vmem:[#allocation24_spill] sm:$0xff] %v2827_v62  ;;  %v2937_v51 = vld [vmem:[%s3424_s3 + $0x90] sm:$0xff]   ;;  %3515 = vst [vmem:[#allocation43_spill] sm:$0xff] %v2981_v60 }
  0x3f   :  { %3510 = vst [vmem:[#allocation38_spill] sm:$0xff] %v2937_v51 }
  0x41   :  { %1912 = vmatpush3.bf16.msra.mxu1 %v2790_v44  ;;  %v2926_v44 = vld [vmem:[%s3424_s3 + $0xd0] sm:$0xff]  }
  0x42   :  { %3508 = vst [vmem:[#allocation36_spill] sm:$0xff] %v2926_v44 }
  0x43   :  { %2170 = vmatmul.mubr.msk.bf16.vlgmr.msra.gmra.mxu0 %vm528_vm0, %v2820_v59  ;;  %v2847_v59 = vld [vmem:[%s3423_s0 + $0x60] ss:$20 sps:$4 sm:$0xff]  }
  0x44   :  { %1938 = vmatpush3.bf16.msra.mxu0 %v2827_v62  ;;  %1097 = vmatmul.mubr.bf16.vlgmr.msra.gmra.mxu1 %v2802_v42  ;;  %3499 = vst [vmem:[#allocation27_spill] sm:$0xff] %v2847_v59  ;;  %v2919_v62 = vld [vmem:[%s3424_s3 + $0x98] sm:$0xff]  }
  0x45   :  { %1939 = vmatprep.subr.bf16.mxu0 %v2834_v52  ;;  %2173 = vmatprep.mubr.msk.bf16.mxu0 %vm528_vm0, %v2847_v59  ;;  %v2872_v59 = vld [vmem:[%s3425_s1 + $0x28] ss:$20 sps:$4 sm:$0xff]   ;;  %3507 = vst [vmem:[#allocation35_spill] sm:$0xff] %v2919_v62 }
  0x46   :  { %1104 = vmatprep.mubr.bf16.mxu1 %v2852_v43  ;;  %v2877_v52 = vld [vmem:[%s3424_s3 + $0xa8] sm:$0xff]  }
  0x47   :  { %3502 = vst [vmem:[#allocation30_spill] sm:$0xff] %v2877_v52 }
  0x48   :  { %1940 = vmatpush3.bf16.msra.mxu0 %v2840_v50  ;;  %v2884_v50 = vld [vmem:[%s3424_s3 + $0xe0] sm:$0xff]  }
  0x49   :  { %1941 = vmatprep.subr.bf16.mxu0 %v2859_v35  ;;  %3503 = vst [vmem:[#allocation31_spill] sm:$0xff] %v2884_v50  ;;  %v2890_v35 = vld [vmem:[%s3424_s3 + $0xa0] sm:$0xff]  }
  0x4a   :  { %3504 = vst [vmem:[#allocation32_spill] sm:$0xff] %v2890_v35 }
  0x4b   :  { %2174 = vmatmul.mubr.msk.bf16.gmra.mxu0 %vm528_vm0, %v2866_v41  ;;  %v2897_v41 = vld [vmem:[%s3425_s1 + $0x54] ss:$20 sps:$4 sm:$0xff]  }
  0x4c   :  { %1942 = vmatpush3.bf16.msra.mxu0 %v2877_v52  ;;  %1105 = vmatmul.mubr.bf16.gmra.mxu1 %v2872_v59  ;;  %v2908_v52 = vld [vmem:[%s3424_s3 + $0x118] sm:$0xff]  }
  0x4d   :  { %1943 = vmatprep.subr.bf16.mxu0 %v2884_v50  ;;  %1112 = vmatprep.mubr.bf16.mxu1 %v2897_v41  ;;  %3506 = vst [vmem:[#allocation34_spill] sm:$0xff] %v2908_v52  ;;  %v2913_v50 = vld [vmem:[%s3425_s1 + $0x50] ss:$20 sps:$4 sm:$0xff]  }
  0x4e   :  { %2177 = vmatprep.subr.bf16.mxu1 %v2908_v52 }
  0x4f   :  { %2178 = vmatpush3.bf16.msra.mxu1 %v2908_v52  ;;  %v2951_v52 = vld [vmem:[%s3424_s3 + $0xc8] sm:$0xff]  }
  0x50   :  { %1944 = vmatpush3.bf16.msra.mxu0 %v2890_v35  ;;  %v2932_v35 = vld [vmem:[%s3424_s3 + $0x110] sm:$0xff]   ;;  %3511 = vst [vmem:[#allocation39_spill] sm:$0xff] %v2951_v52 }
  0x51   :  { %1945 = vmatprep.subr.bf16.mxu0 %v2902_v32  ;;  %3509 = vst [vmem:[#allocation37_spill] sm:$0xff] %v2932_v35  ;;  %2179 = vmatprep.subr.bf16.mxu1 %v2932_v35  ;;  %v2944_v32 = vld [vmem:[%s3425_s1 + $0x7c] ss:$20 sps:$4 sm:$0xff]  }
  0x53   :  { %2180 = vmatpush3.bf16.msra.mxu1 %v2932_v35  ;;  %v2975_v35 = vld [vmem:[%s3424_s3 + $0xc0] sm:$0xff]  }
  0x54   :  { %1946 = vmatpush3.bf16.msra.mxu0 %v2919_v62  ;;  %1113 = vmatmul.mubr.bf16.gmra.mxu1 %v2913_v50  ;;  %v2958_v62 = vld [vmem:[%s3424_s3 + $0x108] sm:$0xff]   ;;  %3514 = vst [vmem:[#allocation42_spill] sm:$0xff] %v2975_v35 }
  0x55   :  { %1947 = vmatprep.subr.bf16.mxu0 %v2926_v44  ;;  %1120 = vmatprep.mubr.bf16.mxu1 %v2944_v32  ;;  %3512 = vst [vmem:[#allocation40_spill] sm:$0xff] %v2958_v62  ;;  %v2968_v44 = vld [vmem:[%s3424_s3 + $0x88] sm:$0xff]  }
  0x56   :  { %3513 = vst [vmem:[#allocation41_spill] sm:$0xff] %v2968_v44  ;;  %2181 = vmatprep.subr.bf16.mxu1 %v2958_v62 }
  0x57   :  { %2182 = vmatpush3.bf16.msra.mxu1 %v2958_v62  ;;  %v2999_v62 = vld [vmem:[%s3425_s1 + $0x10] ss:$20 sps:$4 sm:$0xff]  }
  0x58   :  { %1948 = vmatpush3.bf16.msra.mxu0 %v2937_v51  ;;  %2183 = vmatprep.subr.bf16.mxu1 %v2981_v60  ;;  %v2988_v51 = vld [vmem:[%s3424_s3 + $0x80] sm:$0xff]  }
  0x59   :  { %1949 = vmatprep.subr.bf16.mxu0 %v2951_v52  ;;  %v2339_v52 = vld [vmem:[%s3425_s1 + $0xc] ss:$20 sps:$4 sm:$0xff]  }
  0x5a   :  { %1161 = vmatprep.mubr.bf16.mxu0 %v2339_v52 }
  0x5b   :  { %2184 = vmatpush3.bf16.msra.mxu1 %v2981_v60  ;;  %v3016_v60 = vld [vmem:[%s3425_s1 + $0x38] ss:$20 sps:$4 sm:$0xff]  }
  0x5c   :  { %1950 = vmatpush3.bf16.msra.mxu0 %v2968_v44  ;;  %1121 = vmatmul.mubr.bf16.gmra.mxu1 %v2963_v33  ;;  %v2337_v44 = vld [vmem:[%s3425_s1 + $0x8] ss:$20 sps:$4 sm:$0xff]  }
  0x5d   :  { %1951 = vmatprep.subr.bf16.mxu0 %v2975_v35  ;;  %2185 = vmatprep.mubr.msk.bf16.mxu1 %vm528_vm0, %v2999_v62  ;;  %v2342_v35 = vld [vmem:[%s3425_s1 + $0x34] ss:$20 sps:$4 sm:$0xff]  }
  0x5e   :  { %2025 = vmatprep.subr.bf16.mxu1 %v2391_v1  ;;  %v2345_v1 = vld [vmem:[%s3425_s1 + $0x5c] ss:$20 sps:$4 sm:$0xff]  }
  0x60   :  { %1952 = vmatpush3.bf16.msra.mxu0 %v2988_v51 }
  0x61   :  { %1985 = vmatprep.subr.bf16.mxu0 %v2386_v0  ;;  %v2344_v0 = vld [vmem:[%s3425_s1 + $0x30] ss:$20 sps:$4 sm:$0xff]  }
  0x63   :  { %1162 = vmatmul.mubr.bf16.vlgmr.msra.gmra.mxu0 %v2337_v44 }
  0x64   :  { %1986 = vmatpush3.bf16.msra.mxu0 %v2397_v2  ;;  %1169 = vmatprep.mubr.bf16.mxu0 %v2342_v35  ;;  %v3042_v2 = vld [vmem:[%s3425_s1 + $0x88] ss:$20 sps:$4 sm:$0xff]  }
  0x65   :  { %2186 = vmatmul.mubr.msk.bf16.vlgmr.msra.gmra.mxu1 %vm528_vm0, %v3016_v60  ;;  %1987 = vmatprep.subr.bf16.mxu0 %v2409_v4  ;;  %v2350_v4 = vld [vmem:[%s3425_s1 + $0x84] ss:$20 sps:$4 sm:$0xff]  }
  0x66   :  { %2026 = vmatpush3.bf16.msra.mxu1 %v2403_v3  ;;  %2189 = vmatprep.mubr.msk.bf16.mxu1 %vm528_vm0, %v3021_v53  ;;  %v2347_v3 = vld [vmem:[%s3425_s1 + $0x58] ss:$20 sps:$4 sm:$0xff]  }
  0x67   :  { %2027 = vmatprep.subr.bf16.mxu1 %v2415_v5  ;;  %v2352_v5 = vld [vmem:[%s3425_s1 + $0x80] ss:$20 sps:$4 sm:$0xff]  }
  0x68   :  { %1988 = vmatpush3.bf16.msra.mxu0 %v2421_v6  ;;  %v3516_v6 = vld [vmem:[#allocation18_spill] sm:$0xff] }
  0x69   :  { %1989 = vmatprep.subr.bf16.mxu0 %v2433_v8  ;;  %v3518_v8 = vld [vmem:[#allocation3_spill] sm:$0xff] }
  0x6a   :  { %2028 = vmatpush3.bf16.msra.mxu1 %v2427_v7  ;;  %v3517_v7 = vld [vmem:[#allocation19_spill] sm:$0xff] }
  0x6b   :  { %1170 = vmatmul.mubr.bf16.gmra.mxu0 %v2344_v0  ;;  %2029 = vmatprep.subr.bf16.mxu1 %v2439_v9  ;;  %v3519_v9 = vld [vmem:[#allocation20_spill] sm:$0xff] }
  0x6c   :  { %1990 = vmatpush3.bf16.msra.mxu0 %v2445_v10  ;;  %1177 = vmatprep.mubr.bf16.mxu0 %v2345_v1  ;;  %v3520_v10 = vld [vmem:[#allocation21_spill] sm:$0xff] }
  0x6d   :  { %1991 = vmatprep.subr.bf16.mxu0 %v2457_v12  ;;  %2190 = vmatmul.mubr.msk.bf16.gmra.mxu1 %vm528_vm0, %v3042_v2  ;;  %v3522_v12 = vld [vmem:[#allocation24_spill] sm:$0xff] }
  0x6e   :  { %2030 = vmatpush3.bf16.msra.mxu1 %v2451_v11  ;;  %1356 = vmatprep.mubr.bf16.mxu1 %v2339_v52  ;;  %v3521_v11 = vld [vmem:[#allocation34_spill] sm:$0xff] }
  0x6f   :  { %2031 = vmatprep.subr.bf16.mxu1 %v2463_v13  ;;  %v3523_v13 = vld [vmem:[#allocation2_spill] sm:$0xff] }
  0x70   :  { %1992 = vmatpush3.bf16.msra.mxu0 %v2469_v14  ;;  %v3524_v14 = vld [vmem:[#allocation25_spill] sm:$0xff] }
  0x71   :  { %1993 = vmatprep.subr.bf16.mxu0 %v2481_v16  ;;  %v3526_v16 = vld [vmem:[#allocation37_spill] sm:$0xff] }
  0x72   :  { %2032 = vmatpush3.bf16.msra.mxu1 %v2475_v15  ;;  %v3525_v15 = vld [vmem:[#allocation6_spill] sm:$0xff] }
  0x73   :  { %1178 = vmatmul.mubr.bf16.gmra.mxu0 %v2347_v3  ;;  %2033 = vmatprep.subr.bf16.mxu1 %v2487_v17  ;;  %v3527_v17 = vld [vmem:[#allocation26_spill] sm:$0xff] }
  0x74   :  { %1994 = vmatpush3.bf16.msra.mxu0 %v2493_v18  ;;  %1185 = vmatprep.mubr.bf16.mxu0 %v2350_v4  ;;  %v3528_v18 = vld [vmem:[#allocation28_spill] sm:$0xff] }
  0x75   :  { %1995 = vmatprep.subr.bf16.mxu0 %v2505_v20  ;;  %v3530_v20 = vld [vmem:[#allocation30_spill] sm:$0xff] }
  0x76   :  { %2034 = vmatpush3.bf16.msra.mxu1 %v2499_v19  ;;  %v3529_v19 = vld [vmem:[#allocation40_spill] sm:$0xff] }
  0x77   :  { %2035 = vmatprep.subr.bf16.mxu1 %v2511_v21  ;;  %v3531_v21 = vld [vmem:[#allocation5_spill] sm:$0xff] }
  0x78   :  { %1996 = vmatpush3.bf16.msra.mxu0 %v2517_v22  ;;  %v3532_v22 = vld [vmem:[#allocation8_spill] sm:$0xff] }
  0x79   :  { %1997 = vmatprep.subr.bf16.mxu0 %v2529_v24  ;;  %v3534_v24 = vld [vmem:[#allocation10_spill] sm:$0xff] }
  0x7a   :  { %2036 = vmatpush3.bf16.msra.mxu1 %v2523_v23  ;;  %v3533_v23 = vld [vmem:[#allocation31_spill] sm:$0xff] }
  0x7b   :  { %1186 = vmatmul.mubr.bf16.gmra.mxu0 %v2352_v5  ;;  %2037 = vmatprep.subr.bf16.mxu1 %v2535_v25  ;;  %v3535_v25 = vld [vmem:[#allocation43_spill] sm:$0xff] }
  0x7c   :  { %1998 = vmatpush3.bf16.msra.mxu0 %v2541_v26  ;;  %1291 = vmatprep.mubr.bf16.mxu0 %v2807_v34  ;;  %v3536_v26 = vld [vmem:[#allocation32_spill] sm:$0xff]  ;;  %v3544_v34 = vld [vmem:[#allocation41_spill] sm:$0xff] }
  0x7d   :  { %1999 = vmatprep.subr.bf16.mxu0 %v2553_v28  ;;  %v3538_v28 = vld [vmem:[#allocation35_spill] sm:$0xff] }
  0x7e   :  { %2038 = vmatpush3.bf16.msra.mxu1 %v2547_v27  ;;  %v3537_v27 = vld [vmem:[#allocation33_spill] sm:$0xff] }
  0x7f   :  { %2039 = vmatprep.subr.bf16.mxu1 %v2559_v29  ;;  %v3539_v29 = vld [vmem:[#allocation12_spill] sm:$0xff] }
  0x80   :  { %2000 = vmatpush3.bf16.msra.mxu0 %v2565_v30  ;;  %v3540_v30 = vld [vmem:[#allocation36_spill] sm:$0xff] }
  0x81   :  { %2193 = vmatprep.subr.bf16.mxu0 %v2599_v36 }
  0x82   :  { %2040 = vmatpush3.bf16.msra.mxu1 %v2571_v31  ;;  %v3541_v31 = vld [vmem:[#allocation14_spill] sm:$0xff] }
  0x83   :  { %1292 = vmatmul.mubr.bf16.vlgmr.msra.gmra.mxu0 %v2802_v42  ;;  %2073 = vmatprep.subr.bf16.mxu1 %v2606_v37  ;;  %v3547_v37 = vld [vmem:[#allocation22_spill] sm:$0xff]  ;;  %v3552_v42 = vld [vmem:[#allocation9_spill] sm:$0xff] }
  0x84   :  { %2194 = vmatpush3.bf16.msra.mxu0 %v2599_v36  ;;  %1299 = vmatprep.mubr.bf16.mxu0 %v2852_v43  ;;  %v3546_v36 = vld [vmem:[#allocation42_spill] sm:$0xff]  ;;  %v3553_v43 = vld [vmem:[#allocation11_spill] sm:$0xff] }
  0x85   :  { %1357 = vmatmul.mubr.bf16.vlgmr.msra.gmra.mxu1 %v2337_v44  ;;  %2195 = vmatprep.subr.bf16.mxu0 %v2655_v45  ;;  %v3554_v44 = vld [vmem:[#allocation29_spill] sm:$0xff] }
  0x86   :  { %2074 = vmatpush3.bf16.msra.mxu1 %v2613_v38  ;;  %1364 = vmatprep.mubr.bf16.mxu1 %v2342_v35  ;;  %v3545_v35 = vld [vmem:[#allocation16_spill] sm:$0xff] }
  0x87   :  { %2075 = vmatprep.subr.bf16.mxu1 %v2620_v39  ;;  %v3548_v38 = vld [vmem:[#allocation4_spill] sm:$0xff]  ;;  %v3549_v39 = vld [vmem:[#allocation7_spill] sm:$0xff] }
  0x88   :  { %2196 = vmatpush3.bf16.msra.mxu0 %v2655_v45  ;;  %v3555_v45 = vld [vmem:[#allocation13_spill] sm:$0xff] }
  0x89   :  { %2197 = vmatprep.subr.bf16.mxu0 %v2708_v54 }
  0x8a   :  { %2076 = vmatpush3.bf16.msra.mxu1 %v2626_v40  ;;  %v3550_v40 = vld [vmem:[#allocation23_spill] sm:$0xff] }
  0x8b   :  { %1300 = vmatmul.mubr.bf16.gmra.mxu0 %v2872_v59  ;;  %2077 = vmatprep.subr.bf16.mxu1 %v2661_v46  ;;  %v3556_v46 = vld [vmem:[#allocation15_spill] sm:$0xff] }
  0x8c   :  { %1307 = vmatprep.mubr.bf16.mxu0 %v2897_v41  ;;  %2198 = vmatpush3.bf16.msra.mxu0 %v2708_v54  ;;  %v3551_v41 = vld [vmem:[#allocation27_spill] sm:$0xff] }
  0x8d   :  { %1365 = vmatmul.mubr.bf16.gmra.mxu1 %v2344_v0  ;;  %2199 = vmatprep.subr.bf16.mxu0 %v2764_v63 }
  0x8e   :  { %2078 = vmatpush3.bf16.msra.mxu1 %v2668_v47  ;;  %1372 = vmatprep.mubr.bf16.mxu1 %v2345_v1  ;;  %v3557_v47 = vld [vmem:[#allocation17_spill] sm:$0xff] }
  0x8f   :  { %2079 = vmatprep.subr.bf16.mxu1 %v2675_v48 }
  0x90   :  { %2200 = vmatpush3.bf16.msra.mxu0 %v2764_v63 }
  0x91   :  { %2113 = vmatprep.subr.bf16.mxu0 %v2814_v61 }
  0x92   :  { %2080 = vmatpush3.bf16.msra.mxu1 %v2681_v49 }
  0x93   :  { %1308 = vmatmul.mubr.bf16.gmra.mxu0 %v2913_v50  ;;  %2081 = vmatprep.subr.bf16.mxu1 %v2715_v55 }
  0x94   :  { %1315 = vmatprep.mubr.bf16.mxu0 %v2944_v32  ;;  %v3542_v32 = vld [vmem:[#allocation38_spill] sm:$0xff] }
  0x95   :  { %1373 = vmatmul.mubr.bf16.gmra.mxu1 %v2347_v3 }
  0x96   :  { %2082 = vmatpush3.bf16.msra.mxu1 %v2722_v56  ;;  %1380 = vmatprep.mubr.bf16.mxu1 %v2350_v4 }
  0x97   :  { %2083 = vmatprep.subr.bf16.mxu1 %v2729_v57 }
  0x9a   :  { %2084 = vmatpush3.bf16.msra.mxu1 %v2735_v58 }
  0x9b   :  { %1316 = vmatmul.mubr.bf16.gmra.mxu0 %v2963_v33  ;;  %2085 = vmatprep.subr.bf16.mxu1 %v3516_v6  ;;  %v3543_v33 = vld [vmem:[#allocation39_spill] sm:$0xff] }
  0x9c   :  { %2201 = vmatprep.mubr.msk.bf16.mxu0 %vm528_vm0, %v2999_v62 }
  0x9d   :  { %1381 = vmatmul.mubr.bf16.gmra.mxu1 %v2352_v5 }
  0x9e   :  { %2086 = vmatpush3.bf16.msra.mxu1 %v3517_v7  ;;  %1494 = vmatprep.mubr.bf16.mxu1 %v3518_v8 }
  0x9f   :  { %2087 = vmatprep.subr.bf16.mxu1 %v3519_v9 }
  0xa2   :  { %2088 = vmatpush3.bf16.msra.mxu1 %v3520_v10 }
  0xa3   :  { %2202 = vmatmul.mubr.msk.bf16.vlgmr.msra.gmra.mxu0 %vm528_vm0, %v3016_v60  ;;  %2209 = vmatprep.subr.bf16.mxu1 %v3521_v11 }
  0xa4   :  { %2114 = vmatpush3.bf16.msra.mxu0 %v3522_v12  ;;  %2205 = vmatprep.mubr.msk.bf16.mxu0 %vm528_vm0, %v3021_v53 }
  0xa5   :  { %1495 = vmatmul.mubr.bf16.vlgmr.msra.gmra.mxu1 %v3523_v13  ;;  %2115 = vmatprep.subr.bf16.mxu0 %v3524_v14 }
  0xa6   :  { %1502 = vmatprep.mubr.bf16.mxu1 %v3525_v15  ;;  %2210 = vmatpush3.bf16.msra.mxu1 %v3521_v11 }
  0xa7   :  { %2211 = vmatprep.subr.bf16.mxu1 %v3526_v16 }
  0xa8   :  { %2116 = vmatpush3.bf16.msra.mxu0 %v3527_v17 }
  0xa9   :  { %2117 = vmatprep.subr.bf16.mxu0 %v3528_v18 }
  0xaa   :  { %2212 = vmatpush3.bf16.msra.mxu1 %v3526_v16 }
  0xab   :  { %2206 = vmatmul.mubr.msk.bf16.gmra.mxu0 %vm528_vm0, %v3042_v2  ;;  %2213 = vmatprep.subr.bf16.mxu1 %v3529_v19 }
  0xac   :  { %2118 = vmatpush3.bf16.msra.mxu0 %v3530_v20  ;;  %1559 = vmatprep.mubr.bf16.mxu0 %v3531_v21 }
  0xad   :  { %1503 = vmatmul.mubr.bf16.gmra.mxu1 %v3532_v22  ;;  %2119 = vmatprep.subr.bf16.mxu0 %v3533_v23 }
  0xae   :  { %1510 = vmatprep.mubr.bf16.mxu1 %v3534_v24  ;;  %2214 = vmatpush3.bf16.msra.mxu1 %v3529_v19 }
  0xaf   :  { %2215 = vmatprep.subr.bf16.mxu1 %v3535_v25 }
  0xb0   :  { %2120 = vmatpush3.bf16.msra.mxu0 %v3536_v26 }
  0xb1   :  { %2121 = vmatprep.subr.bf16.mxu0 %v3537_v27 }
  0xb2   :  { %2216 = vmatpush3.bf16.msra.mxu1 %v3535_v25 }
  0xb4   :  { %2122 = vmatpush3.bf16.msra.mxu0 %v3538_v28 }
  0xb5   :  { %1511 = vmatmul.mubr.bf16.gmra.mxu1 %v3539_v29  ;;  %2123 = vmatprep.subr.bf16.mxu0 %v3540_v30 }
  0xb6   :  { %1518 = vmatprep.mubr.bf16.mxu1 %v3541_v31 }
  0xb8   :  { %2124 = vmatpush3.bf16.msra.mxu0 %v3542_v32 }
  0xb9   :  { %2125 = vmatprep.subr.bf16.mxu0 %v3543_v33 }
  0xbc   :  { %2126 = vmatpush3.bf16.msra.mxu0 %v3544_v34 }
  0xbd   :  { %1519 = vmatmul.mubr.bf16.gmra.mxu1 %v3545_v35  ;;  %2127 = vmatprep.subr.bf16.mxu0 %v3546_v36 }
  0xbe   :  { %2217 = vmatprep.mubr.msk.bf16.mxu1 %vm528_vm0, %v3547_v37 }
  0xc0   :  { %2128 = vmatpush3.bf16.msra.mxu0 %v2988_v51 }
  0xc3   :  { %1560 = vmatmul.mubr.bf16.vlgmr.msra.gmra.mxu0 %v3548_v38 }
  0xc4   :  { %1567 = vmatprep.mubr.bf16.mxu0 %v3549_v39 }
  0xc5   :  { %2218 = vmatmul.mubr.msk.bf16.vlgmr.msra.gmra.mxu1 %vm528_vm0, %v3550_v40 }
  0xc6   :  { %2221 = vmatprep.mubr.msk.bf16.mxu1 %vm528_vm0, %v3551_v41 }
  0xcb   :  { %1568 = vmatmul.mubr.bf16.gmra.mxu0 %v3552_v42 }
  0xcc   :  { %1575 = vmatprep.mubr.bf16.mxu0 %v3553_v43 }
  0xcd   :  { %2222 = vmatmul.mubr.msk.bf16.gmra.mxu1 %vm528_vm0, %v3554_v44 }
  0xd3   :  { %1576 = vmatmul.mubr.bf16.gmra.mxu0 %v3555_v45 }
  0xd4   :  { %1583 = vmatprep.mubr.bf16.mxu0 %v3556_v46 }
  0xdb   :  { %1584 = vmatmul.mubr.bf16.gmra.mxu0 %v3557_v47 }
  0xe3   :  { %v1825_v48 = vpop.f32.mrf.mxu0 }
  0xe4   :  { %v1865_v49 = vpop.f32.mrf.mxu1 }
  0xe5   :  { %v1826_v50 = vpop.f32.mrf.mxu0 }
  0xe6   :  { %v1866_v51 = vpop.f32.mrf.mxu1  ;;  %v1827_v41 = vadd.f32 %v1826_v50, %v1825_v48 }
  0xe7   :  { %v1828_v52 = vpop.f32.mrf.mxu0  ;;  %v1867_v42 = vadd.f32 %v1866_v51, %v1865_v49 }
  0xe8   :  { %v1868_v53 = vpop.f32.mrf.mxu1 }
  0xe9   :  { %v1829_v54 = vpop.f32.mrf.mxu0 }
  0xea   :  { %v1869_v55 = vpop.f32.mrf.mxu1 }
  0xeb   :  { %v3167_v56 = vpop.f32.mrf.mxu0 }
  0xec   :  { %v3169_v57 = vpop.f32.mrf.mxu1 }
  0xed   :  { %v3171_v58 = vpop.f32.mrf.mxu0 }
  0xee   :  { %v3173_v59 = vpop.f32.mrf.mxu1  ;;  %v1833_v48 = vadd.f32 %v3171_v58, %v3167_v56 }
  0xef   :  { %v3175_v60 = vpop.f32.mrf.mxu0  ;;  %v1873_v49 = vadd.f32 %v3173_v59, %v3169_v57 }
  0xf0   :  { %v3177_v61 = vpop.f32.mrf.mxu1 }
  0xf1   :  { %v3179_v62 = vpop.f32.mrf.mxu0 }
  0xf2   :  { %v3181_v63 = vpop.f32.mrf.mxu1  ;;  %v1836_v57 = vadd.f32 %v3179_v62, %v3175_v60 }
  0xf3   :  { %v3183_v0 = vpop.f32.mrf.mxu0  ;;  %v1876_v58 = vadd.f32 %v3181_v63, %v3177_v61 }
  0xf4   :  { %v3185_v1 = vpop.f32.mrf.mxu1 }
  0xf5   :  { %v3187_v2 = vpop.f32.mrf.mxu0  ;;  %v652_v63 = vadd.f32 %v1876_v58, %v1836_v57 }
  0xf6   :  { %v3189_v3 = vpop.f32.mrf.mxu1 }
  0xf7   :  { %v3191_v4 = vpop.f32.mrf.mxu0  ;;  %v1879_v60 = vadd.f32 %v3189_v3, %v3185_v1 }
  0xf8   :  { %v3193_v5 = vpop.f32.mrf.mxu1 }
  0xf9   :  { %v3195_v6 = vpop.f32.mrf.mxu0 }
  0xfa   :  { %v3197_v7 = vpop.f32.mrf.mxu1  ;;  %v1842_v3 = vadd.f32 %v3195_v6, %v3191_v4 }
  0xfb   :  { %v3199_v8 = vpop.f32.mrf.mxu0 }
  0xfc   :  { %v3201_v9 = vpop.f32.mrf.mxu1 }
  0xfd   :  { %v3203_v10 = vpop.f32.mrf.mxu0 }
  0xfe   :  { %v3205_v11 = vpop.f32.mrf.mxu1  ;;  %v1845_v4 = vadd.f32 %v3203_v10, %v3199_v8 }
  0xff   :  { %3558 = vst [vmem:[#allocation18_spill] sm:$0xff] %v3205_v11  ;;  %v3207_v12 = vpop.f32.mrf.mxu0 }
 0x100   :  { %3559 = vst [vmem:[#allocation19_spill] sm:$0xff] %v3207_v12  ;;  %v3209_v13 = vpop.f32.mrf.mxu1 }
 0x101   :  { %3560 = vst [vmem:[#allocation3_spill] sm:$0xff] %v3209_v13  ;;  %v3211_v14 = vpop.f32.mrf.mxu0  ;;  %v641_v13 = vadd.f32 %v1867_v42, %v1827_v41 }
 0x102   :  { %3561 = vst [vmem:[#allocation20_spill] sm:$0xff] %v3211_v14  ;;  %v3213_v15 = vpop.f32.mrf.mxu1 }
 0x103   :  { %3562 = vst [vmem:[#allocation21_spill] sm:$0xff] %v3213_v15  ;;  %v3215_v16 = vpop.f32.mrf.mxu0  ;;  %v1870_v15 = vadd.f32 %v1869_v55, %v1868_v53 }
 0x104   :  { %v1913_v17 = vpop.f32.mrf.mxu1 }
 0x105   :  { %v705_v19 = vpop.f32.mrf.mxu0 }
 0x106   :  { %v1914_v18 = vpop.f32.mrf.mxu1  ;;  %v3569_v6 = vld [vmem:[#allocation18_spill] sm:$0xff] }
 0x107   :  { %v3217_v22 = vpop.f32.mrf.mxu0  ;;  %v1915_v45 = vadd.f32 %v1914_v18, %v1913_v17 }
 0x108   :  { %v1916_v20 = vpop.f32.mrf.mxu1 }
 0x109   :  { %v708_v25 = vpop.f32.mrf.mxu0 }
 0x10a   :  { %v1917_v21 = vpop.f32.mrf.mxu1 }
 0x10b   :  { %v3219_v28 = vpop.f32.mrf.mxu0 }
 0x10c   :  { %v1919_v23 = vpop.f32.mrf.mxu1  ;;  %3563 = vst [vmem:[#allocation34_spill] sm:$0xff] %v3219_v28 }
 0x10d   :  { %v3225_v31 = vpop.f32.mrf.mxu0 }
 0x10e   :  { %v1920_v24 = vpop.f32.mrf.mxu1 }
 0x10f   :  { %v3231_v34 = vpop.f32.mrf.mxu0  ;;  %v1921_v55 = vadd.f32 %v1920_v24, %v1919_v23 }
 0x110   :  { %v1922_v26 = vpop.f32.mrf.mxu1  ;;  %3564 = vst [vmem:[#allocation24_spill] sm:$0xff] %v3231_v34  ;;  %v1830_v34 = vadd.f32 %v1829_v54, %v1828_v52 }
 0x111   :  { %v3237_v37 = vpop.f32.mrf.mxu0 }
 0x112   :  { %v1923_v27 = vpop.f32.mrf.mxu1  ;;  %3567 = vst [vmem:[#allocation6_spill] sm:$0xff] %v3237_v37  ;;  %v1918_v37 = vadd.f32 %v1917_v21, %v1916_v20  ;;  %v644_v17 = vadd.f32 %v1870_v15, %v1830_v34 }
 0x113   :  { %v1924_v21 = vadd.f32 %v1923_v27, %v1922_v26 }
 0x114   :  { %v3221_v29 = vpop.f32.mrf.mxu1  ;;  %v709_v54 = vadd.f32 %v708_v25, %v644_v17  ;;  %v1839_v25 = vadd.f32 %v3187_v2, %v3183_v0  ;;  %v3574_v17 = vld [vmem:[#allocation20_spill] sm:$0xff] }
 0x116   :  { %v3223_v30 = vpop.f32.mrf.mxu1  ;;  %v657_v2 = vadd.f32 %v1879_v60, %v1839_v25 }
 0x117   :  { %v1927_v26 = vadd.f32 %v3223_v30, %v3221_v29  ;;  %v3579_v60 = vld [vmem:[#allocation24_spill] sm:$0xff] }
 0x118   :  { %v3227_v32 = vpop.f32.mrf.mxu1  ;;  %v722_v29 = vadd.f32 %v3225_v31, %v657_v2 }
 0x11a   :  { %v3229_v33 = vpop.f32.mrf.mxu1 }
 0x11b   :  { %v1930_v30 = vadd.f32 %v3229_v33, %v3227_v32 }
 0x11c   :  { %v3233_v35 = vpop.f32.mrf.mxu1 }
 0x11d   :  { %3565 = vst [vmem:[#allocation2_spill] sm:$0xff] %v3233_v35  ;;  %v706_v35 = vadd.f32 %v705_v19, %v641_v13 }
 0x11e   :  { %v3235_v36 = vpop.f32.mrf.mxu1 }
 0x11f   :  { %3566 = vst [vmem:[#allocation25_spill] sm:$0xff] %v3235_v36 }
 0x120   :  { %v3239_v38 = vpop.f32.mrf.mxu1 }
 0x121   :  { %3568 = vst [vmem:[#allocation37_spill] sm:$0xff] %v3239_v38 }
 0x122   :  { %v3241_v40 = vpop.f32.mrf.mxu1 }
 0x123   :  { %v1953_v39 = vpop.f32.mrf.mxu0 }
 0x124   :  { %v3571_v33 = vld [vmem:[#allocation2_spill] sm:$0xff] }
 0x125   :  { %v1954_v43 = vpop.f32.mrf.mxu0  ;;  %v2187_v44 = vpop.f32.mrf.mxu1 }
 0x126   :  { %v1955_v46 = vadd.f32 %v1954_v43, %v1953_v39 }
 0x127   :  { %v1956_v47 = vpop.f32.mrf.mxu0  ;;  %v1228_v28 = vpop.f32.mrf.mxu1 }
 0x128   :  { %v1164_v14 = vadd.f32 %v1955_v46, %v1915_v45  ;;  %v3578_v57 = vld [vmem:[#allocation37_spill] sm:$0xff] }
 0x129   :  { %v1957_v12 = vpop.f32.mrf.mxu0  ;;  %v2188_v36 = vpop.f32.mrf.mxu1  ;;  %v1936_v58 = vadd.f32 %v3241_v40, %v3578_v57 }
 0x12a   :  { %v1958_v38 = vadd.f32 %v1957_v12, %v1956_v47  ;;  %v1229_v11 = vadd.f32 %v1228_v28, %v1164_v14  ;;  %v649_v14 = vadd.f32 %v1873_v49, %v1833_v48  ;;  %v3570_v47 = vld [vmem:[#allocation6_spill] sm:$0xff]  ;;  %v3572_v48 = vld [vmem:[#allocation25_spill] sm:$0xff] }
 0x12b   :  { %v1959_v50 = vpop.f32.mrf.mxu0  ;;  %v1231_v51 = vpop.f32.mrf.mxu1  ;;  %v1933_v49 = vadd.f32 %v3572_v48, %v3571_v33 }
 0x12c   :  { %v1454_v18 = vsub.f32 %v706_v35, %v1229_v11  ;;  %v1167_v52 = vadd.f32 %v1958_v38, %v1918_v37  ;;  %v714_v20 = vadd.f32 %v3215_v16, %v649_v14  ;;  %v717_v16 = vadd.f32 %v3217_v22, %v652_v63  ;;  %v3577_v14 = vld [vmem:[#allocation34_spill] sm:$0xff] }
 0x12d   :  { %v1960_v53 = vpop.f32.mrf.mxu0  ;;  %v2191_v56 = vpop.f32.mrf.mxu1  ;;  %v1882_v38 = vadd.f32 %v3197_v7, %v3193_v5  ;;  %v1885_v5 = vadd.f32 %v3569_v6, %v3201_v9  ;;  %v3573_v9 = vld [vmem:[#allocation19_spill] sm:$0xff] }
 0x12e   :  { %1657 = vst [vmem:[%s3426_s4] sm:$0xff] %v1454_v18  ;;  %v1961_v12 = vadd.f32 %v1960_v53, %v1959_v50  ;;  %v1232_v13 = vadd.f32 %v1231_v51, %v1167_v52  ;;  %v1848_v18 = vadd.f32 %v3574_v17, %v3573_v9  ;;  %v3575_v52 = vld [vmem:[#allocation3_spill] sm:$0xff]  ;;  %v3576_v53 = vld [vmem:[#allocation21_spill] sm:$0xff] }
 0x12f   :  { %v1962_v19 = vpop.f32.mrf.mxu0  ;;  %v1244_v61 = vpop.f32.mrf.mxu1  ;;  %v665_v10 = vadd.f32 %v1885_v5, %v1845_v4 }
 0x130   :  { %v1172_v59 = vadd.f32 %v1961_v12, %v1921_v55  ;;  %v1455_v11 = vsub.f32 %v709_v54, %v1232_v13  ;;  %v1888_v54 = vadd.f32 %v3576_v53, %v3575_v52 }
 0x131   :  { %v1963_v15 = vpop.f32.mrf.mxu0  ;;  %v2192_v1 = vpop.f32.mrf.mxu1 }
 0x132   :  { %v1237_v23 = vadd.f32 %v2187_v44, %v1172_v59  ;;  %1658 = vst [vmem:[%s3426_s4 + $0x8] sm:$0xff] %v1455_v11  ;;  %v1964_v24 = vadd.f32 %v1963_v15, %v1962_v19  ;;  %v660_v44 = vadd.f32 %v1882_v38, %v1842_v3  ;;  %v730_v19 = vadd.f32 %v3577_v14, %v665_v10 }
 0x133   :  { %v1965_v62 = vpop.f32.mrf.mxu0  ;;  %v1247_v43 = vpop.f32.mrf.mxu1 }
 0x134   :  { %v1456_v28 = vsub.f32 %v714_v20, %v1237_v23  ;;  %v1175_v34 = vadd.f32 %v1964_v24, %v1924_v21  ;;  %v725_v32 = vadd.f32 %v3570_v47, %v660_v44  ;;  %v668_v20 = vadd.f32 %v1888_v54, %v1848_v18 }
 0x135   :  { %v1966_v35 = vpop.f32.mrf.mxu0 }
 0x136   :  { %1659 = vst [vmem:[%s3426_s4 + $0x10] sm:$0xff] %v1456_v28  ;;  %v1240_v27 = vadd.f32 %v2188_v36, %v1175_v34  ;;  %v1967_v0 = vadd.f32 %v1966_v35, %v1965_v62  ;;  %v733_v62 = vadd.f32 %v3579_v60, %v668_v20 }
 0x137   :  { %v1968_v37 = vpop.f32.mrf.mxu0 }
 0x138   :  { %v1457_v39 = vsub.f32 %v717_v16, %v1240_v27  ;;  %v1180_v22 = vadd.f32 %v1967_v0, %v1927_v26 }
 0x139   :  { %v1969_v41 = vpop.f32.mrf.mxu0 }
 0x13a   :  { %1660 = vst [vmem:[%s3426_s4 + $0x18] sm:$0xff] %v1457_v39  ;;  %v1970_v36 = vadd.f32 %v1969_v41, %v1968_v37  ;;  %v1245_v42 = vadd.f32 %v1244_v61, %v1180_v22 }
 0x13b   :  { %v1971_v7 = vpop.f32.mrf.mxu0 }
 0x13c   :  { %v1458_v45 = vsub.f32 %v722_v29, %v1245_v42  ;;  %v1183_v31 = vadd.f32 %v1970_v36, %v1930_v30 }
 0x13d   :  { %v1972_v46 = vpop.f32.mrf.mxu0 }
 0x13e   :  { %1661 = vst [vmem:[%s3426_s4 + $0x20] sm:$0xff] %v1458_v45  ;;  %v1973_v50 = vadd.f32 %v1972_v46, %v1971_v7  ;;  %v1248_v8 = vadd.f32 %v1247_v43, %v1183_v31 }
 0x13f   :  { %v1974_v51 = vpop.f32.mrf.mxu0 }
 0x140   :  { %v1188_v55 = vadd.f32 %v1973_v50, %v1933_v49  ;;  %v1459_v12 = vsub.f32 %v725_v32, %v1248_v8 }
 0x141   :  { %v1975_v13 = vpop.f32.mrf.mxu0 }
 0x142   :  { %v1253_v59 = vadd.f32 %v2191_v56, %v1188_v55  ;;  %1662 = vst [vmem:[%s3426_s4 + $0x28] sm:$0xff] %v1459_v12  ;;  %v1976_v11 = vadd.f32 %v1975_v13, %v1974_v51 }
 0x143   :  { %v2001_v15 = vpop.f32.mrf.mxu0 }
 0x144   :  { %v1460_v21 = vsub.f32 %v730_v19, %v1253_v59  ;;  %v1191_v23 = vadd.f32 %v1976_v11, %v1936_v58 }
 0x145   :  { %v2041_v24 = vpop.f32.mrf.mxu1  ;;  %v2002_v25 = vpop.f32.mrf.mxu0 }
 0x146   :  { %1663 = vst [vmem:[%s3426_s4 + $0x30] sm:$0xff] %v1460_v21  ;;  %v1256_v61 = vadd.f32 %v2192_v1, %v1191_v23  ;;  %v2003_v13 = vadd.f32 %v2002_v25, %v2001_v15 }
 0x147   :  { %v2042_v40 = vpop.f32.mrf.mxu1  ;;  %v2004_v56 = vpop.f32.mrf.mxu0 }
 0x148   :  { %v1461_v63 = vsub.f32 %v733_v62, %v1256_v61  ;;  %v2043_v14 = vadd.f32 %v2042_v40, %v2041_v24 }
 0x149   :  { %v2044_v28 = vpop.f32.mrf.mxu1  ;;  %v2005_v34 = vpop.f32.mrf.mxu0 }
 0x14a   :  { %1664 = vst [vmem:[%s3426_s4 + $0x38] sm:$0xff] %v1461_v63  ;;  %v2006_v59 = vadd.f32 %v2005_v34, %v2004_v56  ;;  %v1359_v20 = vadd.f32 %v2043_v14, %v2003_v13 }
 0x14b   :  { %v2045_v35 = vpop.f32.mrf.mxu1  ;;  %v2007_v16 = vpop.f32.mrf.mxu0 }
 0x14c   :  { %v2046_v11 = vadd.f32 %v2045_v35, %v2044_v28 }
 0x14d   :  { %v2047_v26 = vpop.f32.mrf.mxu1  ;;  %v2008_v27 = vpop.f32.mrf.mxu0 }
 0x14e   :  { %v1362_v15 = vadd.f32 %v2046_v11, %v2006_v59  ;;  %v2009_v24 = vadd.f32 %v2008_v27, %v2007_v16 }
 0x14f   :  { %v2048_v0 = vpop.f32.mrf.mxu1  ;;  %v3305_v2 = vpop.f32.mrf.mxu0 }
 0x150   :  { %v2049_v25 = vadd.f32 %v2048_v0, %v2047_v26 }
 0x151   :  { %v3307_v37 = vpop.f32.mrf.mxu1  ;;  %v2011_v3 = vpop.f32.mrf.mxu0 }
 0x152   :  { %v2012_v13 = vadd.f32 %v2011_v3, %v3305_v2 }
 0x153   :  { %v2051_v1 = vpop.f32.mrf.mxu1  ;;  %v3309_v38 = vpop.f32.mrf.mxu0 }
 0x155   :  { %v3311_v39 = vpop.f32.mrf.mxu1  ;;  %v3313_v22 = vpop.f32.mrf.mxu0 }
 0x156   :  { %v2015_v2 = vadd.f32 %v3313_v22, %v3309_v38 }
 0x157   :  { %v3315_v41 = vpop.f32.mrf.mxu1  ;;  %v3317_v29 = vpop.f32.mrf.mxu0 }
 0x159   :  { %v3319_v30 = vpop.f32.mrf.mxu1  ;;  %v3321_v36 = vpop.f32.mrf.mxu0 }
 0x15a   :  { %v2018_v38 = vadd.f32 %v3321_v36, %v3317_v29 }
 0x15b   :  { %v3323_v42 = vpop.f32.mrf.mxu1  ;;  %v3325_v4 = vpop.f32.mrf.mxu0 }
 0x15d   :  { %v3327_v6 = vpop.f32.mrf.mxu1  ;;  %v3329_v5 = vpop.f32.mrf.mxu0 }
 0x15f   :  { %v3331_v7 = vpop.f32.mrf.mxu1  ;;  %v3333_v43 = vpop.f32.mrf.mxu0 }
 0x160   :  { %v2061_v36 = vadd.f32 %v3331_v7, %v3327_v6 }
 0x161   :  { %v3335_v44 = vpop.f32.mrf.mxu1  ;;  %v3337_v45 = vpop.f32.mrf.mxu0 }
 0x162   :  { %v2024_v6 = vadd.f32 %v3337_v45, %v3333_v43 }
 0x163   :  { %v3339_v31 = vpop.f32.mrf.mxu1  ;;  %v2203_v46 = vpop.f32.mrf.mxu0 }
 0x165   :  { %v2089_v47 = vpop.f32.mrf.mxu1  ;;  %v1423_v33 = vpop.f32.mrf.mxu0 }
 0x166   :  { %v1424_v60 = vadd.f32 %v1423_v33, %v1359_v20  ;;  %v2052_v33 = vadd.f32 %v2051_v1, %v3307_v37  ;;  %v2055_v37 = vadd.f32 %v3315_v41, %v3311_v39  ;;  %v2058_v39 = vadd.f32 %v3323_v42, %v3319_v30 }
 0x167   :  { %v2090_v32 = vpop.f32.mrf.mxu1  ;;  %v3341_v50 = vpop.f32.mrf.mxu0  ;;  %v2021_v30 = vadd.f32 %v3329_v5, %v3325_v4  ;;  %v2064_v5 = vadd.f32 %v3339_v31, %v3335_v44 }
 0x168   :  { %v2091_v62 = vadd.f32 %v2090_v32, %v2089_v47  ;;  %v1367_v47 = vadd.f32 %v2049_v25, %v2009_v24  ;;  %v1370_v3 = vadd.f32 %v2052_v33, %v2012_v13  ;;  %v1375_v22 = vadd.f32 %v2055_v37, %v2015_v2 }
 0x169   :  { %v2092_v48 = vpop.f32.mrf.mxu1  ;;  %v1426_v51 = vpop.f32.mrf.mxu0  ;;  %v1378_v42 = vadd.f32 %v2058_v39, %v2018_v38  ;;  %v1383_v7 = vadd.f32 %v2061_v36, %v2021_v30  ;;  %v1386_v45 = vadd.f32 %v2064_v5, %v2024_v6 }
 0x16a   :  { %v1432_v11 = vadd.f32 %v2203_v46, %v1367_v47  ;;  %v1435_v46 = vadd.f32 %v3341_v50, %v1370_v3 }
 0x16b   :  { %v2093_v49 = vpop.f32.mrf.mxu1  ;;  %v3343_v18 = vpop.f32.mrf.mxu0 }
 0x16c   :  { %3580 = vst [vmem:[#allocation26_spill] sm:$0xff] %v3343_v18  ;;  %v1497_v18 = vadd.f32 %v2091_v62, %v1424_v60 }
 0x16d   :  { %v2095_v8 = vpop.f32.mrf.mxu1  ;;  %v3349_v54 = vpop.f32.mrf.mxu0 }
 0x16f   :  { %v2096_v10 = vpop.f32.mrf.mxu1  ;;  %v3355_v19 = vpop.f32.mrf.mxu0 }
 0x170   :  { %3581 = vst [vmem:[#allocation28_spill] sm:$0xff] %v3355_v19  ;;  %v2097_v59 = vadd.f32 %v2096_v10, %v2095_v8 }
 0x171   :  { %v2098_v9 = vpop.f32.mrf.mxu1  ;;  %v3361_v21 = vpop.f32.mrf.mxu0 }
 0x173   :  { %v2099_v17 = vpop.f32.mrf.mxu1 }
 0x174   :  { %v2100_v8 = vadd.f32 %v2099_v17, %v2098_v9 }
 0x175   :  { %v3345_v52 = vpop.f32.mrf.mxu1 }
 0x176   :  { %v1508_v9 = vadd.f32 %v2100_v8, %v1435_v46 }
 0x177   :  { %v3347_v53 = vpop.f32.mrf.mxu1 }
 0x178   :  { %v2103_v17 = vadd.f32 %v3347_v53, %v3345_v52 }
 0x179   :  { %v3351_v55 = vpop.f32.mrf.mxu1 }
 0x17b   :  { %v3353_v12 = vpop.f32.mrf.mxu1 }
 0x17c   :  { %v2106_v53 = vadd.f32 %v3353_v12, %v3351_v55 }
 0x17d   :  { %v3357_v57 = vpop.f32.mrf.mxu1 }
 0x17e   :  { %3582 = vst [vmem:[#allocation40_spill] sm:$0xff] %v3357_v57  ;;  %v1427_v57 = vadd.f32 %v1426_v51, %v1362_v15  ;;  %v1440_v15 = vadd.f32 %v3349_v54, %v1375_v22 }
 0x17f   :  { %v3359_v58 = vpop.f32.mrf.mxu1 }
 0x180   :  { %3583 = vst [vmem:[#allocation30_spill] sm:$0xff] %v3359_v58  ;;  %v2094_v58 = vadd.f32 %v2093_v49, %v2092_v48  ;;  %v1505_v49 = vadd.f32 %v2097_v59, %v1432_v11  ;;  %v1513_v52 = vadd.f32 %v2103_v17, %v1440_v15 }
 0x181   :  { %v3363_v23 = vpop.f32.mrf.mxu1 }
 0x182   :  { %v1500_v20 = vadd.f32 %v2094_v58, %v1427_v57 }
 0x183   :  { %v3365_v61 = vpop.f32.mrf.mxu1  ;;  %v2129_v63 = vpop.f32.mrf.mxu0 }
 0x184   :  { %v2112_v31 = vadd.f32 %v3365_v61, %v3363_v23 }
 0x185   :  { %v2130_v40 = vpop.f32.mrf.mxu0  ;;  %v2219_v19 = vpop.f32.mrf.mxu1  ;;  %v3584_v12 = vld [vmem:[#allocation40_spill] sm:$0xff] }
 0x186   :  { %v2131_v56 = vadd.f32 %v2130_v40, %v2129_v63 }
 0x187   :  { %v2132_v28 = vpop.f32.mrf.mxu0  ;;  %v1626_v34 = vpop.f32.mrf.mxu1 }
 0x188   :  { %v1562_v35 = vadd.f32 %v2131_v56, %v1497_v18  ;;  %v1443_v56 = vadd.f32 %v3361_v21, %v1378_v42 }
 0x189   :  { %v2133_v32 = vpop.f32.mrf.mxu0  ;;  %v2220_v14 = vpop.f32.mrf.mxu1 }
 0x18a   :  { %v2134_v16 = vadd.f32 %v2133_v32, %v2132_v28  ;;  %v1627_v26 = vadd.f32 %v1626_v34, %v1562_v35  ;;  %v1516_v55 = vadd.f32 %v2106_v53, %v1443_v56  ;;  %v3585_v34 = vld [vmem:[#allocation30_spill] sm:$0xff] }
 0x18b   :  { %v2135_v27 = vpop.f32.mrf.mxu0  ;;  %v1629_v0 = vpop.f32.mrf.mxu1  ;;  %v2109_v35 = vadd.f32 %v3585_v34, %v3584_v12  ;;  %v3586_v32 = vld [vmem:[#allocation26_spill] sm:$0xff] }
 0x18c   :  { %1665 = vst [vmem:[%s3427_s5] sm:$0xff] %v1627_v26  ;;  %v1565_v48 = vadd.f32 %v2134_v16, %v1500_v20 }
 0x18d   :  { %v2136_v1 = vpop.f32.mrf.mxu0  ;;  %v2223_v57 = vpop.f32.mrf.mxu1 }
 0x18e   :  { %v2137_v10 = vadd.f32 %v2136_v1, %v2135_v27  ;;  %v1630_v51 = vadd.f32 %v1629_v0, %v1565_v48  ;;  %v3587_v27 = vld [vmem:[#allocation28_spill] sm:$0xff] }
 0x18f   :  { %v2138_v18 = vpop.f32.mrf.mxu0  ;;  %v1642_v63 = vpop.f32.mrf.mxu1  ;;  %v1451_v0 = vadd.f32 %v3587_v27, %v1386_v45 }
 0x190   :  { %v1570_v58 = vadd.f32 %v2137_v10, %v1505_v49  ;;  %1666 = vst [vmem:[%s3427_s5 + $0x8] sm:$0xff] %v1630_v51 }
 0x191   :  { %v2139_v41 = vpop.f32.mrf.mxu0  ;;  %v2224_v40 = vpop.f32.mrf.mxu1  ;;  %v1524_v2 = vadd.f32 %v2112_v31, %v1451_v0 }
 0x192   :  { %v1635_v60 = vadd.f32 %v2219_v19, %v1570_v58  ;;  %v2140_v62 = vadd.f32 %v2139_v41, %v2138_v18 }
 0x193   :  { %v2141_v50 = vpop.f32.mrf.mxu0  ;;  %v1645_v47 = vpop.f32.mrf.mxu1 }
 0x194   :  { %1667 = vst [vmem:[%s3427_s5 + $0x10] sm:$0xff] %v1635_v60  ;;  %v1573_v29 = vadd.f32 %v2140_v62, %v1508_v9 }
 0x195   :  { %v2142_v24 = vpop.f32.mrf.mxu0 }
 0x196   :  { %v1638_v19 = vadd.f32 %v2220_v14, %v1573_v29  ;;  %v2143_v25 = vadd.f32 %v2142_v24, %v2141_v50  ;;  %v1448_v14 = vadd.f32 %v3586_v32, %v1383_v7 }
 0x197   :  { %v2144_v54 = vpop.f32.mrf.mxu0 }
 0x198   :  { %1668 = vst [vmem:[%s3427_s5 + $0x18] sm:$0xff] %v1638_v19  ;;  %v1578_v4 = vadd.f32 %v2143_v25, %v1513_v52  ;;  %v1521_v44 = vadd.f32 %v2109_v35, %v1448_v14 }
 0x199   :  { %v2145_v28 = vpop.f32.mrf.mxu0 }
 0x19a   :  { %v2146_v13 = vadd.f32 %v2145_v28, %v2144_v54  ;;  %v1643_v33 = vadd.f32 %v1642_v63, %v1578_v4 }
 0x19b   :  { %v2147_v21 = vpop.f32.mrf.mxu0 }
 0x19c   :  { %1669 = vst [vmem:[%s3427_s5 + $0x20] sm:$0xff] %v1643_v33  ;;  %v1581_v43 = vadd.f32 %v2146_v13, %v1516_v55 }
 0x19d   :  { %v2148_v20 = vpop.f32.mrf.mxu0 }
 0x19e   :  { %v2149_v59 = vadd.f32 %v2148_v20, %v2147_v21  ;;  %v1646_v16 = vadd.f32 %v1645_v47, %v1581_v43 }
 0x19f   :  { %v2150_v26 = vpop.f32.mrf.mxu0 }
 0x1a0   :  { %v1586_v11 = vadd.f32 %v2149_v59, %v1521_v44  ;;  %1670 = vst [vmem:[%s3427_s5 + $0x28] sm:$0xff] %v1646_v16 }
 0x1a1   :  { %v2151_v48 = vpop.f32.mrf.mxu0 }
 0x1a2   :  { %v1651_v37 = vadd.f32 %v2223_v57, %v1586_v11  ;;  %v2152_v3 = vadd.f32 %v2151_v48, %v2150_v26 }
 0x1a4   :  { %1671 = vst [vmem:[%s3427_s5 + $0x30] sm:$0xff] %v1651_v37  ;;  %v1589_v1 = vadd.f32 %v2152_v3, %v1524_v2 }
 0x1a6   :  { %v1654_v23 = vadd.f32 %v2224_v40, %v1589_v1 }
 0x1a8   :  { %1672 = vst [vmem:[%s3427_s5 + $0x38] sm:$0xff] %v1654_v23 }

// kernel: forward.32
= control target key start
LH: loop header
LB: loop body
LE: loop exit
PB: predicated region body
PF: predicated region fallthrough
CT: control target
= control target key end

     0   :  { %vm292_vm0 = vcmask 261120   ;;  %s1938_s2 = inlined_call_operand.vmem [shape: bf16[288,128], index: 2, kind: input, shape index: {}]   ;;  %s1939_s3 = inlined_call_operand.vmem [shape: bf16[288,128], index: 3, kind: input, shape index: {}]   ;;  %s1940_s0 = inlined_call_operand.vmem [shape: bf16[64,288], index: 0, kind: input, shape index: {}]   ;;  %s1941_s1 = inlined_call_operand.vmem [shape: bf16[64,288], index: 1, kind: input, shape index: {}]   ;;  %s1942_s4 = inlined_call_operand.vmem [shape: f32[64,128], index: 4, kind: output, shape index: {0}]   ;;  %s1943_s5 = inlined_call_operand.vmem [shape: f32[64,128], index: 5, kind: output, shape index: {1}]  }
   0x1   :  { %v1446_v0 = vld [vmem:[%s1938_s2 + $0x78] sm:$0xff]   ;;  %v1469_v4 = vld [vmem:[%s1938_s2 + $0x70] sm:$0xff]   ;;  %v1493_v8 = vld [vmem:[%s1938_s2 + $0x68] sm:$0xff]  }
   0x2   :  { %v1451_v1 = vld [vmem:[%s1939_s3 + $0x78] sm:$0xff]   ;;  %1113 = vmatprep.subr.bf16.mxu0 %v1446_v0  ;;  %v1475_v5 = vld [vmem:[%s1939_s3 + $0x70] sm:$0xff]   ;;  %v1499_v9 = vld [vmem:[%s1939_s3 + $0x68] sm:$0xff]  }
   0x3   :  { %v1457_v2 = vld [vmem:[%s1938_s2 + $0x38] sm:$0xff]   ;;  %1159 = vmatprep.subr.bf16.mxu1 %v1451_v1  ;;  %v1481_v6 = vld [vmem:[%s1938_s2 + $0x30] sm:$0xff]   ;;  %v1505_v10 = vld [vmem:[%s1938_s2 + $0x28] sm:$0xff]  }
   0x4   :  { %v1463_v3 = vld [vmem:[%s1939_s3 + $0x38] sm:$0xff]   ;;  %1114 = vmatpush3.bf16.msra.mxu0 %v1457_v2  ;;  %v1487_v7 = vld [vmem:[%s1939_s3 + $0x30] sm:$0xff]   ;;  %v1511_v11 = vld [vmem:[%s1939_s3 + $0x28] sm:$0xff]  }
   0x5   :  { %1160 = vmatpush3.bf16.msra.mxu1 %v1463_v3  ;;  %1115 = vmatprep.subr.bf16.mxu0 %v1469_v4  ;;  %v1517_v12 = vld [vmem:[%s1938_s2 + $0x60] sm:$0xff]   ;;  %v1541_v16 = vld [vmem:[%s1938_s2 + $0x58] sm:$0xff]   ;;  %v1565_v20 = vld [vmem:[%s1938_s2 + $0x50] sm:$0xff]  }
   0x6   :  { %1161 = vmatprep.subr.bf16.mxu1 %v1475_v5  ;;  %v1523_v13 = vld [vmem:[%s1939_s3 + $0x60] sm:$0xff]   ;;  %v1547_v17 = vld [vmem:[%s1939_s3 + $0x58] sm:$0xff]   ;;  %v1571_v21 = vld [vmem:[%s1939_s3 + $0x50] sm:$0xff]  }
   0x7   :  { %v1529_v14 = vld [vmem:[%s1938_s2 + $0x20] sm:$0xff]   ;;  %v1553_v18 = vld [vmem:[%s1938_s2 + $0x18] sm:$0xff]   ;;  %v1577_v22 = vld [vmem:[%s1938_s2 + $0x10] sm:$0xff]  }
   0x8   :  { %1116 = vmatpush3.bf16.msra.mxu0 %v1481_v6  ;;  %v1535_v15 = vld [vmem:[%s1939_s3 + $0x20] sm:$0xff]   ;;  %v1559_v19 = vld [vmem:[%s1939_s3 + $0x18] sm:$0xff]   ;;  %v1583_v23 = vld [vmem:[%s1939_s3 + $0x10] sm:$0xff]  }
   0x9   :  { %1162 = vmatpush3.bf16.msra.mxu1 %v1487_v7  ;;  %1117 = vmatprep.subr.bf16.mxu0 %v1493_v8  ;;  %v1589_v24 = vld [vmem:[%s1938_s2 + $0x48] sm:$0xff]   ;;  %v1613_v28 = vld [vmem:[%s1938_s2 + $0x40] sm:$0xff]   ;;  %v1702_v44 = vld [vmem:[%s1940_s0 + $0x30] ss:$12 sps:$4 sm:$0xff]  }
   0xa   :  { %1163 = vmatprep.subr.bf16.mxu1 %v1499_v9  ;;  %v1595_v25 = vld [vmem:[%s1939_s3 + $0x48] sm:$0xff]   ;;  %v1619_v29 = vld [vmem:[%s1939_s3 + $0x40] sm:$0xff]   ;;  %v1395_v46 = vld [vmem:[%s1941_s1 + $0x30] ss:$12 sps:$4 sm:$0xff]  }
   0xb   :  { %v1601_v26 = vld [vmem:[%s1938_s2 + $0x8] sm:$0xff]   ;;  %v1625_v30 = vld [vmem:[%s1938_s2] sm:$0xff]   ;;  %v1407_v55 = vld [vmem:[%s1940_s0 + $0x50] ss:$12 sps:$4 sm:$0xff]  }
   0xc   :  { %1118 = vmatpush3.bf16.msra.mxu0 %v1505_v10  ;;  %v1607_v27 = vld [vmem:[%s1939_s3 + $0x8] sm:$0xff]   ;;  %v1631_v31 = vld [vmem:[%s1939_s3] sm:$0xff]   ;;  %v1412_v59 = vld [vmem:[%s1941_s1 + $0x50] ss:$12 sps:$4 sm:$0xff]  }
   0xd   :  { %1164 = vmatpush3.bf16.msra.mxu1 %v1511_v11  ;;  %1119 = vmatprep.subr.bf16.mxu0 %v1517_v12  ;;  %v1637_v32 = vld [vmem:[%s1940_s0] ss:$12 sps:$4 sm:$0xff]   ;;  %v1643_v33 = vld [vmem:[%s1940_s0 + $0x4] ss:$12 sps:$4 sm:$0xff]   ;;  %v1662_v37 = vld [vmem:[%s1940_s0 + $0x1c] ss:$12 sps:$4 sm:$0xff]  }
   0xe   :  { %1165 = vmatprep.subr.bf16.mxu1 %v1523_v13  ;;  %v1380_v34 = vld [vmem:[%s1941_s1] ss:$12 sps:$4 sm:$0xff]   ;;  %v1382_v35 = vld [vmem:[%s1941_s1 + $0x4] ss:$12 sps:$4 sm:$0xff]   ;;  %337 = vmatprep.mubr.bf16.mxu0 %v1643_v33  ;;  %v1386_v38 = vld [vmem:[%s1941_s1 + $0x1c] ss:$12 sps:$4 sm:$0xff]  }
   0xf   :  { %v1656_v36 = vld [vmem:[%s1938_s2 + $0x88] sm:$0xff]   ;;  %647 = vmatprep.mubr.bf16.mxu1 %v1382_v35  ;;  %v1675_v39 = vld [vmem:[%s1940_s0 + $0x18] ss:$12 sps:$4 sm:$0xff]   ;;  %v1683_v41 = vld [vmem:[%s1940_s0 + $0x34] ss:$12 sps:$4 sm:$0xff]  }
  0x10   :  { %1120 = vmatpush3.bf16.msra.mxu0 %v1529_v14  ;;  %v1389_v40 = vld [vmem:[%s1941_s1 + $0x18] ss:$12 sps:$4 sm:$0xff]   ;;  %v1392_v43 = vld [vmem:[%s1941_s1 + $0x34] ss:$12 sps:$4 sm:$0xff]   ;;  %v1709_v45 = vld [vmem:[%s1939_s3 + $0x88] sm:$0xff]  }
  0x11   :  { %1166 = vmatpush3.bf16.msra.mxu1 %v1535_v15  ;;  %1121 = vmatprep.subr.bf16.mxu0 %v1541_v16  ;;  %v1688_v42 = vld [vmem:[%s1938_s2 + $0x80] sm:$0xff]   ;;  %v1717_v47 = vld [vmem:[%s1940_s0 + $0x4c] ss:$12 sps:$4 sm:$0xff]   ;;  %v1732_v49 = vld [vmem:[%s1940_s0 + $0x48] ss:$12 sps:$4 sm:$0xff]  }
  0x12   :  { %1167 = vmatprep.subr.bf16.mxu1 %v1547_v17  ;;  %v1399_v48 = vld [vmem:[%s1941_s1 + $0x4c] ss:$12 sps:$4 sm:$0xff]   ;;  %v1402_v50 = vld [vmem:[%s1941_s1 + $0x48] ss:$12 sps:$4 sm:$0xff]   ;;  %v1408_v54 = vld [vmem:[%s1939_s3 + $0x80] sm:$0xff]  }
  0x13   :  { %v1740_v51 = vld [vmem:[%s1940_s0 + $0x8] ss:$12 sps:$4 sm:$0xff]   ;;  %v1404_v52 = vld [vmem:[%s1940_s0 + $0x20] ss:$12 sps:$4 sm:$0xff]   ;;  %v1406_v53 = vld [vmem:[%s1940_s0 + $0x38] ss:$12 sps:$4 sm:$0xff]  }
  0x14   :  { %1122 = vmatpush3.bf16.msra.mxu0 %v1553_v18  ;;  %v1409_v56 = vld [vmem:[%s1941_s1 + $0x8] ss:$12 sps:$4 sm:$0xff]   ;;  %v1410_v57 = vld [vmem:[%s1941_s1 + $0x20] ss:$12 sps:$4 sm:$0xff]   ;;  %v1411_v58 = vld [vmem:[%s1941_s1 + $0x38] ss:$12 sps:$4 sm:$0xff]  }
  0x15   :  { %1168 = vmatpush3.bf16.msra.mxu1 %v1559_v19  ;;  %1123 = vmatprep.subr.bf16.mxu0 %v1565_v20 }
  0x16   :  { %1169 = vmatprep.subr.bf16.mxu1 %v1571_v21 }
  0x18   :  { %1124 = vmatpush3.bf16.msra.mxu0 %v1577_v22 }
  0x19   :  { %1170 = vmatpush3.bf16.msra.mxu1 %v1583_v23  ;;  %1125 = vmatprep.subr.bf16.mxu0 %v1589_v24 }
  0x1a   :  { %1171 = vmatprep.subr.bf16.mxu1 %v1595_v25 }
  0x1c   :  { %1126 = vmatpush3.bf16.msra.mxu0 %v1601_v26 }
  0x1d   :  { %1172 = vmatpush3.bf16.msra.mxu1 %v1607_v27  ;;  %1127 = vmatprep.subr.bf16.mxu0 %v1613_v28 }
  0x1e   :  { %1173 = vmatprep.subr.bf16.mxu1 %v1619_v29 }
  0x20   :  { %1128 = vmatpush3.bf16.msra.mxu0 %v1625_v30 }
  0x21   :  { %1174 = vmatpush3.bf16.msra.mxu1 %v1631_v31  ;;  %1297 = vmatprep.subr.bf16.mxu0 %v1656_v36 }
  0x22   :  { %1205 = vmatprep.subr.bf16.mxu1 %v1446_v0 }
  0x23   :  { %338 = vmatmul.mubr.bf16.vlgmr.msra.gmra.mxu0 %v1637_v32 }
  0x24   :  { %648 = vmatmul.mubr.bf16.vlgmr.msra.gmra.mxu1 %v1380_v34  ;;  %1298 = vmatpush3.bf16.msra.mxu0 %v1656_v36 }
  0x25   :  { %1206 = vmatpush3.bf16.msra.mxu1 %v1457_v2  ;;  %345 = vmatprep.mubr.bf16.mxu0 %v1662_v37 }
  0x26   :  { %1207 = vmatprep.subr.bf16.mxu1 %v1469_v4  ;;  %655 = vmatprep.mubr.bf16.mxu1 %v1386_v38 }
  0x27   :  { %1299 = vmatprep.subr.bf16.mxu0 %v1688_v42 }
  0x28   :  { %1300 = vmatpush3.bf16.msra.mxu0 %v1688_v42 }
  0x29   :  { %1208 = vmatpush3.bf16.msra.mxu1 %v1481_v6  ;;  %1309 = vmatprep.subr.bf16.mxu0 %v1709_v45 }
  0x2a   :  { %1209 = vmatprep.subr.bf16.mxu1 %v1493_v8 }
  0x2b   :  { %346 = vmatmul.mubr.bf16.gmra.mxu0 %v1675_v39 }
  0x2c   :  { %656 = vmatmul.mubr.bf16.gmra.mxu1 %v1389_v40  ;;  %353 = vmatprep.mubr.bf16.mxu0 %v1683_v41 }
  0x2d   :  { %1210 = vmatpush3.bf16.msra.mxu1 %v1505_v10  ;;  %663 = vmatprep.mubr.bf16.mxu1 %v1392_v43 }
  0x2e   :  { %1211 = vmatprep.subr.bf16.mxu1 %v1517_v12 }
  0x31   :  { %1212 = vmatpush3.bf16.msra.mxu1 %v1529_v14 }
  0x32   :  { %1213 = vmatprep.subr.bf16.mxu1 %v1541_v16 }
  0x33   :  { %354 = vmatmul.mubr.bf16.gmra.mxu0 %v1702_v44 }
  0x34   :  { %664 = vmatmul.mubr.bf16.gmra.mxu1 %v1395_v46  ;;  %361 = vmatprep.mubr.bf16.mxu0 %v1717_v47 }
  0x35   :  { %1214 = vmatpush3.bf16.msra.mxu1 %v1553_v18  ;;  %671 = vmatprep.mubr.bf16.mxu1 %v1399_v48 }
  0x36   :  { %1215 = vmatprep.subr.bf16.mxu1 %v1565_v20 }
  0x39   :  { %1216 = vmatpush3.bf16.msra.mxu1 %v1577_v22 }
  0x3a   :  { %1217 = vmatprep.subr.bf16.mxu1 %v1589_v24 }
  0x3b   :  { %362 = vmatmul.mubr.bf16.gmra.mxu0 %v1732_v49 }
  0x3c   :  { %672 = vmatmul.mubr.bf16.gmra.mxu1 %v1402_v50  ;;  %1301 = vmatprep.mubr.msk.bf16.mxu0 %vm292_vm0, %v1740_v51 }
  0x3d   :  { %1218 = vmatpush3.bf16.msra.mxu1 %v1601_v26  ;;  %777 = vmatprep.mubr.bf16.mxu1 %v1382_v35 }
  0x3e   :  { %1219 = vmatprep.subr.bf16.mxu1 %v1613_v28 }
  0x41   :  { %1220 = vmatpush3.bf16.msra.mxu1 %v1625_v30 }
  0x42   :  { %1251 = vmatprep.subr.bf16.mxu1 %v1451_v1 }
  0x43   :  { %1302 = vmatmul.mubr.msk.bf16.vlgmr.msra.gmra.mxu0 %vm292_vm0, %v1404_v52 }
  0x44   :  { %778 = vmatmul.mubr.bf16.vlgmr.msra.gmra.mxu1 %v1380_v34  ;;  %1310 = vmatpush3.bf16.msra.mxu0 %v1709_v45 }
  0x45   :  { %1252 = vmatpush3.bf16.msra.mxu1 %v1463_v3  ;;  %1305 = vmatprep.mubr.msk.bf16.mxu0 %vm292_vm0, %v1406_v53 }
  0x46   :  { %1253 = vmatprep.subr.bf16.mxu1 %v1475_v5  ;;  %785 = vmatprep.mubr.bf16.mxu1 %v1386_v38 }
  0x47   :  { %1311 = vmatprep.subr.bf16.mxu0 %v1408_v54 }
  0x48   :  { %1312 = vmatpush3.bf16.msra.mxu0 %v1408_v54 }
  0x49   :  { %1254 = vmatpush3.bf16.msra.mxu1 %v1487_v7  ;;  %1321 = vmatprep.subr.bf16.mxu0 %v1656_v36 }
  0x4a   :  { %1255 = vmatprep.subr.bf16.mxu1 %v1499_v9 }
  0x4b   :  { %1306 = vmatmul.mubr.msk.bf16.gmra.mxu0 %vm292_vm0, %v1407_v55 }
  0x4c   :  { %786 = vmatmul.mubr.bf16.gmra.mxu1 %v1389_v40  ;;  %1313 = vmatprep.mubr.msk.bf16.mxu0 %vm292_vm0, %v1409_v56 }
  0x4d   :  { %1256 = vmatpush3.bf16.msra.mxu1 %v1511_v11  ;;  %793 = vmatprep.mubr.bf16.mxu1 %v1392_v43 }
  0x4e   :  { %1257 = vmatprep.subr.bf16.mxu1 %v1523_v13 }
  0x51   :  { %1258 = vmatpush3.bf16.msra.mxu1 %v1535_v15 }
  0x52   :  { %1259 = vmatprep.subr.bf16.mxu1 %v1547_v17 }
  0x53   :  { %1314 = vmatmul.mubr.msk.bf16.vlgmr.msra.gmra.mxu0 %vm292_vm0, %v1410_v57 }
  0x54   :  { %794 = vmatmul.mubr.bf16.gmra.mxu1 %v1395_v46  ;;  %1322 = vmatpush3.bf16.msra.mxu0 %v1656_v36 }
  0x55   :  { %1260 = vmatpush3.bf16.msra.mxu1 %v1559_v19  ;;  %1317 = vmatprep.mubr.msk.bf16.mxu0 %vm292_vm0, %v1411_v58 }
  0x56   :  { %1261 = vmatprep.subr.bf16.mxu1 %v1571_v21  ;;  %801 = vmatprep.mubr.bf16.mxu1 %v1399_v48 }
  0x57   :  { %1323 = vmatprep.subr.bf16.mxu0 %v1688_v42 }
  0x58   :  { %1324 = vmatpush3.bf16.msra.mxu0 %v1688_v42 }
  0x59   :  { %1262 = vmatpush3.bf16.msra.mxu1 %v1583_v23  ;;  %1333 = vmatprep.subr.bf16.mxu0 %v1709_v45 }
  0x5a   :  { %1263 = vmatprep.subr.bf16.mxu1 %v1595_v25 }
  0x5b   :  { %1318 = vmatmul.mubr.msk.bf16.gmra.mxu0 %vm292_vm0, %v1412_v59 }
  0x5c   :  { %802 = vmatmul.mubr.bf16.gmra.mxu1 %v1402_v50  ;;  %1325 = vmatprep.mubr.msk.bf16.mxu0 %vm292_vm0, %v1409_v56 }
  0x5d   :  { %1264 = vmatpush3.bf16.msra.mxu1 %v1607_v27  ;;  %915 = vmatprep.mubr.bf16.mxu1 %v1643_v33 }
  0x5e   :  { %1265 = vmatprep.subr.bf16.mxu1 %v1619_v29 }
  0x61   :  { %1266 = vmatpush3.bf16.msra.mxu1 %v1631_v31 }
  0x63   :  { %1326 = vmatmul.mubr.msk.bf16.vlgmr.msra.gmra.mxu0 %vm292_vm0, %v1410_v57 }
  0x64   :  { %916 = vmatmul.mubr.bf16.vlgmr.msra.gmra.mxu1 %v1637_v32  ;;  %1334 = vmatpush3.bf16.msra.mxu0 %v1709_v45 }
  0x65   :  { %1329 = vmatprep.mubr.msk.bf16.mxu0 %vm292_vm0, %v1411_v58  ;;  %923 = vmatprep.mubr.bf16.mxu1 %v1662_v37 }
  0x66   :  { %1335 = vmatprep.subr.bf16.mxu0 %v1408_v54 }
  0x68   :  { %1336 = vmatpush3.bf16.msra.mxu0 %v1408_v54 }
  0x6b   :  { %1330 = vmatmul.mubr.msk.bf16.gmra.mxu0 %vm292_vm0, %v1412_v59 }
  0x6c   :  { %924 = vmatmul.mubr.bf16.gmra.mxu1 %v1675_v39  ;;  %1337 = vmatprep.mubr.msk.bf16.mxu0 %vm292_vm0, %v1740_v51 }
  0x6d   :  { %931 = vmatprep.mubr.bf16.mxu1 %v1683_v41 }
  0x73   :  { %1338 = vmatmul.mubr.msk.bf16.vlgmr.msra.gmra.mxu0 %vm292_vm0, %v1404_v52 }
  0x74   :  { %932 = vmatmul.mubr.bf16.gmra.mxu1 %v1702_v44  ;;  %1341 = vmatprep.mubr.msk.bf16.mxu0 %vm292_vm0, %v1406_v53 }
  0x75   :  { %939 = vmatprep.mubr.bf16.mxu1 %v1717_v47 }
  0x7b   :  { %1342 = vmatmul.mubr.msk.bf16.gmra.mxu0 %vm292_vm0, %v1407_v55 }
  0x7c   :  { %940 = vmatmul.mubr.bf16.gmra.mxu1 %v1732_v49 }
  0xe3   :  { %v1129_v60 = vpop.f32.mrf.mxu0 }
  0xe4   :  { %v1175_v61 = vpop.f32.mrf.mxu1 }
  0xe5   :  { %v1130_v62 = vpop.f32.mrf.mxu0 }
  0xe6   :  { %v1176_v63 = vpop.f32.mrf.mxu1  ;;  %v1131_v47 = vadd.f32 %v1130_v62, %v1129_v60 }
  0xe7   :  { %v1132_v0 = vpop.f32.mrf.mxu0  ;;  %v1177_v48 = vadd.f32 %v1176_v63, %v1175_v61 }
  0xe8   :  { %v1178_v1 = vpop.f32.mrf.mxu1 }
  0xe9   :  { %v1133_v2 = vpop.f32.mrf.mxu0 }
  0xea   :  { %v1179_v3 = vpop.f32.mrf.mxu1  ;;  %v1134_v59 = vadd.f32 %v1133_v2, %v1132_v0 }
  0xeb   :  { %v1135_v4 = vpop.f32.mrf.mxu0 }
  0xec   :  { %v1181_v5 = vpop.f32.mrf.mxu1 }
  0xed   :  { %v1136_v6 = vpop.f32.mrf.mxu0 }
  0xee   :  { %v1182_v7 = vpop.f32.mrf.mxu1  ;;  %v1137_v43 = vadd.f32 %v1136_v6, %v1135_v4 }
  0xef   :  { %v1138_v8 = vpop.f32.mrf.mxu0  ;;  %v1183_v44 = vadd.f32 %v1182_v7, %v1181_v5  ;;  %v1180_v5 = vadd.f32 %v1179_v3, %v1178_v1 }
  0xf0   :  { %v1184_v9 = vpop.f32.mrf.mxu1 }
  0xf1   :  { %v1139_v10 = vpop.f32.mrf.mxu0 }
  0xf2   :  { %v1185_v11 = vpop.f32.mrf.mxu1  ;;  %v1140_v52 = vadd.f32 %v1139_v10, %v1138_v8 }
  0xf3   :  { %v1821_v12 = vpop.f32.mrf.mxu0  ;;  %v1186_v54 = vadd.f32 %v1185_v11, %v1184_v9 }
  0xf4   :  { %v1823_v13 = vpop.f32.mrf.mxu1 }
  0xf5   :  { %v1142_v14 = vpop.f32.mrf.mxu0 }
  0xf6   :  { %v1825_v15 = vpop.f32.mrf.mxu1  ;;  %v1143_v3 = vadd.f32 %v1142_v14, %v1821_v12 }
  0xf7   :  { %v1827_v16 = vpop.f32.mrf.mxu0  ;;  %v1189_v11 = vadd.f32 %v1825_v15, %v1823_v13 }
  0xf8   :  { %v1829_v17 = vpop.f32.mrf.mxu1 }
  0xf9   :  { %v1831_v18 = vpop.f32.mrf.mxu0 }
  0xfa   :  { %v1833_v19 = vpop.f32.mrf.mxu1  ;;  %v1146_v15 = vadd.f32 %v1831_v18, %v1827_v16 }
  0xfb   :  { %v1147_v20 = vpop.f32.mrf.mxu0 }
  0xfc   :  { %v1193_v21 = vpop.f32.mrf.mxu1 }
  0xfd   :  { %v1148_v22 = vpop.f32.mrf.mxu0 }
  0xfe   :  { %v1194_v23 = vpop.f32.mrf.mxu1  ;;  %v1149_v63 = vadd.f32 %v1148_v22, %v1147_v20 }
  0xff   :  { %v1150_v24 = vpop.f32.mrf.mxu0  ;;  %v1195_v8 = vadd.f32 %v1194_v23, %v1193_v21 }
 0x100   :  { %v1196_v25 = vpop.f32.mrf.mxu1 }
 0x101   :  { %v1151_v26 = vpop.f32.mrf.mxu0 }
 0x102   :  { %v1197_v27 = vpop.f32.mrf.mxu1  ;;  %v1152_v23 = vadd.f32 %v1151_v26, %v1150_v24 }
 0x103   :  { %v1303_v28 = vpop.f32.mrf.mxu0 }
 0x104   :  { %v1835_v29 = vpop.f32.mrf.mxu1  ;;  %v413_v49 = vadd.f32 %v1303_v28, %v1137_v43  ;;  %v1192_v43 = vadd.f32 %v1833_v19, %v1829_v17 }
 0x105   :  { %v404_v30 = vpop.f32.mrf.mxu0 }
 0x106   :  { %v1837_v31 = vpop.f32.mrf.mxu1  ;;  %v405_v55 = vadd.f32 %v1131_v47, %v404_v30 }
 0x107   :  { %v1304_v32 = vpop.f32.mrf.mxu0 }
 0x108   :  { %v1839_v33 = vpop.f32.mrf.mxu1  ;;  %v416_v6 = vadd.f32 %v1304_v32, %v1140_v52  ;;  %v1198_v32 = vadd.f32 %v1197_v27, %v1196_v25 }
 0x109   :  { %v407_v34 = vpop.f32.mrf.mxu0 }
 0x10a   :  { %v1841_v35 = vpop.f32.mrf.mxu1  ;;  %v408_v9 = vadd.f32 %v1134_v59, %v407_v34 }
 0x10b   :  { %v1307_v36 = vpop.f32.mrf.mxu0 }
 0x10c   :  { %v1843_v37 = vpop.f32.mrf.mxu1  ;;  %v429_v28 = vadd.f32 %v1307_v36, %v1149_v63 }
 0x10d   :  { %v420_v38 = vpop.f32.mrf.mxu0 }
 0x10e   :  { %v1845_v39 = vpop.f32.mrf.mxu1  ;;  %v421_v34 = vadd.f32 %v1143_v3, %v420_v38 }
 0x10f   :  { %v1308_v40 = vpop.f32.mrf.mxu0 }
 0x110   :  { %v1847_v41 = vpop.f32.mrf.mxu1 }
 0x111   :  { %v423_v42 = vpop.f32.mrf.mxu0 }
 0x112   :  { %v1849_v45 = vpop.f32.mrf.mxu1  ;;  %v424_v38 = vadd.f32 %v1146_v15, %v423_v42 }
 0x113   :  { %v1315_v46 = vpop.f32.mrf.mxu0 }
 0x114   :  { %v723_v50 = vadd.f32 %v1315_v46, %v1183_v44  ;;  %v1851_v51 = vpop.f32.mrf.mxu1  ;;  %v432_v44 = vadd.f32 %v1308_v40, %v1152_v23 }
 0x115   :  { %v714_v53 = vpop.f32.mrf.mxu0 }
 0x116   :  { %v877_v56 = vsub.f32 %v413_v49, %v723_v50  ;;  %v715_v57 = vadd.f32 %v1177_v48, %v714_v53  ;;  %v1853_v58 = vpop.f32.mrf.mxu1 }
 0x117   :  { %v1316_v4 = vpop.f32.mrf.mxu0 }
 0x118   :  { %1015 = vst [vmem:[%s1942_s4 + $0x10] sm:$0xff] %v877_v56  ;;  %v875_v60 = vsub.f32 %v405_v55, %v715_v57  ;;  %v726_v61 = vadd.f32 %v1316_v4, %v1186_v54  ;;  %v1858_v62 = vpop.f32.mrf.mxu1  ;;  %v1223_v56 = vadd.f32 %v1837_v31, %v1835_v29  ;;  %v1229_v57 = vadd.f32 %v1845_v39, %v1843_v37 }
 0x119   :  { %v717_v7 = vpop.f32.mrf.mxu0 }
 0x11a   :  { %1013 = vst [vmem:[%s1942_s4] sm:$0xff] %v875_v60  ;;  %v878_v0 = vsub.f32 %v416_v6, %v726_v61  ;;  %v718_v2 = vadd.f32 %v1180_v5, %v717_v7  ;;  %v1863_v1 = vpop.f32.mrf.mxu1  ;;  %v1232_v7 = vadd.f32 %v1849_v45, %v1847_v41 }
 0x11b   :  { %v1319_v10 = vpop.f32.mrf.mxu0 }
 0x11c   :  { %1016 = vst [vmem:[%s1942_s4 + $0x18] sm:$0xff] %v878_v0  ;;  %v876_v20 = vsub.f32 %v408_v9, %v718_v2  ;;  %v739_v21 = vadd.f32 %v1319_v10, %v1195_v8  ;;  %v1871_v22 = vpop.f32.mrf.mxu1  ;;  %v1226_v9 = vadd.f32 %v1841_v35, %v1839_v33  ;;  %v1235_v33 = vadd.f32 %v1853_v58, %v1851_v51 }
 0x11d   :  { %v730_v30 = vpop.f32.mrf.mxu0  ;;  %v1238_v51 = vadd.f32 %v1863_v1, %v1858_v62 }
 0x11e   :  { %1014 = vst [vmem:[%s1942_s4 + $0x8] sm:$0xff] %v876_v20  ;;  %v881_v12 = vsub.f32 %v429_v28, %v739_v21  ;;  %v731_v14 = vadd.f32 %v1189_v11, %v730_v30  ;;  %v1876_v13 = vpop.f32.mrf.mxu1 }
 0x11f   :  { %v1320_v36 = vpop.f32.mrf.mxu0 }
 0x120   :  { %1019 = vst [vmem:[%s1942_s4 + $0x30] sm:$0xff] %v881_v12  ;;  %v879_v24 = vsub.f32 %v421_v34, %v731_v14  ;;  %v742_v25 = vadd.f32 %v1320_v36, %v1198_v32  ;;  %v1885_v26 = vpop.f32.mrf.mxu1 }
 0x121   :  { %v733_v27 = vpop.f32.mrf.mxu0 }
 0x122   :  { %1017 = vst [vmem:[%s1942_s4 + $0x20] sm:$0xff] %v879_v24  ;;  %v882_v16 = vsub.f32 %v432_v44, %v742_v25  ;;  %v734_v18 = vadd.f32 %v1192_v43, %v733_v27  ;;  %v1890_v46 = vpop.f32.mrf.mxu1  ;;  %v1241_v25 = vadd.f32 %v1876_v13, %v1871_v22 }
 0x123   :  { %v1327_v17 = vpop.f32.mrf.mxu0 }
 0x124   :  { %1020 = vst [vmem:[%s1942_s4 + $0x38] sm:$0xff] %v882_v16  ;;  %v880_v19 = vsub.f32 %v424_v38, %v734_v18  ;;  %v1267_v40 = vpop.f32.mrf.mxu1  ;;  %v853_v6 = vadd.f32 %v1327_v17, %v1229_v57 }
 0x125   :  { %v844_v47 = vpop.f32.mrf.mxu0 }
 0x126   :  { %1018 = vst [vmem:[%s1942_s4 + $0x28] sm:$0xff] %v880_v19  ;;  %v1268_v42 = vpop.f32.mrf.mxu1  ;;  %v845_v60 = vadd.f32 %v1223_v56, %v844_v47  ;;  %v1244_v47 = vadd.f32 %v1890_v46, %v1885_v26 }
 0x127   :  { %v1328_v48 = vpop.f32.mrf.mxu0  ;;  %v1269_v61 = vadd.f32 %v1268_v42, %v1267_v40 }
 0x128   :  { %v1270_v49 = vpop.f32.mrf.mxu1  ;;  %v856_v29 = vadd.f32 %v1328_v48, %v1232_v7 }
 0x129   :  { %v847_v50 = vpop.f32.mrf.mxu0  ;;  %v918_v28 = vadd.f32 %v1269_v61, %v845_v60 }
 0x12a   :  { %v1271_v52 = vpop.f32.mrf.mxu1  ;;  %v848_v37 = vadd.f32 %v1226_v9, %v847_v50 }
 0x12b   :  { %v1331_v53 = vpop.f32.mrf.mxu0  ;;  %v1272_v39 = vadd.f32 %v1271_v52, %v1270_v49 }
 0x12c   :  { %v1273_v54 = vpop.f32.mrf.mxu1  ;;  %v869_v17 = vadd.f32 %v1331_v53, %v1241_v25 }
 0x12d   :  { %v860_v55 = vpop.f32.mrf.mxu0  ;;  %v921_v34 = vadd.f32 %v1272_v39, %v848_v37 }
 0x12e   :  { %v1274_v59 = vpop.f32.mrf.mxu1  ;;  %v861_v14 = vadd.f32 %v1235_v33, %v860_v55 }
 0x12f   :  { %v1275_v4 = vadd.f32 %v1274_v59, %v1273_v54  ;;  %v1332_v5 = vpop.f32.mrf.mxu0 }
 0x130   :  { %v1276_v63 = vpop.f32.mrf.mxu1  ;;  %v872_v13 = vadd.f32 %v1332_v5, %v1244_v47 }
 0x131   :  { %v863_v8 = vpop.f32.mrf.mxu0  ;;  %v926_v2 = vadd.f32 %v1275_v4, %v853_v6 }
 0x132   :  { %v1277_v0 = vpop.f32.mrf.mxu1  ;;  %v864_v38 = vadd.f32 %v1238_v51, %v863_v8 }
 0x133   :  { %v1278_v31 = vadd.f32 %v1277_v0, %v1276_v63  ;;  %v1339_v3 = vpop.f32.mrf.mxu0 }
 0x134   :  { %v1279_v10 = vpop.f32.mrf.mxu1  ;;  %v991_v11 = vadd.f32 %v1339_v3, %v926_v2 }
 0x135   :  { %v982_v20 = vpop.f32.mrf.mxu0  ;;  %v929_v21 = vadd.f32 %v1278_v31, %v856_v29 }
 0x136   :  { %1023 = vst [vmem:[%s1943_s5 + $0x10] sm:$0xff] %v991_v11  ;;  %v1280_v41 = vpop.f32.mrf.mxu1  ;;  %v983_v45 = vadd.f32 %v982_v20, %v918_v28 }
 0x137   :  { %v1340_v23 = vpop.f32.mrf.mxu0  ;;  %v1281_v35 = vadd.f32 %v1280_v41, %v1279_v10 }
 0x138   :  { %1021 = vst [vmem:[%s1943_s5] sm:$0xff] %v983_v45  ;;  %v1282_v30 = vpop.f32.mrf.mxu1  ;;  %v994_v32 = vadd.f32 %v1340_v23, %v929_v21 }
 0x139   :  { %v985_v12 = vpop.f32.mrf.mxu0  ;;  %v934_v24 = vadd.f32 %v1281_v35, %v861_v14 }
 0x13a   :  { %1024 = vst [vmem:[%s1943_s5 + $0x18] sm:$0xff] %v994_v32  ;;  %v1283_v15 = vpop.f32.mrf.mxu1  ;;  %v986_v36 = vadd.f32 %v985_v12, %v921_v34 }
 0x13b   :  { %v1343_v43 = vpop.f32.mrf.mxu0  ;;  %v1284_v58 = vadd.f32 %v1283_v15, %v1282_v30 }
 0x13c   :  { %1022 = vst [vmem:[%s1943_s5 + $0x8] sm:$0xff] %v986_v36  ;;  %v1285_v44 = vpop.f32.mrf.mxu1 }
 0x13d   :  { %v998_v27 = vpop.f32.mrf.mxu0  ;;  %v937_v1 = vadd.f32 %v1284_v58, %v864_v38 }
 0x13e   :  { %v1286_v16 = vpop.f32.mrf.mxu1  ;;  %v999_v18 = vadd.f32 %v998_v27, %v934_v24 }
 0x13f   :  { %v1287_v19 = vadd.f32 %v1286_v16, %v1285_v44  ;;  %v1344_v40 = vpop.f32.mrf.mxu0 }
 0x140   :  { %1025 = vst [vmem:[%s1943_s5 + $0x20] sm:$0xff] %v999_v18  ;;  %v1288_v62 = vpop.f32.mrf.mxu1 }
 0x141   :  { %v942_v42 = vadd.f32 %v1287_v19, %v869_v17  ;;  %v1001_v48 = vpop.f32.mrf.mxu0 }
 0x142   :  { %v1289_v49 = vpop.f32.mrf.mxu1  ;;  %v1002_v22 = vadd.f32 %v1001_v48, %v937_v1 }
 0x143   :  { %v1007_v50 = vadd.f32 %v1343_v43, %v942_v42  ;;  %v1290_v52 = vadd.f32 %v1289_v49, %v1288_v62 }
 0x144   :  { %1026 = vst [vmem:[%s1943_s5 + $0x28] sm:$0xff] %v1002_v22 }
 0x145   :  { %1027 = vst [vmem:[%s1943_s5 + $0x30] sm:$0xff] %v1007_v50  ;;  %v945_v53 = vadd.f32 %v1290_v52, %v872_v13 }
 0x147   :  { %v1010_v54 = vadd.f32 %v1344_v40, %v945_v53 }
 0x149   :  { %1028 = vst [vmem:[%s1943_s5 + $0x38] sm:$0xff] %v1010_v54 }

// kernel: forward.33
= control target key start
LH: loop header
LB: loop body
LE: loop exit
PB: predicated region body
PF: predicated region fallthrough
CT: control target
= control target key end

     0   :  { %vm76_vm0 = vcmask 261120   ;;  %s667_s2 = inlined_call_operand.vmem [shape: bf16[32,128], index: 2, kind: input, shape index: {}]   ;;  %s668_s3 = inlined_call_operand.vmem [shape: bf16[32,128], index: 3, kind: input, shape index: {}]   ;;  %s669_s0 = inlined_call_operand.vmem [shape: bf16[64,32], index: 0, kind: input, shape index: {}]   ;;  %s670_s1 = inlined_call_operand.vmem [shape: bf16[64,32], index: 1, kind: input, shape index: {}]   ;;  %s671_s4 = inlined_call_operand.vmem [shape: f32[64,128], index: 4, kind: output, shape index: {0}]   ;;  %s672_s5 = inlined_call_operand.vmem [shape: f32[64,128], index: 5, kind: output, shape index: {1}]  }
   0x1   :  { %v525_v0 = vld [vmem:[%s667_s2 + $0x8] sm:$0xff]   ;;  %v527_v2 = vld [vmem:[%s667_s2] sm:$0xff]   ;;  %v533_v8 = vld [vmem:[%s669_s0 + $0x10] sm:$0xff]  }
   0x2   :  { %v526_v1 = vld [vmem:[%s668_s3 + $0x8] sm:$0xff]   ;;  %477 = vmatprep.subr.bf16.mxu0 %v525_v0  ;;  %v528_v3 = vld [vmem:[%s668_s3] sm:$0xff]   ;;  %v534_v9 = vld [vmem:[%s670_s1 + $0x10] sm:$0xff]  }
   0x3   :  { %489 = vmatprep.subr.bf16.mxu1 %v526_v1  ;;  %478 = vmatpush3.bf16.msra.mxu0 %v525_v0  ;;  %v529_v4 = vld [vmem:[%s669_s0] sm:$0xff]   ;;  %v531_v6 = vld [vmem:[%s669_s0 + $0x8] sm:$0xff]   ;;  %v535_v10 = vld [vmem:[%s669_s0 + $0x18] sm:$0xff]  }
   0x4   :  { %490 = vmatpush3.bf16.msra.mxu1 %v526_v1  ;;  %479 = vmatprep.subr.bf16.mxu0 %v527_v2  ;;  %v530_v5 = vld [vmem:[%s670_s1] sm:$0xff]   ;;  %v532_v7 = vld [vmem:[%s670_s1 + $0x8] sm:$0xff]   ;;  %v536_v11 = vld [vmem:[%s670_s1 + $0x18] sm:$0xff]  }
   0x5   :  { %491 = vmatprep.subr.bf16.mxu1 %v528_v3  ;;  %481 = vmatprep.mubr.msk.bf16.mxu0 %vm76_vm0, %v529_v4 }
   0x6   :  { %493 = vmatprep.mubr.msk.bf16.mxu1 %vm76_vm0, %v530_v5 }
   0x7   :  { %480 = vmatpush3.bf16.msra.mxu0 %v527_v2 }
   0x8   :  { %492 = vmatpush3.bf16.msra.mxu1 %v528_v3  ;;  %501 = vmatprep.subr.bf16.mxu0 %v525_v0 }
   0x9   :  { %513 = vmatprep.subr.bf16.mxu1 %v526_v1 }
   0xa   :  { %482 = vmatmul.mubr.msk.bf16.vlgmr.msra.gmra.mxu0 %vm76_vm0, %v531_v6 }
   0xb   :  { %494 = vmatmul.mubr.msk.bf16.vlgmr.msra.gmra.mxu1 %vm76_vm0, %v532_v7  ;;  %502 = vmatpush3.bf16.msra.mxu0 %v525_v0 }
   0xc   :  { %514 = vmatpush3.bf16.msra.mxu1 %v526_v1  ;;  %485 = vmatprep.mubr.msk.bf16.mxu0 %vm76_vm0, %v533_v8 }
   0xd   :  { %497 = vmatprep.mubr.msk.bf16.mxu1 %vm76_vm0, %v534_v9  ;;  %503 = vmatprep.subr.bf16.mxu0 %v527_v2 }
   0xe   :  { %515 = vmatprep.subr.bf16.mxu1 %v528_v3 }
   0xf   :  { %504 = vmatpush3.bf16.msra.mxu0 %v527_v2 }
  0x10   :  { %516 = vmatpush3.bf16.msra.mxu1 %v528_v3 }
  0x12   :  { %486 = vmatmul.mubr.msk.bf16.gmra.mxu0 %vm76_vm0, %v535_v10 }
  0x13   :  { %498 = vmatmul.mubr.msk.bf16.gmra.mxu1 %vm76_vm0, %v536_v11  ;;  %505 = vmatprep.mubr.msk.bf16.mxu0 %vm76_vm0, %v530_v5 }
  0x14   :  { %517 = vmatprep.mubr.msk.bf16.mxu1 %vm76_vm0, %v529_v4 }
  0x1a   :  { %506 = vmatmul.mubr.msk.bf16.vlgmr.msra.gmra.mxu0 %vm76_vm0, %v532_v7 }
  0x1b   :  { %518 = vmatmul.mubr.msk.bf16.vlgmr.msra.gmra.mxu1 %vm76_vm0, %v531_v6  ;;  %509 = vmatprep.mubr.msk.bf16.mxu0 %vm76_vm0, %v534_v9 }
  0x1c   :  { %521 = vmatprep.mubr.msk.bf16.mxu1 %vm76_vm0, %v533_v8 }
  0x22   :  { %510 = vmatmul.mubr.msk.bf16.gmra.mxu0 %vm76_vm0, %v536_v11 }
  0x23   :  { %522 = vmatmul.mubr.msk.bf16.gmra.mxu1 %vm76_vm0, %v535_v10 }
  0xca   :  { %v483_v12 = vpop.f32.mrf.mxu0 }
  0xcb   :  { %v495_v13 = vpop.f32.mrf.mxu1 }
  0xcc   :  { %v330_v14 = vsub.f32 %v483_v12, %v495_v13  ;;  %v123_v15 = vpop.f32.mrf.mxu0 }
  0xcd   :  { %v232_v16 = vpop.f32.mrf.mxu1 }
  0xce   :  { %403 = vst [vmem:[%s671_s4 + $0x10] sm:$0xff] %v330_v14  ;;  %v328_v17 = vsub.f32 %v123_v15, %v232_v16  ;;  %v484_v18 = vpop.f32.mrf.mxu0 }
  0xcf   :  { %v496_v19 = vpop.f32.mrf.mxu1 }
  0xd0   :  { %401 = vst [vmem:[%s671_s4] sm:$0xff] %v328_v17  ;;  %v331_v20 = vsub.f32 %v484_v18, %v496_v19  ;;  %v126_v21 = vpop.f32.mrf.mxu0 }
  0xd1   :  { %v235_v22 = vpop.f32.mrf.mxu1 }
  0xd2   :  { %404 = vst [vmem:[%s671_s4 + $0x18] sm:$0xff] %v331_v20  ;;  %v329_v23 = vsub.f32 %v126_v21, %v235_v22  ;;  %v487_v24 = vpop.f32.mrf.mxu0 }
  0xd3   :  { %v499_v25 = vpop.f32.mrf.mxu1 }
  0xd4   :  { %402 = vst [vmem:[%s671_s4 + $0x8] sm:$0xff] %v329_v23  ;;  %v334_v26 = vsub.f32 %v487_v24, %v499_v25  ;;  %v139_v27 = vpop.f32.mrf.mxu0 }
  0xd5   :  { %v248_v28 = vpop.f32.mrf.mxu1 }
  0xd6   :  { %407 = vst [vmem:[%s671_s4 + $0x30] sm:$0xff] %v334_v26  ;;  %v332_v29 = vsub.f32 %v139_v27, %v248_v28  ;;  %v488_v30 = vpop.f32.mrf.mxu0 }
  0xd7   :  { %v500_v31 = vpop.f32.mrf.mxu1 }
  0xd8   :  { %405 = vst [vmem:[%s671_s4 + $0x20] sm:$0xff] %v332_v29  ;;  %v335_v32 = vsub.f32 %v488_v30, %v500_v31  ;;  %v142_v33 = vpop.f32.mrf.mxu0 }
  0xd9   :  { %v251_v34 = vpop.f32.mrf.mxu1 }
  0xda   :  { %408 = vst [vmem:[%s671_s4 + $0x38] sm:$0xff] %v335_v32  ;;  %v333_v35 = vsub.f32 %v142_v33, %v251_v34  ;;  %v507_v36 = vpop.f32.mrf.mxu0 }
  0xdb   :  { %v519_v37 = vpop.f32.mrf.mxu1 }
  0xdc   :  { %406 = vst [vmem:[%s671_s4 + $0x28] sm:$0xff] %v333_v35  ;;  %v379_v38 = vadd.f32 %v519_v37, %v507_v36  ;;  %v297_v39 = vpop.f32.mrf.mxu0 }
  0xdd   :  { %v370_v40 = vpop.f32.mrf.mxu1 }
  0xde   :  { %411 = vst [vmem:[%s672_s5 + $0x10] sm:$0xff] %v379_v38  ;;  %v371_v41 = vadd.f32 %v370_v40, %v297_v39  ;;  %v508_v42 = vpop.f32.mrf.mxu0 }
  0xdf   :  { %v520_v43 = vpop.f32.mrf.mxu1 }
  0xe0   :  { %409 = vst [vmem:[%s672_s5] sm:$0xff] %v371_v41  ;;  %v382_v44 = vadd.f32 %v520_v43, %v508_v42  ;;  %v300_v45 = vpop.f32.mrf.mxu0 }
  0xe1   :  { %v373_v46 = vpop.f32.mrf.mxu1 }
  0xe2   :  { %412 = vst [vmem:[%s672_s5 + $0x18] sm:$0xff] %v382_v44  ;;  %v374_v47 = vadd.f32 %v373_v46, %v300_v45  ;;  %v511_v48 = vpop.f32.mrf.mxu0 }
  0xe3   :  { %v523_v49 = vpop.f32.mrf.mxu1 }
  0xe4   :  { %410 = vst [vmem:[%s672_s5 + $0x8] sm:$0xff] %v374_v47  ;;  %v395_v50 = vadd.f32 %v523_v49, %v511_v48  ;;  %v313_v51 = vpop.f32.mrf.mxu0 }
  0xe5   :  { %v386_v52 = vpop.f32.mrf.mxu1 }
  0xe6   :  { %415 = vst [vmem:[%s672_s5 + $0x30] sm:$0xff] %v395_v50  ;;  %v387_v53 = vadd.f32 %v386_v52, %v313_v51  ;;  %v512_v54 = vpop.f32.mrf.mxu0 }
  0xe7   :  { %v524_v55 = vpop.f32.mrf.mxu1 }
  0xe8   :  { %413 = vst [vmem:[%s672_s5 + $0x20] sm:$0xff] %v387_v53  ;;  %v398_v56 = vadd.f32 %v524_v55, %v512_v54  ;;  %v316_v57 = vpop.f32.mrf.mxu0 }
  0xe9   :  { %v389_v58 = vpop.f32.mrf.mxu1 }
  0xea   :  { %416 = vst [vmem:[%s672_s5 + $0x38] sm:$0xff] %v398_v56  ;;  %v390_v59 = vadd.f32 %v389_v58, %v316_v57 }
  0xec   :  { %414 = vst [vmem:[%s672_s5 + $0x28] sm:$0xff] %v390_v59 }

// kernel: forward.34
= control target key start
LH: loop header
LB: loop body
LE: loop exit
PB: predicated region body
PF: predicated region fallthrough
CT: control target
= control target key end

     0   :  { %vm384_vm0 = vcmask 261120   ;;  %s3160_s2 = inlined_call_operand.vmem [shape: bf16[288,128], index: 2, kind: input, shape index: {}]   ;;  %s3161_s0 = inlined_call_operand.vmem [shape: bf16[128,288], index: 0, kind: input, shape index: {}]   ;;  %s3162_s3 = inlined_call_operand.vmem [shape: bf16[288,128], index: 3, kind: input, shape index: {}]   ;;  %s3163_s1 = inlined_call_operand.vmem [shape: bf16[128,288], index: 1, kind: input, shape index: {}]   ;;  %s3164_s4 = inlined_call_operand.vmem [shape: f32[128,128], index: 4, kind: output, shape index: {0}]   ;;  %s3165_s5 = inlined_call_operand.vmem [shape: f32[128,128], index: 5, kind: output, shape index: {1}]  }
   0x1   :  { %v2134_v0 = vld [vmem:[%s3160_s2 + $0x78] sm:$0xff]   ;;  %v2139_v1 = vld [vmem:[%s3160_s2 + $0x88] sm:$0xff]   ;;  %v2151_v3 = vld [vmem:[%s3160_s2 + $0x70] sm:$0xff]  }
   0x2   :  { %1609 = vmatprep.subr.bf16.mxu0 %v2134_v0  ;;  %v2145_v2 = vld [vmem:[%s3160_s2 + $0x38] sm:$0xff]   ;;  %1905 = vmatprep.subr.bf16.mxu1 %v2139_v1  ;;  %v2158_v4 = vld [vmem:[%s3160_s2 + $0x80] sm:$0xff]   ;;  %v2164_v5 = vld [vmem:[%s3160_s2 + $0x30] sm:$0xff]  }
   0x3   :  { %1610 = vmatpush3.bf16.msra.mxu0 %v2145_v2  ;;  %1906 = vmatpush3.bf16.msra.mxu1 %v2139_v1  ;;  %v2170_v6 = vld [vmem:[%s3161_s0 + $0x8] ss:$12 sps:$4 sm:$0xff]   ;;  %v2182_v8 = vld [vmem:[%s3161_s0 + $0x20] ss:$12 sps:$4 sm:$0xff]   ;;  %v2190_v9 = vld [vmem:[%s3162_s3 + $0x78] sm:$0xff]  }
   0x4   :  { %1611 = vmatprep.subr.bf16.mxu0 %v2151_v3  ;;  %1907 = vmatprep.subr.bf16.mxu1 %v2158_v4  ;;  %v2175_v7 = vld [vmem:[%s3160_s2 + $0x68] sm:$0xff]   ;;  %v2203_v11 = vld [vmem:[%s3162_s3 + $0x38] sm:$0xff]   ;;  %v2209_v12 = vld [vmem:[%s3160_s2 + $0x60] sm:$0xff]  }
   0x5   :  { %1909 = vmatprep.mubr.msk.bf16.mxu1 %vm384_vm0, %v2170_v6  ;;  %v2195_v10 = vld [vmem:[%s3160_s2 + $0x28] sm:$0xff]   ;;  %v2215_v13 = vld [vmem:[%s3162_s3 + $0x70] sm:$0xff]   ;;  %v2221_v14 = vld [vmem:[%s3160_s2 + $0x20] sm:$0xff]  }
   0x6   :  { %v2227_v15 = vld [vmem:[%s3162_s3 + $0x30] sm:$0xff]   ;;  %v2233_v16 = vld [vmem:[%s3161_s0 + $0x38] ss:$12 sps:$4 sm:$0xff]   ;;  %v2252_v19 = vld [vmem:[%s3162_s3 + $0x68] sm:$0xff]  }
   0x7   :  { %1612 = vmatpush3.bf16.msra.mxu0 %v2164_v5  ;;  %1908 = vmatpush3.bf16.msra.mxu1 %v2158_v4  ;;  %v2239_v17 = vld [vmem:[%s3160_s2 + $0x58] sm:$0xff]   ;;  %v2265_v21 = vld [vmem:[%s3162_s3 + $0x28] sm:$0xff]   ;;  %v2271_v22 = vld [vmem:[%s3160_s2 + $0x50] sm:$0xff]  }
   0x8   :  { %1613 = vmatprep.subr.bf16.mxu0 %v2175_v7  ;;  %1683 = vmatprep.subr.bf16.mxu1 %v2190_v9  ;;  %v2246_v18 = vld [vmem:[%s3161_s0 + $0x50] ss:$12 sps:$4 sm:$0xff]   ;;  %v2277_v23 = vld [vmem:[%s3162_s3 + $0x60] sm:$0xff]   ;;  %v2295_v26 = vld [vmem:[%s3161_s0 + $0x68] ss:$12 sps:$4 sm:$0xff]  }
   0x9   :  { %v2259_v20 = vld [vmem:[%s3160_s2 + $0x18] sm:$0xff]   ;;  %v2283_v24 = vld [vmem:[%s3160_s2 + $0x10] sm:$0xff]   ;;  %v2289_v25 = vld [vmem:[%s3162_s3 + $0x20] sm:$0xff]  }
   0xa   :  { %1910 = vmatmul.mubr.msk.bf16.vlgmr.msra.gmra.mxu1 %vm384_vm0, %v2182_v8  ;;  %v2301_v27 = vld [vmem:[%s3160_s2 + $0x48] sm:$0xff]   ;;  %v2314_v29 = vld [vmem:[%s3162_s3 + $0x58] sm:$0xff]   ;;  %v2333_v32 = vld [vmem:[%s3160_s2 + $0x40] sm:$0xff]  }
   0xb   :  { %1614 = vmatpush3.bf16.msra.mxu0 %v2195_v10  ;;  %1684 = vmatpush3.bf16.msra.mxu1 %v2203_v11  ;;  %v2308_v28 = vld [vmem:[%s3161_s0 + $0x80] ss:$12 sps:$4 sm:$0xff]   ;;  %v2327_v31 = vld [vmem:[%s3162_s3 + $0x18] sm:$0xff]   ;;  %v2339_v33 = vld [vmem:[%s3162_s3 + $0x50] sm:$0xff]  }
   0xc   :  { %1615 = vmatprep.subr.bf16.mxu0 %v2209_v12  ;;  %1685 = vmatprep.subr.bf16.mxu1 %v2215_v13  ;;  %v2321_v30 = vld [vmem:[%s3160_s2 + $0x8] sm:$0xff]   ;;  %v2345_v34 = vld [vmem:[%s3160_s2] sm:$0xff]   ;;  %v2351_v35 = vld [vmem:[%s3162_s3 + $0x10] sm:$0xff]  }
   0xd   :  { %1913 = vmatprep.mubr.msk.bf16.mxu1 %vm384_vm0, %v2233_v16  ;;  %v2357_v36 = vld [vmem:[%s3161_s0] ss:$12 sps:$4 sm:$0xff]   ;;  %v2363_v37 = vld [vmem:[%s3161_s0 + $0x4] ss:$12 sps:$4 sm:$0xff]   ;;  %v2414_v45 = vld [vmem:[%s3161_s0 + $0x1c] ss:$12 sps:$4 sm:$0xff]  }
   0xe   :  { %v2368_v38 = vld [vmem:[%s3161_s0 + $0x98] ss:$12 sps:$4 sm:$0xff]   ;;  %441 = vmatprep.mubr.bf16.mxu0 %v2363_v37  ;;  %v2374_v39 = vld [vmem:[%s3161_s0 + $0xb0] ss:$12 sps:$4 sm:$0xff]   ;;  %v2382_v40 = vld [vmem:[%s3162_s3 + $0x48] sm:$0xff]  }
   0xf   :  { %1616 = vmatpush3.bf16.msra.mxu0 %v2221_v14  ;;  %1686 = vmatpush3.bf16.msra.mxu1 %v2227_v15  ;;  %v2389_v41 = vld [vmem:[%s3162_s3 + $0x88] sm:$0xff]   ;;  %v2401_v43 = vld [vmem:[%s3162_s3 + $0x40] sm:$0xff]   ;;  %v2453_v51 = vld [vmem:[%s3161_s0 + $0x30] ss:$12 sps:$4 sm:$0xff]  }
  0x10   :  { %1617 = vmatprep.subr.bf16.mxu0 %v2239_v17  ;;  %1687 = vmatprep.subr.bf16.mxu1 %v2252_v19  ;;  %v2395_v42 = vld [vmem:[%s3162_s3 + $0x8] sm:$0xff]   ;;  %v2408_v44 = vld [vmem:[%s3162_s3] sm:$0xff]   ;;  %v2500_v58 = vld [vmem:[%s3163_s1 + $0x30] ss:$12 sps:$4 sm:$0xff]  }
  0x11   :  { %v2419_v46 = vld [vmem:[%s3163_s1] ss:$12 sps:$4 sm:$0xff]   ;;  %v2424_v47 = vld [vmem:[%s3163_s1 + $0x4] ss:$12 sps:$4 sm:$0xff]   ;;  %v2442_v50 = vld [vmem:[%s3163_s1 + $0x1c] ss:$12 sps:$4 sm:$0xff]  }
  0x12   :  { %1914 = vmatmul.mubr.msk.bf16.gmra.mxu1 %vm384_vm0, %v2246_v18  ;;  %v2429_v48 = vld [vmem:[%s3161_s0 + $0x18] ss:$12 sps:$4 sm:$0xff]   ;;  %v2435_v49 = vld [vmem:[%s3161_s0 + $0x34] ss:$12 sps:$4 sm:$0xff]   ;;  %v2523_v61 = vld [vmem:[%s3161_s0 + $0x7c] ss:$12 sps:$4 sm:$0xff]  }
  0x13   :  { %1618 = vmatpush3.bf16.msra.mxu0 %v2259_v20  ;;  %1688 = vmatpush3.bf16.msra.mxu1 %v2265_v21  ;;  %v2459_v52 = vld [vmem:[%s3163_s1 + $0x18] ss:$12 sps:$4 sm:$0xff]   ;;  %v2474_v55 = vld [vmem:[%s3163_s1 + $0x34] ss:$12 sps:$4 sm:$0xff]  }
  0x14   :  { %1619 = vmatprep.subr.bf16.mxu0 %v2271_v22  ;;  %1689 = vmatprep.subr.bf16.mxu1 %v2277_v23  ;;  %v2464_v53 = vld [vmem:[%s3161_s0 + $0x4c] ss:$12 sps:$4 sm:$0xff]   ;;  %v2469_v54 = vld [vmem:[%s3162_s3 + $0x80] sm:$0xff]   ;;  %v2488_v56 = vld [vmem:[%s3161_s0 + $0x48] ss:$12 sps:$4 sm:$0xff]  }
  0x15   :  { %1917 = vmatprep.mubr.msk.bf16.mxu1 %vm384_vm0, %v2295_v26  ;;  %v2495_v57 = vld [vmem:[%s3161_s0 + $0x64] ss:$12 sps:$4 sm:$0xff]   ;;  %v2505_v59 = vld [vmem:[%s3163_s1 + $0x4c] ss:$12 sps:$4 sm:$0xff]   ;;  %v2528_v62 = vld [vmem:[%s3163_s1 + $0x48] ss:$12 sps:$4 sm:$0xff]  }
  0x16   :  { %v2517_v60 = vld [vmem:[%s3161_s0 + $0x60] ss:$12 sps:$4 sm:$0xff]   ;;  %v2533_v63 = vld [vmem:[%s3163_s1 + $0x64] ss:$12 sps:$4 sm:$0xff]  }
  0x17   :  { %1620 = vmatpush3.bf16.msra.mxu0 %v2283_v24  ;;  %1690 = vmatpush3.bf16.msra.mxu1 %v2289_v25 }
  0x18   :  { %1621 = vmatprep.subr.bf16.mxu0 %v2301_v27  ;;  %1691 = vmatprep.subr.bf16.mxu1 %v2314_v29 }
  0x1a   :  { %1918 = vmatmul.mubr.msk.bf16.gmra.mxu1 %vm384_vm0, %v2308_v28 }
  0x1b   :  { %1622 = vmatpush3.bf16.msra.mxu0 %v2321_v30  ;;  %1692 = vmatpush3.bf16.msra.mxu1 %v2327_v31 }
  0x1c   :  { %1623 = vmatprep.subr.bf16.mxu0 %v2333_v32  ;;  %1693 = vmatprep.subr.bf16.mxu1 %v2339_v33 }
  0x1d   :  { %1921 = vmatprep.mubr.msk.bf16.mxu1 %vm384_vm0, %v2368_v38 }
  0x1f   :  { %1624 = vmatpush3.bf16.msra.mxu0 %v2345_v34  ;;  %1694 = vmatpush3.bf16.msra.mxu1 %v2351_v35 }
  0x20   :  { %1695 = vmatprep.subr.bf16.mxu1 %v2382_v40  ;;  %1925 = vmatprep.subr.bf16.mxu0 %v2389_v41 }
  0x22   :  { %442 = vmatmul.mubr.bf16.vlgmr.msra.gmra.mxu0 %v2357_v36  ;;  %1922 = vmatmul.mubr.msk.bf16.gmra.mxu1 %vm384_vm0, %v2374_v39 }
  0x23   :  { %1696 = vmatpush3.bf16.msra.mxu1 %v2395_v42  ;;  %1926 = vmatpush3.bf16.msra.mxu0 %v2389_v41 }
  0x24   :  { %1697 = vmatprep.subr.bf16.mxu1 %v2401_v43  ;;  %449 = vmatprep.mubr.bf16.mxu0 %v2414_v45 }
  0x25   :  { %887 = vmatprep.mubr.bf16.mxu1 %v2424_v47  ;;  %1927 = vmatprep.subr.bf16.mxu0 %v2469_v54 }
  0x27   :  { %1698 = vmatpush3.bf16.msra.mxu1 %v2408_v44  ;;  %1928 = vmatpush3.bf16.msra.mxu0 %v2469_v54 }
  0x28   :  { %1757 = vmatprep.subr.bf16.mxu1 %v2134_v0  ;;  %1945 = vmatprep.subr.bf16.mxu0 %v2139_v1  ;;  %v2545_v0 = vld [vmem:[%s3161_s0 + $0x78] ss:$12 sps:$4 sm:$0xff]  }
  0x2a   :  { %450 = vmatmul.mubr.bf16.gmra.mxu0 %v2429_v48  ;;  %888 = vmatmul.mubr.bf16.vlgmr.msra.gmra.mxu1 %v2419_v46 }
  0x2b   :  { %457 = vmatprep.mubr.bf16.mxu0 %v2435_v49  ;;  %895 = vmatprep.mubr.bf16.mxu1 %v2442_v50 }
  0x2c   :  { %1758 = vmatpush3.bf16.msra.mxu1 %v2145_v2  ;;  %v2551_v2 = vld [vmem:[%s3161_s0 + $0x94] ss:$12 sps:$4 sm:$0xff]  }
  0x2d   :  { %1759 = vmatprep.subr.bf16.mxu1 %v2151_v3  ;;  %v2556_v3 = vld [vmem:[%s3163_s1 + $0x60] ss:$12 sps:$4 sm:$0xff]  }
  0x30   :  { %1760 = vmatpush3.bf16.msra.mxu1 %v2164_v5  ;;  %v2561_v5 = vld [vmem:[%s3163_s1 + $0x7c] ss:$12 sps:$4 sm:$0xff]  }
  0x31   :  { %1761 = vmatprep.subr.bf16.mxu1 %v2175_v7  ;;  %v2572_v7 = vld [vmem:[%s3161_s0 + $0x90] ss:$12 sps:$4 sm:$0xff]  }
  0x32   :  { %458 = vmatmul.mubr.bf16.gmra.mxu0 %v2453_v51  ;;  %896 = vmatmul.mubr.bf16.gmra.mxu1 %v2459_v52  ;;  %3167 = vst [vmem:[#allocation2_spill] sm:$0xff] %v2572_v7 }
  0x33   :  { %465 = vmatprep.mubr.bf16.mxu0 %v2464_v53  ;;  %903 = vmatprep.mubr.bf16.mxu1 %v2474_v55 }
  0x34   :  { %1762 = vmatpush3.bf16.msra.mxu1 %v2195_v10  ;;  %v2577_v10 = vld [vmem:[%s3161_s0 + $0xac] ss:$12 sps:$4 sm:$0xff]  }
  0x35   :  { %1763 = vmatprep.subr.bf16.mxu1 %v2209_v12  ;;  %v2582_v12 = vld [vmem:[%s3163_s1 + $0x78] ss:$12 sps:$4 sm:$0xff]  }
  0x38   :  { %1764 = vmatpush3.bf16.msra.mxu1 %v2221_v14  ;;  %v2587_v14 = vld [vmem:[%s3163_s1 + $0x94] ss:$12 sps:$4 sm:$0xff]  }
  0x39   :  { %1765 = vmatprep.subr.bf16.mxu1 %v2239_v17  ;;  %v2596_v17 = vld [vmem:[%s3161_s0 + $0xa8] ss:$12 sps:$4 sm:$0xff]  }
  0x3a   :  { %466 = vmatmul.mubr.bf16.gmra.mxu0 %v2488_v56  ;;  %904 = vmatmul.mubr.bf16.gmra.mxu1 %v2500_v58 }
  0x3b   :  { %473 = vmatprep.mubr.bf16.mxu0 %v2495_v57  ;;  %911 = vmatprep.mubr.bf16.mxu1 %v2505_v59 }
  0x3c   :  { %1766 = vmatpush3.bf16.msra.mxu1 %v2259_v20  ;;  %v2092_v20 = vld [vmem:[%s3163_s1 + $0x8] ss:$12 sps:$4 sm:$0xff]  }
  0x3d   :  { %1767 = vmatprep.subr.bf16.mxu1 %v2271_v22  ;;  %v2604_v22 = vld [vmem:[%s3163_s1 + $0x90] ss:$12 sps:$4 sm:$0xff]  }
  0x40   :  { %1768 = vmatpush3.bf16.msra.mxu1 %v2283_v24  ;;  %v2609_v24 = vld [vmem:[%s3163_s1 + $0xac] ss:$12 sps:$4 sm:$0xff]  }
  0x41   :  { %1769 = vmatprep.subr.bf16.mxu1 %v2301_v27  ;;  %v2094_v27 = vld [vmem:[%s3163_s1 + $0x20] ss:$12 sps:$4 sm:$0xff]  }
  0x42   :  { %474 = vmatmul.mubr.bf16.gmra.mxu0 %v2517_v60  ;;  %912 = vmatmul.mubr.bf16.gmra.mxu1 %v2528_v62 }
  0x43   :  { %481 = vmatprep.mubr.bf16.mxu0 %v2523_v61  ;;  %919 = vmatprep.mubr.bf16.mxu1 %v2533_v63 }
  0x44   :  { %1770 = vmatpush3.bf16.msra.mxu1 %v2321_v30  ;;  %v2095_v30 = vld [vmem:[%s3163_s1 + $0x38] ss:$12 sps:$4 sm:$0xff]  }
  0x45   :  { %1771 = vmatprep.subr.bf16.mxu1 %v2333_v32  ;;  %v2624_v32 = vld [vmem:[%s3163_s1 + $0xa8] ss:$12 sps:$4 sm:$0xff]  }
  0x48   :  { %1772 = vmatpush3.bf16.msra.mxu1 %v2345_v34  ;;  %v2096_v34 = vld [vmem:[%s3163_s1 + $0x50] ss:$12 sps:$4 sm:$0xff]  }
  0x49   :  { %1985 = vmatprep.subr.bf16.mxu1 %v2190_v9 }
  0x4a   :  { %482 = vmatmul.mubr.bf16.gmra.mxu0 %v2545_v0  ;;  %920 = vmatmul.mubr.bf16.gmra.mxu1 %v2556_v3 }
  0x4b   :  { %489 = vmatprep.mubr.bf16.mxu0 %v2551_v2  ;;  %927 = vmatprep.mubr.bf16.mxu1 %v2561_v5 }
  0x52   :  { %490 = vmatmul.mubr.bf16.gmra.mxu0 %v2572_v7  ;;  %928 = vmatmul.mubr.bf16.gmra.mxu1 %v2582_v12  ;;  %v2097_v7 = vld [vmem:[%s3163_s1 + $0x68] ss:$12 sps:$4 sm:$0xff]  }
  0x53   :  { %497 = vmatprep.mubr.bf16.mxu0 %v2577_v10  ;;  %935 = vmatprep.mubr.bf16.mxu1 %v2587_v14 }
  0x5a   :  { %498 = vmatmul.mubr.bf16.gmra.mxu0 %v2596_v17  ;;  %936 = vmatmul.mubr.bf16.gmra.mxu1 %v2604_v22 }
  0x5b   :  { %1929 = vmatprep.mubr.msk.bf16.mxu0 %vm384_vm0, %v2092_v20  ;;  %943 = vmatprep.mubr.bf16.mxu1 %v2609_v24 }
  0x62   :  { %1930 = vmatmul.mubr.msk.bf16.vlgmr.msra.gmra.mxu0 %vm384_vm0, %v2094_v27  ;;  %944 = vmatmul.mubr.bf16.gmra.mxu1 %v2624_v32 }
  0x63   :  { %1946 = vmatpush3.bf16.msra.mxu0 %v2139_v1  ;;  %1933 = vmatprep.mubr.msk.bf16.mxu0 %vm384_vm0, %v2095_v30  ;;  %v2098_v1 = vld [vmem:[%s3163_s1 + $0x80] ss:$12 sps:$4 sm:$0xff]  }
  0x64   :  { %1947 = vmatprep.subr.bf16.mxu0 %v2158_v4  ;;  %1081 = vmatprep.mubr.bf16.mxu1 %v2424_v47 }
  0x67   :  { %1948 = vmatpush3.bf16.msra.mxu0 %v2158_v4  ;;  %v2099_v4 = vld [vmem:[%s3163_s1 + $0x98] ss:$12 sps:$4 sm:$0xff]  }
  0x68   :  { %1831 = vmatprep.subr.bf16.mxu0 %v2190_v9  ;;  %v2100_v9 = vld [vmem:[%s3163_s1 + $0xb0] ss:$12 sps:$4 sm:$0xff]  }
  0x6a   :  { %1934 = vmatmul.mubr.msk.bf16.gmra.mxu0 %vm384_vm0, %v2096_v34  ;;  %1082 = vmatmul.mubr.bf16.vlgmr.msra.gmra.mxu1 %v2419_v46 }
  0x6b   :  { %1937 = vmatprep.mubr.msk.bf16.mxu0 %vm384_vm0, %v2097_v7  ;;  %1089 = vmatprep.mubr.bf16.mxu1 %v2442_v50 }
  0x6c   :  { %1993 = vmatpush3.bf16.msra.mxu1 %v2203_v11 }
  0x6d   :  { %1986 = vmatprep.subr.bf16.mxu1 %v2215_v13 }
  0x70   :  { %1994 = vmatpush3.bf16.msra.mxu1 %v2227_v15 }
  0x71   :  { %1987 = vmatprep.subr.bf16.mxu1 %v2252_v19 }
  0x72   :  { %1938 = vmatmul.mubr.msk.bf16.gmra.mxu0 %vm384_vm0, %v2098_v1  ;;  %1090 = vmatmul.mubr.bf16.gmra.mxu1 %v2459_v52 }
  0x73   :  { %1941 = vmatprep.mubr.msk.bf16.mxu0 %vm384_vm0, %v2099_v4  ;;  %1097 = vmatprep.mubr.bf16.mxu1 %v2474_v55 }
  0x74   :  { %1995 = vmatpush3.bf16.msra.mxu1 %v2265_v21 }
  0x75   :  { %1988 = vmatprep.subr.bf16.mxu1 %v2277_v23 }
  0x78   :  { %1996 = vmatpush3.bf16.msra.mxu1 %v2289_v25 }
  0x79   :  { %1989 = vmatprep.subr.bf16.mxu1 %v2314_v29 }
  0x7a   :  { %1942 = vmatmul.mubr.msk.bf16.gmra.mxu0 %vm384_vm0, %v2100_v9  ;;  %1098 = vmatmul.mubr.bf16.gmra.mxu1 %v2500_v58 }
  0x7b   :  { %1949 = vmatprep.mubr.msk.bf16.mxu0 %vm384_vm0, %v2092_v20  ;;  %1105 = vmatprep.mubr.bf16.mxu1 %v2505_v59 }
  0x7c   :  { %1997 = vmatpush3.bf16.msra.mxu1 %v2327_v31 }
  0x7d   :  { %1990 = vmatprep.subr.bf16.mxu1 %v2339_v33 }
  0x80   :  { %1998 = vmatpush3.bf16.msra.mxu1 %v2351_v35 }
  0x81   :  { %1991 = vmatprep.subr.bf16.mxu1 %v2382_v40 }
  0x82   :  { %1950 = vmatmul.mubr.msk.bf16.vlgmr.msra.gmra.mxu0 %vm384_vm0, %v2094_v27  ;;  %1106 = vmatmul.mubr.bf16.gmra.mxu1 %v2528_v62 }
  0x83   :  { %1832 = vmatpush3.bf16.msra.mxu0 %v2203_v11  ;;  %1953 = vmatprep.mubr.msk.bf16.mxu0 %vm384_vm0, %v2095_v30 }
  0x84   :  { %1833 = vmatprep.subr.bf16.mxu0 %v2215_v13  ;;  %1113 = vmatprep.mubr.bf16.mxu1 %v2533_v63 }
  0x85   :  { %1999 = vmatpush3.bf16.msra.mxu1 %v2395_v42 }
  0x86   :  { %1992 = vmatprep.subr.bf16.mxu1 %v2401_v43 }
  0x87   :  { %1834 = vmatpush3.bf16.msra.mxu0 %v2227_v15 }
  0x88   :  { %1835 = vmatprep.subr.bf16.mxu0 %v2252_v19  ;;  %v3168_v19 = vld [vmem:[#allocation2_spill] sm:$0xff] }
  0x89   :  { %2000 = vmatpush3.bf16.msra.mxu1 %v2408_v44 }
  0x8a   :  { %1954 = vmatmul.mubr.msk.bf16.gmra.mxu0 %vm384_vm0, %v2096_v34  ;;  %1965 = vmatprep.subr.bf16.mxu1 %v2389_v41 }
  0x8b   :  { %1836 = vmatpush3.bf16.msra.mxu0 %v2265_v21  ;;  %1957 = vmatprep.mubr.msk.bf16.mxu0 %vm384_vm0, %v2097_v7 }
  0x8c   :  { %1114 = vmatmul.mubr.bf16.gmra.mxu1 %v2556_v3  ;;  %1837 = vmatprep.subr.bf16.mxu0 %v2277_v23 }
  0x8d   :  { %1121 = vmatprep.mubr.bf16.mxu1 %v2561_v5 }
  0x8f   :  { %1838 = vmatpush3.bf16.msra.mxu0 %v2289_v25 }
  0x90   :  { %1839 = vmatprep.subr.bf16.mxu0 %v2314_v29 }
  0x92   :  { %1958 = vmatmul.mubr.msk.bf16.gmra.mxu0 %vm384_vm0, %v2098_v1 }
  0x93   :  { %1840 = vmatpush3.bf16.msra.mxu0 %v2327_v31  ;;  %1961 = vmatprep.mubr.msk.bf16.mxu0 %vm384_vm0, %v2099_v4 }
  0x94   :  { %1122 = vmatmul.mubr.bf16.gmra.mxu1 %v2582_v12  ;;  %1841 = vmatprep.subr.bf16.mxu0 %v2339_v33 }
  0x95   :  { %1129 = vmatprep.mubr.bf16.mxu1 %v2587_v14 }
  0x97   :  { %1842 = vmatpush3.bf16.msra.mxu0 %v2351_v35 }
  0x98   :  { %1843 = vmatprep.subr.bf16.mxu0 %v2382_v40 }
  0x9a   :  { %1962 = vmatmul.mubr.msk.bf16.gmra.mxu0 %vm384_vm0, %v2100_v9 }
  0x9b   :  { %1844 = vmatpush3.bf16.msra.mxu0 %v2395_v42  ;;  %1291 = vmatprep.mubr.bf16.mxu0 %v2363_v37 }
  0x9c   :  { %1130 = vmatmul.mubr.bf16.gmra.mxu1 %v2604_v22  ;;  %1845 = vmatprep.subr.bf16.mxu0 %v2401_v43 }
  0x9d   :  { %1137 = vmatprep.mubr.bf16.mxu1 %v2609_v24 }
  0x9f   :  { %1846 = vmatpush3.bf16.msra.mxu0 %v2408_v44 }
  0xa2   :  { %1292 = vmatmul.mubr.bf16.vlgmr.msra.gmra.mxu0 %v2357_v36 }
  0xa3   :  { %1299 = vmatprep.mubr.bf16.mxu0 %v2414_v45 }
  0xa4   :  { %1138 = vmatmul.mubr.bf16.gmra.mxu1 %v2624_v32 }
  0xa5   :  { %1347 = vmatprep.mubr.bf16.mxu1 %v2577_v10 }
  0xaa   :  { %1300 = vmatmul.mubr.bf16.gmra.mxu0 %v2429_v48 }
  0xab   :  { %1307 = vmatprep.mubr.bf16.mxu0 %v2435_v49 }
  0xac   :  { %1348 = vmatmul.mubr.bf16.vlgmr.msra.gmra.mxu1 %v2596_v17 }
  0xad   :  { %1966 = vmatpush3.bf16.msra.mxu1 %v2389_v41  ;;  %1969 = vmatprep.mubr.msk.bf16.mxu1 %vm384_vm0, %v2170_v6 }
  0xae   :  { %1967 = vmatprep.subr.bf16.mxu1 %v2469_v54 }
  0xb1   :  { %1968 = vmatpush3.bf16.msra.mxu1 %v2469_v54 }
  0xb2   :  { %1308 = vmatmul.mubr.bf16.gmra.mxu0 %v2453_v51 }
  0xb3   :  { %1315 = vmatprep.mubr.bf16.mxu0 %v2464_v53 }
  0xb4   :  { %1970 = vmatmul.mubr.msk.bf16.vlgmr.msra.gmra.mxu1 %vm384_vm0, %v2182_v8 }
  0xb5   :  { %1973 = vmatprep.mubr.msk.bf16.mxu1 %vm384_vm0, %v2233_v16 }
  0xba   :  { %1316 = vmatmul.mubr.bf16.gmra.mxu0 %v2488_v56 }
  0xbb   :  { %1323 = vmatprep.mubr.bf16.mxu0 %v2495_v57 }
  0xbc   :  { %1974 = vmatmul.mubr.msk.bf16.gmra.mxu1 %vm384_vm0, %v2246_v18 }
  0xbd   :  { %1977 = vmatprep.mubr.msk.bf16.mxu1 %vm384_vm0, %v2295_v26 }
  0xc2   :  { %1324 = vmatmul.mubr.bf16.gmra.mxu0 %v2517_v60 }
  0xc3   :  { %1331 = vmatprep.mubr.bf16.mxu0 %v2523_v61 }
  0xc4   :  { %1978 = vmatmul.mubr.msk.bf16.gmra.mxu1 %vm384_vm0, %v2308_v28 }
  0xc5   :  { %1981 = vmatprep.mubr.msk.bf16.mxu1 %vm384_vm0, %v2368_v38 }
  0xca   :  { %v2736_v6 = vpop.f32.mrf.mxu1  ;;  %1332 = vmatmul.mubr.bf16.gmra.mxu0 %v2545_v0 }
  0xcb   :  { %1339 = vmatprep.mubr.bf16.mxu0 %v2551_v2 }
  0xcc   :  { %v540_v8 = vpop.f32.mrf.mxu1  ;;  %1982 = vmatmul.mubr.msk.bf16.gmra.mxu1 %vm384_vm0, %v2374_v39 }
  0xce   :  { %v2740_v11 = vpop.f32.mrf.mxu1 }
  0xd0   :  { %v543_v13 = vpop.f32.mrf.mxu1 }
  0xd2   :  { %v2746_v15 = vpop.f32.mrf.mxu1  ;;  %1340 = vmatmul.mubr.bf16.gmra.mxu0 %v3168_v19 }
  0xd4   :  { %v2748_v16 = vpop.f32.mrf.mxu1 }
  0xd6   :  { %v2750_v18 = vpop.f32.mrf.mxu1 }
  0xd8   :  { %v2753_v21 = vpop.f32.mrf.mxu1 }
  0xda   :  { %v2755_v23 = vpop.f32.mrf.mxu1 }
  0xdc   :  { %v2757_v25 = vpop.f32.mrf.mxu1 }
  0xde   :  { %v2759_v26 = vpop.f32.mrf.mxu1 }
  0xdf   :  { %3169 = vst [vmem:[#allocation2_spill] sm:$0xff] %v2759_v26 }
  0xe0   :  { %v2761_v28 = vpop.f32.mrf.mxu1 }
  0xe1   :  { %3170 = vst [vmem:[#allocation3_spill] sm:$0xff] %v2761_v28 }
  0xe2   :  { %v1625_v29 = vpop.f32.mrf.mxu0  ;;  %v2763_v31 = vpop.f32.mrf.mxu1 }
  0xe3   :  { %3171 = vst [vmem:[#allocation4_spill] sm:$0xff] %v2763_v31 }
  0xe4   :  { %v1626_v33 = vpop.f32.mrf.mxu0  ;;  %v2765_v36 = vpop.f32.mrf.mxu1 }
  0xe5   :  { %v1627_v35 = vadd.f32 %v1626_v33, %v1625_v29  ;;  %3172 = vst [vmem:[#allocation5_spill] sm:$0xff] %v2765_v36 }
  0xe6   :  { %v1628_v37 = vpop.f32.mrf.mxu0  ;;  %v2769_v39 = vpop.f32.mrf.mxu1 }
  0xe7   :  { %v2767_v38 = vadd.f32 %v1627_v35, %v540_v8  ;;  %3173 = vst [vmem:[#allocation6_spill] sm:$0xff] %v2769_v39 }
  0xe8   :  { %v1629_v40 = vpop.f32.mrf.mxu0  ;;  %v2771_v42 = vpop.f32.mrf.mxu1 }
  0xe9   :  { %v1630_v41 = vadd.f32 %v1629_v40, %v1628_v37  ;;  %3174 = vst [vmem:[#allocation7_spill] sm:$0xff] %v2771_v42 }
  0xea   :  { %v1631_v44 = vpop.f32.mrf.mxu0  ;;  %v1699_v45 = vpop.f32.mrf.mxu1 }
  0xeb   :  { %v2773_v43 = vadd.f32 %v1630_v41, %v543_v13 }
  0xec   :  { %v1632_v46 = vpop.f32.mrf.mxu0  ;;  %v1700_v47 = vpop.f32.mrf.mxu1 }
  0xee   :  { %v1634_v48 = vpop.f32.mrf.mxu0  ;;  %v2775_v49 = vpop.f32.mrf.mxu1 }
  0xf0   :  { %v1635_v50 = vpop.f32.mrf.mxu0  ;;  %v2777_v51 = vpop.f32.mrf.mxu1 }
  0xf2   :  { %v2779_v52 = vpop.f32.mrf.mxu0  ;;  %v1705_v53 = vpop.f32.mrf.mxu1 }
  0xf4   :  { %v2781_v54 = vpop.f32.mrf.mxu0  ;;  %v1706_v55 = vpop.f32.mrf.mxu1 }
  0xf6   :  { %v2783_v56 = vpop.f32.mrf.mxu0  ;;  %v1708_v57 = vpop.f32.mrf.mxu1 }
  0xf8   :  { %v2785_v58 = vpop.f32.mrf.mxu0  ;;  %v1709_v59 = vpop.f32.mrf.mxu1 }
  0xfa   :  { %v1643_v60 = vpop.f32.mrf.mxu0  ;;  %v2787_v61 = vpop.f32.mrf.mxu1 }
  0xfc   :  { %v1644_v62 = vpop.f32.mrf.mxu0  ;;  %v2789_v63 = vpop.f32.mrf.mxu1 }
  0xfe   :  { %v2791_v0 = vpop.f32.mrf.mxu0  ;;  %v2793_v2 = vpop.f32.mrf.mxu1 }
 0x100   :  { %v1647_v3 = vpop.f32.mrf.mxu0  ;;  %v2795_v5 = vpop.f32.mrf.mxu1 }
 0x102   :  { %v2797_v7 = vpop.f32.mrf.mxu0  ;;  %v1717_v10 = vpop.f32.mrf.mxu1 }
 0x104   :  { %v2799_v12 = vpop.f32.mrf.mxu0  ;;  %v1718_v14 = vpop.f32.mrf.mxu1 }
 0x106   :  { %v2801_v17 = vpop.f32.mrf.mxu0  ;;  %v2803_v20 = vpop.f32.mrf.mxu1 }
 0x108   :  { %v2805_v22 = vpop.f32.mrf.mxu0  ;;  %v2807_v24 = vpop.f32.mrf.mxu1 }
 0x109   :  { %3175 = vst [vmem:[#allocation8_spill] sm:$0xff] %v2805_v22 }
 0x10a   :  { %v2809_v27 = vpop.f32.mrf.mxu0  ;;  %v2811_v30 = vpop.f32.mrf.mxu1 }
 0x10c   :  { %v2813_v32 = vpop.f32.mrf.mxu0  ;;  %v2815_v34 = vpop.f32.mrf.mxu1 }
 0x10e   :  { %v2817_v1 = vpop.f32.mrf.mxu0  ;;  %v2819_v4 = vpop.f32.mrf.mxu1 }
 0x10f   :  { %3176 = vst [vmem:[#allocation9_spill] sm:$0xff] %v2819_v4  ;;  %v1636_v4 = vadd.f32 %v1635_v50, %v1634_v48  ;;  %v1704_v48 = vadd.f32 %v2777_v51, %v2775_v49  ;;  %v1645_v50 = vadd.f32 %v1644_v62, %v1643_v60  ;;  %v1648_v49 = vadd.f32 %v1647_v3, %v2791_v0 }
 0x110   :  { %v2821_v9 = vpop.f32.mrf.mxu0  ;;  %v2823_v8 = vpop.f32.mrf.mxu1  ;;  %v1716_v0 = vadd.f32 %v2795_v5, %v2793_v2 }
 0x111   :  { %3177 = vst [vmem:[#allocation10_spill] sm:$0xff] %v2823_v8  ;;  %v1707_v8 = vadd.f32 %v1706_v55, %v1705_v53  ;;  %v568_v62 = vadd.f32 %v2750_v18, %v1648_v49 }
 0x112   :  { %v2825_v13 = vpop.f32.mrf.mxu0  ;;  %v2827_v19 = vpop.f32.mrf.mxu1 }
 0x113   :  { %3178 = vst [vmem:[#allocation11_spill] sm:$0xff] %v2825_v13 }
 0x114   :  { %v2829_v29 = vpop.f32.mrf.mxu0  ;;  %v2831_v33 = vpop.f32.mrf.mxu1 }
 0x115   :  { %3179 = vst [vmem:[#allocation12_spill] sm:$0xff] %v2829_v29  ;;  %v1633_v29 = vadd.f32 %v1632_v46, %v1631_v44  ;;  %v552_v44 = vadd.f32 %v2740_v11, %v1636_v4 }
 0x116   :  { %v2833_v35 = vpop.f32.mrf.mxu0  ;;  %v2835_v37 = vpop.f32.mrf.mxu1 }
 0x117   :  { %3180 = vst [vmem:[#allocation13_spill] sm:$0xff] %v2833_v35  ;;  %3181 = vst [vmem:[#allocation14_spill] sm:$0xff] %v2835_v37 }
 0x118   :  { %v2837_v40 = vpop.f32.mrf.mxu0  ;;  %v2839_v41 = vpop.f32.mrf.mxu1 }
 0x119   :  { %3182 = vst [vmem:[#allocation15_spill] sm:$0xff] %v2837_v40  ;;  %3183 = vst [vmem:[#allocation16_spill] sm:$0xff] %v2839_v41  ;;  %v1701_v41 = vadd.f32 %v1700_v47, %v1699_v45 }
 0x11a   :  { %v2841_v42 = vpop.f32.mrf.mxu0  ;;  %v2843_v39 = vpop.f32.mrf.mxu1  ;;  %v3198_v49 = vld [vmem:[#allocation11_spill] sm:$0xff] }
 0x11b   :  { %3184 = vst [vmem:[#allocation17_spill] sm:$0xff] %v2841_v42  ;;  %3185 = vst [vmem:[#allocation18_spill] sm:$0xff] %v2843_v39  ;;  %v549_v42 = vadd.f32 %v2736_v6, %v1633_v29 }
 0x11c   :  { %v2845_v36 = vpop.f32.mrf.mxu0  ;;  %v2847_v31 = vpop.f32.mrf.mxu1 }
 0x11d   :  { %3186 = vst [vmem:[#allocation19_spill] sm:$0xff] %v2845_v36  ;;  %3187 = vst [vmem:[#allocation20_spill] sm:$0xff] %v2847_v31  ;;  %v1710_v31 = vadd.f32 %v1709_v59, %v1708_v57  ;;  %v1642_v59 = vadd.f32 %v2785_v58, %v2783_v56 }
 0x11e   :  { %v2849_v28 = vpop.f32.mrf.mxu0  ;;  %v2851_v13 = vpop.f32.mrf.mxu1  ;;  %v3191_v29 = vld [vmem:[#allocation14_spill] sm:$0xff] }
 0x11f   :  { %3188 = vst [vmem:[#allocation21_spill] sm:$0xff] %v2849_v28  ;;  %3189 = vst [vmem:[#allocation22_spill] sm:$0xff] %v2851_v13 }
 0x120   :  { %v2853_v35 = vpop.f32.mrf.mxu0  ;;  %v2855_v40 = vpop.f32.mrf.mxu1 }
 0x122   :  { %v1931_v26 = vpop.f32.mrf.mxu0  ;;  %v2858_v37 = vpop.f32.mrf.mxu1 }
 0x123   :  { %v995_v39 = vadd.f32 %v1931_v26, %v1707_v8 }
 0x124   :  { %v986_v36 = vpop.f32.mrf.mxu0  ;;  %v2861_v46 = vpop.f32.mrf.mxu1 }
 0x125   :  { %v1245_v22 = vsub.f32 %v549_v42, %v995_v39  ;;  %v987_v28 = vadd.f32 %v1701_v41, %v986_v36  ;;  %v1639_v39 = vadd.f32 %v2781_v54, %v2779_v52  ;;  %v1719_v42 = vadd.f32 %v1718_v14, %v1717_v10 }
 0x126   :  { %v1932_v13 = vpop.f32.mrf.mxu0  ;;  %v2871_v36 = vpop.f32.mrf.mxu1  ;;  %v1651_v10 = vadd.f32 %v2799_v12, %v2797_v7  ;;  %v1660_v12 = vadd.f32 %v2821_v9, %v2817_v1 }
 0x127   :  { %1455 = vst [vmem:[%s3164_s4 + $0x10] sm:$0xff] %v1245_v22  ;;  %v1243_v6 = vsub.f32 %v2767_v38, %v987_v28  ;;  %v998_v26 = vadd.f32 %v1932_v13, %v1710_v31  ;;  %v565_v28 = vadd.f32 %v2746_v15, %v1645_v50  ;;  %v1713_v31 = vadd.f32 %v2789_v63, %v2787_v61 }
 0x128   :  { %v989_v11 = vpop.f32.mrf.mxu0  ;;  %v2877_v51 = vpop.f32.mrf.mxu1  ;;  %v557_v54 = vadd.f32 %v1639_v39, %v2748_v16  ;;  %v1722_v15 = vadd.f32 %v2807_v24, %v2803_v20  ;;  %v560_v20 = vadd.f32 %v1642_v59, %v2753_v21  ;;  %v1731_v22 = vadd.f32 %v2831_v33, %v2827_v19  ;;  %v3192_v33 = vld [vmem:[#allocation16_spill] sm:$0xff] }
 0x129   :  { %1453 = vst [vmem:[%s3164_s4] sm:$0xff] %v1243_v6  ;;  %v1246_v45 = vsub.f32 %v552_v44, %v998_v26  ;;  %v990_v47 = vadd.f32 %v1704_v48, %v989_v11  ;;  %v573_v13 = vadd.f32 %v1651_v10, %v2757_v25  ;;  %v1734_v41 = vadd.f32 %v3192_v33, %v3191_v29  ;;  %v3193_v44 = vld [vmem:[#allocation17_spill] sm:$0xff]  ;;  %v3194_v48 = vld [vmem:[#allocation19_spill] sm:$0xff]  ;;  %v3195_v26 = vld [vmem:[#allocation2_spill] sm:$0xff] }
 0x12a   :  { %v1935_v53 = vpop.f32.mrf.mxu0  ;;  %v1773_v55 = vpop.f32.mrf.mxu1  ;;  %v1669_v50 = vadd.f32 %v3194_v48, %v3193_v44  ;;  %v584_v39 = vadd.f32 %v3195_v26, %v1660_v12  ;;  %v3196_v11 = vld [vmem:[#allocation9_spill] sm:$0xff] }
 0x12b   :  { %1456 = vst [vmem:[%s3164_s4 + $0x18] sm:$0xff] %v1246_v45  ;;  %v1244_v38 = vsub.f32 %v2773_v43, %v990_v47  ;;  %v1011_v52 = vadd.f32 %v1935_v53, %v1719_v42  ;;  %v1657_v43 = vadd.f32 %v2813_v32, %v2809_v27  ;;  %v1725_v27 = vadd.f32 %v2815_v34, %v2811_v30  ;;  %v3190_v30 = vld [vmem:[#allocation8_spill] sm:$0xff]  ;;  %v3197_v42 = vld [vmem:[#allocation10_spill] sm:$0xff] }
 0x12c   :  { %v1002_v57 = vpop.f32.mrf.mxu0  ;;  %v1774_v16 = vpop.f32.mrf.mxu1  ;;  %v1654_v34 = vadd.f32 %v3190_v30, %v2801_v17  ;;  %v1728_v17 = vadd.f32 %v3197_v42, %v3196_v11  ;;  %v3199_v53 = vld [vmem:[#allocation12_spill] sm:$0xff]  ;;  %v3210_v30 = vld [vmem:[#allocation7_spill] sm:$0xff] }
 0x12d   :  { %1454 = vst [vmem:[%s3164_s4 + $0x8] sm:$0xff] %v1244_v38  ;;  %v1249_v60 = vsub.f32 %v565_v28, %v1011_v52  ;;  %v1003_v61 = vadd.f32 %v1713_v31, %v1002_v57  ;;  %v2902_v58 = vadd.f32 %v1774_v16, %v1773_v55  ;;  %v581_v24 = vadd.f32 %v2755_v23, %v1657_v43  ;;  %v3200_v52 = vld [vmem:[#allocation3_spill] sm:$0xff]  ;;  %v3202_v43 = vld [vmem:[#allocation18_spill] sm:$0xff]  ;;  %v3203_v16 = vld [vmem:[#allocation20_spill] sm:$0xff] }
 0x12e   :  { %v1936_v63 = vpop.f32.mrf.mxu0  ;;  %v1776_v18 = vpop.f32.mrf.mxu1  ;;  %v1663_v28 = vadd.f32 %v3199_v53, %v3198_v49  ;;  %v1743_v55 = vadd.f32 %v2861_v46, %v2858_v37 }
 0x12f   :  { %1459 = vst [vmem:[%s3164_s4 + $0x30] sm:$0xff] %v1249_v60  ;;  %v1247_v56 = vsub.f32 %v557_v54, %v1003_v61  ;;  %v1014_v3 = vadd.f32 %v1936_v63, %v1722_v15  ;;  %v576_v54 = vadd.f32 %v1654_v34, %v3200_v52  ;;  %v3201_v15 = vld [vmem:[#allocation4_spill] sm:$0xff]  ;;  %v1737_v63 = vadd.f32 %v3203_v16, %v3202_v43 }
 0x130   :  { %v1005_v14 = vpop.f32.mrf.mxu0  ;;  %v1777_v32 = vpop.f32.mrf.mxu1  ;;  %v597_v60 = vadd.f32 %v3201_v15, %v1669_v50 }
 0x131   :  { %1457 = vst [vmem:[%s3164_s4 + $0x20] sm:$0xff] %v1247_v56  ;;  %v1250_v2 = vsub.f32 %v568_v62, %v1014_v3  ;;  %v1006_v5 = vadd.f32 %v1716_v0, %v1005_v14  ;;  %v2920_v4 = vadd.f32 %v1777_v32, %v1776_v18  ;;  %v3204_v0 = vld [vmem:[#allocation21_spill] sm:$0xff] }
 0x132   :  { %v1939_v7 = vpop.f32.mrf.mxu0  ;;  %v2923_v19 = vpop.f32.mrf.mxu1  ;;  %v1672_v56 = vadd.f32 %v2853_v35, %v3204_v0  ;;  %v3205_v3 = vld [vmem:[#allocation5_spill] sm:$0xff] }
 0x133   :  { %1460 = vst [vmem:[%s3164_s4 + $0x38] sm:$0xff] %v1250_v2  ;;  %v1248_v21 = vsub.f32 %v560_v20, %v1006_v5  ;;  %v1027_v8 = vadd.f32 %v1939_v7, %v1731_v22  ;;  %v589_v10 = vadd.f32 %v1663_v28, %v3205_v3  ;;  %v3206_v20 = vld [vmem:[#allocation13_spill] sm:$0xff]  ;;  %v3207_v22 = vld [vmem:[#allocation15_spill] sm:$0xff]  ;;  %v1746_v5 = vadd.f32 %v2877_v51, %v2871_v36  ;;  %v3208_v7 = vld [vmem:[#allocation6_spill] sm:$0xff] }
 0x134   :  { %v1018_v23 = vpop.f32.mrf.mxu0  ;;  %v2934_v6 = vpop.f32.mrf.mxu1  ;;  %v1666_v2 = vadd.f32 %v3207_v22, %v3206_v20  ;;  %v600_v12 = vadd.f32 %v3208_v7, %v1672_v56 }
 0x135   :  { %1458 = vst [vmem:[%s3164_s4 + $0x28] sm:$0xff] %v1248_v21  ;;  %v1253_v1 = vsub.f32 %v581_v24, %v1027_v8  ;;  %v1019_v9 = vadd.f32 %v1725_v27, %v1018_v23  ;;  %v3209_v21 = vld [vmem:[#allocation22_spill] sm:$0xff] }
 0x136   :  { %v1940_v25 = vpop.f32.mrf.mxu0  ;;  %v2944_v31 = vpop.f32.mrf.mxu1  ;;  %v1740_v8 = vadd.f32 %v2855_v40, %v3209_v21  ;;  %v592_v34 = vadd.f32 %v1666_v2, %v3210_v30 }
 0x137   :  { %1463 = vst [vmem:[%s3164_s4 + $0x50] sm:$0xff] %v1253_v1  ;;  %v1251_v45 = vsub.f32 %v573_v13, %v1019_v9  ;;  %v1030_v47 = vadd.f32 %v1940_v25, %v1734_v41 }
 0x138   :  { %v1021_v38 = vpop.f32.mrf.mxu0  ;;  %v2953_v61 = vpop.f32.mrf.mxu1 }
 0x139   :  { %1461 = vst [vmem:[%s3164_s4 + $0x40] sm:$0xff] %v1251_v45  ;;  %v1254_v57 = vsub.f32 %v584_v39, %v1030_v47  ;;  %v1022_v59 = vadd.f32 %v1728_v17, %v1021_v38 }
 0x13a   :  { %v1943_v62 = vpop.f32.mrf.mxu0  ;;  %v2963_v18 = vpop.f32.mrf.mxu1 }
 0x13b   :  { %1464 = vst [vmem:[%s3164_s4 + $0x58] sm:$0xff] %v1254_v57  ;;  %v1252_v37 = vsub.f32 %v576_v54, %v1022_v59  ;;  %v1043_v46 = vadd.f32 %v1943_v62, %v1743_v55 }
 0x13c   :  { %v1034_v14 = vpop.f32.mrf.mxu0  ;;  %v2972_v27 = vpop.f32.mrf.mxu1 }
 0x13d   :  { %1462 = vst [vmem:[%s3164_s4 + $0x48] sm:$0xff] %v1252_v37  ;;  %v1257_v35 = vsub.f32 %v597_v60, %v1043_v46  ;;  %v1035_v24 = vadd.f32 %v1737_v63, %v1034_v14 }
 0x13e   :  { %v1944_v32 = vpop.f32.mrf.mxu0  ;;  %v2980_v51 = vpop.f32.mrf.mxu1 }
 0x13f   :  { %1467 = vst [vmem:[%s3164_s4 + $0x70] sm:$0xff] %v1257_v35  ;;  %v1255_v13 = vsub.f32 %v589_v10, %v1035_v24  ;;  %v1046_v36 = vadd.f32 %v1944_v32, %v1746_v5 }
 0x140   :  { %v1037_v23 = vpop.f32.mrf.mxu0  ;;  %v2986_v41 = vpop.f32.mrf.mxu1 }
 0x141   :  { %1465 = vst [vmem:[%s3164_s4 + $0x60] sm:$0xff] %v1255_v13  ;;  %v1258_v29 = vsub.f32 %v600_v12, %v1046_v36  ;;  %v1038_v33 = vadd.f32 %v1740_v8, %v1037_v23  ;;  %v1781_v8 = vadd.f32 %v2934_v6, %v2923_v19 }
 0x142   :  { %v1951_v40 = vpop.f32.mrf.mxu0  ;;  %v2991_v9 = vpop.f32.mrf.mxu1 }
 0x143   :  { %1468 = vst [vmem:[%s3164_s4 + $0x78] sm:$0xff] %v1258_v29  ;;  %v1256_v1 = vsub.f32 %v592_v34, %v1038_v33  ;;  %v1189_v30 = vadd.f32 %v1951_v40, %v1781_v8 }
 0x144   :  { %v1180_v44 = vpop.f32.mrf.mxu0  ;;  %v2996_v48 = vpop.f32.mrf.mxu1 }
 0x145   :  { %1466 = vst [vmem:[%s3164_s4 + $0x68] sm:$0xff] %v1256_v1  ;;  %v1784_v1 = vadd.f32 %v2953_v61, %v2944_v31 }
 0x146   :  { %v1952_v50 = vpop.f32.mrf.mxu0  ;;  %v2998_v25 = vpop.f32.mrf.mxu1 }
 0x148   :  { %v1183_v26 = vpop.f32.mrf.mxu0  ;;  %v3000_v39 = vpop.f32.mrf.mxu1 }
 0x149   :  { %v1184_v40 = vadd.f32 %v2920_v4, %v1183_v26 }
 0x14a   :  { %v3002_v11 = vpop.f32.mrf.mxu0 }
 0x14c   :  { %v3004_v42 = vpop.f32.mrf.mxu1  ;;  %v3006_v17 = vpop.f32.mrf.mxu0 }
 0x14e   :  { %v3008_v45 = vpop.f32.mrf.mxu1  ;;  %v3010_v47 = vpop.f32.mrf.mxu0 }
 0x150   :  { %v3012_v49 = vpop.f32.mrf.mxu1  ;;  %v3014_v53 = vpop.f32.mrf.mxu0 }
 0x152   :  { %v3016_v28 = vpop.f32.mrf.mxu1  ;;  %v3018_v38 = vpop.f32.mrf.mxu0 }
 0x154   :  { %v3020_v52 = vpop.f32.mrf.mxu1  ;;  %v3022_v54 = vpop.f32.mrf.mxu0 }
 0x156   :  { %v3024_v55 = vpop.f32.mrf.mxu1  ;;  %v3026_v57 = vpop.f32.mrf.mxu0 }
 0x157   :  { %3211 = vst [vmem:[#allocation8_spill] sm:$0xff] %v3026_v57 }
 0x158   :  { %v3028_v59 = vpop.f32.mrf.mxu1  ;;  %v3030_v15 = vpop.f32.mrf.mxu0 }
 0x15a   :  { %v3032_v60 = vpop.f32.mrf.mxu1  ;;  %v3034_v62 = vpop.f32.mrf.mxu0 }
 0x15c   :  { %v3036_v43 = vpop.f32.mrf.mxu1  ;;  %v3038_v16 = vpop.f32.mrf.mxu0 }
 0x15d   :  { %3212 = vst [vmem:[#allocation14_spill] sm:$0xff] %v3036_v43  ;;  %3213 = vst [vmem:[#allocation16_spill] sm:$0xff] %v3038_v16  ;;  %v1192_v43 = vadd.f32 %v1952_v50, %v1784_v1  ;;  %v1793_v50 = vadd.f32 %v2996_v48, %v2991_v9  ;;  %v1796_v9 = vadd.f32 %v3000_v39, %v2998_v25 }
 0x15e   :  { %v3040_v63 = vpop.f32.mrf.mxu1  ;;  %v3042_v0 = vpop.f32.mrf.mxu0 }
 0x15f   :  { %3214 = vst [vmem:[#allocation17_spill] sm:$0xff] %v3040_v63 }
 0x160   :  { %v3044_v56 = vpop.f32.mrf.mxu1  ;;  %v3046_v37 = vpop.f32.mrf.mxu0 }
 0x161   :  { %3215 = vst [vmem:[#allocation19_spill] sm:$0xff] %v3044_v56  ;;  %3216 = vst [vmem:[#allocation2_spill] sm:$0xff] %v3046_v37  ;;  %v1181_v37 = vadd.f32 %v2902_v58, %v1180_v44  ;;  %v1787_v58 = vadd.f32 %v2972_v27, %v2963_v18  ;;  %v1790_v27 = vadd.f32 %v2986_v41, %v2980_v51 }
 0x162   :  { %v3048_v46 = vpop.f32.mrf.mxu1  ;;  %v1847_v3 = vpop.f32.mrf.mxu0  ;;  %v1799_v41 = vadd.f32 %v3008_v45, %v3004_v42  ;;  %v1802_v42 = vadd.f32 %v3016_v28, %v3012_v49  ;;  %v1805_v28 = vadd.f32 %v3024_v55, %v3020_v52 }
 0x163   :  { %3217 = vst [vmem:[#allocation9_spill] sm:$0xff] %v3048_v46  ;;  %v1200_v8 = vadd.f32 %v1790_v27, %v3014_v53 }
 0x164   :  { %v3050_v10 = vpop.f32.mrf.mxu1  ;;  %v1848_v14 = vpop.f32.mrf.mxu0 }
 0x165   :  { %v1849_v34 = vadd.f32 %v1848_v14, %v1847_v3  ;;  %v1197_v14 = vadd.f32 %v1787_v58, %v3006_v17 }
 0x166   :  { %v3052_v20 = vpop.f32.mrf.mxu1  ;;  %v1850_v22 = vpop.f32.mrf.mxu0 }
 0x168   :  { %v3054_v2 = vpop.f32.mrf.mxu1  ;;  %v1851_v5 = vpop.f32.mrf.mxu0 }
 0x169   :  { %v1852_v19 = vadd.f32 %v1851_v5, %v1850_v22 }
 0x16a   :  { %v3056_v35 = vpop.f32.mrf.mxu1  ;;  %v1853_v24 = vpop.f32.mrf.mxu0 }
 0x16b   :  { %v1297_v26 = vadd.f32 %v1852_v19, %v1184_v40  ;;  %v1213_v19 = vadd.f32 %v1799_v41, %v3022_v54  ;;  %v1216_v54 = vadd.f32 %v1802_v42, %v3030_v15  ;;  %v1221_v15 = vadd.f32 %v3018_v38, %v1805_v28 }
 0x16c   :  { %v3058_v32 = vpop.f32.mrf.mxu1  ;;  %v1854_v7 = vpop.f32.mrf.mxu0 }
 0x16d   :  { %v1855_v13 = vadd.f32 %v1854_v7, %v1853_v24  ;;  %v1294_v24 = vadd.f32 %v1849_v34, %v1181_v37 }
 0x16e   :  { %v3060_v12 = vpop.f32.mrf.mxu1  ;;  %v1856_v21 = vpop.f32.mrf.mxu0 }
 0x16f   :  { %v1302_v56 = vadd.f32 %v1855_v13, %v1189_v30 }
 0x170   :  { %v3064_v36 = vpop.f32.mrf.mxu1  ;;  %v1857_v23 = vpop.f32.mrf.mxu0 }
 0x171   :  { %v1858_v46 = vadd.f32 %v1857_v23, %v1856_v21 }
 0x172   :  { %v3066_v29 = vpop.f32.mrf.mxu1  ;;  %v1859_v33 = vpop.f32.mrf.mxu0 }
 0x173   :  { %v1305_v31 = vadd.f32 %v1858_v46, %v1192_v43 }
 0x174   :  { %v1971_v16 = vpop.f32.mrf.mxu1  ;;  %v1860_v63 = vpop.f32.mrf.mxu0 }
 0x175   :  { %v1399_v6 = vadd.f32 %v1971_v16, %v1302_v56  ;;  %v1861_v16 = vadd.f32 %v1860_v63, %v1859_v33  ;;  %v1205_v63 = vadd.f32 %v3002_v11, %v1793_v50  ;;  %v1208_v11 = vadd.f32 %v3010_v47, %v1796_v9  ;;  %v3220_v9 = vld [vmem:[#allocation17_spill] sm:$0xff] }
 0x176   :  { %v1390_v7 = vpop.f32.mrf.mxu1  ;;  %v1862_v57 = vpop.f32.mrf.mxu0 }
 0x177   :  { %1471 = vst [vmem:[%s3165_s5 + $0x10] sm:$0xff] %v1399_v6  ;;  %v1391_v3 = vadd.f32 %v1390_v7, %v1294_v24  ;;  %v1310_v22 = vadd.f32 %v1861_v16, %v1197_v14  ;;  %v1817_v6 = vadd.f32 %v3052_v20, %v3050_v10  ;;  %v1894_v16 = vadd.f32 %v3066_v29, %v3064_v36 }
 0x178   :  { %v1972_v61 = vpop.f32.mrf.mxu1  ;;  %v1863_v44 = vpop.f32.mrf.mxu0 }
 0x179   :  { %1469 = vst [vmem:[%s3165_s5] sm:$0xff] %v1391_v3  ;;  %v1402_v4 = vadd.f32 %v1972_v61, %v1305_v31  ;;  %v1864_v46 = vadd.f32 %v1863_v44, %v1862_v57  ;;  %v1891_v31 = vadd.f32 %v3060_v12, %v3058_v32  ;;  %v1237_v58 = vadd.f32 %v3034_v62, %v1817_v6 }
 0x17a   :  { %v1393_v56 = vpop.f32.mrf.mxu1  ;;  %v1865_v37 = vpop.f32.mrf.mxu0  ;;  %v1820_v61 = vadd.f32 %v3056_v35, %v3054_v2  ;;  %v1808_v62 = vadd.f32 %v3032_v60, %v3028_v59  ;;  %v3218_v59 = vld [vmem:[#allocation8_spill] sm:$0xff] }
 0x17b   :  { %1472 = vst [vmem:[%s3165_s5 + $0x18] sm:$0xff] %v1402_v4  ;;  %v1394_v18 = vadd.f32 %v1393_v56, %v1297_v26  ;;  %v1313_v30 = vadd.f32 %v1864_v46, %v1200_v8  ;;  %v1350_v55 = vadd.f32 %v1891_v31, %v1237_v58 }
 0x17c   :  { %v1975_v48 = vpop.f32.mrf.mxu1  ;;  %v1866_v43 = vpop.f32.mrf.mxu0  ;;  %v1240_v35 = vadd.f32 %v3042_v0, %v1820_v61  ;;  %v1224_v60 = vadd.f32 %v3218_v59, %v1808_v62  ;;  %v3219_v0 = vld [vmem:[#allocation14_spill] sm:$0xff] }
 0x17d   :  { %1470 = vst [vmem:[%s3165_s5 + $0x8] sm:$0xff] %v1394_v18  ;;  %v1867_v17 = vadd.f32 %v1866_v43, %v1865_v37 }
 0x17e   :  { %v1406_v5 = vpop.f32.mrf.mxu1  ;;  %v1868_v21 = vpop.f32.mrf.mxu0  ;;  %v1353_v29 = vadd.f32 %v1894_v16, %v1240_v35 }
 0x17f   :  { %v1318_v13 = vadd.f32 %v1867_v17, %v1205_v63  ;;  %v1407_v51 = vadd.f32 %v1406_v5, %v1310_v22 }
 0x180   :  { %v1976_v25 = vpop.f32.mrf.mxu1  ;;  %v1869_v39 = vpop.f32.mrf.mxu0 }
 0x181   :  { %v1415_v57 = vadd.f32 %v1975_v48, %v1318_v13  ;;  %1473 = vst [vmem:[%s3165_s5 + $0x20] sm:$0xff] %v1407_v51  ;;  %v1870_v23 = vadd.f32 %v1869_v39, %v1868_v21  ;;  %v1811_v48 = vadd.f32 %v3220_v9, %v3219_v0  ;;  %v3221_v21 = vld [vmem:[#allocation16_spill] sm:$0xff]  ;;  %v3222_v13 = vld [vmem:[#allocation19_spill] sm:$0xff]  ;;  %v3223_v51 = vld [vmem:[#allocation9_spill] sm:$0xff] }
 0x182   :  { %v1409_v34 = vpop.f32.mrf.mxu1  ;;  %v1871_v33 = vpop.f32.mrf.mxu0  ;;  %v1814_v41 = vadd.f32 %v3223_v51, %v3222_v13 }
 0x183   :  { %1475 = vst [vmem:[%s3165_s5 + $0x30] sm:$0xff] %v1415_v57  ;;  %v1321_v53 = vadd.f32 %v1870_v23, %v1208_v11  ;;  %v1410_v1 = vadd.f32 %v1409_v34, %v1313_v30  ;;  %v1229_v8 = vadd.f32 %v1811_v48, %v3221_v21  ;;  %v3224_v30 = vld [vmem:[#allocation2_spill] sm:$0xff] }
 0x184   :  { %v1979_v45 = vpop.f32.mrf.mxu1  ;;  %v1872_v47 = vpop.f32.mrf.mxu0  ;;  %v1232_v34 = vadd.f32 %v1814_v41, %v3224_v30 }
 0x185   :  { %v1418_v24 = vadd.f32 %v1976_v25, %v1321_v53  ;;  %1474 = vst [vmem:[%s3165_s5 + $0x28] sm:$0xff] %v1410_v1  ;;  %v1873_v7 = vadd.f32 %v1872_v47, %v1871_v33 }
 0x186   :  { %v1422_v40 = vpop.f32.mrf.mxu1  ;;  %v1874_v3 = vpop.f32.mrf.mxu0 }
 0x187   :  { %1476 = vst [vmem:[%s3165_s5 + $0x38] sm:$0xff] %v1418_v24  ;;  %v1326_v49 = vadd.f32 %v1873_v7, %v1213_v19 }
 0x188   :  { %v1980_v10 = vpop.f32.mrf.mxu1  ;;  %v1875_v20 = vpop.f32.mrf.mxu0 }
 0x189   :  { %v1423_v44 = vadd.f32 %v1422_v40, %v1326_v49  ;;  %v1876_v50 = vadd.f32 %v1875_v20, %v1874_v3 }
 0x18a   :  { %v1425_v32 = vpop.f32.mrf.mxu1  ;;  %v1877_v12 = vpop.f32.mrf.mxu0 }
 0x18b   :  { %1477 = vst [vmem:[%s3165_s5 + $0x40] sm:$0xff] %v1423_v44  ;;  %v1329_v52 = vadd.f32 %v1876_v50, %v1216_v54 }
 0x18c   :  { %v1983_v4 = vpop.f32.mrf.mxu1  ;;  %v1878_v2 = vpop.f32.mrf.mxu0 }
 0x18d   :  { %v1426_v26 = vadd.f32 %v1425_v32, %v1329_v52  ;;  %v1447_v56 = vadd.f32 %v1983_v4, %v1350_v55  ;;  %v1879_v37 = vadd.f32 %v1878_v2, %v1877_v12 }
 0x18e   :  { %v1438_v14 = vpop.f32.mrf.mxu1  ;;  %v1880_v36 = vpop.f32.mrf.mxu0 }
 0x18f   :  { %1478 = vst [vmem:[%s3165_s5 + $0x48] sm:$0xff] %v1426_v26  ;;  %1483 = vst [vmem:[%s3165_s5 + $0x70] sm:$0xff] %v1447_v56  ;;  %v1334_v38 = vadd.f32 %v1879_v37, %v1221_v15 }
 0x190   :  { %v1984_v18 = vpop.f32.mrf.mxu1  ;;  %v1881_v27 = vpop.f32.mrf.mxu0 }
 0x191   :  { %v1431_v43 = vadd.f32 %v1979_v45, %v1334_v38  ;;  %v1450_v63 = vadd.f32 %v1984_v18, %v1353_v29  ;;  %v1882_v46 = vadd.f32 %v1881_v27, %v1880_v36 }
 0x192   :  { %v1883_v17 = vpop.f32.mrf.mxu0  ;;  %v1441_v42 = vpop.f32.mrf.mxu1 }
 0x193   :  { %1479 = vst [vmem:[%s3165_s5 + $0x50] sm:$0xff] %v1431_v43  ;;  %1484 = vst [vmem:[%s3165_s5 + $0x78] sm:$0xff] %v1450_v63  ;;  %v1337_v22 = vadd.f32 %v1882_v46, %v1224_v60 }
 0x194   :  { %v1884_v5 = vpop.f32.mrf.mxu0 }
 0x195   :  { %v1434_v25 = vadd.f32 %v1980_v10, %v1337_v22  ;;  %v1885_v39 = vadd.f32 %v1884_v5, %v1883_v17 }
 0x196   :  { %v1886_v11 = vpop.f32.mrf.mxu0 }
 0x197   :  { %1480 = vst [vmem:[%s3165_s5 + $0x58] sm:$0xff] %v1434_v25  ;;  %v1342_v57 = vadd.f32 %v1885_v39, %v1229_v8 }
 0x198   :  { %v1887_v23 = vpop.f32.mrf.mxu0 }
 0x199   :  { %v1439_v33 = vadd.f32 %v1438_v14, %v1342_v57  ;;  %v1888_v53 = vadd.f32 %v1887_v23, %v1886_v11 }
 0x19b   :  { %1481 = vst [vmem:[%s3165_s5 + $0x60] sm:$0xff] %v1439_v33  ;;  %v1345_v1 = vadd.f32 %v1888_v53, %v1232_v34 }
 0x19d   :  { %v1442_v45 = vadd.f32 %v1441_v42, %v1345_v1 }
 0x19f   :  { %1482 = vst [vmem:[%s3165_s5 + $0x68] sm:$0xff] %v1442_v45 }

// kernel: forward.35
= control target key start
LH: loop header
LB: loop body
LE: loop exit
PB: predicated region body
PF: predicated region fallthrough
CT: control target
= control target key end

     0   :  { %v982_v0 = vmov 0   ;;  %vm214_vm0 = vcmask 130048   ;;  %s1471_s2 = inlined_call_operand.vmem [shape: bf16[144,128], index: 2, kind: input, shape index: {}]   ;;  %s1472_s3 = inlined_call_operand.vmem [shape: bf16[144,128], index: 3, kind: input, shape index: {}]   ;;  %s1473_s0 = inlined_call_operand.vmem [shape: bf16[128,144], index: 0, kind: input, shape index: {}]   ;;  %s1474_s1 = inlined_call_operand.vmem [shape: bf16[128,144], index: 1, kind: input, shape index: {}]   ;;  %s1475_s4 = inlined_call_operand.vmem [shape: f32[128,128], index: 4, kind: output, shape index: {0}]   ;;  %s1476_s5 = inlined_call_operand.vmem [shape: f32[128,128], index: 5, kind: output, shape index: {1}]  }
   0x1   :  { %239 = vmatprep.subr.bf16.mxu0 %v982_v0  ;;  %486 = vmatprep.subr.bf16.mxu1 %v982_v0  ;;  %v1018_v1 = vld [vmem:[%s1471_s2 + $0x38] sm:$0xff]   ;;  %v1029_v3 = vld [vmem:[%s1471_s2 + $0x30] sm:$0xff]   ;;  %v1043_v5 = vld [vmem:[%s1471_s2 + $0x28] sm:$0xff]  }
   0x2   :  { %v1023_v2 = vld [vmem:[%s1472_s3 + $0x38] sm:$0xff]   ;;  %240 = vmatpush1.bf16.msra.mxu0 %v1018_v1  ;;  %v1036_v4 = vld [vmem:[%s1472_s3 + $0x30] sm:$0xff]   ;;  %v1050_v6 = vld [vmem:[%s1472_s3 + $0x28] sm:$0xff]  }
   0x3   :  { %487 = vmatpush1.bf16.msra.mxu1 %v1023_v2  ;;  %241 = vmatprep.subr.bf16.mxu0 %v982_v0  ;;  %v1057_v7 = vld [vmem:[%s1471_s2 + $0x20] sm:$0xff]   ;;  %v1071_v9 = vld [vmem:[%s1471_s2 + $0x18] sm:$0xff]   ;;  %v1084_v11 = vld [vmem:[%s1471_s2 + $0x10] sm:$0xff]  }
   0x4   :  { %488 = vmatprep.subr.bf16.mxu1 %v982_v0  ;;  %v1064_v8 = vld [vmem:[%s1472_s3 + $0x20] sm:$0xff]   ;;  %v1078_v10 = vld [vmem:[%s1472_s3 + $0x18] sm:$0xff]   ;;  %v1090_v12 = vld [vmem:[%s1472_s3 + $0x10] sm:$0xff]  }
   0x5   :  { %v1097_v13 = vld [vmem:[%s1473_s0 + $0x4] ss:$8 sps:$4 sm:$0xff]   ;;  %v1154_v21 = vld [vmem:[%s1473_s0] ss:$8 sps:$4 sm:$0xff]   ;;  %v1167_v23 = vld [vmem:[%s1473_s0 + $0x14] ss:$8 sps:$4 sm:$0xff]  }
   0x6   :  { %242 = vmatpush1.bf16.msra.mxu0 %v1029_v3  ;;  %v1103_v14 = vld [vmem:[%s1474_s1 + $0x4] ss:$8 sps:$4 sm:$0xff]   ;;  %858 = vmatprep.mubr.msk.bf16.mxu0 %vm214_vm0, %v1097_v13  ;;  %v1160_v22 = vld [vmem:[%s1474_s1] ss:$8 sps:$4 sm:$0xff]   ;;  %v1173_v24 = vld [vmem:[%s1474_s1 + $0x14] ss:$8 sps:$4 sm:$0xff]  }
   0x7   :  { %489 = vmatpush1.bf16.msra.mxu1 %v1036_v4  ;;  %243 = vmatprep.subr.bf16.mxu0 %v982_v0  ;;  %v1111_v15 = vld [vmem:[%s1471_s2 + $0x8] sm:$0xff]   ;;  %v1127_v17 = vld [vmem:[%s1471_s2] sm:$0xff]   ;;  %v1187_v25 = vld [vmem:[%s1473_s0 + $0x10] ss:$8 sps:$4 sm:$0xff]  }
   0x8   :  { %490 = vmatprep.subr.bf16.mxu1 %v982_v0  ;;  %891 = vmatprep.mubr.msk.bf16.mxu1 %vm214_vm0, %v1103_v14  ;;  %v1120_v16 = vld [vmem:[%s1472_s3 + $0x8] sm:$0xff]   ;;  %v1134_v18 = vld [vmem:[%s1472_s3] sm:$0xff]   ;;  %v1193_v26 = vld [vmem:[%s1474_s1 + $0x10] ss:$8 sps:$4 sm:$0xff]  }
   0x9   :  { %v1141_v19 = vld [vmem:[%s1471_s2 + $0x40] sm:$0xff]   ;;  %v1232_v31 = vld [vmem:[%s1473_s0 + $0x34] ss:$8 sps:$4 sm:$0xff]   ;;  %v1255_v33 = vld [vmem:[%s1473_s0 + $0x30] ss:$8 sps:$4 sm:$0xff]  }
   0xa   :  { %244 = vmatpush1.bf16.msra.mxu0 %v1043_v5  ;;  %v1148_v20 = vld [vmem:[%s1472_s3 + $0x40] sm:$0xff]   ;;  %v1237_v32 = vld [vmem:[%s1474_s1 + $0x34] ss:$8 sps:$4 sm:$0xff]   ;;  %v1261_v34 = vld [vmem:[%s1474_s1 + $0x30] ss:$8 sps:$4 sm:$0xff]  }
   0xb   :  { %491 = vmatpush1.bf16.msra.mxu1 %v1050_v6  ;;  %245 = vmatprep.subr.bf16.mxu0 %v982_v0  ;;  %v1199_v27 = vld [vmem:[%s1473_s0 + $0x24] ss:$8 sps:$4 sm:$0xff]   ;;  %v1221_v29 = vld [vmem:[%s1473_s0 + $0x20] ss:$8 sps:$4 sm:$0xff]   ;;  %v964_v39 = vld [vmem:[%s1473_s0 + $0x54] ss:$8 sps:$4 sm:$0xff]  }
   0xc   :  { %492 = vmatprep.subr.bf16.mxu1 %v982_v0  ;;  %v1205_v28 = vld [vmem:[%s1474_s1 + $0x24] ss:$8 sps:$4 sm:$0xff]   ;;  %v1227_v30 = vld [vmem:[%s1474_s1 + $0x20] ss:$8 sps:$4 sm:$0xff]   ;;  %v966_v40 = vld [vmem:[%s1474_s1 + $0x54] ss:$8 sps:$4 sm:$0xff]  }
   0xd   :  { %v1266_v35 = vld [vmem:[%s1473_s0 + $0x44] ss:$8 sps:$4 sm:$0xff]   ;;  %v962_v37 = vld [vmem:[%s1473_s0 + $0x40] ss:$8 sps:$4 sm:$0xff]   ;;  %v968_v41 = vld [vmem:[%s1473_s0 + $0x50] ss:$8 sps:$4 sm:$0xff]  }
   0xe   :  { %246 = vmatpush1.bf16.msra.mxu0 %v1057_v7  ;;  %v1271_v36 = vld [vmem:[%s1474_s1 + $0x44] ss:$8 sps:$4 sm:$0xff]   ;;  %v963_v38 = vld [vmem:[%s1474_s1 + $0x40] ss:$8 sps:$4 sm:$0xff]   ;;  %v969_v42 = vld [vmem:[%s1474_s1 + $0x50] ss:$8 sps:$4 sm:$0xff]  }
   0xf   :  { %493 = vmatpush1.bf16.msra.mxu1 %v1064_v8  ;;  %247 = vmatprep.subr.bf16.mxu0 %v982_v0  ;;  %v970_v43 = vld [vmem:[%s1473_s0 + $0x64] ss:$8 sps:$4 sm:$0xff]   ;;  %v974_v45 = vld [vmem:[%s1473_s0 + $0x60] ss:$8 sps:$4 sm:$0xff]   ;;  %v976_v47 = vld [vmem:[%s1473_s0 + $0x74] ss:$8 sps:$4 sm:$0xff]  }
  0x10   :  { %494 = vmatprep.subr.bf16.mxu1 %v982_v0  ;;  %v972_v44 = vld [vmem:[%s1474_s1 + $0x64] ss:$8 sps:$4 sm:$0xff]   ;;  %v975_v46 = vld [vmem:[%s1474_s1 + $0x60] ss:$8 sps:$4 sm:$0xff]   ;;  %v978_v48 = vld [vmem:[%s1474_s1 + $0x74] ss:$8 sps:$4 sm:$0xff]  }
  0x11   :  { %v980_v49 = vld [vmem:[%s1473_s0 + $0x70] ss:$8 sps:$4 sm:$0xff]  }
  0x12   :  { %248 = vmatpush1.bf16.msra.mxu0 %v1071_v9  ;;  %v981_v50 = vld [vmem:[%s1474_s1 + $0x70] ss:$8 sps:$4 sm:$0xff]  }
  0x13   :  { %495 = vmatpush1.bf16.msra.mxu1 %v1078_v10  ;;  %249 = vmatprep.subr.bf16.mxu0 %v982_v0 }
  0x14   :  { %496 = vmatprep.subr.bf16.mxu1 %v982_v0 }
  0x16   :  { %250 = vmatpush1.bf16.msra.mxu0 %v1084_v11 }
  0x17   :  { %497 = vmatpush1.bf16.msra.mxu1 %v1090_v12  ;;  %251 = vmatprep.subr.bf16.mxu0 %v982_v0 }
  0x18   :  { %498 = vmatprep.subr.bf16.mxu1 %v982_v0 }
  0x1a   :  { %252 = vmatpush1.bf16.msra.mxu0 %v1111_v15 }
  0x1b   :  { %499 = vmatpush1.bf16.msra.mxu1 %v1120_v16  ;;  %253 = vmatprep.subr.bf16.mxu0 %v982_v0 }
  0x1c   :  { %500 = vmatprep.subr.bf16.mxu1 %v982_v0 }
  0x1e   :  { %254 = vmatpush1.bf16.msra.mxu0 %v1127_v17 }
  0x1f   :  { %501 = vmatpush1.bf16.msra.mxu1 %v1134_v18  ;;  %269 = vmatprep.subr.bf16.mxu0 %v982_v0 }
  0x20   :  { %516 = vmatprep.subr.bf16.mxu1 %v982_v0 }
  0x22   :  { %270 = vmatpush2.bf16.msra.mxu0 %v1141_v19 }
  0x23   :  { %517 = vmatpush2.bf16.msra.mxu1 %v1148_v20  ;;  %583 = vmatprep.subr.bf16.mxu0 %v982_v0 }
  0x24   :  { %696 = vmatprep.subr.bf16.mxu1 %v982_v0 }
  0x25   :  { %272 = vmatmul.mubr.bf16.vlgmr.msra.gmra.mxu0 %v1154_v21 }
  0x26   :  { %519 = vmatmul.mubr.bf16.vlgmr.msra.gmra.mxu1 %v1160_v22  ;;  %584 = vmatpush1.bf16.msra.mxu0 %v1018_v1 }
  0x27   :  { %697 = vmatpush1.bf16.msra.mxu1 %v1023_v2  ;;  %859 = vmatprep.mubr.msk.bf16.mxu0 %vm214_vm0, %v1167_v23 }
  0x28   :  { %892 = vmatprep.mubr.msk.bf16.mxu1 %vm214_vm0, %v1173_v24  ;;  %585 = vmatprep.subr.bf16.mxu0 %v982_v0 }
  0x29   :  { %698 = vmatprep.subr.bf16.mxu1 %v982_v0 }
  0x2a   :  { %586 = vmatpush1.bf16.msra.mxu0 %v1029_v3 }
  0x2b   :  { %699 = vmatpush1.bf16.msra.mxu1 %v1036_v4  ;;  %587 = vmatprep.subr.bf16.mxu0 %v982_v0 }
  0x2c   :  { %700 = vmatprep.subr.bf16.mxu1 %v982_v0 }
  0x2d   :  { %280 = vmatmul.mubr.bf16.gmra.mxu0 %v1187_v25 }
  0x2e   :  { %527 = vmatmul.mubr.bf16.gmra.mxu1 %v1193_v26  ;;  %860 = vmatprep.mubr.msk.bf16.mxu0 %vm214_vm0, %v1199_v27 }
  0x2f   :  { %893 = vmatprep.mubr.msk.bf16.mxu1 %vm214_vm0, %v1205_v28  ;;  %588 = vmatpush1.bf16.msra.mxu0 %v1043_v5 }
  0x30   :  { %701 = vmatpush1.bf16.msra.mxu1 %v1050_v6  ;;  %589 = vmatprep.subr.bf16.mxu0 %v982_v0 }
  0x31   :  { %702 = vmatprep.subr.bf16.mxu1 %v982_v0 }
  0x33   :  { %590 = vmatpush1.bf16.msra.mxu0 %v1057_v7 }
  0x34   :  { %703 = vmatpush1.bf16.msra.mxu1 %v1064_v8  ;;  %591 = vmatprep.subr.bf16.mxu0 %v982_v0 }
  0x35   :  { %288 = vmatmul.mubr.bf16.gmra.mxu0 %v1221_v29  ;;  %704 = vmatprep.subr.bf16.mxu1 %v982_v0 }
  0x36   :  { %535 = vmatmul.mubr.bf16.gmra.mxu1 %v1227_v30  ;;  %861 = vmatprep.mubr.msk.bf16.mxu0 %vm214_vm0, %v1232_v31 }
  0x37   :  { %894 = vmatprep.mubr.msk.bf16.mxu1 %vm214_vm0, %v1237_v32  ;;  %592 = vmatpush1.bf16.msra.mxu0 %v1071_v9 }
  0x38   :  { %705 = vmatpush1.bf16.msra.mxu1 %v1078_v10  ;;  %593 = vmatprep.subr.bf16.mxu0 %v982_v0 }
  0x39   :  { %706 = vmatprep.subr.bf16.mxu1 %v982_v0 }
  0x3b   :  { %594 = vmatpush1.bf16.msra.mxu0 %v1084_v11 }
  0x3c   :  { %707 = vmatpush1.bf16.msra.mxu1 %v1090_v12  ;;  %595 = vmatprep.subr.bf16.mxu0 %v982_v0 }
  0x3d   :  { %296 = vmatmul.mubr.bf16.gmra.mxu0 %v1255_v33  ;;  %708 = vmatprep.subr.bf16.mxu1 %v982_v0 }
  0x3e   :  { %543 = vmatmul.mubr.bf16.gmra.mxu1 %v1261_v34  ;;  %862 = vmatprep.mubr.msk.bf16.mxu0 %vm214_vm0, %v1266_v35 }
  0x3f   :  { %895 = vmatprep.mubr.msk.bf16.mxu1 %vm214_vm0, %v1271_v36  ;;  %596 = vmatpush1.bf16.msra.mxu0 %v1111_v15 }
  0x40   :  { %709 = vmatpush1.bf16.msra.mxu1 %v1120_v16  ;;  %597 = vmatprep.subr.bf16.mxu0 %v982_v0 }
  0x41   :  { %710 = vmatprep.subr.bf16.mxu1 %v982_v0 }
  0x43   :  { %598 = vmatpush1.bf16.msra.mxu0 %v1127_v17 }
  0x44   :  { %711 = vmatpush1.bf16.msra.mxu1 %v1134_v18  ;;  %613 = vmatprep.subr.bf16.mxu0 %v982_v0 }
  0x45   :  { %304 = vmatmul.mubr.bf16.gmra.mxu0 %v962_v37  ;;  %726 = vmatprep.subr.bf16.mxu1 %v982_v0 }
  0x46   :  { %551 = vmatmul.mubr.bf16.gmra.mxu1 %v963_v38  ;;  %863 = vmatprep.mubr.msk.bf16.mxu0 %vm214_vm0, %v964_v39 }
  0x47   :  { %896 = vmatprep.mubr.msk.bf16.mxu1 %vm214_vm0, %v966_v40  ;;  %614 = vmatpush2.bf16.msra.mxu0 %v1141_v19 }
  0x48   :  { %727 = vmatpush2.bf16.msra.mxu1 %v1148_v20 }
  0x4d   :  { %312 = vmatmul.mubr.bf16.gmra.mxu0 %v968_v41 }
  0x4e   :  { %559 = vmatmul.mubr.bf16.gmra.mxu1 %v969_v42  ;;  %864 = vmatprep.mubr.msk.bf16.mxu0 %vm214_vm0, %v970_v43 }
  0x4f   :  { %897 = vmatprep.mubr.msk.bf16.mxu1 %vm214_vm0, %v972_v44 }
  0x55   :  { %320 = vmatmul.mubr.bf16.gmra.mxu0 %v974_v45 }
  0x56   :  { %567 = vmatmul.mubr.bf16.gmra.mxu1 %v975_v46  ;;  %865 = vmatprep.mubr.msk.bf16.mxu0 %vm214_vm0, %v976_v47 }
  0x57   :  { %898 = vmatprep.mubr.msk.bf16.mxu1 %vm214_vm0, %v978_v48 }
  0x5d   :  { %328 = vmatmul.mubr.bf16.gmra.mxu0 %v980_v49 }
  0x5e   :  { %575 = vmatmul.mubr.bf16.gmra.mxu1 %v981_v50  ;;  %899 = vmatprep.mubr.msk.bf16.mxu0 %vm214_vm0, %v1103_v14 }
  0x5f   :  { %907 = vmatprep.mubr.msk.bf16.mxu1 %vm214_vm0, %v1097_v13 }
  0x65   :  { %616 = vmatmul.mubr.bf16.vlgmr.msra.gmra.mxu0 %v1160_v22 }
  0x66   :  { %729 = vmatmul.mubr.bf16.vlgmr.msra.gmra.mxu1 %v1154_v21  ;;  %900 = vmatprep.mubr.msk.bf16.mxu0 %vm214_vm0, %v1173_v24 }
  0x67   :  { %908 = vmatprep.mubr.msk.bf16.mxu1 %vm214_vm0, %v1167_v23 }
  0x6d   :  { %624 = vmatmul.mubr.bf16.gmra.mxu0 %v1193_v26 }
  0x6e   :  { %737 = vmatmul.mubr.bf16.gmra.mxu1 %v1187_v25  ;;  %901 = vmatprep.mubr.msk.bf16.mxu0 %vm214_vm0, %v1205_v28 }
  0x6f   :  { %909 = vmatprep.mubr.msk.bf16.mxu1 %vm214_vm0, %v1199_v27 }
  0x75   :  { %632 = vmatmul.mubr.bf16.gmra.mxu0 %v1227_v30 }
  0x76   :  { %745 = vmatmul.mubr.bf16.gmra.mxu1 %v1221_v29  ;;  %902 = vmatprep.mubr.msk.bf16.mxu0 %vm214_vm0, %v1237_v32 }
  0x77   :  { %910 = vmatprep.mubr.msk.bf16.mxu1 %vm214_vm0, %v1232_v31 }
  0x7d   :  { %640 = vmatmul.mubr.bf16.gmra.mxu0 %v1261_v34 }
  0x7e   :  { %753 = vmatmul.mubr.bf16.gmra.mxu1 %v1255_v33  ;;  %903 = vmatprep.mubr.msk.bf16.mxu0 %vm214_vm0, %v1271_v36 }
  0x7f   :  { %911 = vmatprep.mubr.msk.bf16.mxu1 %vm214_vm0, %v1266_v35 }
  0x85   :  { %648 = vmatmul.mubr.bf16.gmra.mxu0 %v963_v38 }
  0x86   :  { %761 = vmatmul.mubr.bf16.gmra.mxu1 %v962_v37  ;;  %904 = vmatprep.mubr.msk.bf16.mxu0 %vm214_vm0, %v966_v40 }
  0x87   :  { %912 = vmatprep.mubr.msk.bf16.mxu1 %vm214_vm0, %v964_v39 }
  0x8d   :  { %656 = vmatmul.mubr.bf16.gmra.mxu0 %v969_v42 }
  0x8e   :  { %769 = vmatmul.mubr.bf16.gmra.mxu1 %v968_v41  ;;  %905 = vmatprep.mubr.msk.bf16.mxu0 %vm214_vm0, %v972_v44 }
  0x8f   :  { %913 = vmatprep.mubr.msk.bf16.mxu1 %vm214_vm0, %v970_v43 }
  0x95   :  { %664 = vmatmul.mubr.bf16.gmra.mxu0 %v975_v46 }
  0x96   :  { %777 = vmatmul.mubr.bf16.gmra.mxu1 %v974_v45  ;;  %906 = vmatprep.mubr.msk.bf16.mxu0 %vm214_vm0, %v978_v48 }
  0x97   :  { %914 = vmatprep.mubr.msk.bf16.mxu1 %vm214_vm0, %v976_v47 }
  0x9d   :  { %672 = vmatmul.mubr.bf16.gmra.mxu0 %v981_v50 }
  0x9e   :  { %785 = vmatmul.mubr.bf16.gmra.mxu1 %v980_v49 }
  0xe5   :  { %v273_v51 = vpop.f32.mrf.mxu0 }
  0xe6   :  { %v520_v52 = vpop.f32.mrf.mxu1 }
  0xe7   :  { %v680_v53 = vsub.f32 %v273_v51, %v520_v52  ;;  %v275_v54 = vpop.f32.mrf.mxu0 }
  0xe8   :  { %v522_v55 = vpop.f32.mrf.mxu1 }
  0xe9   :  { %793 = vst [vmem:[%s1475_s4] sm:$0xff] %v680_v53  ;;  %v276_v56 = vpop.f32.mrf.mxu0 }
  0xea   :  { %v523_v57 = vpop.f32.mrf.mxu1 }
  0xeb   :  { %v681_v58 = vsub.f32 %v276_v56, %v523_v57  ;;  %v278_v59 = vpop.f32.mrf.mxu0 }
  0xec   :  { %v525_v60 = vpop.f32.mrf.mxu1 }
  0xed   :  { %794 = vst [vmem:[%s1475_s4 + $0x8] sm:$0xff] %v681_v58  ;;  %v281_v61 = vpop.f32.mrf.mxu0 }
  0xee   :  { %v528_v62 = vpop.f32.mrf.mxu1 }
  0xef   :  { %v682_v63 = vsub.f32 %v281_v61, %v528_v62  ;;  %v283_v0 = vpop.f32.mrf.mxu0 }
  0xf0   :  { %v530_v1 = vpop.f32.mrf.mxu1 }
  0xf1   :  { %795 = vst [vmem:[%s1475_s4 + $0x10] sm:$0xff] %v682_v63  ;;  %v284_v2 = vpop.f32.mrf.mxu0 }
  0xf2   :  { %v531_v3 = vpop.f32.mrf.mxu1 }
  0xf3   :  { %v683_v4 = vsub.f32 %v284_v2, %v531_v3  ;;  %v286_v5 = vpop.f32.mrf.mxu0 }
  0xf4   :  { %v533_v6 = vpop.f32.mrf.mxu1 }
  0xf5   :  { %796 = vst [vmem:[%s1475_s4 + $0x18] sm:$0xff] %v683_v4  ;;  %v289_v7 = vpop.f32.mrf.mxu0 }
  0xf6   :  { %v536_v8 = vpop.f32.mrf.mxu1 }
  0xf7   :  { %v684_v9 = vsub.f32 %v289_v7, %v536_v8  ;;  %v291_v10 = vpop.f32.mrf.mxu0 }
  0xf8   :  { %v538_v11 = vpop.f32.mrf.mxu1 }
  0xf9   :  { %797 = vst [vmem:[%s1475_s4 + $0x20] sm:$0xff] %v684_v9  ;;  %v292_v12 = vpop.f32.mrf.mxu0 }
  0xfa   :  { %v539_v13 = vpop.f32.mrf.mxu1 }
  0xfb   :  { %v685_v14 = vsub.f32 %v292_v12, %v539_v13  ;;  %v294_v15 = vpop.f32.mrf.mxu0 }
  0xfc   :  { %v541_v16 = vpop.f32.mrf.mxu1 }
  0xfd   :  { %798 = vst [vmem:[%s1475_s4 + $0x28] sm:$0xff] %v685_v14  ;;  %v297_v17 = vpop.f32.mrf.mxu0 }
  0xfe   :  { %v544_v18 = vpop.f32.mrf.mxu1 }
  0xff   :  { %v686_v19 = vsub.f32 %v297_v17, %v544_v18  ;;  %v299_v20 = vpop.f32.mrf.mxu0 }
 0x100   :  { %v546_v21 = vpop.f32.mrf.mxu1 }
 0x101   :  { %799 = vst [vmem:[%s1475_s4 + $0x30] sm:$0xff] %v686_v19  ;;  %v300_v22 = vpop.f32.mrf.mxu0 }
 0x102   :  { %v547_v23 = vpop.f32.mrf.mxu1 }
 0x103   :  { %v687_v24 = vsub.f32 %v300_v22, %v547_v23  ;;  %v302_v25 = vpop.f32.mrf.mxu0 }
 0x104   :  { %v549_v26 = vpop.f32.mrf.mxu1 }
 0x105   :  { %800 = vst [vmem:[%s1475_s4 + $0x38] sm:$0xff] %v687_v24  ;;  %v305_v27 = vpop.f32.mrf.mxu0 }
 0x106   :  { %v552_v28 = vpop.f32.mrf.mxu1 }
 0x107   :  { %v688_v29 = vsub.f32 %v305_v27, %v552_v28  ;;  %v307_v30 = vpop.f32.mrf.mxu0 }
 0x108   :  { %v554_v31 = vpop.f32.mrf.mxu1 }
 0x109   :  { %801 = vst [vmem:[%s1475_s4 + $0x40] sm:$0xff] %v688_v29  ;;  %v308_v32 = vpop.f32.mrf.mxu0 }
 0x10a   :  { %v555_v33 = vpop.f32.mrf.mxu1 }
 0x10b   :  { %v689_v34 = vsub.f32 %v308_v32, %v555_v33  ;;  %v310_v35 = vpop.f32.mrf.mxu0 }
 0x10c   :  { %v557_v36 = vpop.f32.mrf.mxu1 }
 0x10d   :  { %802 = vst [vmem:[%s1475_s4 + $0x48] sm:$0xff] %v689_v34  ;;  %v313_v37 = vpop.f32.mrf.mxu0 }
 0x10e   :  { %v560_v38 = vpop.f32.mrf.mxu1 }
 0x10f   :  { %v690_v39 = vsub.f32 %v313_v37, %v560_v38  ;;  %v315_v40 = vpop.f32.mrf.mxu0 }
 0x110   :  { %v562_v41 = vpop.f32.mrf.mxu1 }
 0x111   :  { %803 = vst [vmem:[%s1475_s4 + $0x50] sm:$0xff] %v690_v39  ;;  %v316_v42 = vpop.f32.mrf.mxu0 }
 0x112   :  { %v563_v43 = vpop.f32.mrf.mxu1 }
 0x113   :  { %v691_v44 = vsub.f32 %v316_v42, %v563_v43  ;;  %v318_v45 = vpop.f32.mrf.mxu0 }
 0x114   :  { %v565_v46 = vpop.f32.mrf.mxu1 }
 0x115   :  { %804 = vst [vmem:[%s1475_s4 + $0x58] sm:$0xff] %v691_v44  ;;  %v321_v47 = vpop.f32.mrf.mxu0 }
 0x116   :  { %v568_v48 = vpop.f32.mrf.mxu1 }
 0x117   :  { %v692_v49 = vsub.f32 %v321_v47, %v568_v48  ;;  %v323_v50 = vpop.f32.mrf.mxu0 }
 0x118   :  { %v570_v51 = vpop.f32.mrf.mxu1 }
 0x119   :  { %805 = vst [vmem:[%s1475_s4 + $0x60] sm:$0xff] %v692_v49  ;;  %v324_v52 = vpop.f32.mrf.mxu0 }
 0x11a   :  { %v571_v53 = vpop.f32.mrf.mxu1 }
 0x11b   :  { %v693_v54 = vsub.f32 %v324_v52, %v571_v53  ;;  %v326_v55 = vpop.f32.mrf.mxu0 }
 0x11c   :  { %v573_v56 = vpop.f32.mrf.mxu1 }
 0x11d   :  { %806 = vst [vmem:[%s1475_s4 + $0x68] sm:$0xff] %v693_v54  ;;  %v329_v57 = vpop.f32.mrf.mxu0 }
 0x11e   :  { %v576_v58 = vpop.f32.mrf.mxu1 }
 0x11f   :  { %v694_v59 = vsub.f32 %v329_v57, %v576_v58  ;;  %v331_v60 = vpop.f32.mrf.mxu0 }
 0x120   :  { %v578_v61 = vpop.f32.mrf.mxu1 }
 0x121   :  { %807 = vst [vmem:[%s1475_s4 + $0x70] sm:$0xff] %v694_v59  ;;  %v332_v62 = vpop.f32.mrf.mxu0 }
 0x122   :  { %v579_v63 = vpop.f32.mrf.mxu1 }
 0x123   :  { %v695_v0 = vsub.f32 %v332_v62, %v579_v63  ;;  %v334_v1 = vpop.f32.mrf.mxu0 }
 0x124   :  { %v581_v2 = vpop.f32.mrf.mxu1 }
 0x125   :  { %808 = vst [vmem:[%s1475_s4 + $0x78] sm:$0xff] %v695_v0  ;;  %v617_v3 = vpop.f32.mrf.mxu0 }
 0x126   :  { %v730_v4 = vpop.f32.mrf.mxu1 }
 0x127   :  { %v731_v5 = vadd.f32 %v730_v4, %v617_v3  ;;  %v619_v6 = vpop.f32.mrf.mxu0 }
 0x128   :  { %v732_v7 = vpop.f32.mrf.mxu1 }
 0x129   :  { %809 = vst [vmem:[%s1476_s5] sm:$0xff] %v731_v5  ;;  %v620_v8 = vpop.f32.mrf.mxu0 }
 0x12a   :  { %v733_v9 = vpop.f32.mrf.mxu1 }
 0x12b   :  { %v734_v10 = vadd.f32 %v733_v9, %v620_v8  ;;  %v622_v11 = vpop.f32.mrf.mxu0 }
 0x12c   :  { %v735_v12 = vpop.f32.mrf.mxu1 }
 0x12d   :  { %810 = vst [vmem:[%s1476_s5 + $0x8] sm:$0xff] %v734_v10  ;;  %v625_v13 = vpop.f32.mrf.mxu0 }
 0x12e   :  { %v738_v14 = vpop.f32.mrf.mxu1 }
 0x12f   :  { %v739_v15 = vadd.f32 %v738_v14, %v625_v13  ;;  %v627_v16 = vpop.f32.mrf.mxu0 }
 0x130   :  { %v740_v17 = vpop.f32.mrf.mxu1 }
 0x131   :  { %811 = vst [vmem:[%s1476_s5 + $0x10] sm:$0xff] %v739_v15  ;;  %v628_v18 = vpop.f32.mrf.mxu0 }
 0x132   :  { %v741_v19 = vpop.f32.mrf.mxu1 }
 0x133   :  { %v742_v20 = vadd.f32 %v741_v19, %v628_v18  ;;  %v630_v21 = vpop.f32.mrf.mxu0 }
 0x134   :  { %v743_v22 = vpop.f32.mrf.mxu1 }
 0x135   :  { %812 = vst [vmem:[%s1476_s5 + $0x18] sm:$0xff] %v742_v20  ;;  %v633_v23 = vpop.f32.mrf.mxu0 }
 0x136   :  { %v746_v24 = vpop.f32.mrf.mxu1 }
 0x137   :  { %v747_v25 = vadd.f32 %v746_v24, %v633_v23  ;;  %v635_v26 = vpop.f32.mrf.mxu0 }
 0x138   :  { %v748_v27 = vpop.f32.mrf.mxu1 }
 0x139   :  { %813 = vst [vmem:[%s1476_s5 + $0x20] sm:$0xff] %v747_v25  ;;  %v636_v28 = vpop.f32.mrf.mxu0 }
 0x13a   :  { %v749_v29 = vpop.f32.mrf.mxu1 }
 0x13b   :  { %v750_v30 = vadd.f32 %v749_v29, %v636_v28  ;;  %v638_v31 = vpop.f32.mrf.mxu0 }
 0x13c   :  { %v751_v32 = vpop.f32.mrf.mxu1 }
 0x13d   :  { %814 = vst [vmem:[%s1476_s5 + $0x28] sm:$0xff] %v750_v30  ;;  %v641_v33 = vpop.f32.mrf.mxu0 }
 0x13e   :  { %v754_v34 = vpop.f32.mrf.mxu1 }
 0x13f   :  { %v755_v35 = vadd.f32 %v754_v34, %v641_v33  ;;  %v643_v36 = vpop.f32.mrf.mxu0 }
 0x140   :  { %v756_v37 = vpop.f32.mrf.mxu1 }
 0x141   :  { %815 = vst [vmem:[%s1476_s5 + $0x30] sm:$0xff] %v755_v35  ;;  %v644_v38 = vpop.f32.mrf.mxu0 }
 0x142   :  { %v757_v39 = vpop.f32.mrf.mxu1 }
 0x143   :  { %v758_v40 = vadd.f32 %v757_v39, %v644_v38  ;;  %v646_v41 = vpop.f32.mrf.mxu0 }
 0x144   :  { %v759_v42 = vpop.f32.mrf.mxu1 }
 0x145   :  { %816 = vst [vmem:[%s1476_s5 + $0x38] sm:$0xff] %v758_v40  ;;  %v649_v43 = vpop.f32.mrf.mxu0 }
 0x146   :  { %v762_v44 = vpop.f32.mrf.mxu1 }
 0x147   :  { %v763_v45 = vadd.f32 %v762_v44, %v649_v43  ;;  %v651_v46 = vpop.f32.mrf.mxu0 }
 0x148   :  { %v764_v47 = vpop.f32.mrf.mxu1 }
 0x149   :  { %817 = vst [vmem:[%s1476_s5 + $0x40] sm:$0xff] %v763_v45  ;;  %v652_v48 = vpop.f32.mrf.mxu0 }
 0x14a   :  { %v765_v49 = vpop.f32.mrf.mxu1 }
 0x14b   :  { %v766_v50 = vadd.f32 %v765_v49, %v652_v48  ;;  %v654_v51 = vpop.f32.mrf.mxu0 }
 0x14c   :  { %v767_v52 = vpop.f32.mrf.mxu1 }
 0x14d   :  { %818 = vst [vmem:[%s1476_s5 + $0x48] sm:$0xff] %v766_v50  ;;  %v657_v53 = vpop.f32.mrf.mxu0 }
 0x14e   :  { %v770_v54 = vpop.f32.mrf.mxu1 }
 0x14f   :  { %v771_v55 = vadd.f32 %v770_v54, %v657_v53  ;;  %v659_v56 = vpop.f32.mrf.mxu0 }
 0x150   :  { %v772_v57 = vpop.f32.mrf.mxu1 }
 0x151   :  { %819 = vst [vmem:[%s1476_s5 + $0x50] sm:$0xff] %v771_v55  ;;  %v660_v58 = vpop.f32.mrf.mxu0 }
 0x152   :  { %v773_v59 = vpop.f32.mrf.mxu1 }
 0x153   :  { %v774_v60 = vadd.f32 %v773_v59, %v660_v58  ;;  %v662_v61 = vpop.f32.mrf.mxu0 }
 0x154   :  { %v775_v62 = vpop.f32.mrf.mxu1 }
 0x155   :  { %820 = vst [vmem:[%s1476_s5 + $0x58] sm:$0xff] %v774_v60  ;;  %v665_v63 = vpop.f32.mrf.mxu0 }
 0x156   :  { %v778_v0 = vpop.f32.mrf.mxu1 }
 0x157   :  { %v779_v1 = vadd.f32 %v778_v0, %v665_v63  ;;  %v667_v2 = vpop.f32.mrf.mxu0 }
 0x158   :  { %v780_v3 = vpop.f32.mrf.mxu1 }
 0x159   :  { %821 = vst [vmem:[%s1476_s5 + $0x60] sm:$0xff] %v779_v1  ;;  %v668_v4 = vpop.f32.mrf.mxu0 }
 0x15a   :  { %v781_v5 = vpop.f32.mrf.mxu1 }
 0x15b   :  { %v782_v6 = vadd.f32 %v781_v5, %v668_v4  ;;  %v670_v7 = vpop.f32.mrf.mxu0 }
 0x15c   :  { %v783_v8 = vpop.f32.mrf.mxu1 }
 0x15d   :  { %822 = vst [vmem:[%s1476_s5 + $0x68] sm:$0xff] %v782_v6  ;;  %v673_v9 = vpop.f32.mrf.mxu0 }
 0x15e   :  { %v786_v10 = vpop.f32.mrf.mxu1 }
 0x15f   :  { %v787_v11 = vadd.f32 %v786_v10, %v673_v9  ;;  %v675_v12 = vpop.f32.mrf.mxu0 }
 0x160   :  { %v788_v13 = vpop.f32.mrf.mxu1 }
 0x161   :  { %823 = vst [vmem:[%s1476_s5 + $0x70] sm:$0xff] %v787_v11  ;;  %v676_v14 = vpop.f32.mrf.mxu0 }
 0x162   :  { %v789_v15 = vpop.f32.mrf.mxu1 }
 0x163   :  { %v790_v16 = vadd.f32 %v789_v15, %v676_v14  ;;  %v678_v17 = vpop.f32.mrf.mxu0 }
 0x164   :  { %v791_v18 = vpop.f32.mrf.mxu1 }
 0x165   :  { %824 = vst [vmem:[%s1476_s5 + $0x78] sm:$0xff] %v790_v16 }

// kernel: forward.36
= control target key start
LH: loop header
LB: loop body
LE: loop exit
PB: predicated region body
PF: predicated region fallthrough
CT: control target
= control target key end

     0   :  { %v1398_v0 = vmov 0   ;;  %vm214_vm0 = vcmask 130048   ;;  %s2256_s2 = inlined_call_operand.vmem [shape: bf16[144,128], index: 2, kind: input, shape index: {}]   ;;  %s2257_s3 = inlined_call_operand.vmem [shape: bf16[144,128], index: 3, kind: input, shape index: {}]   ;;  %s2258_s0 = inlined_call_operand.vmem [shape: bf16[128,144], index: 0, kind: input, shape index: {}]   ;;  %s2259_s1 = inlined_call_operand.vmem [shape: bf16[128,144], index: 1, kind: input, shape index: {}]   ;;  %s2260_s4 = inlined_call_operand.vmem [shape: f32[128,128], index: 4, kind: output, shape index: {0}]   ;;  %s2261_s5 = inlined_call_operand.vmem [shape: f32[128,128], index: 5, kind: output, shape index: {1}]  }
   0x1   :  { %239 = vmatprep.subr.bf16.mxu0 %v1398_v0  ;;  %486 = vmatprep.subr.bf16.mxu1 %v1398_v0  ;;  %v1434_v1 = vld [vmem:[%s2256_s2 + $0x38] sm:$0xff]   ;;  %v1445_v3 = vld [vmem:[%s2256_s2 + $0x30] sm:$0xff]   ;;  %v1459_v5 = vld [vmem:[%s2256_s2 + $0x28] sm:$0xff]  }
   0x2   :  { %v1439_v2 = vld [vmem:[%s2257_s3 + $0x38] sm:$0xff]   ;;  %240 = vmatpush1.bf16.msra.mxu0 %v1434_v1  ;;  %v1452_v4 = vld [vmem:[%s2257_s3 + $0x30] sm:$0xff]   ;;  %v1466_v6 = vld [vmem:[%s2257_s3 + $0x28] sm:$0xff]  }
   0x3   :  { %487 = vmatpush1.bf16.msra.mxu1 %v1439_v2  ;;  %241 = vmatprep.subr.bf16.mxu0 %v1398_v0  ;;  %v1473_v7 = vld [vmem:[%s2256_s2 + $0x20] sm:$0xff]   ;;  %v1487_v9 = vld [vmem:[%s2256_s2 + $0x18] sm:$0xff]   ;;  %v1500_v11 = vld [vmem:[%s2256_s2 + $0x10] sm:$0xff]  }
   0x4   :  { %488 = vmatprep.subr.bf16.mxu1 %v1398_v0  ;;  %v1480_v8 = vld [vmem:[%s2257_s3 + $0x20] sm:$0xff]   ;;  %v1494_v10 = vld [vmem:[%s2257_s3 + $0x18] sm:$0xff]   ;;  %v1506_v12 = vld [vmem:[%s2257_s3 + $0x10] sm:$0xff]  }
   0x5   :  { %v1513_v13 = vld [vmem:[%s2258_s0 + $0x4] ss:$8 sps:$4 sm:$0xff]   ;;  %v1570_v21 = vld [vmem:[%s2258_s0] ss:$8 sps:$4 sm:$0xff]   ;;  %v1583_v23 = vld [vmem:[%s2258_s0 + $0x14] ss:$8 sps:$4 sm:$0xff]  }
   0x6   :  { %242 = vmatpush1.bf16.msra.mxu0 %v1445_v3  ;;  %v1519_v14 = vld [vmem:[%s2259_s1 + $0x4] ss:$8 sps:$4 sm:$0xff]   ;;  %1178 = vmatprep.mubr.msk.bf16.mxu0 %vm214_vm0, %v1513_v13  ;;  %v1576_v22 = vld [vmem:[%s2259_s1] ss:$8 sps:$4 sm:$0xff]   ;;  %v1589_v24 = vld [vmem:[%s2259_s1 + $0x14] ss:$8 sps:$4 sm:$0xff]  }
   0x7   :  { %489 = vmatpush1.bf16.msra.mxu1 %v1452_v4  ;;  %243 = vmatprep.subr.bf16.mxu0 %v1398_v0  ;;  %v1527_v15 = vld [vmem:[%s2256_s2 + $0x8] sm:$0xff]   ;;  %v1543_v17 = vld [vmem:[%s2256_s2] sm:$0xff]   ;;  %v1603_v25 = vld [vmem:[%s2258_s0 + $0x10] ss:$8 sps:$4 sm:$0xff]  }
   0x8   :  { %490 = vmatprep.subr.bf16.mxu1 %v1398_v0  ;;  %1211 = vmatprep.mubr.msk.bf16.mxu1 %vm214_vm0, %v1519_v14  ;;  %v1536_v16 = vld [vmem:[%s2257_s3 + $0x8] sm:$0xff]   ;;  %v1550_v18 = vld [vmem:[%s2257_s3] sm:$0xff]   ;;  %v1609_v26 = vld [vmem:[%s2259_s1 + $0x10] ss:$8 sps:$4 sm:$0xff]  }
   0x9   :  { %v1557_v19 = vld [vmem:[%s2256_s2 + $0x40] sm:$0xff]   ;;  %v1648_v31 = vld [vmem:[%s2258_s0 + $0x34] ss:$8 sps:$4 sm:$0xff]   ;;  %v1671_v33 = vld [vmem:[%s2258_s0 + $0x30] ss:$8 sps:$4 sm:$0xff]  }
   0xa   :  { %244 = vmatpush1.bf16.msra.mxu0 %v1459_v5  ;;  %v1564_v20 = vld [vmem:[%s2257_s3 + $0x40] sm:$0xff]   ;;  %v1653_v32 = vld [vmem:[%s2259_s1 + $0x34] ss:$8 sps:$4 sm:$0xff]   ;;  %v1677_v34 = vld [vmem:[%s2259_s1 + $0x30] ss:$8 sps:$4 sm:$0xff]  }
   0xb   :  { %491 = vmatpush1.bf16.msra.mxu1 %v1466_v6  ;;  %245 = vmatprep.subr.bf16.mxu0 %v1398_v0  ;;  %v1615_v27 = vld [vmem:[%s2258_s0 + $0x24] ss:$8 sps:$4 sm:$0xff]   ;;  %v1637_v29 = vld [vmem:[%s2258_s0 + $0x20] ss:$8 sps:$4 sm:$0xff]   ;;  %v1284_v39 = vld [vmem:[%s2258_s0 + $0x54] ss:$8 sps:$4 sm:$0xff]  }
   0xc   :  { %492 = vmatprep.subr.bf16.mxu1 %v1398_v0  ;;  %v1621_v28 = vld [vmem:[%s2259_s1 + $0x24] ss:$8 sps:$4 sm:$0xff]   ;;  %v1643_v30 = vld [vmem:[%s2259_s1 + $0x20] ss:$8 sps:$4 sm:$0xff]   ;;  %v1286_v40 = vld [vmem:[%s2259_s1 + $0x54] ss:$8 sps:$4 sm:$0xff]  }
   0xd   :  { %v1682_v35 = vld [vmem:[%s2258_s0 + $0x44] ss:$8 sps:$4 sm:$0xff]   ;;  %v1282_v37 = vld [vmem:[%s2258_s0 + $0x40] ss:$8 sps:$4 sm:$0xff]   ;;  %v1288_v41 = vld [vmem:[%s2258_s0 + $0x50] ss:$8 sps:$4 sm:$0xff]  }
   0xe   :  { %246 = vmatpush1.bf16.msra.mxu0 %v1473_v7  ;;  %v1687_v36 = vld [vmem:[%s2259_s1 + $0x44] ss:$8 sps:$4 sm:$0xff]   ;;  %v1283_v38 = vld [vmem:[%s2259_s1 + $0x40] ss:$8 sps:$4 sm:$0xff]   ;;  %v1289_v42 = vld [vmem:[%s2259_s1 + $0x50] ss:$8 sps:$4 sm:$0xff]  }
   0xf   :  { %493 = vmatpush1.bf16.msra.mxu1 %v1480_v8  ;;  %247 = vmatprep.subr.bf16.mxu0 %v1398_v0  ;;  %v1290_v43 = vld [vmem:[%s2258_s0 + $0x64] ss:$8 sps:$4 sm:$0xff]   ;;  %v1294_v45 = vld [vmem:[%s2258_s0 + $0x60] ss:$8 sps:$4 sm:$0xff]   ;;  %v1296_v47 = vld [vmem:[%s2258_s0 + $0x74] ss:$8 sps:$4 sm:$0xff]  }
  0x10   :  { %494 = vmatprep.subr.bf16.mxu1 %v1398_v0  ;;  %v1292_v44 = vld [vmem:[%s2259_s1 + $0x64] ss:$8 sps:$4 sm:$0xff]   ;;  %v1295_v46 = vld [vmem:[%s2259_s1 + $0x60] ss:$8 sps:$4 sm:$0xff]   ;;  %v1298_v48 = vld [vmem:[%s2259_s1 + $0x74] ss:$8 sps:$4 sm:$0xff]  }
  0x11   :  { %v1300_v49 = vld [vmem:[%s2258_s0 + $0x70] ss:$8 sps:$4 sm:$0xff]  }
  0x12   :  { %248 = vmatpush1.bf16.msra.mxu0 %v1487_v9  ;;  %v1301_v50 = vld [vmem:[%s2259_s1 + $0x70] ss:$8 sps:$4 sm:$0xff]  }
  0x13   :  { %495 = vmatpush1.bf16.msra.mxu1 %v1494_v10  ;;  %249 = vmatprep.subr.bf16.mxu0 %v1398_v0 }
  0x14   :  { %496 = vmatprep.subr.bf16.mxu1 %v1398_v0 }
  0x16   :  { %250 = vmatpush1.bf16.msra.mxu0 %v1500_v11 }
  0x17   :  { %497 = vmatpush1.bf16.msra.mxu1 %v1506_v12  ;;  %251 = vmatprep.subr.bf16.mxu0 %v1398_v0 }
  0x18   :  { %498 = vmatprep.subr.bf16.mxu1 %v1398_v0 }
  0x1a   :  { %252 = vmatpush1.bf16.msra.mxu0 %v1527_v15 }
  0x1b   :  { %499 = vmatpush1.bf16.msra.mxu1 %v1536_v16  ;;  %253 = vmatprep.subr.bf16.mxu0 %v1398_v0 }
  0x1c   :  { %500 = vmatprep.subr.bf16.mxu1 %v1398_v0 }
  0x1e   :  { %254 = vmatpush1.bf16.msra.mxu0 %v1543_v17 }
  0x1f   :  { %501 = vmatpush1.bf16.msra.mxu1 %v1550_v18  ;;  %269 = vmatprep.subr.bf16.mxu0 %v1398_v0 }
  0x20   :  { %516 = vmatprep.subr.bf16.mxu1 %v1398_v0 }
  0x22   :  { %270 = vmatpush2.bf16.msra.mxu0 %v1557_v19 }
  0x23   :  { %517 = vmatpush2.bf16.msra.mxu1 %v1564_v20  ;;  %583 = vmatprep.subr.bf16.mxu0 %v1398_v0 }
  0x24   :  { %696 = vmatprep.subr.bf16.mxu1 %v1398_v0 }
  0x25   :  { %272 = vmatmul.mubr.bf16.vlgmr.msra.gmra.mxu0 %v1570_v21 }
  0x26   :  { %519 = vmatmul.mubr.bf16.vlgmr.msra.gmra.mxu1 %v1576_v22  ;;  %584 = vmatpush1.bf16.msra.mxu0 %v1434_v1 }
  0x27   :  { %697 = vmatpush1.bf16.msra.mxu1 %v1439_v2  ;;  %1179 = vmatprep.mubr.msk.bf16.mxu0 %vm214_vm0, %v1583_v23 }
  0x28   :  { %1212 = vmatprep.mubr.msk.bf16.mxu1 %vm214_vm0, %v1589_v24  ;;  %585 = vmatprep.subr.bf16.mxu0 %v1398_v0 }
  0x29   :  { %698 = vmatprep.subr.bf16.mxu1 %v1398_v0 }
  0x2a   :  { %586 = vmatpush1.bf16.msra.mxu0 %v1445_v3 }
  0x2b   :  { %699 = vmatpush1.bf16.msra.mxu1 %v1452_v4  ;;  %587 = vmatprep.subr.bf16.mxu0 %v1398_v0 }
  0x2c   :  { %700 = vmatprep.subr.bf16.mxu1 %v1398_v0 }
  0x2d   :  { %280 = vmatmul.mubr.bf16.gmra.mxu0 %v1603_v25 }
  0x2e   :  { %527 = vmatmul.mubr.bf16.gmra.mxu1 %v1609_v26  ;;  %1180 = vmatprep.mubr.msk.bf16.mxu0 %vm214_vm0, %v1615_v27 }
  0x2f   :  { %1213 = vmatprep.mubr.msk.bf16.mxu1 %vm214_vm0, %v1621_v28  ;;  %588 = vmatpush1.bf16.msra.mxu0 %v1459_v5 }
  0x30   :  { %701 = vmatpush1.bf16.msra.mxu1 %v1466_v6  ;;  %589 = vmatprep.subr.bf16.mxu0 %v1398_v0 }
  0x31   :  { %702 = vmatprep.subr.bf16.mxu1 %v1398_v0 }
  0x33   :  { %590 = vmatpush1.bf16.msra.mxu0 %v1473_v7 }
  0x34   :  { %703 = vmatpush1.bf16.msra.mxu1 %v1480_v8  ;;  %591 = vmatprep.subr.bf16.mxu0 %v1398_v0 }
  0x35   :  { %288 = vmatmul.mubr.bf16.gmra.mxu0 %v1637_v29  ;;  %704 = vmatprep.subr.bf16.mxu1 %v1398_v0 }
  0x36   :  { %535 = vmatmul.mubr.bf16.gmra.mxu1 %v1643_v30  ;;  %1181 = vmatprep.mubr.msk.bf16.mxu0 %vm214_vm0, %v1648_v31 }
  0x37   :  { %1214 = vmatprep.mubr.msk.bf16.mxu1 %vm214_vm0, %v1653_v32  ;;  %592 = vmatpush1.bf16.msra.mxu0 %v1487_v9 }
  0x38   :  { %705 = vmatpush1.bf16.msra.mxu1 %v1494_v10  ;;  %593 = vmatprep.subr.bf16.mxu0 %v1398_v0 }
  0x39   :  { %706 = vmatprep.subr.bf16.mxu1 %v1398_v0 }
  0x3b   :  { %594 = vmatpush1.bf16.msra.mxu0 %v1500_v11 }
  0x3c   :  { %707 = vmatpush1.bf16.msra.mxu1 %v1506_v12  ;;  %595 = vmatprep.subr.bf16.mxu0 %v1398_v0 }
  0x3d   :  { %296 = vmatmul.mubr.bf16.gmra.mxu0 %v1671_v33  ;;  %708 = vmatprep.subr.bf16.mxu1 %v1398_v0 }
  0x3e   :  { %543 = vmatmul.mubr.bf16.gmra.mxu1 %v1677_v34  ;;  %1182 = vmatprep.mubr.msk.bf16.mxu0 %vm214_vm0, %v1682_v35 }
  0x3f   :  { %1215 = vmatprep.mubr.msk.bf16.mxu1 %vm214_vm0, %v1687_v36  ;;  %596 = vmatpush1.bf16.msra.mxu0 %v1527_v15 }
  0x40   :  { %709 = vmatpush1.bf16.msra.mxu1 %v1536_v16  ;;  %597 = vmatprep.subr.bf16.mxu0 %v1398_v0 }
  0x41   :  { %710 = vmatprep.subr.bf16.mxu1 %v1398_v0 }
  0x43   :  { %598 = vmatpush1.bf16.msra.mxu0 %v1543_v17 }
  0x44   :  { %711 = vmatpush1.bf16.msra.mxu1 %v1550_v18  ;;  %613 = vmatprep.subr.bf16.mxu0 %v1398_v0 }
  0x45   :  { %304 = vmatmul.mubr.bf16.gmra.mxu0 %v1282_v37  ;;  %726 = vmatprep.subr.bf16.mxu1 %v1398_v0 }
  0x46   :  { %551 = vmatmul.mubr.bf16.gmra.mxu1 %v1283_v38  ;;  %1183 = vmatprep.mubr.msk.bf16.mxu0 %vm214_vm0, %v1284_v39 }
  0x47   :  { %1216 = vmatprep.mubr.msk.bf16.mxu1 %vm214_vm0, %v1286_v40  ;;  %614 = vmatpush2.bf16.msra.mxu0 %v1557_v19 }
  0x48   :  { %727 = vmatpush2.bf16.msra.mxu1 %v1564_v20 }
  0x4d   :  { %312 = vmatmul.mubr.bf16.gmra.mxu0 %v1288_v41 }
  0x4e   :  { %559 = vmatmul.mubr.bf16.gmra.mxu1 %v1289_v42  ;;  %1184 = vmatprep.mubr.msk.bf16.mxu0 %vm214_vm0, %v1290_v43 }
  0x4f   :  { %1217 = vmatprep.mubr.msk.bf16.mxu1 %vm214_vm0, %v1292_v44 }
  0x55   :  { %320 = vmatmul.mubr.bf16.gmra.mxu0 %v1294_v45 }
  0x56   :  { %567 = vmatmul.mubr.bf16.gmra.mxu1 %v1295_v46  ;;  %1185 = vmatprep.mubr.msk.bf16.mxu0 %vm214_vm0, %v1296_v47 }
  0x57   :  { %1218 = vmatprep.mubr.msk.bf16.mxu1 %vm214_vm0, %v1298_v48 }
  0x5d   :  { %328 = vmatmul.mubr.bf16.gmra.mxu0 %v1300_v49 }
  0x5e   :  { %575 = vmatmul.mubr.bf16.gmra.mxu1 %v1301_v50  ;;  %1219 = vmatprep.mubr.msk.bf16.mxu0 %vm214_vm0, %v1519_v14 }
  0x5f   :  { %1227 = vmatprep.mubr.msk.bf16.mxu1 %vm214_vm0, %v1513_v13 }
  0x65   :  { %616 = vmatmul.mubr.bf16.vlgmr.msra.gmra.mxu0 %v1576_v22 }
  0x66   :  { %729 = vmatmul.mubr.bf16.vlgmr.msra.gmra.mxu1 %v1570_v21  ;;  %1220 = vmatprep.mubr.msk.bf16.mxu0 %vm214_vm0, %v1589_v24 }
  0x67   :  { %1228 = vmatprep.mubr.msk.bf16.mxu1 %vm214_vm0, %v1583_v23 }
  0x6d   :  { %624 = vmatmul.mubr.bf16.gmra.mxu0 %v1609_v26 }
  0x6e   :  { %737 = vmatmul.mubr.bf16.gmra.mxu1 %v1603_v25  ;;  %1221 = vmatprep.mubr.msk.bf16.mxu0 %vm214_vm0, %v1621_v28 }
  0x6f   :  { %1229 = vmatprep.mubr.msk.bf16.mxu1 %vm214_vm0, %v1615_v27 }
  0x75   :  { %632 = vmatmul.mubr.bf16.gmra.mxu0 %v1643_v30 }
  0x76   :  { %745 = vmatmul.mubr.bf16.gmra.mxu1 %v1637_v29  ;;  %1222 = vmatprep.mubr.msk.bf16.mxu0 %vm214_vm0, %v1653_v32 }
  0x77   :  { %1230 = vmatprep.mubr.msk.bf16.mxu1 %vm214_vm0, %v1648_v31 }
  0x7d   :  { %640 = vmatmul.mubr.bf16.gmra.mxu0 %v1677_v34 }
  0x7e   :  { %753 = vmatmul.mubr.bf16.gmra.mxu1 %v1671_v33  ;;  %1223 = vmatprep.mubr.msk.bf16.mxu0 %vm214_vm0, %v1687_v36 }
  0x7f   :  { %1231 = vmatprep.mubr.msk.bf16.mxu1 %vm214_vm0, %v1682_v35 }
  0x85   :  { %648 = vmatmul.mubr.bf16.gmra.mxu0 %v1283_v38 }
  0x86   :  { %761 = vmatmul.mubr.bf16.gmra.mxu1 %v1282_v37  ;;  %1224 = vmatprep.mubr.msk.bf16.mxu0 %vm214_vm0, %v1286_v40 }
  0x87   :  { %1232 = vmatprep.mubr.msk.bf16.mxu1 %vm214_vm0, %v1284_v39 }
  0x8d   :  { %656 = vmatmul.mubr.bf16.gmra.mxu0 %v1289_v42 }
  0x8e   :  { %769 = vmatmul.mubr.bf16.gmra.mxu1 %v1288_v41  ;;  %1225 = vmatprep.mubr.msk.bf16.mxu0 %vm214_vm0, %v1292_v44 }
  0x8f   :  { %1233 = vmatprep.mubr.msk.bf16.mxu1 %vm214_vm0, %v1290_v43 }
  0x95   :  { %664 = vmatmul.mubr.bf16.gmra.mxu0 %v1295_v46 }
  0x96   :  { %777 = vmatmul.mubr.bf16.gmra.mxu1 %v1294_v45  ;;  %1226 = vmatprep.mubr.msk.bf16.mxu0 %vm214_vm0, %v1298_v48 }
  0x97   :  { %1234 = vmatprep.mubr.msk.bf16.mxu1 %vm214_vm0, %v1296_v47 }
  0x9d   :  { %672 = vmatmul.mubr.bf16.gmra.mxu0 %v1301_v50 }
  0x9e   :  { %785 = vmatmul.mubr.bf16.gmra.mxu1 %v1300_v49 }
  0xe5   :  { %v273_v51 = vpop.f32.mrf.mxu0 }
  0xe6   :  { %v520_v52 = vpop.f32.mrf.mxu1 }
  0xe7   :  { %v1791_v53 = vsub.f32 %v273_v51, %v520_v52  ;;  %v275_v54 = vpop.f32.mrf.mxu0 }
  0xe8   :  { %v522_v55 = vpop.f32.mrf.mxu1 }
  0xe9   :  { %v276_v56 = vpop.f32.mrf.mxu0 }
  0xea   :  { %v523_v57 = vpop.f32.mrf.mxu1 }
  0xeb   :  { %v1793_v58 = vsub.f32 %v276_v56, %v523_v57  ;;  %v278_v59 = vpop.f32.mrf.mxu0 }
  0xec   :  { %v525_v60 = vpop.f32.mrf.mxu1 }
  0xed   :  { %v281_v61 = vpop.f32.mrf.mxu0 }
  0xee   :  { %v528_v62 = vpop.f32.mrf.mxu1 }
  0xef   :  { %v1795_v63 = vsub.f32 %v281_v61, %v528_v62  ;;  %v283_v0 = vpop.f32.mrf.mxu0 }
  0xf0   :  { %v530_v1 = vpop.f32.mrf.mxu1 }
  0xf1   :  { %v284_v2 = vpop.f32.mrf.mxu0 }
  0xf2   :  { %v531_v3 = vpop.f32.mrf.mxu1 }
  0xf3   :  { %v1797_v4 = vsub.f32 %v284_v2, %v531_v3  ;;  %v286_v5 = vpop.f32.mrf.mxu0 }
  0xf4   :  { %v533_v6 = vpop.f32.mrf.mxu1 }
  0xf5   :  { %v289_v7 = vpop.f32.mrf.mxu0 }
  0xf6   :  { %v536_v8 = vpop.f32.mrf.mxu1 }
  0xf7   :  { %v1799_v9 = vsub.f32 %v289_v7, %v536_v8  ;;  %v291_v10 = vpop.f32.mrf.mxu0 }
  0xf8   :  { %v538_v11 = vpop.f32.mrf.mxu1 }
  0xf9   :  { %v292_v12 = vpop.f32.mrf.mxu0 }
  0xfa   :  { %v539_v13 = vpop.f32.mrf.mxu1 }
  0xfb   :  { %v1801_v14 = vsub.f32 %v292_v12, %v539_v13  ;;  %v294_v15 = vpop.f32.mrf.mxu0  ;;  %v793_v13 = vmul.f32 %v1791_v53, %v1791_v53 }
  0xfc   :  { %v541_v16 = vpop.f32.mrf.mxu1 }
  0xfd   :  { %v297_v17 = vpop.f32.mrf.mxu0 }
  0xfe   :  { %v544_v18 = vpop.f32.mrf.mxu1 }
  0xff   :  { %v1803_v19 = vsub.f32 %v297_v17, %v544_v18  ;;  %v299_v20 = vpop.f32.mrf.mxu0 }
 0x100   :  { %v546_v21 = vpop.f32.mrf.mxu1 }
 0x101   :  { %v300_v22 = vpop.f32.mrf.mxu0 }
 0x102   :  { %v547_v23 = vpop.f32.mrf.mxu1 }
 0x103   :  { %v1805_v24 = vsub.f32 %v300_v22, %v547_v23  ;;  %v302_v25 = vpop.f32.mrf.mxu0 }
 0x104   :  { %v549_v26 = vpop.f32.mrf.mxu1  ;;  %v794_v25 = vmul.f32 %v1793_v58, %v1793_v58 }
 0x105   :  { %v305_v27 = vpop.f32.mrf.mxu0 }
 0x106   :  { %v552_v28 = vpop.f32.mrf.mxu1 }
 0x107   :  { %v1807_v29 = vsub.f32 %v305_v27, %v552_v28  ;;  %v307_v30 = vpop.f32.mrf.mxu0 }
 0x108   :  { %v554_v31 = vpop.f32.mrf.mxu1 }
 0x109   :  { %v308_v32 = vpop.f32.mrf.mxu0 }
 0x10a   :  { %v555_v33 = vpop.f32.mrf.mxu1 }
 0x10b   :  { %v1809_v34 = vsub.f32 %v308_v32, %v555_v33  ;;  %v310_v35 = vpop.f32.mrf.mxu0  ;;  %v795_v33 = vmul.f32 %v1795_v63, %v1795_v63 }
 0x10c   :  { %v557_v36 = vpop.f32.mrf.mxu1 }
 0x10d   :  { %v313_v37 = vpop.f32.mrf.mxu0 }
 0x10e   :  { %v560_v38 = vpop.f32.mrf.mxu1 }
 0x10f   :  { %v1811_v39 = vsub.f32 %v313_v37, %v560_v38  ;;  %v315_v40 = vpop.f32.mrf.mxu0 }
 0x110   :  { %v562_v41 = vpop.f32.mrf.mxu1 }
 0x111   :  { %v316_v42 = vpop.f32.mrf.mxu0 }
 0x112   :  { %v563_v43 = vpop.f32.mrf.mxu1 }
 0x113   :  { %v1813_v44 = vsub.f32 %v316_v42, %v563_v43  ;;  %v318_v45 = vpop.f32.mrf.mxu0 }
 0x114   :  { %v565_v46 = vpop.f32.mrf.mxu1  ;;  %v796_v45 = vmul.f32 %v1797_v4, %v1797_v4 }
 0x115   :  { %v321_v47 = vpop.f32.mrf.mxu0 }
 0x116   :  { %v568_v48 = vpop.f32.mrf.mxu1 }
 0x117   :  { %v1815_v49 = vsub.f32 %v321_v47, %v568_v48  ;;  %v323_v50 = vpop.f32.mrf.mxu0 }
 0x118   :  { %v570_v51 = vpop.f32.mrf.mxu1 }
 0x119   :  { %v324_v52 = vpop.f32.mrf.mxu0 }
 0x11a   :  { %v571_v54 = vpop.f32.mrf.mxu1 }
 0x11b   :  { %v1817_v55 = vsub.f32 %v324_v52, %v571_v54  ;;  %v326_v56 = vpop.f32.mrf.mxu0  ;;  %v797_v54 = vmul.f32 %v1799_v9, %v1799_v9 }
 0x11c   :  { %v573_v57 = vpop.f32.mrf.mxu1 }
 0x11d   :  { %v329_v59 = vpop.f32.mrf.mxu0 }
 0x11e   :  { %v576_v60 = vpop.f32.mrf.mxu1 }
 0x11f   :  { %v1819_v61 = vsub.f32 %v329_v59, %v576_v60  ;;  %v331_v62 = vpop.f32.mrf.mxu0 }
 0x120   :  { %v578_v0 = vpop.f32.mrf.mxu1 }
 0x121   :  { %v332_v1 = vpop.f32.mrf.mxu0 }
 0x122   :  { %v579_v2 = vpop.f32.mrf.mxu1 }
 0x123   :  { %v1821_v3 = vsub.f32 %v332_v1, %v579_v2  ;;  %v334_v5 = vpop.f32.mrf.mxu0 }
 0x124   :  { %v581_v6 = vpop.f32.mrf.mxu1 }
 0x125   :  { %v617_v7 = vpop.f32.mrf.mxu0 }
 0x126   :  { %v730_v8 = vpop.f32.mrf.mxu1 }
 0x127   :  { %v1823_v10 = vadd.f32 %v730_v8, %v617_v7  ;;  %v619_v11 = vpop.f32.mrf.mxu0 }
 0x128   :  { %v732_v12 = vpop.f32.mrf.mxu1  ;;  %v798_v11 = vmul.f32 %v1801_v14, %v1801_v14 }
 0x129   :  { %v809_v15 = vmul.f32 %v1823_v10, %v1823_v10  ;;  %v620_v16 = vpop.f32.mrf.mxu0 }
 0x12a   :  { %v733_v17 = vpop.f32.mrf.mxu1 }
 0x12b   :  { %v825_v18 = vadd.f32 %v809_v15, %v793_v13  ;;  %v1829_v20 = vadd.f32 %v733_v17, %v620_v16  ;;  %v622_v21 = vpop.f32.mrf.mxu0  ;;  %v799_v17 = vmul.f32 %v1803_v19, %v1803_v19 }
 0x12c   :  { %v735_v22 = vpop.f32.mrf.mxu1 }
 0x12d   :  { %1302 = vrsqrt.f32 %v825_v18  ;;  %v625_v23 = vpop.f32.mrf.mxu0  ;;  %v810_v26 = vmul.f32 %v1829_v20, %v1829_v20  ;;  %vm843_vm1 = vcmp.eq.f32.partialorder %v825_v18, inf  ;;  %v846_v5 = vand.u32 2147483648, %v825_v18 }
 0x12e   :  { %v738_v27 = vpop.f32.mrf.mxu1  ;;  %vm845_vm2 = vcmp.eq.f32.partialorder %v825_v18, 0.0 }
 0x12f   :  { %v1835_v28 = vadd.f32 %v738_v27, %v625_v23  ;;  %v627_v30 = vpop.f32.mrf.mxu0  ;;  %v1837_v31 = vadd.f32 %v810_v26, %v794_v25  ;;  %v800_v23 = vmul.f32 %v1805_v24, %v1805_v24 }
 0x130   :  { %v740_v32 = vpop.f32.mrf.mxu1 }
 0x131   :  { %v811_v35 = vmul.f32 %v1835_v28, %v1835_v28  ;;  %v628_v36 = vpop.f32.mrf.mxu0  ;;  %1304 = vrsqrt.f32 %v1837_v31  ;;  %vm850_vm3 = vcmp.eq.f32.partialorder %v1837_v31, inf  ;;  %v853_v32 = vand.u32 2147483648, %v1837_v31 }
 0x132   :  { %v741_v37 = vpop.f32.mrf.mxu1  ;;  %vm852_vm4 = vcmp.eq.f32.partialorder %v1837_v31, 0.0 }
 0x133   :  { %v1844_v38 = vadd.f32 %v811_v35, %v795_v33  ;;  %v1846_v40 = vadd.f32 %v741_v37, %v628_v36  ;;  %v630_v41 = vpop.f32.mrf.mxu0  ;;  %v1890_v37 = vmul.f32 %v1807_v29, %v1807_v29 }
 0x134   :  { %v743_v42 = vpop.f32.mrf.mxu1  ;;  %v1894_v41 = vmul.f32 %v1809_v34, %v1809_v34 }
 0x135   :  { %1306 = vrsqrt.f32 %v1844_v38  ;;  %v633_v43 = vpop.f32.mrf.mxu0  ;;  %v812_v46 = vmul.f32 %v1846_v40, %v1846_v40  ;;  %vm857_vm5 = vcmp.eq.f32.partialorder %v1844_v38, inf  ;;  %vm859_vm6 = vcmp.eq.f32.partialorder %v1844_v38, 0.0 }
 0x136   :  { %v746_v47 = vpop.f32.mrf.mxu1 }
 0x137   :  { %v1853_v48 = vadd.f32 %v746_v47, %v633_v43  ;;  %v635_v50 = vpop.f32.mrf.mxu0  ;;  %v1855_v51 = vadd.f32 %v812_v46, %v796_v45  ;;  %v1900_v45 = vmul.f32 %v1811_v39, %v1811_v39 }
 0x138   :  { %v748_v52 = vpop.f32.mrf.mxu1 }
 0x139   :  { %v813_v56 = vmul.f32 %v1853_v48, %v1853_v48  ;;  %v636_v57 = vpop.f32.mrf.mxu0  ;;  %1308 = vrsqrt.f32 %v1855_v51  ;;  %vm864_vm7 = vcmp.eq.f32.partialorder %v1855_v51, inf  ;;  %vm866_vm8 = vcmp.eq.f32.partialorder %v1855_v51, 0.0 }
 0x13a   :  { %v1303_v59 = vpop.eup %1302  ;;  %v749_v60 = vpop.f32.mrf.mxu1 }
 0x13b   :  { %v842_v62 = vmul.f32 %v1303_v59, %v825_v18  ;;  %v1862_v0 = vadd.f32 %v813_v56, %v797_v54  ;;  %v1864_v1 = vadd.f32 %v749_v60, %v636_v57  ;;  %v638_v2 = vpop.f32.mrf.mxu0  ;;  %v860_v54 = vand.u32 2147483648, %v1844_v38 }
 0x13c   :  { %v751_v6 = vpop.f32.mrf.mxu1 }
 0x13d   :  { %v844_v7 = vsel %vm843_vm1, %v825_v18, %v842_v62  ;;  %1310 = vrsqrt.f32 %v1862_v0  ;;  %v641_v8 = vpop.f32.mrf.mxu0  ;;  %v814_v13 = vmul.f32 %v1864_v1, %v1864_v1  ;;  %v1917_v62 = vmul.f32 %v1813_v44, %v1813_v44 }
 0x13e   :  { %v1869_v12 = vsel %vm845_vm2, %v846_v5, %v844_v7  ;;  %v754_v15 = vpop.f32.mrf.mxu1  ;;  %v1305_v16 = vpop.eup %1304  ;;  %vm871_vm9 = vcmp.eq.f32.partialorder %v1862_v0, inf  ;;  %vm873_vm10 = vcmp.eq.f32.partialorder %v1862_v0, 0.0 }
 0x13f   :  { %v969_v21 = vmul.f32 0.70710677, %v1869_v12  ;;  %v1876_v22 = vadd.f32 %v754_v15, %v641_v8  ;;  %v643_v18 = vpop.f32.mrf.mxu0  ;;  %v849_v25 = vmul.f32 %v1305_v16, %v1837_v31  ;;  %v1882_v26 = vadd.f32 %v814_v13, %v798_v11 }
 0x140   :  { %v756_v27 = vpop.f32.mrf.mxu1  ;;  %v1033_v30 = vadd.f32 1e-08, %v1869_v12  ;;  %v1922_v8 = vmul.f32 %v1815_v49, %v1815_v49  ;;  %v867_v18 = vand.u32 2147483648, %v1855_v51 }
 0x141   :  { %1312 = verf.f32 %v969_v21  ;;  %v815_v33 = vmul.f32 %v1876_v22, %v1876_v22  ;;  %v644_v35 = vpop.f32.mrf.mxu0  ;;  %v851_v42 = vsel %vm850_vm3, %v1837_v31, %v849_v25  ;;  %vm878_vm11 = vcmp.eq.f32.partialorder %v1882_v26, inf }
 0x142   :  { %v1307_v36 = vpop.eup %1306  ;;  %v757_v43 = vpop.f32.mrf.mxu1  ;;  %v1902_v46 = vsel %vm852_vm4, %v853_v32, %v851_v42  ;;  %1314 = vrsqrt.f32 %v1882_v26  ;;  %vm880_vm12 = vcmp.eq.f32.partialorder %v1882_v26, 0.0 }
 0x143   :  { %v856_v47 = vmul.f32 %v1307_v36, %v1844_v38  ;;  %v646_v50 = vpop.f32.mrf.mxu0  ;;  %v970_v52 = vmul.f32 0.70710677, %v1902_v46  ;;  %v1909_v56 = vadd.f32 %v815_v33, %v799_v17  ;;  %1316 = vrcp.f32 %v1033_v30 }
 0x144   :  { %v759_v31 = vpop.f32.mrf.mxu1  ;;  %v1913_v59 = vadd.f32 %v757_v43, %v644_v35  ;;  %v1034_v2 = vadd.f32 1e-08, %v1902_v46 }
 0x145   :  { %v858_v57 = vsel %vm857_vm5, %v1844_v38, %v856_v47  ;;  %v649_v60 = vpop.f32.mrf.mxu0  ;;  %1318 = verf.f32 %v970_v52  ;;  %v1926_v38 = vmul.f32 %v1817_v55, %v1817_v55  ;;  %vm885_vm13 = vcmp.eq.f32.partialorder %v1909_v56, inf }
 0x146   :  { %v861_v5 = vsel %vm859_vm6, %v860_v54, %v858_v57  ;;  %v762_v6 = vpop.f32.mrf.mxu1  ;;  %v1309_v7 = vpop.eup %1308  ;;  %1320 = vrsqrt.f32 %v1909_v56  ;;  %v816_v16 = vmul.f32 %v1913_v59, %v1913_v59  ;;  %v874_v54 = vand.u32 2147483648, %v1862_v0 }
 0x147   :  { %v971_v11 = vmul.f32 0.70710677, %v861_v5  ;;  %v651_v13 = vpop.f32.mrf.mxu0  ;;  %v863_v15 = vmul.f32 %v1309_v7, %v1855_v51  ;;  %v1035_v21 = vadd.f32 1e-08, %v861_v5  ;;  %v1935_v25 = vadd.f32 %v762_v6, %v649_v60 }
 0x148   :  { %v764_v17 = vpop.f32.mrf.mxu1  ;;  %v1939_v33 = vadd.f32 %v816_v16, %v800_v23  ;;  %v953_v23 = vmul.f32 0.5, %v1869_v12  ;;  %vm887_vm14 = vcmp.eq.f32.partialorder %v1909_v56, 0.0 }
 0x149   :  { %1322 = verf.f32 %v971_v11  ;;  %v652_v27 = vpop.f32.mrf.mxu0  ;;  %v865_v32 = vsel %vm864_vm7, %v1855_v51, %v863_v15  ;;  %v817_v43 = vmul.f32 %v1935_v25, %v1935_v25  ;;  %v954_v17 = vmul.f32 0.5, %v1902_v46 }
 0x14a   :  { %v1311_v30 = vpop.eup %1310  ;;  %1324 = vrcp.f32 %v1034_v2  ;;  %v765_v35 = vpop.f32.mrf.mxu1  ;;  %v868_v36 = vsel %vm866_vm8, %v867_v18, %v865_v32  ;;  %vm892_vm15 = vcmp.eq.f32.partialorder %v1939_v33, inf  ;;  %vm894_vm0 = vcmp.eq.f32.partialorder %v1939_v33, 0.0 }
 0x14b   :  { %v870_v42 = vmul.f32 %v1311_v30, %v1862_v0  ;;  %v1944_v47 = vadd.f32 %v765_v35, %v652_v27  ;;  %v654_v50 = vpop.f32.mrf.mxu0  ;;  %v972_v52 = vmul.f32 0.70710677, %v868_v36  ;;  %1326 = vrsqrt.f32 %v1939_v33 }
 0x14c   :  { %v767_v51 = vpop.f32.mrf.mxu1  ;;  %1328 = vrcp.f32 %v1035_v21  ;;  %v1036_v31 = vadd.f32 1e-08, %v868_v36  ;;  %v1956_v7 = vadd.f32 %v817_v43, %v1890_v37  ;;  %v881_v21 = vand.u32 2147483648, %v1882_v26 }
 0x14d   :  { %v872_v57 = vsel %vm871_vm9, %v1862_v0, %v870_v42  ;;  %v657_v60 = vpop.f32.mrf.mxu0  ;;  %1330 = verf.f32 %v972_v52  ;;  %v818_v11 = vmul.f32 %v1944_v47, %v1944_v47  ;;  %v955_v42 = vmul.f32 0.5, %v861_v5 }
 0x14e   :  { %v1313_v2 = vpop.eup %1312  ;;  %v1953_v6 = vsel %vm873_vm10, %v874_v54, %v872_v57  ;;  %v770_v13 = vpop.f32.mrf.mxu1  ;;  %1332 = vrsqrt.f32 %v1956_v7  ;;  %v888_v51 = vand.u32 2147483648, %v1909_v56  ;;  %v956_v5 = vmul.f32 0.5, %v868_v36 }
 0x14f   :  { %v1001_v15 = vadd.f32 1.0, %v1313_v2  ;;  %v973_v12 = vmul.f32 0.70710677, %v1953_v6  ;;  %v659_v0 = vpop.f32.mrf.mxu0  ;;  %v1315_v16 = vpop.eup %1314  ;;  %v1037_v27 = vadd.f32 1e-08, %v1953_v6  ;;  %v1971_v46 = vadd.f32 %v818_v11, %v1894_v41 }
 0x150   :  { %v772_v37 = vpop.f32.mrf.mxu1  ;;  %v877_v30 = vmul.f32 %v1315_v16, %v1882_v26  ;;  %v1317_v35 = vpop.eup %1316  ;;  %vm899_vm1 = vcmp.eq.f32.partialorder %v1956_v7, inf  ;;  %vm901_vm2 = vcmp.eq.f32.partialorder %v1956_v7, 0.0 }
 0x151   :  { %v1017_v18 = vmul.f32 %v1001_v15, %v953_v23  ;;  %1334 = verf.f32 %v973_v12  ;;  %v660_v32 = vpop.f32.mrf.mxu0  ;;  %v1977_v23 = vadd.f32 %v770_v13, %v657_v60  ;;  %vm906_vm3 = vcmp.eq.f32.partialorder %v1971_v46, inf }
 0x152   :  { %1336 = vrcp.f32 %v1036_v31  ;;  %v773_v43 = vpop.f32.mrf.mxu1  ;;  %v1319_v50 = vpop.eup %1318  ;;  %v879_v54 = vsel %vm878_vm11, %v1882_v26, %v877_v30  ;;  %v895_v30 = vand.u32 2147483648, %v1939_v33  ;;  %vm908_vm4 = vcmp.eq.f32.partialorder %v1971_v46, 0.0 }
 0x153   :  { %v1050_v52 = vmul.f32 %v1317_v35, %v1017_v18  ;;  %v662_v57 = vpop.f32.mrf.mxu0  ;;  %v1002_v2 = vadd.f32 1.0, %v1319_v50  ;;  %v1981_v31 = vsel %vm880_vm12, %v881_v21, %v879_v54  ;;  %1338 = vrsqrt.f32 %v1971_v46  ;;  %v1321_v11 = vpop.eup %1320 }
 0x154   :  { %v775_v41 = vpop.f32.mrf.mxu1  ;;  %1340 = vrcp.f32 %v1037_v27  ;;  %v974_v0 = vmul.f32 0.70710677, %v1981_v31  ;;  %v1038_v36 = vadd.f32 1e-08, %v1981_v31  ;;  %v884_v26 = vmul.f32 %v1321_v11, %v1909_v56 }
 0x155   :  { %v1081_v15 = vmul.f32 %v1050_v52, %v1791_v53  ;;  %v1097_v12 = vmul.f32 %v1050_v52, %v1823_v10  ;;  %v665_v60 = vpop.f32.mrf.mxu0  ;;  %v1018_v16 = vmul.f32 %v1002_v2, %v954_v17  ;;  %v819_v10 = vmul.f32 %v1977_v23, %v1977_v23 }
 0x156   :  { %v1323_v13 = vpop.eup %1322  ;;  %v778_v21 = vpop.f32.mrf.mxu1  ;;  %1342 = verf.f32 %v974_v0  ;;  %v886_v27 = vsel %vm885_vm13, %v1909_v56, %v884_v26  ;;  %v2003_v35 = vadd.f32 %v773_v43, %v660_v32  ;;  %v957_v57 = vmul.f32 0.5, %v1953_v6 }
 0x157   :  { %v1325_v37 = vpop.eup %1324  ;;  %1113 = vst [vmem:[%s2260_s4] sm:$0xff] %v1081_v15  ;;  %1129 = vst [vmem:[%s2261_s5] sm:$0xff] %v1097_v12  ;;  %v1003_v53 = vadd.f32 1.0, %v1323_v13  ;;  %v667_v17 = vpop.f32.mrf.mxu0  ;;  %v2008_v2 = vsel %vm887_vm14, %v888_v51, %v886_v27  ;;  %v2011_v41 = vadd.f32 %v819_v10, %v1900_v45  ;;  %1344 = vrcp.f32 %v1038_v36 }
 0x158   :  { %v1052_v18 = vmul.f32 %v1325_v37, %v1018_v16  ;;  %v780_v50 = vpop.f32.mrf.mxu1  ;;  %v1327_v52 = vpop.eup %1326  ;;  %v975_v32 = vmul.f32 0.70710677, %v2008_v2  ;;  %v820_v56 = vmul.f32 %v2003_v35, %v2003_v35 }
 0x159   :  { %v1019_v54 = vmul.f32 %v1003_v53, %v955_v42  ;;  %v668_v11 = vpop.f32.mrf.mxu0  ;;  %v1329_v15 = vpop.eup %1328  ;;  %v891_v6 = vmul.f32 %v1327_v52, %v1939_v33  ;;  %1346 = vrsqrt.f32 %v2011_v41  ;;  %v2033_v53 = vadd.f32 %v778_v21, %v665_v60 }
 0x15a   :  { %v1082_v12 = vmul.f32 %v1052_v18, %v1793_v58  ;;  %v1098_v0 = vmul.f32 %v1052_v18, %v1829_v20  ;;  %v781_v43 = vpop.f32.mrf.mxu1  ;;  %v1331_v42 = vpop.eup %1330  ;;  %1348 = verf.f32 %v975_v32  ;;  %v1039_v20 = vadd.f32 1e-08, %v2008_v2 }
 0x15b   :  { %v1054_v13 = vmul.f32 %v1329_v15, %v1019_v54  ;;  %v670_v45 = vpop.f32.mrf.mxu0  ;;  %v1004_v58 = vadd.f32 1.0, %v1331_v42  ;;  %v1333_v16 = vpop.eup %1332  ;;  %v893_v37 = vsel %vm892_vm15, %v1939_v33, %v891_v6  ;;  %v902_v21 = vand.u32 2147483648, %v1956_v7 }
 0x15c   :  { %1114 = vst [vmem:[%s2260_s4 + $0x8] sm:$0xff] %v1082_v12  ;;  %1130 = vst [vmem:[%s2261_s5 + $0x8] sm:$0xff] %v1098_v0  ;;  %v783_v51 = vpop.f32.mrf.mxu1  ;;  %v2039_v27 = vsel %vm894_vm0, %v895_v30, %v893_v37  ;;  %v898_v50 = vmul.f32 %v1333_v16, %v1956_v7  ;;  %1350 = vrcp.f32 %v1039_v20  ;;  %v2056_v15 = vadd.f32 %v820_v56, %v1917_v62 }
 0x15d   :  { %v1083_v36 = vmul.f32 %v1054_v13, %v1795_v63  ;;  %v1099_v26 = vmul.f32 %v1054_v13, %v1835_v28  ;;  %v2035_v10 = vpop.f32.mrf.mxu0  ;;  %v1020_v18 = vmul.f32 %v1004_v58, %v956_v5  ;;  %v976_v5 = vmul.f32 0.70710677, %v2039_v27 }
 0x15e   :  { %v1335_v17 = vpop.eup %1334  ;;  %v786_v63 = vpop.f32.mrf.mxu1  ;;  %v1040_v33 = vadd.f32 1e-08, %v2039_v27  ;;  %v900_v54 = vsel %vm899_vm1, %v1956_v7, %v898_v50  ;;  %v821_v13 = vmul.f32 %v2033_v53, %v2033_v53  ;;  %v2066_v62 = vadd.f32 %v781_v43, %v668_v11 }
 0x15f   :  { %v1337_v28 = vpop.eup %1336  ;;  %1115 = vst [vmem:[%s2260_s4 + $0x10] sm:$0xff] %v1083_v36  ;;  %1131 = vst [vmem:[%s2261_s5 + $0x10] sm:$0xff] %v1099_v26  ;;  %v1005_v60 = vadd.f32 1.0, %v1335_v17  ;;  %v675_v30 = vpop.f32.mrf.mxu0  ;;  %1352 = verf.f32 %v976_v5  ;;  %v2060_v42 = vsel %vm901_vm2, %v902_v21, %v900_v54  ;;  %vm913_vm5 = vcmp.eq.f32.partialorder %v2011_v41, inf }
 0x160   :  { %v1056_v52 = vmul.f32 %v1337_v28, %v1020_v18  ;;  %v788_v12 = vpop.f32.mrf.mxu1  ;;  %v1339_v0 = vpop.eup %1338  ;;  %1354 = vrcp.f32 %v1040_v33  ;;  %v1041_v7 = vadd.f32 1e-08, %v2060_v42  ;;  %v2086_v50 = vadd.f32 %v821_v13, %v1922_v8 }
 0x161   :  { %v1021_v32 = vmul.f32 %v1005_v60, %v957_v57  ;;  %v676_v6 = vpop.f32.mrf.mxu0  ;;  %v1341_v45 = vpop.eup %1340  ;;  %v977_v57 = vmul.f32 0.70710677, %v2060_v42  ;;  %v905_v16 = vmul.f32 %v1339_v0, %v1971_v46  ;;  %1356 = vrsqrt.f32 %v2056_v15 }
 0x162   :  { %v1084_v58 = vmul.f32 %v1056_v52, %v1797_v4  ;;  %v1100_v20 = vmul.f32 %v1056_v52, %v1846_v40  ;;  %v789_v56 = vpop.f32.mrf.mxu1  ;;  %v958_v4 = vmul.f32 0.5, %v1981_v31  ;;  %v909_v40 = vand.u32 2147483648, %v1971_v46 }
 0x163   :  { %v1058_v51 = vmul.f32 %v1341_v45, %v1021_v32  ;;  %v678_v36 = vpop.f32.mrf.mxu0  ;;  %v1343_v26 = vpop.eup %1342  ;;  %1358 = verf.f32 %v977_v57  ;;  %v907_v18 = vsel %vm906_vm3, %v1971_v46, %v905_v16  ;;  %v822_v31 = vmul.f32 %v2066_v62, %v2066_v62 }
 0x164   :  { %1116 = vst [vmem:[%s2260_s4 + $0x18] sm:$0xff] %v1084_v58  ;;  %1132 = vst [vmem:[%s2261_s5 + $0x18] sm:$0xff] %v1100_v20  ;;  %v791_v11 = vpop.f32.mrf.mxu1  ;;  %v1006_v17 = vadd.f32 1.0, %v1343_v26  ;;  %v1345_v28 = vpop.eup %1344  ;;  %1360 = vrcp.f32 %v1041_v7  ;;  %v2097_v46 = vsel %vm908_vm4, %v909_v40, %v907_v18  ;;  %v916_v5 = vand.u32 2147483648, %v2011_v41 }
 0x165   :  { %v1085_v43 = vmul.f32 %v1058_v51, %v1799_v9  ;;  %v1101_v37 = vmul.f32 %v1058_v51, %v1853_v48  ;;  %v959_v48 = vmul.f32 0.5, %v2008_v2  ;;  %v978_v60 = vmul.f32 0.70710677, %v2097_v46 }
 0x166   :  { %v1022_v9 = vmul.f32 %v1006_v17, %v958_v4  ;;  %v1347_v8 = vpop.eup %1346  ;;  %1362 = vrsqrt.f32 %v2086_v50  ;;  %v2105_v52 = vadd.f32 %v786_v63, %v2035_v10  ;;  %v2107_v2 = vadd.f32 %v789_v56, %v676_v6 }
 0x167   :  { %1117 = vst [vmem:[%s2260_s4 + $0x20] sm:$0xff] %v1085_v43  ;;  %1133 = vst [vmem:[%s2261_s5 + $0x20] sm:$0xff] %v1101_v37  ;;  %v1349_v33 = vpop.eup %1348  ;;  %v912_v30 = vmul.f32 %v1347_v8, %v2011_v41  ;;  %1364 = verf.f32 %v978_v60  ;;  %v1042_v12 = vadd.f32 1e-08, %v2097_v46  ;;  %v2111_v0 = vadd.f32 %v822_v31, %v1926_v38 }
 0x168   :  { %v1060_v21 = vmul.f32 %v1345_v28, %v1022_v9  ;;  %v1007_v54 = vadd.f32 1.0, %v1349_v33  ;;  %vm915_vm6 = vcmp.eq.f32.partialorder %v2011_v41, 0.0  ;;  %v807_v6 = vmul.f32 %v1819_v61, %v1819_v61 }
 0x169   :  { %v914_v45 = vsel %vm913_vm5, %v2011_v41, %v912_v30  ;;  %1366 = vrsqrt.f32 %v2111_v0  ;;  %v1351_v63 = vpop.eup %1350  ;;  %v823_v20 = vmul.f32 %v2105_v52, %v2105_v52  ;;  %v824_v56 = vmul.f32 %v2107_v2, %v2107_v2 }
 0x16a   :  { %v1086_v32 = vmul.f32 %v1060_v21, %v1801_v14  ;;  %v1102_v13 = vmul.f32 %v1060_v21, %v1864_v1  ;;  %v1023_v58 = vmul.f32 %v1007_v54, %v959_v48  ;;  %v2117_v10 = vsel %vm915_vm6, %v916_v5, %v914_v45 }
 0x16b   :  { %v979_v14 = vmul.f32 0.70710677, %v2117_v10  ;;  %v1043_v1 = vadd.f32 1e-08, %v2117_v10  ;;  %1368 = vrcp.f32 %v1042_v12  ;;  %v808_v57 = vmul.f32 %v1821_v3, %v1821_v3 }
 0x16c   :  { %1118 = vst [vmem:[%s2260_s4 + $0x28] sm:$0xff] %v1086_v32  ;;  %1134 = vst [vmem:[%s2261_s5 + $0x28] sm:$0xff] %v1102_v13  ;;  %v1353_v38 = vpop.eup %1352  ;;  %v1062_v41 = vmul.f32 %v1351_v63, %v1023_v58  ;;  %v960_v7 = vmul.f32 0.5, %v2039_v27  ;;  %v2139_v4 = vadd.f32 %v823_v20, %v807_v6  ;;  %vm920_vm7 = vcmp.eq.f32.partialorder %v2056_v15, inf }
 0x16d   :  { %v1355_v51 = vpop.eup %1354  ;;  %v1008_v16 = vadd.f32 1.0, %v1353_v38  ;;  %1370 = verf.f32 %v979_v14  ;;  %v2141_v43 = vadd.f32 %v824_v56, %v808_v57  ;;  %v923_v18 = vand.u32 2147483648, %v2056_v15 }
 0x16e   :  { %v1087_v36 = vmul.f32 %v1062_v41, %v1803_v19  ;;  %v1103_v26 = vmul.f32 %v1062_v41, %v1876_v22  ;;  %v1357_v40 = vpop.eup %1356  ;;  %1372 = vrcp.f32 %v1043_v1  ;;  %v961_v19 = vmul.f32 0.5, %v2060_v42 }
 0x16f   :  { %v1024_v11 = vmul.f32 %v1008_v16, %v960_v7  ;;  %v919_v22 = vmul.f32 %v1357_v40, %v2056_v15  ;;  %1374 = vrsqrt.f32 %v2139_v4  ;;  %vm922_vm8 = vcmp.eq.f32.partialorder %v2056_v15, 0.0 }
 0x170   :  { %v1359_v37 = vpop.eup %1358  ;;  %1119 = vst [vmem:[%s2260_s4 + $0x30] sm:$0xff] %v1087_v36  ;;  %1135 = vst [vmem:[%s2261_s5 + $0x30] sm:$0xff] %v1103_v26  ;;  %1376 = vrsqrt.f32 %v2141_v43  ;;  %v962_v5 = vmul.f32 0.5, %v2097_v46  ;;  %vm927_vm9 = vcmp.eq.f32.partialorder %v2086_v50, inf  ;;  %vm929_vm10 = vcmp.eq.f32.partialorder %v2086_v50, 0.0 }
 0x171   :  { %v1064_v27 = vmul.f32 %v1355_v51, %v1024_v11  ;;  %v1009_v17 = vadd.f32 1.0, %v1359_v37  ;;  %v1361_v31 = vpop.eup %1360  ;;  %v921_v28 = vsel %vm920_vm7, %v2056_v15, %v919_v22  ;;  %v930_v15 = vand.u32 2147483648, %v2086_v50 }
 0x172   :  { %v2159_v60 = vsel %vm922_vm8, %v923_v18, %v921_v28  ;;  %vm934_vm11 = vcmp.eq.f32.partialorder %v2111_v0, inf  ;;  %v937_v1 = vand.u32 2147483648, %v2111_v0  ;;  %v963_v38 = vmul.f32 0.5, %v2117_v10 }
 0x173   :  { %v1363_v9 = vpop.eup %1362  ;;  %v1088_v42 = vmul.f32 %v1064_v27, %v1805_v24  ;;  %v1104_v48 = vmul.f32 %v1064_v27, %v1913_v59  ;;  %v1025_v8 = vmul.f32 %v1009_v17, %v961_v19  ;;  %v980_v33 = vmul.f32 0.70710677, %v2159_v60 }
 0x174   :  { %v926_v21 = vmul.f32 %v1363_v9, %v2086_v50  ;;  %v1365_v30 = vpop.eup %1364  ;;  %v1044_v59 = vadd.f32 1e-08, %v2159_v60  ;;  %vm936_vm12 = vcmp.eq.f32.partialorder %v2111_v0, 0.0  ;;  %vm941_vm13 = vcmp.eq.f32.partialorder %v2139_v4, inf }
 0x175   :  { %1120 = vst [vmem:[%s2260_s4 + $0x38] sm:$0xff] %v1088_v42  ;;  %1136 = vst [vmem:[%s2261_s5 + $0x38] sm:$0xff] %v1104_v48  ;;  %v1066_v24 = vmul.f32 %v1361_v31, %v1025_v8  ;;  %v1010_v46 = vadd.f32 1.0, %v1365_v30  ;;  %1378 = verf.f32 %v980_v33  ;;  %vm943_vm14 = vcmp.eq.f32.partialorder %v2139_v4, 0.0 }
 0x176   :  { %v928_v54 = vsel %vm927_vm9, %v2086_v50, %v926_v21  ;;  %v1367_v12 = vpop.eup %1366  ;;  %1380 = vrcp.f32 %v1044_v59  ;;  %vm948_vm15 = vcmp.eq.f32.partialorder %v2141_v43, inf  ;;  %vm950_vm0 = vcmp.eq.f32.partialorder %v2141_v43, 0.0 }
 0x177   :  { %v1089_v32 = vmul.f32 %v1066_v24, %v1807_v29  ;;  %v1105_v13 = vmul.f32 %v1066_v24, %v1935_v25  ;;  %v931_v45 = vsel %vm929_vm10, %v930_v15, %v928_v54  ;;  %v1026_v58 = vmul.f32 %v1010_v46, %v962_v5 }
 0x178   :  { %v981_v63 = vmul.f32 0.70710677, %v931_v45  ;;  %v1369_v6 = vpop.eup %1368  ;;  %v933_v50 = vmul.f32 %v1367_v12, %v2111_v0  ;;  %v1045_v25 = vadd.f32 1e-08, %v931_v45  ;;  %v951_v19 = vand.u32 2147483648, %v2141_v43 }
 0x179   :  { %1121 = vst [vmem:[%s2260_s4 + $0x40] sm:$0xff] %v1089_v32  ;;  %1137 = vst [vmem:[%s2261_s5 + $0x40] sm:$0xff] %v1105_v13  ;;  %v1068_v14 = vmul.f32 %v1369_v6, %v1026_v58  ;;  %v965_v21 = vmul.f32 0.5, %v931_v45 }
 0x17a   :  { %v1371_v29 = vpop.eup %1370  ;;  %1382 = verf.f32 %v981_v63  ;;  %v935_v20 = vsel %vm934_vm11, %v2111_v0, %v933_v50 }
 0x17b   :  { %v1011_v41 = vadd.f32 1.0, %v1371_v29  ;;  %v1373_v56 = vpop.eup %1372  ;;  %v1090_v51 = vmul.f32 %v1068_v14, %v1809_v34  ;;  %v1106_v57 = vmul.f32 %v1068_v14, %v1944_v47  ;;  %v938_v7 = vsel %vm936_vm12, %v937_v1, %v935_v20 }
 0x17c   :  { %v1375_v16 = vpop.eup %1374  ;;  %v982_v26 = vmul.f32 0.70710677, %v938_v7  ;;  %1384 = vrcp.f32 %v1045_v25  ;;  %v944_v47 = vand.u32 2147483648, %v2139_v4  ;;  %v1046_v10 = vadd.f32 1e-08, %v938_v7 }
 0x17d   :  { %v1027_v36 = vmul.f32 %v1011_v41, %v963_v38  ;;  %v1377_v40 = vpop.eup %1376  ;;  %1122 = vst [vmem:[%s2260_s4 + $0x48] sm:$0xff] %v1090_v51  ;;  %1138 = vst [vmem:[%s2261_s5 + $0x48] sm:$0xff] %v1106_v57  ;;  %v940_v34 = vmul.f32 %v1375_v16, %v2139_v4  ;;  %v966_v12 = vmul.f32 0.5, %v938_v7 }
 0x17e   :  { %1386 = verf.f32 %v982_v26  ;;  %v947_v11 = vmul.f32 %v1377_v40, %v2141_v43 }
 0x17f   :  { %v1070_v0 = vmul.f32 %v1373_v56, %v1027_v36  ;;  %v942_v37 = vsel %vm941_vm13, %v2139_v4, %v940_v34  ;;  %1388 = vrcp.f32 %v1046_v10 }
 0x180   :  { %v945_v17 = vsel %vm943_vm14, %v944_v47, %v942_v37  ;;  %v949_v18 = vsel %vm948_vm15, %v2141_v43, %v947_v11 }
 0x181   :  { %v1091_v22 = vmul.f32 %v1070_v0, %v1811_v39  ;;  %v1107_v27 = vmul.f32 %v1070_v0, %v1977_v23  ;;  %v983_v31 = vmul.f32 0.70710677, %v945_v17  ;;  %v952_v28 = vsel %vm950_vm0, %v951_v19, %v949_v18 }
 0x182   :  { %v1379_v9 = vpop.eup %1378  ;;  %v984_v4 = vmul.f32 0.70710677, %v952_v28  ;;  %v964_v39 = vmul.f32 0.5, %v2159_v60  ;;  %v1047_v23 = vadd.f32 1e-08, %v945_v17  ;;  %v967_v6 = vmul.f32 0.5, %v945_v17 }
 0x183   :  { %1123 = vst [vmem:[%s2260_s4 + $0x50] sm:$0xff] %v1091_v22  ;;  %1139 = vst [vmem:[%s2261_s5 + $0x50] sm:$0xff] %v1107_v27  ;;  %v1012_v42 = vadd.f32 1.0, %v1379_v9  ;;  %1390 = verf.f32 %v983_v31  ;;  %v1381_v48 = vpop.eup %1380  ;;  %v1048_v8 = vadd.f32 1e-08, %v952_v28  ;;  %v968_v25 = vmul.f32 0.5, %v952_v28 }
 0x184   :  { %1392 = verf.f32 %v984_v4 }
 0x185   :  { %v1028_v43 = vmul.f32 %v1012_v42, %v964_v39  ;;  %1394 = vrcp.f32 %v1047_v23 }
 0x186   :  { %1396 = vrcp.f32 %v1048_v8 }
 0x187   :  { %v1383_v5 = vpop.eup %1382  ;;  %v1072_v33 = vmul.f32 %v1381_v48, %v1028_v43 }
 0x188   :  { %v1013_v30 = vadd.f32 1.0, %v1383_v5 }
 0x189   :  { %v1092_v24 = vmul.f32 %v1072_v33, %v1813_v44  ;;  %v1108_v59 = vmul.f32 %v1072_v33, %v2003_v35  ;;  %v1385_v46 = vpop.eup %1384 }
 0x18a   :  { %v1029_v15 = vmul.f32 %v1013_v30, %v965_v21 }
 0x18b   :  { %v1387_v60 = vpop.eup %1386  ;;  %1124 = vst [vmem:[%s2260_s4 + $0x58] sm:$0xff] %v1092_v24  ;;  %1140 = vst [vmem:[%s2261_s5 + $0x58] sm:$0xff] %v1108_v59 }
 0x18c   :  { %v1074_v54 = vmul.f32 %v1385_v46, %v1029_v15  ;;  %v1014_v32 = vadd.f32 1.0, %v1387_v60  ;;  %v1389_v45 = vpop.eup %1388 }
 0x18e   :  { %v1093_v13 = vmul.f32 %v1074_v54, %v1815_v49  ;;  %v1109_v44 = vmul.f32 %v1074_v54, %v2033_v53  ;;  %v1030_v35 = vmul.f32 %v1014_v32, %v966_v12 }
 0x190   :  { %1125 = vst [vmem:[%s2260_s4 + $0x60] sm:$0xff] %v1093_v13  ;;  %1141 = vst [vmem:[%s2261_s5 + $0x60] sm:$0xff] %v1109_v44  ;;  %v1391_v58 = vpop.eup %1390  ;;  %v1076_v63 = vmul.f32 %v1389_v45, %v1030_v35 }
 0x191   :  { %v1015_v50 = vadd.f32 1.0, %v1391_v58  ;;  %v1393_v29 = vpop.eup %1392 }
 0x192   :  { %v1094_v14 = vmul.f32 %v1076_v63, %v1817_v55  ;;  %v1110_v49 = vmul.f32 %v1076_v63, %v2066_v62  ;;  %v1016_v1 = vadd.f32 1.0, %v1393_v29  ;;  %v1395_v38 = vpop.eup %1394 }
 0x193   :  { %v1031_v53 = vmul.f32 %v1015_v50, %v967_v6  ;;  %v1397_v56 = vpop.eup %1396 }
 0x194   :  { %1126 = vst [vmem:[%s2260_s4 + $0x68] sm:$0xff] %v1094_v14  ;;  %1142 = vst [vmem:[%s2261_s5 + $0x68] sm:$0xff] %v1110_v49  ;;  %v1032_v20 = vmul.f32 %v1016_v1, %v968_v25 }
 0x195   :  { %v1078_v41 = vmul.f32 %v1395_v38, %v1031_v53 }
 0x196   :  { %v1080_v62 = vmul.f32 %v1397_v56, %v1032_v20 }
 0x197   :  { %v1095_v51 = vmul.f32 %v1078_v41, %v1819_v61  ;;  %v1111_v55 = vmul.f32 %v1078_v41, %v2105_v52 }
 0x198   :  { %v1096_v57 = vmul.f32 %v1080_v62, %v1821_v3  ;;  %v1112_v7 = vmul.f32 %v1080_v62, %v2107_v2 }
 0x199   :  { %1127 = vst [vmem:[%s2260_s4 + $0x70] sm:$0xff] %v1095_v51  ;;  %1143 = vst [vmem:[%s2261_s5 + $0x70] sm:$0xff] %v1111_v55 }
 0x19a   :  { %1128 = vst [vmem:[%s2260_s4 + $0x78] sm:$0xff] %v1096_v57  ;;  %1144 = vst [vmem:[%s2261_s5 + $0x78] sm:$0xff] %v1112_v7 }

// kernel: forward.37
= control target key start
LH: loop header
LB: loop body
LE: loop exit
PB: predicated region body
PF: predicated region fallthrough
CT: control target
= control target key end

     0   :  { %vm102_vm0 = vcmask 130048   ;;  %s1029_s2 = inlined_call_operand.vmem [shape: bf16[16,128], index: 2, kind: input, shape index: {}]   ;;  %s1030_s3 = inlined_call_operand.vmem [shape: bf16[16,128], index: 3, kind: input, shape index: {}]   ;;  %s1031_s0 = inlined_call_operand.vmem [shape: bf16[128,16], index: 0, kind: input, shape index: {}]   ;;  %s1032_s1 = inlined_call_operand.vmem [shape: bf16[128,16], index: 1, kind: input, shape index: {}]   ;;  %s1033_s4 = inlined_call_operand.vmem [shape: f32[128,128], index: 4, kind: output, shape index: {0}]   ;;  %s1034_s5 = inlined_call_operand.vmem [shape: f32[128,128], index: 5, kind: output, shape index: {1}]  }
   0x1   :  { %v799_v0 = vld [vmem:[%s1029_s2] sm:$0xff]   ;;  %v803_v4 = vld [vmem:[%s1031_s0 + $0x8] sm:$0xff]   ;;  %v805_v6 = vld [vmem:[%s1031_s0 + $0x10] sm:$0xff]  }
   0x2   :  { %v800_v1 = vld [vmem:[%s1030_s3] sm:$0xff]   ;;  %727 = vmatprep.subr.bf16.mxu0 %v799_v0  ;;  %v804_v5 = vld [vmem:[%s1032_s1 + $0x8] sm:$0xff]   ;;  %v806_v7 = vld [vmem:[%s1032_s1 + $0x10] sm:$0xff]  }
   0x3   :  { %v801_v2 = vld [vmem:[%s1031_s0] sm:$0xff]   ;;  %745 = vmatprep.subr.bf16.mxu1 %v800_v1  ;;  %728 = vmatpush3.bf16.msra.mxu0 %v799_v0  ;;  %v807_v8 = vld [vmem:[%s1031_s0 + $0x18] sm:$0xff]   ;;  %v811_v12 = vld [vmem:[%s1031_s0 + $0x28] sm:$0xff]  }
   0x4   :  { %v802_v3 = vld [vmem:[%s1032_s1] sm:$0xff]   ;;  %746 = vmatpush3.bf16.msra.mxu1 %v800_v1  ;;  %729 = vmatprep.mubr.msk.bf16.mxu0 %vm102_vm0, %v801_v2  ;;  %v808_v9 = vld [vmem:[%s1032_s1 + $0x18] sm:$0xff]   ;;  %v812_v13 = vld [vmem:[%s1032_s1 + $0x28] sm:$0xff]  }
   0x5   :  { %747 = vmatprep.mubr.msk.bf16.mxu1 %vm102_vm0, %v802_v3  ;;  %763 = vmatprep.subr.bf16.mxu0 %v799_v0  ;;  %v809_v10 = vld [vmem:[%s1031_s0 + $0x20] sm:$0xff]   ;;  %v813_v14 = vld [vmem:[%s1031_s0 + $0x30] sm:$0xff]   ;;  %v815_v16 = vld [vmem:[%s1031_s0 + $0x38] sm:$0xff]  }
   0x6   :  { %730 = vmatmul.mubr.msk.bf16.vlgmr.msra.gmra.mxu0 %vm102_vm0, %v803_v4  ;;  %781 = vmatprep.subr.bf16.mxu1 %v800_v1  ;;  %v810_v11 = vld [vmem:[%s1032_s1 + $0x20] sm:$0xff]   ;;  %v814_v15 = vld [vmem:[%s1032_s1 + $0x30] sm:$0xff]   ;;  %v816_v17 = vld [vmem:[%s1032_s1 + $0x38] sm:$0xff]  }
   0x7   :  { %748 = vmatmul.mubr.msk.bf16.vlgmr.msra.gmra.mxu1 %vm102_vm0, %v804_v5  ;;  %764 = vmatpush3.bf16.msra.mxu0 %v799_v0 }
   0x8   :  { %782 = vmatpush3.bf16.msra.mxu1 %v800_v1  ;;  %733 = vmatprep.mubr.msk.bf16.mxu0 %vm102_vm0, %v805_v6 }
   0x9   :  { %751 = vmatprep.mubr.msk.bf16.mxu1 %vm102_vm0, %v806_v7 }
   0xe   :  { %734 = vmatmul.mubr.msk.bf16.gmra.mxu0 %vm102_vm0, %v807_v8 }
   0xf   :  { %752 = vmatmul.mubr.msk.bf16.gmra.mxu1 %vm102_vm0, %v808_v9  ;;  %737 = vmatprep.mubr.msk.bf16.mxu0 %vm102_vm0, %v809_v10 }
  0x10   :  { %755 = vmatprep.mubr.msk.bf16.mxu1 %vm102_vm0, %v810_v11 }
  0x16   :  { %738 = vmatmul.mubr.msk.bf16.gmra.mxu0 %vm102_vm0, %v811_v12 }
  0x17   :  { %756 = vmatmul.mubr.msk.bf16.gmra.mxu1 %vm102_vm0, %v812_v13  ;;  %741 = vmatprep.mubr.msk.bf16.mxu0 %vm102_vm0, %v813_v14 }
  0x18   :  { %759 = vmatprep.mubr.msk.bf16.mxu1 %vm102_vm0, %v814_v15 }
  0x1e   :  { %742 = vmatmul.mubr.msk.bf16.gmra.mxu0 %vm102_vm0, %v815_v16 }
  0x1f   :  { %760 = vmatmul.mubr.msk.bf16.gmra.mxu1 %vm102_vm0, %v816_v17  ;;  %765 = vmatprep.mubr.msk.bf16.mxu0 %vm102_vm0, %v802_v3 }
  0x20   :  { %783 = vmatprep.mubr.msk.bf16.mxu1 %vm102_vm0, %v801_v2 }
  0x26   :  { %766 = vmatmul.mubr.msk.bf16.vlgmr.msra.gmra.mxu0 %vm102_vm0, %v804_v5 }
  0x27   :  { %784 = vmatmul.mubr.msk.bf16.vlgmr.msra.gmra.mxu1 %vm102_vm0, %v803_v4  ;;  %769 = vmatprep.mubr.msk.bf16.mxu0 %vm102_vm0, %v806_v7 }
  0x28   :  { %787 = vmatprep.mubr.msk.bf16.mxu1 %vm102_vm0, %v805_v6 }
  0x2e   :  { %770 = vmatmul.mubr.msk.bf16.gmra.mxu0 %vm102_vm0, %v808_v9 }
  0x2f   :  { %788 = vmatmul.mubr.msk.bf16.gmra.mxu1 %vm102_vm0, %v807_v8  ;;  %773 = vmatprep.mubr.msk.bf16.mxu0 %vm102_vm0, %v810_v11 }
  0x30   :  { %791 = vmatprep.mubr.msk.bf16.mxu1 %vm102_vm0, %v809_v10 }
  0x36   :  { %774 = vmatmul.mubr.msk.bf16.gmra.mxu0 %vm102_vm0, %v812_v13 }
  0x37   :  { %792 = vmatmul.mubr.msk.bf16.gmra.mxu1 %vm102_vm0, %v811_v12  ;;  %777 = vmatprep.mubr.msk.bf16.mxu0 %vm102_vm0, %v814_v15 }
  0x38   :  { %795 = vmatprep.mubr.msk.bf16.mxu1 %vm102_vm0, %v813_v14 }
  0x3e   :  { %778 = vmatmul.mubr.msk.bf16.gmra.mxu0 %vm102_vm0, %v816_v17 }
  0x3f   :  { %796 = vmatmul.mubr.msk.bf16.gmra.mxu1 %vm102_vm0, %v815_v16 }
  0xc6   :  { %v731_v18 = vpop.f32.mrf.mxu0 }
  0xc7   :  { %v749_v19 = vpop.f32.mrf.mxu1 }
  0xc8   :  { %v490_v20 = vsub.f32 %v731_v18, %v749_v19  ;;  %v161_v21 = vpop.f32.mrf.mxu0 }
  0xc9   :  { %v328_v22 = vpop.f32.mrf.mxu1 }
  0xca   :  { %603 = vst [vmem:[%s1033_s4 + $0x10] sm:$0xff] %v490_v20  ;;  %v488_v23 = vsub.f32 %v161_v21, %v328_v22  ;;  %v732_v24 = vpop.f32.mrf.mxu0 }
  0xcb   :  { %v750_v25 = vpop.f32.mrf.mxu1 }
  0xcc   :  { %601 = vst [vmem:[%s1033_s4] sm:$0xff] %v488_v23  ;;  %v491_v26 = vsub.f32 %v732_v24, %v750_v25  ;;  %v164_v27 = vpop.f32.mrf.mxu0 }
  0xcd   :  { %v331_v28 = vpop.f32.mrf.mxu1 }
  0xce   :  { %604 = vst [vmem:[%s1033_s4 + $0x18] sm:$0xff] %v491_v26  ;;  %v489_v29 = vsub.f32 %v164_v27, %v331_v28  ;;  %v735_v30 = vpop.f32.mrf.mxu0 }
  0xcf   :  { %v753_v31 = vpop.f32.mrf.mxu1 }
  0xd0   :  { %602 = vst [vmem:[%s1033_s4 + $0x8] sm:$0xff] %v489_v29  ;;  %v494_v32 = vsub.f32 %v735_v30, %v753_v31  ;;  %v177_v33 = vpop.f32.mrf.mxu0 }
  0xd1   :  { %v344_v34 = vpop.f32.mrf.mxu1 }
  0xd2   :  { %607 = vst [vmem:[%s1033_s4 + $0x30] sm:$0xff] %v494_v32  ;;  %v492_v35 = vsub.f32 %v177_v33, %v344_v34  ;;  %v736_v36 = vpop.f32.mrf.mxu0 }
  0xd3   :  { %v754_v37 = vpop.f32.mrf.mxu1 }
  0xd4   :  { %605 = vst [vmem:[%s1033_s4 + $0x20] sm:$0xff] %v492_v35  ;;  %v495_v38 = vsub.f32 %v736_v36, %v754_v37  ;;  %v180_v39 = vpop.f32.mrf.mxu0 }
  0xd5   :  { %v347_v40 = vpop.f32.mrf.mxu1 }
  0xd6   :  { %608 = vst [vmem:[%s1033_s4 + $0x38] sm:$0xff] %v495_v38  ;;  %v493_v41 = vsub.f32 %v180_v39, %v347_v40  ;;  %v739_v42 = vpop.f32.mrf.mxu0 }
  0xd7   :  { %v757_v43 = vpop.f32.mrf.mxu1 }
  0xd8   :  { %606 = vst [vmem:[%s1033_s4 + $0x28] sm:$0xff] %v493_v41  ;;  %v498_v44 = vsub.f32 %v739_v42, %v757_v43  ;;  %v193_v45 = vpop.f32.mrf.mxu0 }
  0xd9   :  { %v360_v46 = vpop.f32.mrf.mxu1 }
  0xda   :  { %611 = vst [vmem:[%s1033_s4 + $0x50] sm:$0xff] %v498_v44  ;;  %v496_v47 = vsub.f32 %v193_v45, %v360_v46  ;;  %v740_v48 = vpop.f32.mrf.mxu0 }
  0xdb   :  { %v758_v49 = vpop.f32.mrf.mxu1 }
  0xdc   :  { %609 = vst [vmem:[%s1033_s4 + $0x40] sm:$0xff] %v496_v47  ;;  %v499_v50 = vsub.f32 %v740_v48, %v758_v49  ;;  %v196_v51 = vpop.f32.mrf.mxu0 }
  0xdd   :  { %v363_v52 = vpop.f32.mrf.mxu1 }
  0xde   :  { %612 = vst [vmem:[%s1033_s4 + $0x58] sm:$0xff] %v499_v50  ;;  %v497_v53 = vsub.f32 %v196_v51, %v363_v52  ;;  %v743_v54 = vpop.f32.mrf.mxu0 }
  0xdf   :  { %v761_v55 = vpop.f32.mrf.mxu1 }
  0xe0   :  { %610 = vst [vmem:[%s1033_s4 + $0x48] sm:$0xff] %v497_v53  ;;  %v502_v56 = vsub.f32 %v743_v54, %v761_v55  ;;  %v209_v57 = vpop.f32.mrf.mxu0 }
  0xe1   :  { %v376_v58 = vpop.f32.mrf.mxu1 }
  0xe2   :  { %615 = vst [vmem:[%s1033_s4 + $0x70] sm:$0xff] %v502_v56  ;;  %v500_v59 = vsub.f32 %v209_v57, %v376_v58  ;;  %v744_v60 = vpop.f32.mrf.mxu0 }
  0xe3   :  { %v762_v61 = vpop.f32.mrf.mxu1 }
  0xe4   :  { %613 = vst [vmem:[%s1033_s4 + $0x60] sm:$0xff] %v500_v59  ;;  %v503_v62 = vsub.f32 %v744_v60, %v762_v61  ;;  %v212_v63 = vpop.f32.mrf.mxu0 }
  0xe5   :  { %v379_v0 = vpop.f32.mrf.mxu1 }
  0xe6   :  { %616 = vst [vmem:[%s1033_s4 + $0x78] sm:$0xff] %v503_v62  ;;  %v501_v1 = vsub.f32 %v212_v63, %v379_v0  ;;  %v767_v2 = vpop.f32.mrf.mxu0 }
  0xe7   :  { %v785_v3 = vpop.f32.mrf.mxu1 }
  0xe8   :  { %614 = vst [vmem:[%s1033_s4 + $0x68] sm:$0xff] %v501_v1  ;;  %v547_v4 = vadd.f32 %v785_v3, %v767_v2  ;;  %v425_v5 = vpop.f32.mrf.mxu0 }
  0xe9   :  { %v538_v6 = vpop.f32.mrf.mxu1 }
  0xea   :  { %619 = vst [vmem:[%s1034_s5 + $0x10] sm:$0xff] %v547_v4  ;;  %v539_v7 = vadd.f32 %v538_v6, %v425_v5  ;;  %v768_v8 = vpop.f32.mrf.mxu0 }
  0xeb   :  { %v786_v9 = vpop.f32.mrf.mxu1 }
  0xec   :  { %617 = vst [vmem:[%s1034_s5] sm:$0xff] %v539_v7  ;;  %v550_v10 = vadd.f32 %v786_v9, %v768_v8  ;;  %v428_v11 = vpop.f32.mrf.mxu0 }
  0xed   :  { %v541_v12 = vpop.f32.mrf.mxu1 }
  0xee   :  { %620 = vst [vmem:[%s1034_s5 + $0x18] sm:$0xff] %v550_v10  ;;  %v542_v13 = vadd.f32 %v541_v12, %v428_v11  ;;  %v771_v14 = vpop.f32.mrf.mxu0 }
  0xef   :  { %v789_v15 = vpop.f32.mrf.mxu1 }
  0xf0   :  { %618 = vst [vmem:[%s1034_s5 + $0x8] sm:$0xff] %v542_v13  ;;  %v563_v16 = vadd.f32 %v789_v15, %v771_v14  ;;  %v441_v17 = vpop.f32.mrf.mxu0 }
  0xf1   :  { %v554_v18 = vpop.f32.mrf.mxu1 }
  0xf2   :  { %623 = vst [vmem:[%s1034_s5 + $0x30] sm:$0xff] %v563_v16  ;;  %v555_v19 = vadd.f32 %v554_v18, %v441_v17  ;;  %v772_v20 = vpop.f32.mrf.mxu0 }
  0xf3   :  { %v790_v21 = vpop.f32.mrf.mxu1 }
  0xf4   :  { %621 = vst [vmem:[%s1034_s5 + $0x20] sm:$0xff] %v555_v19  ;;  %v566_v22 = vadd.f32 %v790_v21, %v772_v20  ;;  %v444_v23 = vpop.f32.mrf.mxu0 }
  0xf5   :  { %v557_v24 = vpop.f32.mrf.mxu1 }
  0xf6   :  { %624 = vst [vmem:[%s1034_s5 + $0x38] sm:$0xff] %v566_v22  ;;  %v558_v25 = vadd.f32 %v557_v24, %v444_v23  ;;  %v775_v26 = vpop.f32.mrf.mxu0 }
  0xf7   :  { %v793_v27 = vpop.f32.mrf.mxu1 }
  0xf8   :  { %622 = vst [vmem:[%s1034_s5 + $0x28] sm:$0xff] %v558_v25  ;;  %v579_v28 = vadd.f32 %v793_v27, %v775_v26  ;;  %v457_v29 = vpop.f32.mrf.mxu0 }
  0xf9   :  { %v570_v30 = vpop.f32.mrf.mxu1 }
  0xfa   :  { %627 = vst [vmem:[%s1034_s5 + $0x50] sm:$0xff] %v579_v28  ;;  %v571_v31 = vadd.f32 %v570_v30, %v457_v29  ;;  %v776_v32 = vpop.f32.mrf.mxu0 }
  0xfb   :  { %v794_v33 = vpop.f32.mrf.mxu1 }
  0xfc   :  { %625 = vst [vmem:[%s1034_s5 + $0x40] sm:$0xff] %v571_v31  ;;  %v582_v34 = vadd.f32 %v794_v33, %v776_v32  ;;  %v460_v35 = vpop.f32.mrf.mxu0 }
  0xfd   :  { %v573_v36 = vpop.f32.mrf.mxu1 }
  0xfe   :  { %628 = vst [vmem:[%s1034_s5 + $0x58] sm:$0xff] %v582_v34  ;;  %v574_v37 = vadd.f32 %v573_v36, %v460_v35  ;;  %v779_v38 = vpop.f32.mrf.mxu0 }
  0xff   :  { %v797_v39 = vpop.f32.mrf.mxu1 }
 0x100   :  { %626 = vst [vmem:[%s1034_s5 + $0x48] sm:$0xff] %v574_v37  ;;  %v595_v40 = vadd.f32 %v797_v39, %v779_v38  ;;  %v473_v41 = vpop.f32.mrf.mxu0 }
 0x101   :  { %v586_v42 = vpop.f32.mrf.mxu1 }
 0x102   :  { %631 = vst [vmem:[%s1034_s5 + $0x70] sm:$0xff] %v595_v40  ;;  %v587_v43 = vadd.f32 %v586_v42, %v473_v41  ;;  %v780_v44 = vpop.f32.mrf.mxu0 }
 0x103   :  { %v798_v45 = vpop.f32.mrf.mxu1 }
 0x104   :  { %629 = vst [vmem:[%s1034_s5 + $0x60] sm:$0xff] %v587_v43  ;;  %v598_v46 = vadd.f32 %v798_v45, %v780_v44  ;;  %v476_v47 = vpop.f32.mrf.mxu0 }
 0x105   :  { %v589_v48 = vpop.f32.mrf.mxu1 }
 0x106   :  { %632 = vst [vmem:[%s1034_s5 + $0x78] sm:$0xff] %v598_v46  ;;  %v590_v49 = vadd.f32 %v589_v48, %v476_v47 }
 0x108   :  { %630 = vst [vmem:[%s1034_s5 + $0x68] sm:$0xff] %v590_v49 }

// kernel: custom-call
= control target key start
LH: loop header
LB: loop body
LE: loop exit
PB: predicated region body
PF: predicated region fallthrough
CT: control target
= control target key end

     0   :  { %s92_s0 = inlined_call_operand.vmem [shape: f32[1,2,8,16], index: 0, kind: input, shape index: {}]   ;;  %s93_s1 = inlined_call_operand.vmem [shape: f32[1,2,8,16], index: 1, kind: input, shape index: {}]   ;;  %s94_s2 = inlined_call_operand.hbm [shape: c64[1,2,8,16], index: 2, kind: output, shape index: {}]  }
   0x1   :  { %s3_s11 = scalar_lea.hbm %s94_s2, 256 }
   0x2   :  { %4 = vsyncpa [#allocation0], 0  ;;  %s5_s14 = sshll.u32 %s92_s0, 4  ;;  %s6_s14 = int_to_ptr.vmem [resolvable:$true] %s5_s14 }
   0x3   :  { %s18_s15 = scalar_lea.vmem %s6_s14, 256  ;;  %p23_p1 = scmp.lt.s32.totalorder %s6_s14, %s6_s14 }
   0x4   :  { %p19_p0 = scmp.ne.s32.totalorder %s6_s14, %s18_s15  ;;  %p24_p2 = scmp.lt.s32.totalorder %s18_s15, %s18_s15 }
   0x6   :  { %p25_p3 = por %p24_p2, %p23_p1 }
   0x8   :  { %p26_p4 = pnand %p25_p3, %p19_p0 }
   0xa   :  { %29 = shalt.err (!%p26_p4)  }
   0xb   :  { %8 = dma.vmem_to_hbm [thread:$0]  %s6_s14, 256, %s94_s2, [#allocation0] }
   0xc   :  { %61 = dma.done.wait [#allocation0], 256  }
   0xd   :  { %62 = vsyncadd [#allocation0], 4294967040 }
   0xe   :  { %10 = vsyncpa [#allocation0], 1 }
   0xf   :  { %11 = vsyncpa [#allocation1], 0  ;;  %s12_s0 = sshll.u32 %s93_s1, 4  ;;  %s13_s0 = int_to_ptr.vmem [resolvable:$true] %s12_s0 }
  0x10   :  { %s38_s20 = scalar_lea.vmem %s13_s0, 256  ;;  %p43_p6 = scmp.lt.s32.totalorder %s13_s0, %s13_s0 }
  0x11   :  { %p39_p5 = scmp.ne.s32.totalorder %s13_s0, %s38_s20  ;;  %p44_p7 = scmp.lt.s32.totalorder %s38_s20, %s38_s20 }
  0x13   :  { %p45_p8 = por %p44_p7, %p43_p6 }
  0x15   :  { %p46_p9 = pnand %p45_p8, %p39_p5 }
  0x17   :  { %49 = shalt.err (!%p46_p9)  }
  0x18   :  { %15 = dma.vmem_to_hbm [thread:$0]  %s13_s0, 256, %s3_s11, [#allocation1] }
  0x19   :  { %63 = dma.done.wait [#allocation1], 256  }
  0x1a   :  { %64 = vsyncadd [#allocation1], 4294967040 }
  0x1b   :  { %17 = vsyncpa [#allocation1], 1 }

</bundles_post_ra>
